<compile_context>
chip_gen: v5e
topology: v5e:2x2
jax: 0.10.0
libtpu: 0.0.40
codegen_flags: <defaults>
</compile_context>

<pallas_src>
import functools
import math

import jax
import jax.numpy as jnp
from jax import lax
from jax.experimental import pallas as pl
from jax.experimental.pallas import tpu as pltpu

LN_EPS = 1e-5                      # nn.LayerNorm default eps
_SQRT2_INV = 1.0 / math.sqrt(2.0)  # exact (erf-based) GELU
_F32 = jnp.float32
_BF16 = jnp.bfloat16
_VMEM_LIMIT = 32 * 1024 * 1024     # explicit scoped-VMEM limit (safe on v5e/v6e/v7x)


# ----------------------------------------------------------------------------
# In-kernel helpers
# ----------------------------------------------------------------------------
def _ln_f32(x, gamma, beta):
    """LayerNorm over the last axis; two-pass centered variance (PyTorch LN)."""
    mean = jnp.mean(x, axis=-1, keepdims=True)
    xc = x - mean
    var = jnp.mean(xc * xc, axis=-1, keepdims=True)
    return xc * lax.rsqrt(var + LN_EPS) * gamma + beta


def _gelu_exact(x):
    """Exact GELU (matches torch.nn.GELU default)."""
    return 0.5 * x * (1.0 + lax.erf(x * _SQRT2_INV))


def _mha(xn, wq_ref, wk_ref, wv_ref, wp_ref, bp, *, num_heads, scale):
    """Multi-head self-attention on a (T, C) slab, bf16 matmuls / f32 accum.

    wq/wk/wv refs: (H, C, hd) bf16; wp ref: (H, hd, C) bf16; bp: (1, C) f32.
    Per-head weights are indexed along the leading ref axis (free), so there is
    no lane-offset slicing of activations and no concat of head outputs.
    """
    xb = xn.astype(_BF16)
    acc = None
    for h in range(num_heads):                 # static unroll over 2 / 4 heads
        q = jnp.dot(xb, wq_ref[h], preferred_element_type=_F32)
        k = jnp.dot(xb, wk_ref[h], preferred_element_type=_F32)
        v = jnp.dot(xb, wv_ref[h], preferred_element_type=_F32)
        # scores = q @ k.T  (contract last dims; no explicit transpose)
        s = lax.dot_general(q.astype(_BF16), k.astype(_BF16),
                            (((1,), (1,)), ((), ())),
                            preferred_element_type=_F32) * scale
        s = s - jnp.max(s, axis=-1, keepdims=True)
        p = jnp.exp(s)
        p = p * pl.reciprocal(jnp.sum(p, axis=-1, keepdims=True), approx=True)
        o = jnp.dot(p.astype(_BF16), v.astype(_BF16),
                    preferred_element_type=_F32)                  # (T, hd)
        contrib = jnp.dot(o.astype(_BF16), wp_ref[h],
                          preferred_element_type=_F32)            # (T, C)
        acc = contrib if acc is None else acc + contrib
    return acc + bp


# ----------------------------------------------------------------------------
# Kernel 1: fused sentence sub-block  x += Attn(LN(x)); x += MLP(LN(x))
#   grid = (2, B): axis 0 selects {row: attn_out1/mlp1, col: attn_out2/mlp2}
# ----------------------------------------------------------------------------
def _sentence_kernel(x_ref, ga_ref, ba_ref,
                     wq_ref, wk_ref, wv_ref, wp_ref, bp_ref,
                     gm_ref, bm_ref,
                     w1_ref, b1_ref, w2_ref, b2_ref,
                     o_ref, *, num_heads, scale):
    x = x_ref[...].astype(_F32)                                   # (N, C)
    # --- x += Attention(LN_out(x)) ---
    x = x + _mha(_ln_f32(x, ga_ref[...], ba_ref[...]),
                 wq_ref, wk_ref, wv_ref, wp_ref, bp_ref[...],
                 num_heads=num_heads, scale=scale)
    # --- x += MLP(LN_mlp(x)) ---
    xn = _ln_f32(x, gm_ref[...], bm_ref[...])
    h = jnp.dot(xn.astype(_BF16), w1_ref[...],
                preferred_element_type=_F32) + b1_ref[...]
    h = _gelu_exact(h)
    y = jnp.dot(h.astype(_BF16), w2_ref[...],
                preferred_element_type=_F32) + b2_ref[...]
    o_ref[...] = (x + y).astype(o_ref.dtype)


def fused_sentence_blocks(xs, ln_attn, ln_mlp, attn_s, mlp_s, *, num_heads):
    """xs: (2, B, N, C) stack of [row_embed, column_embed]."""
    S, B, N, C = xs.shape
    hd = C // num_heads
    g_att, be_att = ln_attn
    g_mlp, be_mlp = ln_mlp
    wq, wk, wv, wp, bp = attn_s
    w1, b1, w2, b2 = mlp_s
    hidden = w1.shape[-1]
    kernel = functools.partial(_sentence_kernel, num_heads=num_heads,
                               scale=hd ** -0.5)
    const2 = lambda s, b: (0, 0)
    sel3 = lambda s, b: (s, 0, 0)
    sel4 = lambda s, b: (s, 0, 0, 0)
    xmap = lambda s, b: (s, b, 0, 0)
    return pl.pallas_call(
        kernel,
        out_shape=jax.ShapeDtypeStruct(xs.shape, xs.dtype),
        grid_spec=pltpu.PrefetchScalarGridSpec(
            num_scalar_prefetch=0,
            grid=(S, B),
            in_specs=[
                pl.BlockSpec((None, None, N, C), xmap),          # x (residual)
                pl.BlockSpec((1, C), const2),                    # LN_out gamma
                pl.BlockSpec((1, C), const2),                    # LN_out beta
                pl.BlockSpec((None, num_heads, C, hd), sel4),    # Wq per head
                pl.BlockSpec((None, num_heads, C, hd), sel4),    # Wk per head
                pl.BlockSpec((None, num_heads, C, hd), sel4),    # Wv per head
                pl.BlockSpec((None, num_heads, hd, C), sel4),    # Wproj per head
                pl.BlockSpec((None, 1, C), sel3),                # proj bias
                pl.BlockSpec((1, C), const2),                    # LN_mlp gamma
                pl.BlockSpec((1, C), const2),                    # LN_mlp beta
                pl.BlockSpec((None, C, hidden), sel3),           # mlp W1
                pl.BlockSpec((None, 1, hidden), sel3),           # mlp b1
                pl.BlockSpec((None, hidden, C), sel3),           # mlp W2
                pl.BlockSpec((None, 1, C), sel3),                # mlp b2
            ],
            out_specs=pl.BlockSpec((None, None, N, C), xmap),
        ),
        input_output_aliases={0: 0},
        compiler_params=pltpu.CompilerParams(
            dimension_semantics=("parallel", "parallel"),
            vmem_limit_bytes=_VMEM_LIMIT),
    )(xs, g_att, be_att, wq, wk, wv, wp, bp, g_mlp, be_mlp, w1, b1, w2, b2)


# ----------------------------------------------------------------------------
# Kernel 2: fully fused pixel path  proj_a -> attn_a -> proj_b -> attn_b -> mlp
#   grid = (2, B): axis 0 selects path1 / path2 weights (and their src order)
# ----------------------------------------------------------------------------
def _pixel_kernel(px_ref, srca_ref, srcb_ref,
                  gpr_ref, bpr_ref,
                  wpa_ref, bpa_ref, wpb_ref, bpb_ref,
                  gin_ref, bin_ref,
                  awq_ref, awk_ref, awv_ref, awp_ref, abp_ref,
                  bwq_ref, bwk_ref, bwv_ref, bwp_ref, bbp_ref,
                  gm_ref, bm_ref,
                  w1_ref, b1_ref, w2_ref, b2_ref,
                  o_ref, *, num_heads, scale):
    x = px_ref[...].astype(_F32)                                  # (HW, C)
    gpr, bpr = gpr_ref[...], bpr_ref[...]
    gin, bin_ = gin_ref[...], bin_ref[...]

    # 1) x += proj_a(LN_proj(src_a))
    sa = _ln_f32(srca_ref[...].astype(_F32), gpr, bpr)
    x = x + jnp.dot(sa.astype(_BF16), wpa_ref[...],
                    preferred_element_type=_F32) + bpa_ref[...]
    # 2) x += attn_a(LN_in(x))
    x = x + _mha(_ln_f32(x, gin, bin_),
                 awq_ref, awk_ref, awv_ref, awp_ref, abp_ref[...],
                 num_heads=num_heads, scale=scale)
    # 3) x += proj_b(LN_proj(src_b))
    sb = _ln_f32(srcb_ref[...].astype(_F32), gpr, bpr)
    x = x + jnp.dot(sb.astype(_BF16), wpb_ref[...],
                    preferred_element_type=_F32) + bpb_ref[...]
    # 4) x += attn_b(LN_in(x))
    x = x + _mha(_ln_f32(x, gin, bin_),
                 bwq_ref, bwk_ref, bwv_ref, bwp_ref, bbp_ref[...],
                 num_heads=num_heads, scale=scale)
    # 5) x += MLP(LN_mlp_in(x))
    xn = _ln_f32(x, gm_ref[...], bm_ref[...])
    h = jnp.dot(xn.astype(_BF16), w1_ref[...],
                preferred_element_type=_F32) + b1_ref[...]
    h = _gelu_exact(h)
    y = jnp.dot(h.astype(_BF16), w2_ref[...],
                preferred_element_type=_F32) + b2_ref[...]
    # Note: c_in is only 16 wide -> masked stores, but after full fusion this
    # slab touches HBM exactly once per path, so it is no longer a hot path.
    o_ref[...] = (x + y).astype(o_ref.dtype)


def fused_pixel_paths(pxs, srca, srcb, ln_proj, proj_a, proj_b,
                      ln_in, attn_a, attn_b, ln_mlp, mlp, *, num_heads):
    """pxs/srca/srcb: (2, B, HW, C) stacks for the two pixel paths."""
    S, B, T, C = pxs.shape
    hd = C // num_heads
    g_pr, b_pr = ln_proj
    wpa, bpa = proj_a
    wpb, bpb = proj_b
    g_in, b_in = ln_in
    awq, awk, awv, awp, abp = attn_a
    bwq, bwk, bwv, bwp, bbp = attn_b
    g_m, b_m = ln_mlp
    w1, b1, w2, b2 = mlp
    hidden = w1.shape[-1]
    kernel = functools.partial(_pixel_kernel, num_heads=num_heads,
                               scale=hd ** -0.5)
    const2 = lambda s, b: (0, 0)
    sel3 = lambda s, b: (s, 0, 0)
    sel4 = lambda s, b: (s, 0, 0, 0)
    xmap = lambda s, b: (s, b, 0, 0)
    attn_specs = [pl.BlockSpec((None, num_heads, C, hd), sel4),
                  pl.BlockSpec((None, num_heads, C, hd), sel4),
                  pl.BlockSpec((None, num_heads, C, hd), sel4),
                  pl.BlockSpec((None, num_heads, hd, C), sel4),
                  pl.BlockSpec((None, 1, C), sel3)]
    return pl.pallas_call(
        kernel,
        out_shape=jax.ShapeDtypeStruct(pxs.shape, pxs.dtype),
        grid_spec=pltpu.PrefetchScalarGridSpec(
            num_scalar_prefetch=0,
            grid=(S, B),
            in_specs=[
                pl.BlockSpec((None, None, T, C), xmap),          # px (residual)
                pl.BlockSpec((None, None, T, C), xmap),          # src_a
                pl.BlockSpec((None, None, T, C), xmap),          # src_b
                pl.BlockSpec((1, C), const2),                    # LN_proj gamma
                pl.BlockSpec((1, C), const2),                    # LN_proj beta
                pl.BlockSpec((None, C, C), sel3),                # proj_a W
                pl.BlockSpec((None, 1, C), sel3),                # proj_a b
                pl.BlockSpec((None, C, C), sel3),                # proj_b W
                pl.BlockSpec((None, 1, C), sel3),                # proj_b b
                pl.BlockSpec((1, C), const2),                    # LN_in gamma
                pl.BlockSpec((1, C), const2),                    # LN_in beta
                *attn_specs,                                      # attn_a (5)
                *attn_specs,                                      # attn_b (5)
                pl.BlockSpec((1, C), const2),                    # LN_mlp_in gamma
                pl.BlockSpec((1, C), const2),                    # LN_mlp_in beta
                pl.BlockSpec((None, C, hidden), sel3),           # mlp W1
                pl.BlockSpec((None, 1, hidden), sel3),           # mlp b1
                pl.BlockSpec((None, hidden, C), sel3),           # mlp W2
                pl.BlockSpec((None, 1, C), sel3),                # mlp b2
            ],
            out_specs=pl.BlockSpec((None, None, T, C), xmap),
        ),
        input_output_aliases={0: 0},
        compiler_params=pltpu.CompilerParams(
            dimension_semantics=("parallel", "parallel"),
            vmem_limit_bytes=_VMEM_LIMIT),
    )(pxs, srca, srcb, g_pr, b_pr, wpa, bpa, wpb, bpb, g_in, b_in,
      awq, awk, awv, awp, abp, bwq, bwk, bwv, bwp, bbp,
      g_m, b_m, w1, b1, w2, b2)


# ----------------------------------------------------------------------------
# Parameter construction + kernel-ready (bf16, per-head split, stacked) prep
# ----------------------------------------------------------------------------
def _linear_params(key, fan_in, fan_out, bias=True, std=0.05):
    kw, kb = jax.random.split(key)
    w = jax.random.normal(kw, (fan_in, fan_out), _F32) * std
    b = jax.random.normal(kb, (fan_out,), _F32) * std if bias else None
    return w, b


def _attn_params(key, c):
    k1, k2, k3 = jax.random.split(key, 3)
    w_qk, _ = _linear_params(k1, c, 2 * c, bias=False)   # qkv_bias=False
    w_v, _ = _linear_params(k2, c, c, bias=False)
    w_proj, b_proj = _linear_params(k3, c, c, bias=True)
    return w_qk, w_v, w_proj, b_proj


def _mlp_params(key, c, hidden):
    k1, k2 = jax.random.split(key)
    w1, b1 = _linear_params(k1, c, hidden)
    w2, b2 = _linear_params(k2, hidden, c)
    return w1, b1, w2, b2


def _ln_params(c):
    # nn.LayerNorm default init: weight=1, bias=0; stored as (1, c) for kernels.
    return jnp.ones((1, c), _F32), jnp.zeros((1, c), _F32)


def _prep_attn(params, num_heads):
    """Split q/k/v/proj weights per head and cast to bf16."""
    w_qk, w_v, w_proj, b_proj = params
    c = w_v.shape[0]
    hd = c // num_heads
    wq = jnp.transpose(w_qk[:, :c].reshape(c, num_heads, hd), (1, 0, 2))
    wk = jnp.transpose(w_qk[:, c:].reshape(c, num_heads, hd), (1, 0, 2))
    wv = jnp.transpose(w_v.reshape(c, num_heads, hd), (1, 0, 2))
    wp = w_proj.reshape(num_heads, hd, c)
    return (wq.astype(_BF16), wk.astype(_BF16), wv.astype(_BF16),
            wp.astype(_BF16), b_proj.reshape(1, c).astype(_F32))


def _prep_mlp(params):
    w1, b1, w2, b2 = params
    return (w1.astype(_BF16), b1.reshape(1, -1).astype(_F32),
            w2.astype(_BF16), b2.reshape(1, -1).astype(_F32))


def _prep_linear(params):
    w, b = params
    return w.astype(_BF16), b.reshape(1, -1).astype(_F32)


def _stack2(a, b):
    """Stack two matching parameter tuples along a new leading axis of size 2."""
    return tuple(jnp.stack([x, y]) for x, y in zip(a, b))


class Block:
    """JAX/Pallas port of the PyTorch hovertrans.Block (eval mode)."""

    def __init__(self, dim, words_in_sentence, patch_size, sentences,
                 in_chans=3, num_heads=2, num_inner_heads=4, mlp_ratio=4.0,
                 qkv_bias=False, drop=0.0, attn_drop=0.0, drop_path=0.0,
                 key=None):
        del sentences, in_chans
        assert not qkv_bias, "only qkv_bias=False is implemented"
        # TODO(synk): Dropout/DropPath with p>0 (training mode) not implemented;
        # defaults (0.0 / eval) make them identity.
        del drop, attn_drop, drop_path
        if key is None:
            key = jax.random.PRNGKey(0)

        self.patch_size = patch_size
        self.num_heads = num_heads
        self.num_inner_heads = num_inner_heads
        words = patch_size * patch_size
        self.c_in = dim * words                     # pixel-token feature dim
        self.c_out = dim * words_in_sentence        # row/col-token feature dim
        hid_in = int(self.c_in * 4)
        hid_out = int(self.c_out * mlp_ratio)

        # ---- raw f32 parameters (also consumed by the pure-JAX reference) --
        self.norm_in = _ln_params(self.c_in)
        self.norm_mlp_in = _ln_params(self.c_in)
        self.norm_proj = _ln_params(self.c_in)
        self.norm_out = _ln_params(self.c_out)
        self.norm_mlp = _ln_params(self.c_out)

        ks = jax.random.split(key, 10)
        self.attn_in1 = _attn_params(ks[0], self.c_in)
        self.attn_in2 = _attn_params(ks[1], self.c_in)
        self.attn_out1 = _attn_params(ks[2], self.c_out)
        self.attn_out2 = _attn_params(ks[3], self.c_out)
        self.mlp_in1 = _mlp_params(ks[4], self.c_in, hid_in)
        self.mlp_in2 = _mlp_params(ks[5], self.c_in, hid_in)
        self.mlp1 = _mlp_params(ks[6], self.c_out, hid_out)
        self.mlp2 = _mlp_params(ks[7], self.c_out, hid_out)
        self.proj1 = _linear_params(ks[8], self.c_in, self.c_in)
        self.proj2 = _linear_params(ks[9], self.c_in, self.c_in)

        # ---- kernel-ready parameters: bf16 matmul weights, per-head split,
        #      stacked along the leading "which path" axis (size 2) ----------
        self.sent_attn = _stack2(_prep_attn(self.attn_out1, num_heads),
                                 _prep_attn(self.attn_out2, num_heads))
        self.sent_mlp = _stack2(_prep_mlp(self.mlp1), _prep_mlp(self.mlp2))

        p1, p2 = _prep_linear(self.proj1), _prep_linear(self.proj2)
        a1 = _prep_attn(self.attn_in1, num_inner_heads)
        a2 = _prep_attn(self.attn_in2, num_inner_heads)
        # path0 (pixel_embed1): proj1 -> attn_in1 -> proj2 -> attn_in2 -> mlp_in1
        # path1 (pixel_embed2): proj2 -> attn_in2 -> proj1 -> attn_in1 -> mlp_in2
        self.px_proj_a = _stack2(p1, p2)
        self.px_proj_b = _stack2(p2, p1)
        self.px_attn_a = _stack2(a1, a2)
        self.px_attn_b = _stack2(a2, a1)
        self.px_mlp = _stack2(_prep_mlp(self.mlp_in1), _prep_mlp(self.mlp_in2))

    def __call__(self, pixel_embed1, pixel_embed2, row_embed, column_embed,
                 relative_pos=None):
        assert relative_pos is None  # TODO(synk): relative_pos bias not implemented
        BH, W_grid, c_in = pixel_embed1.shape
        H_grid = W_grid
        p = self.patch_size
        B, N, c_out = row_embed.shape
        assert N == H_grid and c_in == self.c_in and c_out == self.c_out
        assert BH == B * H_grid

        # --- sentence (row / column) sub-blocks: ONE fused pallas_call -------
        xs = jnp.stack([row_embed, column_embed])            # (2, B, N, c_out)
        xs = fused_sentence_blocks(xs, self.norm_out, self.norm_mlp,
                                   self.sent_attn, self.sent_mlp,
                                   num_heads=self.num_heads)
        row_embed, column_embed = xs[0], xs[1]

        # --- re-layout row / column embeds onto the pixel grid (XLA) --------
        dim = c_in // (p * p)
        HW = H_grid * W_grid
        row_in = jnp.transpose(
            row_embed.reshape(B * H_grid, p, W_grid, p, dim),
            (0, 2, 1, 3, 4)).reshape(B, HW, c_in)
        col_in = jnp.transpose(
            column_embed.reshape(B, W_grid, H_grid, c_in),
            (0, 2, 1, 3)).reshape(B, HW, c_in)

        # --- both pixel paths: ONE fused pallas_call -------------------------
        pxs = jnp.stack([pixel_embed1.reshape(B, HW, c_in),
                         pixel_embed2.reshape(B, HW, c_in)])
        srca = jnp.stack([row_in, col_in])
        srcb = jnp.stack([col_in, row_in])
        pxs = fused_pixel_paths(pxs, srca, srcb,
                                self.norm_proj, self.px_proj_a, self.px_proj_b,
                                self.norm_in, self.px_attn_a, self.px_attn_b,
                                self.norm_mlp_in, self.px_mlp,
                                num_heads=self.num_inner_heads)
        px1 = pxs[0].reshape(B * H_grid, W_grid, c_in)
        px2 = pxs[1].reshape(B * H_grid, W_grid, c_in)
        return px1, px2, row_embed, column_embed


# ----------------------------------------------------------------------------
# Pure-JAX reference (f32, highest matmul precision) for validation
# ----------------------------------------------------------------------------
_HP = jax.lax.Precision.HIGHEST


def _ref_ln(x, g, b):
    mean = jnp.mean(x, axis=-1, keepdims=True)
    var = jnp.mean((x - mean) ** 2, axis=-1, keepdims=True)
    return (x - mean) * jax.lax.rsqrt(var + LN_EPS) * g + b


def _ref_attn(x, params, num_heads):
    w_qk, w_v, w_proj, b_proj = params
    B, N, C = x.shape
    hd = C // num_heads
    qk = jnp.einsum('bnc,cd->bnd', x, w_qk, precision=_HP)
    q = qk[..., :C].reshape(B, N, num_heads, hd).transpose(0, 2, 1, 3)
    k = qk[..., C:].reshape(B, N, num_heads, hd).transpose(0, 2, 1, 3)
    v = jnp.einsum('bnc,cd->bnd', x, w_v, precision=_HP
                   ).reshape(B, N, num_heads, hd).transpose(0, 2, 1, 3)
    s = jnp.einsum('bhnd,bhmd->bhnm', q, k, precision=_HP) * (hd ** -0.5)
    pattn = jax.nn.softmax(s, axis=-1)
    o = jnp.einsum('bhnm,bhmd->bhnd', pattn, v, precision=_HP)
    o = o.transpose(0, 2, 1, 3).reshape(B, N, C)
    return jnp.einsum('bnc,cd->bnd', o, w_proj, precision=_HP) + b_proj


def _ref_mlp(x, params):
    w1, b1, w2, b2 = params
    h = jnp.dot(x, w1, precision=_HP) + b1
    h = _gelu_exact(h)
    return jnp.dot(h, w2, precision=_HP) + b2


def _ref_block(model, px1, px2, row, col):
    p = model.patch_size
    B, N, c_out = row.shape
    H = W = N
    c_in = model.c_in
    g_out, b_out = model.norm_out
    g_mlp, b_mlp = model.norm_mlp
    g_proj, b_proj = model.norm_proj
    g_in, b_in = model.norm_in
    g_mlp_in, b_mlp_in = model.norm_mlp_in

    row = row + _ref_attn(_ref_ln(row, g_out, b_out), model.attn_out1, model.num_heads)
    row = row + _ref_mlp(_ref_ln(row, g_mlp, b_mlp), model.mlp1)
    col = col + _ref_attn(_ref_ln(col, g_out, b_out), model.attn_out2, model.num_heads)
    col = col + _ref_mlp(_ref_ln(col, g_mlp, b_mlp), model.mlp2)

    dim = c_in // (p * p)
    row_in = jnp.transpose(row.reshape(B * H, p, W, p, dim),
                           (0, 2, 1, 3, 4)).reshape(B * H, W, c_in)
    col_in = jnp.transpose(col.reshape(B, W, H, c_in),
                           (0, 2, 1, 3)).reshape(B * H, W, c_in)

    def proj(y, params):
        w, b = params
        return jnp.dot(_ref_ln(y, g_proj, b_proj), w, precision=_HP) + b

    def inner_attn(px, params):
        y = _ref_attn(_ref_ln(px.reshape(B, H * W, c_in), g_in, b_in), params,
                      model.num_inner_heads)
        return px + y.reshape(B * H, W, c_in)

    px1 = px1 + proj(row_in, model.proj1)
    px1 = inner_attn(px1, model.attn_in1)
    px1 = px1 + proj(col_in, model.proj2)
    px1 = inner_attn(px1, model.attn_in2)
    px1 = px1 + _ref_mlp(_ref_ln(px1, g_mlp_in, b_mlp_in), model.mlp_in1)

    px2 = px2 + proj(col_in, model.proj2)
    px2 = inner_attn(px2, model.attn_in2)
    px2 = px2 + proj(row_in, model.proj1)
    px2 = inner_attn(px2, model.attn_in1)
    px2 = px2 + _ref_mlp(_ref_ln(px2, g_mlp_in, b_mlp_in), model.mlp_in2)

    return px1, px2, row, col


# ----------------------------------------------------------------------------
if __name__ == "__main__":
    # Shapes consistent with hovertrans usage: img_size=16, patch_size=2, dim=4
    #   -> 8x8 patch grid, inner token dim 16, outer (row/col) token dim 128.
    dim = 4
    patch_size = 2
    img_size = 16
    grid = img_size // patch_size              # 8
    words_in_sentence = patch_size * img_size  # 32
    B = 2
    c_in = dim * patch_size * patch_size       # 16
    c_out = dim * words_in_sentence            # 128

    key = jax.random.PRNGKey(0)
    k_px1, k_px2, k_row, k_col, k_params = jax.random.split(key, 5)
    pixel_embed1 = jax.random.normal(k_px1, (B * grid, grid, c_in), jnp.float32)
    pixel_embed2 = jax.random.normal(k_px2, (B * grid, grid, c_in), jnp.float32)
    row_embed = jax.random.normal(k_row, (B, grid, c_out), jnp.float32)
    column_embed = jax.random.normal(k_col, (B, grid, c_out), jnp.float32)

    model = Block(dim=dim, words_in_sentence=words_in_sentence,
                  patch_size=patch_size, sentences=grid, in_chans=dim,
                  num_heads=2, num_inner_heads=4, key=k_params)

    fwd = jax.jit(lambda a, b, c, d: model(a, b, c, d))
    px1, px2, row_out, col_out = fwd(pixel_embed1, pixel_embed2,
                                     row_embed, column_embed)
    jax.block_until_ready((px1, px2, row_out, col_out))

    assert px1.shape == (B * grid, grid, c_in)
    assert px2.shape == (B * grid, grid, c_in)
    assert row_out.shape == (B, grid, c_out)
    assert col_out.shape == (B, grid, c_out)

    # Numerical validation against the f32 pure-JAX reference of the whole
    # Block. Tolerance accounts for bf16 matmul operands + EUP approx
    # reciprocal in the kernel (accumulation is f32).
    r_px1, r_px2, r_row, r_col = _ref_block(model, pixel_embed1, pixel_embed2,
                                            row_embed, column_embed)
    for got, want in ((px1, r_px1), (px2, r_px2),
                      (row_out, r_row), (col_out, r_col)):
        err = float(jnp.max(jnp.abs(got - want)))
        assert jnp.allclose(got, want, rtol=1e-1, atol=1e-1), err

    print("KERNEL_OK")
</pallas_src>

<mosaic_0001>
module attributes {stable_mosaic.version = 11 : i64} {
  func.func @_sentence_kernel(%arg0: i32, %arg1: i32, %arg2: memref<1x1x8x128xf32, #tpu.memory_space<vmem>>, %arg3: memref<1x128xf32, #tpu.memory_space<vmem>>, %arg4: memref<1x128xf32, #tpu.memory_space<vmem>>, %arg5: memref<1x2x128x64xbf16, #tpu.memory_space<vmem>>, %arg6: memref<1x2x128x64xbf16, #tpu.memory_space<vmem>>, %arg7: memref<1x2x128x64xbf16, #tpu.memory_space<vmem>>, %arg8: memref<1x2x64x128xbf16, #tpu.memory_space<vmem>>, %arg9: memref<1x1x128xf32, #tpu.memory_space<vmem>>, %arg10: memref<1x128xf32, #tpu.memory_space<vmem>>, %arg11: memref<1x128xf32, #tpu.memory_space<vmem>>, %arg12: memref<1x128x512xbf16, #tpu.memory_space<vmem>>, %arg13: memref<1x1x512xf32, #tpu.memory_space<vmem>>, %arg14: memref<1x512x128xbf16, #tpu.memory_space<vmem>>, %arg15: memref<1x1x128xf32, #tpu.memory_space<vmem>>, %arg16: memref<1x1x8x128xf32, #tpu.memory_space<vmem>>) attributes {dimension_semantics = [#tpu.dimension_semantics<parallel>, #tpu.dimension_semantics<parallel>], iteration_bounds = array<i64: 2, 2>, scalar_prefetch = 0 : i64, scratch_operands = 0 : i64, tpu.core_type = #tpu.core_type<tc>, window_params = [{transform_indices = @transform_0, window_bounds = array<i64: 1, 1, 8, 128>}, {pipeline_mode = #tpu.pipeline_mode<synchronous>, transform_indices = @transform_1, window_bounds = array<i64: 1, 128>}, {pipeline_mode = #tpu.pipeline_mode<synchronous>, transform_indices = @transform_2, window_bounds = array<i64: 1, 128>}, {transform_indices = @transform_3, window_bounds = array<i64: 1, 2, 128, 64>}, {transform_indices = @transform_4, window_bounds = array<i64: 1, 2, 128, 64>}, {transform_indices = @transform_5, window_bounds = array<i64: 1, 2, 128, 64>}, {transform_indices = @transform_6, window_bounds = array<i64: 1, 2, 64, 128>}, {transform_indices = @transform_7, window_bounds = array<i64: 1, 1, 128>}, {pipeline_mode = #tpu.pipeline_mode<synchronous>, transform_indices = @transform_8, window_bounds = array<i64: 1, 128>}, {pipeline_mode = #tpu.pipeline_mode<synchronous>, transform_indices = @transform_9, window_bounds = array<i64: 1, 128>}, {transform_indices = @transform_10, window_bounds = array<i64: 1, 128, 512>}, {transform_indices = @transform_11, window_bounds = array<i64: 1, 1, 512>}, {transform_indices = @transform_12, window_bounds = array<i64: 1, 512, 128>}, {transform_indices = @transform_13, window_bounds = array<i64: 1, 1, 128>}, {transform_indices = @transform_14, window_bounds = array<i64: 1, 1, 8, 128>}]} {
    %c0 = arith.constant 0 : index
    %c0_0 = arith.constant 0 : index
    %c0_1 = arith.constant 0 : index
    %c0_2 = arith.constant 0 : index
    %0 = vector.load %arg2[%c0, %c0_0, %c0_1, %c0_2] : memref<1x1x8x128xf32, #tpu.memory_space<vmem>>, vector<1x1x8x128xf32>
    %1 = vector.shape_cast %0 : vector<1x1x8x128xf32> to vector<8x128xf32>
    %c0_3 = arith.constant 0 : index
    %c0_4 = arith.constant 0 : index
    %2 = vector.load %arg3[%c0_3, %c0_4] : memref<1x128xf32, #tpu.memory_space<vmem>>, vector<1x128xf32>
    %c0_5 = arith.constant 0 : index
    %c0_6 = arith.constant 0 : index
    %3 = vector.load %arg4[%c0_5, %c0_6] : memref<1x128xf32, #tpu.memory_space<vmem>>, vector<1x128xf32>
    %cst = arith.constant dense<0.000000e+00> : vector<8xf32>
    %4 = vector.multi_reduction <add>, %1, %cst [1] : vector<8x128xf32> to vector<8xf32>
    %5 = vector.shape_cast %4 : vector<8xf32> to vector<8x1xf32>
    %cst_7 = arith.constant 1.280000e+02 : f32
    %6 = vector.broadcast %cst_7 : f32 to vector<8x1xf32>
    %7 = arith.divf %5, %6 : vector<8x1xf32>
    %8 = vector.broadcast %7 : vector<8x1xf32> to vector<8x128xf32>
    %9 = arith.subf %1, %8 : vector<8x128xf32>
    %10 = arith.mulf %9, %9 : vector<8x128xf32>
    %cst_8 = arith.constant dense<0.000000e+00> : vector<8xf32>
    %11 = vector.multi_reduction <add>, %10, %cst_8 [1] : vector<8x128xf32> to vector<8xf32>
    %12 = vector.shape_cast %11 : vector<8xf32> to vector<8x1xf32>
    %cst_9 = arith.constant 1.280000e+02 : f32
    %13 = vector.broadcast %cst_9 : f32 to vector<8x1xf32>
    %14 = arith.divf %12, %13 : vector<8x1xf32>
    %cst_10 = arith.constant 9.99999974E-6 : f32
    %15 = vector.broadcast %cst_10 : f32 to vector<8x1xf32>
    %16 = arith.addf %14, %15 : vector<8x1xf32>
    %17 = math.rsqrt %16 : vector<8x1xf32>
    %18 = vector.broadcast %17 : vector<8x1xf32> to vector<8x128xf32>
    %19 = arith.mulf %9, %18 : vector<8x128xf32>
    %20 = vector.broadcast %2 : vector<1x128xf32> to vector<8x128xf32>
    %21 = arith.mulf %19, %20 : vector<8x128xf32>
    %22 = vector.broadcast %3 : vector<1x128xf32> to vector<8x128xf32>
    %23 = arith.addf %21, %22 : vector<8x128xf32>
    %c0_11 = arith.constant 0 : index
    %c0_12 = arith.constant 0 : index
    %c0_13 = arith.constant 0 : index
    %24 = vector.load %arg9[%c0_11, %c0_12, %c0_13] : memref<1x1x128xf32, #tpu.memory_space<vmem>>, vector<1x1x128xf32>
    %25 = vector.shape_cast %24 : vector<1x1x128xf32> to vector<1x128xf32>
    %26 = arith.truncf %23 : vector<8x128xf32> to vector<8x128xbf16>
    %c0_14 = arith.constant 0 : index
    %c0_15 = arith.constant 0 : index
    %c0_16 = arith.constant 0 : index
    %c0_17 = arith.constant 0 : index
    %27 = vector.load %arg5[%c0_14, %c0_15, %c0_16, %c0_17] : memref<1x2x128x64xbf16, #tpu.memory_space<vmem>>, vector<1x1x128x64xbf16>
    %28 = vector.shape_cast %27 : vector<1x1x128x64xbf16> to vector<128x64xbf16>
    %cst_18 = arith.constant dense<0.000000e+00> : vector<8x64xf32>
    %29 = tpu.matmul %26, %28, %cst_18 {dimension_numbers = #tpu.dot_dimension_numbers<[1], [0], [0], [1], [0, 0, 1, 1], [], []>} : vector<8x128xbf16>, vector<128x64xbf16>, vector<8x64xf32> -> vector<8x64xf32>
    %c0_19 = arith.constant 0 : index
    %c0_20 = arith.constant 0 : index
    %c0_21 = arith.constant 0 : index
    %c0_22 = arith.constant 0 : index
    %30 = vector.load %arg6[%c0_19, %c0_20, %c0_21, %c0_22] : memref<1x2x128x64xbf16, #tpu.memory_space<vmem>>, vector<1x1x128x64xbf16>
    %31 = vector.shape_cast %30 : vector<1x1x128x64xbf16> to vector<128x64xbf16>
    %cst_23 = arith.constant dense<0.000000e+00> : vector<8x64xf32>
    %32 = tpu.matmul %26, %31, %cst_23 {dimension_numbers = #tpu.dot_dimension_numbers<[1], [0], [0], [1], [0, 0, 1, 1], [], []>} : vector<8x128xbf16>, vector<128x64xbf16>, vector<8x64xf32> -> vector<8x64xf32>
    %c0_24 = arith.constant 0 : index
    %c0_25 = arith.constant 0 : index
    %c0_26 = arith.constant 0 : index
    %c0_27 = arith.constant 0 : index
    %33 = vector.load %arg7[%c0_24, %c0_25, %c0_26, %c0_27] : memref<1x2x128x64xbf16, #tpu.memory_space<vmem>>, vector<1x1x128x64xbf16>
    %34 = vector.shape_cast %33 : vector<1x1x128x64xbf16> to vector<128x64xbf16>
    %cst_28 = arith.constant dense<0.000000e+00> : vector<8x64xf32>
    %35 = tpu.matmul %26, %34, %cst_28 {dimension_numbers = #tpu.dot_dimension_numbers<[1], [0], [0], [1], [0, 0, 1, 1], [], []>} : vector<8x128xbf16>, vector<128x64xbf16>, vector<8x64xf32> -> vector<8x64xf32>
    %36 = arith.truncf %29 : vector<8x64xf32> to vector<8x64xbf16>
    %37 = arith.truncf %32 : vector<8x64xf32> to vector<8x64xbf16>
    %cst_29 = arith.constant dense<0.000000e+00> : vector<8x8xf32>
    %38 = tpu.matmul %36, %37, %cst_29 {dimension_numbers = #tpu.dot_dimension_numbers<[1], [1], [0], [0], [0, 0, 1, 0], [], []>} : vector<8x64xbf16>, vector<8x64xbf16>, vector<8x8xf32> -> vector<8x8xf32>
    %cst_30 = arith.constant 1.250000e-01 : f32
    %39 = vector.broadcast %cst_30 : f32 to vector<8x8xf32>
    %40 = arith.mulf %38, %39 : vector<8x8xf32>
    %cst_31 = arith.constant dense<0xFF800000> : vector<8xf32>
    %41 = vector.multi_reduction <maximumf>, %40, %cst_31 [1] : vector<8x8xf32> to vector<8xf32>
    %42 = vector.shape_cast %41 : vector<8xf32> to vector<8x1xf32>
    %43 = vector.broadcast %42 : vector<8x1xf32> to vector<8x8xf32>
    %44 = arith.subf %40, %43 : vector<8x8xf32>
    %45 = math.exp %44 : vector<8x8xf32>
    %cst_32 = arith.constant dense<0.000000e+00> : vector<8xf32>
    %46 = vector.multi_reduction <add>, %45, %cst_32 [1] : vector<8x8xf32> to vector<8xf32>
    %47 = vector.shape_cast %46 : vector<8xf32> to vector<8x1xf32>
    %48 = tpu.reciprocal %47 {approx = true} : vector<8x1xf32> -> vector<8x1xf32>
    %49 = vector.broadcast %48 : vector<8x1xf32> to vector<8x8xf32>
    %50 = arith.mulf %45, %49 : vector<8x8xf32>
    %51 = arith.truncf %50 : vector<8x8xf32> to vector<8x8xbf16>
    %52 = arith.truncf %35 : vector<8x64xf32> to vector<8x64xbf16>
    %cst_33 = arith.constant dense<0.000000e+00> : vector<8x64xf32>
    %53 = tpu.matmul %51, %52, %cst_33 {dimension_numbers = #tpu.dot_dimension_numbers<[1], [0], [0], [1], [0, 0, 1, 1], [], []>} : vector<8x8xbf16>, vector<8x64xbf16>, vector<8x64xf32> -> vector<8x64xf32>
    %54 = arith.truncf %53 : vector<8x64xf32> to vector<8x64xbf16>
    %c0_34 = arith.constant 0 : index
    %c0_35 = arith.constant 0 : index
    %c0_36 = arith.constant 0 : index
    %c0_37 = arith.constant 0 : index
    %55 = vector.load %arg8[%c0_34, %c0_35, %c0_36, %c0_37] : memref<1x2x64x128xbf16, #tpu.memory_space<vmem>>, vector<1x1x64x128xbf16>
    %56 = vector.shape_cast %55 : vector<1x1x64x128xbf16> to vector<64x128xbf16>
    %cst_38 = arith.constant dense<0.000000e+00> : vector<8x128xf32>
    %57 = tpu.matmul %54, %56, %cst_38 {dimension_numbers = #tpu.dot_dimension_numbers<[1], [0], [0], [1], [0, 0, 1, 1], [], []>} : vector<8x64xbf16>, vector<64x128xbf16>, vector<8x128xf32> -> vector<8x128xf32>
    %c0_39 = arith.constant 0 : index
    %c1 = arith.constant 1 : index
    %c0_40 = arith.constant 0 : index
    %c0_41 = arith.constant 0 : index
    %58 = vector.load %arg5[%c0_39, %c1, %c0_40, %c0_41] : memref<1x2x128x64xbf16, #tpu.memory_space<vmem>>, vector<1x1x128x64xbf16>
    %59 = vector.shape_cast %58 : vector<1x1x128x64xbf16> to vector<128x64xbf16>
    %cst_42 = arith.constant dense<0.000000e+00> : vector<8x64xf32>
    %60 = tpu.matmul %26, %59, %cst_42 {dimension_numbers = #tpu.dot_dimension_numbers<[1], [0], [0], [1], [0, 0, 1, 1], [], []>} : vector<8x128xbf16>, vector<128x64xbf16>, vector<8x64xf32> -> vector<8x64xf32>
    %c0_43 = arith.constant 0 : index
    %c1_44 = arith.constant 1 : index
    %c0_45 = arith.constant 0 : index
    %c0_46 = arith.constant 0 : index
    %61 = vector.load %arg6[%c0_43, %c1_44, %c0_45, %c0_46] : memref<1x2x128x64xbf16, #tpu.memory_space<vmem>>, vector<1x1x128x64xbf16>
    %62 = vector.shape_cast %61 : vector<1x1x128x64xbf16> to vector<128x64xbf16>
    %cst_47 = arith.constant dense<0.000000e+00> : vector<8x64xf32>
    %63 = tpu.matmul %26, %62, %cst_47 {dimension_numbers = #tpu.dot_dimension_numbers<[1], [0], [0], [1], [0, 0, 1, 1], [], []>} : vector<8x128xbf16>, vector<128x64xbf16>, vector<8x64xf32> -> vector<8x64xf32>
    %c0_48 = arith.constant 0 : index
    %c1_49 = arith.constant 1 : index
    %c0_50 = arith.constant 0 : index
    %c0_51 = arith.constant 0 : index
    %64 = vector.load %arg7[%c0_48, %c1_49, %c0_50, %c0_51] : memref<1x2x128x64xbf16, #tpu.memory_space<vmem>>, vector<1x1x128x64xbf16>
    %65 = vector.shape_cast %64 : vector<1x1x128x64xbf16> to vector<128x64xbf16>
    %cst_52 = arith.constant dense<0.000000e+00> : vector<8x64xf32>
    %66 = tpu.matmul %26, %65, %cst_52 {dimension_numbers = #tpu.dot_dimension_numbers<[1], [0], [0], [1], [0, 0, 1, 1], [], []>} : vector<8x128xbf16>, vector<128x64xbf16>, vector<8x64xf32> -> vector<8x64xf32>
    %67 = arith.truncf %60 : vector<8x64xf32> to vector<8x64xbf16>
    %68 = arith.truncf %63 : vector<8x64xf32> to vector<8x64xbf16>
    %cst_53 = arith.constant dense<0.000000e+00> : vector<8x8xf32>
    %69 = tpu.matmul %67, %68, %cst_53 {dimension_numbers = #tpu.dot_dimension_numbers<[1], [1], [0], [0], [0, 0, 1, 0], [], []>} : vector<8x64xbf16>, vector<8x64xbf16>, vector<8x8xf32> -> vector<8x8xf32>
    %cst_54 = arith.constant 1.250000e-01 : f32
    %70 = vector.broadcast %cst_54 : f32 to vector<8x8xf32>
    %71 = arith.mulf %69, %70 : vector<8x8xf32>
    %cst_55 = arith.constant dense<0xFF800000> : vector<8xf32>
    %72 = vector.multi_reduction <maximumf>, %71, %cst_55 [1] : vector<8x8xf32> to vector<8xf32>
    %73 = vector.shape_cast %72 : vector<8xf32> to vector<8x1xf32>
    %74 = vector.broadcast %73 : vector<8x1xf32> to vector<8x8xf32>
    %75 = arith.subf %71, %74 : vector<8x8xf32>
    %76 = math.exp %75 : vector<8x8xf32>
    %cst_56 = arith.constant dense<0.000000e+00> : vector<8xf32>
    %77 = vector.multi_reduction <add>, %76, %cst_56 [1] : vector<8x8xf32> to vector<8xf32>
    %78 = vector.shape_cast %77 : vector<8xf32> to vector<8x1xf32>
    %79 = tpu.reciprocal %78 {approx = true} : vector<8x1xf32> -> vector<8x1xf32>
    %80 = vector.broadcast %79 : vector<8x1xf32> to vector<8x8xf32>
    %81 = arith.mulf %76, %80 : vector<8x8xf32>
    %82 = arith.truncf %81 : vector<8x8xf32> to vector<8x8xbf16>
    %83 = arith.truncf %66 : vector<8x64xf32> to vector<8x64xbf16>
    %cst_57 = arith.constant dense<0.000000e+00> : vector<8x64xf32>
    %84 = tpu.matmul %82, %83, %cst_57 {dimension_numbers = #tpu.dot_dimension_numbers<[1], [0], [0], [1], [0, 0, 1, 1], [], []>} : vector<8x8xbf16>, vector<8x64xbf16>, vector<8x64xf32> -> vector<8x64xf32>
    %85 = arith.truncf %84 : vector<8x64xf32> to vector<8x64xbf16>
    %c0_58 = arith.constant 0 : index
    %c1_59 = arith.constant 1 : index
    %c0_60 = arith.constant 0 : index
    %c0_61 = arith.constant 0 : index
    %86 = vector.load %arg8[%c0_58, %c1_59, %c0_60, %c0_61] : memref<1x2x64x128xbf16, #tpu.memory_space<vmem>>, vector<1x1x64x128xbf16>
    %87 = vector.shape_cast %86 : vector<1x1x64x128xbf16> to vector<64x128xbf16>
    %cst_62 = arith.constant dense<0.000000e+00> : vector<8x128xf32>
    %88 = tpu.matmul %85, %87, %cst_62 {dimension_numbers = #tpu.dot_dimension_numbers<[1], [0], [0], [1], [0, 0, 1, 1], [], []>} : vector<8x64xbf16>, vector<64x128xbf16>, vector<8x128xf32> -> vector<8x128xf32>
    %89 = arith.addf %57, %88 : vector<8x128xf32>
    %90 = vector.broadcast %25 : vector<1x128xf32> to vector<8x128xf32>
    %91 = arith.addf %89, %90 : vector<8x128xf32>
    %92 = arith.addf %1, %91 : vector<8x128xf32>
    %c0_63 = arith.constant 0 : index
    %c0_64 = arith.constant 0 : index
    %93 = vector.load %arg10[%c0_63, %c0_64] : memref<1x128xf32, #tpu.memory_space<vmem>>, vector<1x128xf32>
    %c0_65 = arith.constant 0 : index
    %c0_66 = arith.constant 0 : index
    %94 = vector.load %arg11[%c0_65, %c0_66] : memref<1x128xf32, #tpu.memory_space<vmem>>, vector<1x128xf32>
    %cst_67 = arith.constant dense<0.000000e+00> : vector<8xf32>
    %95 = vector.multi_reduction <add>, %92, %cst_67 [1] : vector<8x128xf32> to vector<8xf32>
    %96 = vector.shape_cast %95 : vector<8xf32> to vector<8x1xf32>
    %cst_68 = arith.constant 1.280000e+02 : f32
    %97 = vector.broadcast %cst_68 : f32 to vector<8x1xf32>
    %98 = arith.divf %96, %97 : vector<8x1xf32>
    %99 = vector.broadcast %98 : vector<8x1xf32> to vector<8x128xf32>
    %100 = arith.subf %92, %99 : vector<8x128xf32>
    %101 = arith.mulf %100, %100 : vector<8x128xf32>
    %cst_69 = arith.constant dense<0.000000e+00> : vector<8xf32>
    %102 = vector.multi_reduction <add>, %101, %cst_69 [1] : vector<8x128xf32> to vector<8xf32>
    %103 = vector.shape_cast %102 : vector<8xf32> to vector<8x1xf32>
    %cst_70 = arith.constant 1.280000e+02 : f32
    %104 = vector.broadcast %cst_70 : f32 to vector<8x1xf32>
    %105 = arith.divf %103, %104 : vector<8x1xf32>
    %cst_71 = arith.constant 9.99999974E-6 : f32
    %106 = vector.broadcast %cst_71 : f32 to vector<8x1xf32>
    %107 = arith.addf %105, %106 : vector<8x1xf32>
    %108 = math.rsqrt %107 : vector<8x1xf32>
    %109 = vector.broadcast %108 : vector<8x1xf32> to vector<8x128xf32>
    %110 = arith.mulf %100, %109 : vector<8x128xf32>
    %111 = vector.broadcast %93 : vector<1x128xf32> to vector<8x128xf32>
    %112 = arith.mulf %110, %111 : vector<8x128xf32>
    %113 = vector.broadcast %94 : vector<1x128xf32> to vector<8x128xf32>
    %114 = arith.addf %112, %113 : vector<8x128xf32>
    %115 = arith.truncf %114 : vector<8x128xf32> to vector<8x128xbf16>
    %c0_72 = arith.constant 0 : index
    %c0_73 = arith.constant 0 : index
    %c0_74 = arith.constant 0 : index
    %116 = vector.load %arg12[%c0_72, %c0_73, %c0_74] : memref<1x128x512xbf16, #tpu.memory_space<vmem>>, vector<1x128x512xbf16>
    %117 = vector.shape_cast %116 : vector<1x128x512xbf16> to vector<128x512xbf16>
    %cst_75 = arith.constant dense<0.000000e+00> : vector<8x512xf32>
    %118 = tpu.matmul %115, %117, %cst_75 {dimension_numbers = #tpu.dot_dimension_numbers<[1], [0], [0], [1], [0, 0, 1, 1], [], []>} : vector<8x128xbf16>, vector<128x512xbf16>, vector<8x512xf32> -> vector<8x512xf32>
    %c0_76 = arith.constant 0 : index
    %c0_77 = arith.constant 0 : index
    %c0_78 = arith.constant 0 : index
    %119 = vector.load %arg13[%c0_76, %c0_77, %c0_78] : memref<1x1x512xf32, #tpu.memory_space<vmem>>, vector<1x1x512xf32>
    %120 = vector.shape_cast %119 : vector<1x1x512xf32> to vector<1x512xf32>
    %121 = vector.broadcast %120 : vector<1x512xf32> to vector<8x512xf32>
    %122 = arith.addf %118, %121 : vector<8x512xf32>
    %cst_79 = arith.constant 5.000000e-01 : f32
    %123 = vector.broadcast %cst_79 : f32 to vector<8x512xf32>
    %124 = arith.mulf %123, %122 : vector<8x512xf32>
    %cst_80 = arith.constant 0.707106769 : f32
    %125 = vector.broadcast %cst_80 : f32 to vector<8x512xf32>
    %126 = arith.mulf %122, %125 : vector<8x512xf32>
    %127 = math.erf %126 : vector<8x512xf32>
    %cst_81 = arith.constant 1.000000e+00 : f32
    %128 = vector.broadcast %cst_81 : f32 to vector<8x512xf32>
    %129 = arith.addf %128, %127 : vector<8x512xf32>
    %130 = arith.mulf %124, %129 : vector<8x512xf32>
    %131 = arith.truncf %130 : vector<8x512xf32> to vector<8x512xbf16>
    %c0_82 = arith.constant 0 : index
    %c0_83 = arith.constant 0 : index
    %c0_84 = arith.constant 0 : index
    %132 = vector.load %arg14[%c0_82, %c0_83, %c0_84] : memref<1x512x128xbf16, #tpu.memory_space<vmem>>, vector<1x512x128xbf16>
    %133 = vector.shape_cast %132 : vector<1x512x128xbf16> to vector<512x128xbf16>
    %cst_85 = arith.constant dense<0.000000e+00> : vector<8x128xf32>
    %134 = tpu.matmul %131, %133, %cst_85 {dimension_numbers = #tpu.dot_dimension_numbers<[1], [0], [0], [1], [0, 0, 1, 1], [], []>} : vector<8x512xbf16>, vector<512x128xbf16>, vector<8x128xf32> -> vector<8x128xf32>
    %c0_86 = arith.constant 0 : index
    %c0_87 = arith.constant 0 : index
    %c0_88 = arith.constant 0 : index
    %135 = vector.load %arg15[%c0_86, %c0_87, %c0_88] : memref<1x1x128xf32, #tpu.memory_space<vmem>>, vector<1x1x128xf32>
    %136 = vector.shape_cast %135 : vector<1x1x128xf32> to vector<1x128xf32>
    %137 = vector.broadcast %136 : vector<1x128xf32> to vector<8x128xf32>
    %138 = arith.addf %134, %137 : vector<8x128xf32>
    %139 = arith.addf %92, %138 : vector<8x128xf32>
    %c0_89 = arith.constant 0 : index
    %c0_90 = arith.constant 0 : index
    %c0_91 = arith.constant 0 : index
    %c0_92 = arith.constant 0 : index
    %140 = vector.load %arg16[%c0_89, %c0_90, %c0_91, %c0_92] : memref<1x1x8x128xf32, #tpu.memory_space<vmem>>, vector<1x1x8x128xf32>
    %141 = vector.shape_cast %140 : vector<1x1x8x128xf32> to vector<8x128xf32>
    %142 = vector.shape_cast %139 : vector<8x128xf32> to vector<1x1x8x128xf32>
    tpu.vector_store %arg16[%c0_89, %c0_90, %c0_91, %c0_92], %142 {strides = array<i32>} : memref<1x1x8x128xf32, #tpu.memory_space<vmem>>, vector<1x1x8x128xf32>,
    return
  }
  func.func @transform_0(%arg0: i32, %arg1: i32) -> (i32, i32, i32, i32) {
    %c0_i32 = arith.constant 0 : i32
    %c0_i32_0 = arith.constant 0 : i32
    %c0_i32_1 = arith.constant 0 : i32
    return %arg0, %arg1, %c0_i32, %c0_i32_0 : i32, i32, i32, i32
  }
  func.func @transform_1(%arg0: i32, %arg1: i32) -> (i32, i32) {
    %c0_i32 = arith.constant 0 : i32
    %c0_i32_0 = arith.constant 0 : i32
    %c0_i32_1 = arith.constant 0 : i32
    return %c0_i32, %c0_i32_0 : i32, i32
  }
  func.func @transform_2(%arg0: i32, %arg1: i32) -> (i32, i32) {
    %c0_i32 = arith.constant 0 : i32
    %c0_i32_0 = arith.constant 0 : i32
    %c0_i32_1 = arith.constant 0 : i32
    return %c0_i32, %c0_i32_0 : i32, i32
  }
  func.func @transform_3(%arg0: i32, %arg1: i32) -> (i32, i32, i32, i32) {
    %c0_i32 = arith.constant 0 : i32
    %c0_i32_0 = arith.constant 0 : i32
    %c0_i32_1 = arith.constant 0 : i32
    %c0_i32_2 = arith.constant 0 : i32
    return %arg0, %c0_i32, %c0_i32_0, %c0_i32_1 : i32, i32, i32, i32
  }
  func.func @transform_4(%arg0: i32, %arg1: i32) -> (i32, i32, i32, i32) {
    %c0_i32 = arith.constant 0 : i32
    %c0_i32_0 = arith.constant 0 : i32
    %c0_i32_1 = arith.constant 0 : i32
    %c0_i32_2 = arith.constant 0 : i32
    return %arg0, %c0_i32, %c0_i32_0, %c0_i32_1 : i32, i32, i32, i32
  }
  func.func @transform_5(%arg0: i32, %arg1: i32) -> (i32, i32, i32, i32) {
    %c0_i32 = arith.constant 0 : i32
    %c0_i32_0 = arith.constant 0 : i32
    %c0_i32_1 = arith.constant 0 : i32
    %c0_i32_2 = arith.constant 0 : i32
    return %arg0, %c0_i32, %c0_i32_0, %c0_i32_1 : i32, i32, i32, i32
  }
  func.func @transform_6(%arg0: i32, %arg1: i32) -> (i32, i32, i32, i32) {
    %c0_i32 = arith.constant 0 : i32
    %c0_i32_0 = arith.constant 0 : i32
    %c0_i32_1 = arith.constant 0 : i32
    %c0_i32_2 = arith.constant 0 : i32
    return %arg0, %c0_i32, %c0_i32_0, %c0_i32_1 : i32, i32, i32, i32
  }
  func.func @transform_7(%arg0: i32, %arg1: i32) -> (i32, i32, i32) {
    %c0_i32 = arith.constant 0 : i32
    %c0_i32_0 = arith.constant 0 : i32
    %c0_i32_1 = arith.constant 0 : i32
    return %arg0, %c0_i32, %c0_i32_0 : i32, i32, i32
  }
  func.func @transform_8(%arg0: i32, %arg1: i32) -> (i32, i32) {
    %c0_i32 = arith.constant 0 : i32
    %c0_i32_0 = arith.constant 0 : i32
    %c0_i32_1 = arith.constant 0 : i32
    return %c0_i32, %c0_i32_0 : i32, i32
  }
  func.func @transform_9(%arg0: i32, %arg1: i32) -> (i32, i32) {
    %c0_i32 = arith.constant 0 : i32
    %c0_i32_0 = arith.constant 0 : i32
    %c0_i32_1 = arith.constant 0 : i32
    return %c0_i32, %c0_i32_0 : i32, i32
  }
  func.func @transform_10(%arg0: i32, %arg1: i32) -> (i32, i32, i32) {
    %c0_i32 = arith.constant 0 : i32
    %c0_i32_0 = arith.constant 0 : i32
    %c0_i32_1 = arith.constant 0 : i32
    return %arg0, %c0_i32, %c0_i32_0 : i32, i32, i32
  }
  func.func @transform_11(%arg0: i32, %arg1: i32) -> (i32, i32, i32) {
    %c0_i32 = arith.constant 0 : i32
    %c0_i32_0 = arith.constant 0 : i32
    %c0_i32_1 = arith.constant 0 : i32
    return %arg0, %c0_i32, %c0_i32_0 : i32, i32, i32
  }
  func.func @transform_12(%arg0: i32, %arg1: i32) -> (i32, i32, i32) {
    %c0_i32 = arith.constant 0 : i32
    %c0_i32_0 = arith.constant 0 : i32
    %c0_i32_1 = arith.constant 0 : i32
    return %arg0, %c0_i32, %c0_i32_0 : i32, i32, i32
  }
  func.func @transform_13(%arg0: i32, %arg1: i32) -> (i32, i32, i32) {
    %c0_i32 = arith.constant 0 : i32
    %c0_i32_0 = arith.constant 0 : i32
    %c0_i32_1 = arith.constant 0 : i32
    return %arg0, %c0_i32, %c0_i32_0 : i32, i32, i32
  }
  func.func @transform_14(%arg0: i32, %arg1: i32) -> (i32, i32, i32, i32) {
    %c0_i32 = arith.constant 0 : i32
    %c0_i32_0 = arith.constant 0 : i32
    %c0_i32_1 = arith.constant 0 : i32
    return %arg0, %arg1, %c0_i32, %c0_i32_0 : i32, i32, i32, i32
  }
}

module attributes {stable_mosaic.version = 11 : i64} {
  func.func @_pixel_kernel(%arg0: i32, %arg1: i32, %arg2: memref<1x1x64x16xf32, #tpu.memory_space<vmem>>, %arg3: memref<1x1x64x16xf32, #tpu.memory_space<vmem>>, %arg4: memref<1x1x64x16xf32, #tpu.memory_space<vmem>>, %arg5: memref<1x16xf32, #tpu.memory_space<vmem>>, %arg6: memref<1x16xf32, #tpu.memory_space<vmem>>, %arg7: memref<1x16x16xbf16, #tpu.memory_space<vmem>>, %arg8: memref<1x1x16xf32, #tpu.memory_space<vmem>>, %arg9: memref<1x16x16xbf16, #tpu.memory_space<vmem>>, %arg10: memref<1x1x16xf32, #tpu.memory_space<vmem>>, %arg11: memref<1x16xf32, #tpu.memory_space<vmem>>, %arg12: memref<1x16xf32, #tpu.memory_space<vmem>>, %arg13: memref<1x4x16x4xbf16, #tpu.memory_space<vmem>>, %arg14: memref<1x4x16x4xbf16, #tpu.memory_space<vmem>>, %arg15: memref<1x4x16x4xbf16, #tpu.memory_space<vmem>>, %arg16: memref<1x4x4x16xbf16, #tpu.memory_space<vmem>>, %arg17: memref<1x1x16xf32, #tpu.memory_space<vmem>>, %arg18: memref<1x4x16x4xbf16, #tpu.memory_space<vmem>>, %arg19: memref<1x4x16x4xbf16, #tpu.memory_space<vmem>>, %arg20: memref<1x4x16x4xbf16, #tpu.memory_space<vmem>>, %arg21: memref<1x4x4x16xbf16, #tpu.memory_space<vmem>>, %arg22: memref<1x1x16xf32, #tpu.memory_space<vmem>>, %arg23: memref<1x16xf32, #tpu.memory_space<vmem>>, %arg24: memref<1x16xf32, #tpu.memory_space<vmem>>, %arg25: memref<1x16x64xbf16, #tpu.memory_space<vmem>>, %arg26: memref<1x1x64xf32, #tpu.memory_space<vmem>>, %arg27: memref<1x64x16xbf16, #tpu.memory_space<vmem>>, %arg28: memref<1x1x16xf32, #tpu.memory_space<vmem>>, %arg29: memref<1x1x64x16xf32, #tpu.memory_space<vmem>>) attributes {dimension_semantics = [#tpu.dimension_semantics<parallel>, #tpu.dimension_semantics<parallel>], iteration_bounds = array<i64: 2, 2>, scalar_prefetch = 0 : i64, scratch_operands = 0 : i64, tpu.core_type = #tpu.core_type<tc>, window_params = [{transform_indices = @transform_0, window_bounds = array<i64: 1, 1, 64, 16>}, {transform_indices = @transform_1, window_bounds = array<i64: 1, 1, 64, 16>}, {transform_indices = @transform_2, window_bounds = array<i64: 1, 1, 64, 16>}, {pipeline_mode = #tpu.pipeline_mode<synchronous>, transform_indices = @transform_3, window_bounds = array<i64: 1, 16>}, {pipeline_mode = #tpu.pipeline_mode<synchronous>, transform_indices = @transform_4, window_bounds = array<i64: 1, 16>}, {transform_indices = @transform_5, window_bounds = array<i64: 1, 16, 16>}, {transform_indices = @transform_6, window_bounds = array<i64: 1, 1, 16>}, {transform_indices = @transform_7, window_bounds = array<i64: 1, 16, 16>}, {transform_indices = @transform_8, window_bounds = array<i64: 1, 1, 16>}, {pipeline_mode = #tpu.pipeline_mode<synchronous>, transform_indices = @transform_9, window_bounds = array<i64: 1, 16>}, {pipeline_mode = #tpu.pipeline_mode<synchronous>, transform_indices = @transform_10, window_bounds = array<i64: 1, 16>}, {transform_indices = @transform_11, window_bounds = array<i64: 1, 4, 16, 4>}, {transform_indices = @transform_12, window_bounds = array<i64: 1, 4, 16, 4>}, {transform_indices = @transform_13, window_bounds = array<i64: 1, 4, 16, 4>}, {transform_indices = @transform_14, window_bounds = array<i64: 1, 4, 4, 16>}, {transform_indices = @transform_15, window_bounds = array<i64: 1, 1, 16>}, {transform_indices = @transform_16, window_bounds = array<i64: 1, 4, 16, 4>}, {transform_indices = @transform_17, window_bounds = array<i64: 1, 4, 16, 4>}, {transform_indices = @transform_18, window_bounds = array<i64: 1, 4, 16, 4>}, {transform_indices = @transform_19, window_bounds = array<i64: 1, 4, 4, 16>}, {transform_indices = @transform_20, window_bounds = array<i64: 1, 1, 16>}, {pipeline_mode = #tpu.pipeline_mode<synchronous>, transform_indices = @transform_21, window_bounds = array<i64: 1, 16>}, {pipeline_mode = #tpu.pipeline_mode<synchronous>, transform_indices = @transform_22, window_bounds = array<i64: 1, 16>}, {transform_indices = @transform_23, window_bounds = array<i64: 1, 16, 64>}, {transform_indices = @transform_24, window_bounds = array<i64: 1, 1, 64>}, {transform_indices = @transform_25, window_bounds = array<i64: 1, 64, 16>}, {transform_indices = @transform_26, window_bounds = array<i64: 1, 1, 16>}, {transform_indices = @transform_27, window_bounds = array<i64: 1, 1, 64, 16>}]} {
    %c0 = arith.constant 0 : index
    %c0_0 = arith.constant 0 : index
    %c0_1 = arith.constant 0 : index
    %c0_2 = arith.constant 0 : index
    %0 = vector.load %arg2[%c0, %c0_0, %c0_1, %c0_2] : memref<1x1x64x16xf32, #tpu.memory_space<vmem>>, vector<1x1x64x16xf32>
    %1 = vector.shape_cast %0 : vector<1x1x64x16xf32> to vector<64x16xf32>
    %c0_3 = arith.constant 0 : index
    %c0_4 = arith.constant 0 : index
    %2 = vector.load %arg5[%c0_3, %c0_4] : memref<1x16xf32, #tpu.memory_space<vmem>>, vector<1x16xf32>
    %c0_5 = arith.constant 0 : index
    %c0_6 = arith.constant 0 : index
    %3 = vector.load %arg6[%c0_5, %c0_6] : memref<1x16xf32, #tpu.memory_space<vmem>>, vector<1x16xf32>
    %c0_7 = arith.constant 0 : index
    %c0_8 = arith.constant 0 : index
    %4 = vector.load %arg11[%c0_7, %c0_8] : memref<1x16xf32, #tpu.memory_space<vmem>>, vector<1x16xf32>
    %c0_9 = arith.constant 0 : index
    %c0_10 = arith.constant 0 : index
    %5 = vector.load %arg12[%c0_9, %c0_10] : memref<1x16xf32, #tpu.memory_space<vmem>>, vector<1x16xf32>
    %c0_11 = arith.constant 0 : index
    %c0_12 = arith.constant 0 : index
    %c0_13 = arith.constant 0 : index
    %c0_14 = arith.constant 0 : index
    %6 = vector.load %arg3[%c0_11, %c0_12, %c0_13, %c0_14] : memref<1x1x64x16xf32, #tpu.memory_space<vmem>>, vector<1x1x64x16xf32>
    %7 = vector.shape_cast %6 : vector<1x1x64x16xf32> to vector<64x16xf32>
    %cst = arith.constant dense<0.000000e+00> : vector<64xf32>
    %8 = vector.multi_reduction <add>, %7, %cst [1] : vector<64x16xf32> to vector<64xf32>
    %9 = vector.shape_cast %8 : vector<64xf32> to vector<64x1xf32>
    %cst_15 = arith.constant 1.600000e+01 : f32
    %10 = vector.broadcast %cst_15 : f32 to vector<64x1xf32>
    %11 = arith.divf %9, %10 : vector<64x1xf32>
    %12 = vector.broadcast %11 : vector<64x1xf32> to vector<64x16xf32>
    %13 = arith.subf %7, %12 : vector<64x16xf32>
    %14 = arith.mulf %13, %13 : vector<64x16xf32>
    %cst_16 = arith.constant dense<0.000000e+00> : vector<64xf32>
    %15 = vector.multi_reduction <add>, %14, %cst_16 [1] : vector<64x16xf32> to vector<64xf32>
    %16 = vector.shape_cast %15 : vector<64xf32> to vector<64x1xf32>
    %cst_17 = arith.constant 1.600000e+01 : f32
    %17 = vector.broadcast %cst_17 : f32 to vector<64x1xf32>
    %18 = arith.divf %16, %17 : vector<64x1xf32>
    %cst_18 = arith.constant 9.99999974E-6 : f32
    %19 = vector.broadcast %cst_18 : f32 to vector<64x1xf32>
    %20 = arith.addf %18, %19 : vector<64x1xf32>
    %21 = math.rsqrt %20 : vector<64x1xf32>
    %22 = vector.broadcast %21 : vector<64x1xf32> to vector<64x16xf32>
    %23 = arith.mulf %13, %22 : vector<64x16xf32>
    %24 = vector.broadcast %2 : vector<1x16xf32> to vector<64x16xf32>
    %25 = arith.mulf %23, %24 : vector<64x16xf32>
    %26 = vector.broadcast %3 : vector<1x16xf32> to vector<64x16xf32>
    %27 = arith.addf %25, %26 : vector<64x16xf32>
    %28 = arith.truncf %27 : vector<64x16xf32> to vector<64x16xbf16>
    %c0_19 = arith.constant 0 : index
    %c0_20 = arith.constant 0 : index
    %c0_21 = arith.constant 0 : index
    %29 = vector.load %arg7[%c0_19, %c0_20, %c0_21] : memref<1x16x16xbf16, #tpu.memory_space<vmem>>, vector<1x16x16xbf16>
    %30 = vector.shape_cast %29 : vector<1x16x16xbf16> to vector<16x16xbf16>
    %cst_22 = arith.constant dense<0.000000e+00> : vector<64x16xf32>
    %31 = tpu.matmul %28, %30, %cst_22 {dimension_numbers = #tpu.dot_dimension_numbers<[1], [0], [0], [1], [0, 0, 1, 1], [], []>} : vector<64x16xbf16>, vector<16x16xbf16>, vector<64x16xf32> -> vector<64x16xf32>
    %32 = arith.addf %1, %31 : vector<64x16xf32>
    %c0_23 = arith.constant 0 : index
    %c0_24 = arith.constant 0 : index
    %c0_25 = arith.constant 0 : index
    %33 = vector.load %arg8[%c0_23, %c0_24, %c0_25] : memref<1x1x16xf32, #tpu.memory_space<vmem>>, vector<1x1x16xf32>
    %34 = vector.shape_cast %33 : vector<1x1x16xf32> to vector<1x16xf32>
    %35 = vector.broadcast %34 : vector<1x16xf32> to vector<64x16xf32>
    %36 = arith.addf %32, %35 : vector<64x16xf32>
    %cst_26 = arith.constant dense<0.000000e+00> : vector<64xf32>
    %37 = vector.multi_reduction <add>, %36, %cst_26 [1] : vector<64x16xf32> to vector<64xf32>
    %38 = vector.shape_cast %37 : vector<64xf32> to vector<64x1xf32>
    %cst_27 = arith.constant 1.600000e+01 : f32
    %39 = vector.broadcast %cst_27 : f32 to vector<64x1xf32>
    %40 = arith.divf %38, %39 : vector<64x1xf32>
    %41 = vector.broadcast %40 : vector<64x1xf32> to vector<64x16xf32>
    %42 = arith.subf %36, %41 : vector<64x16xf32>
    %43 = arith.mulf %42, %42 : vector<64x16xf32>
    %cst_28 = arith.constant dense<0.000000e+00> : vector<64xf32>
    %44 = vector.multi_reduction <add>, %43, %cst_28 [1] : vector<64x16xf32> to vector<64xf32>
    %45 = vector.shape_cast %44 : vector<64xf32> to vector<64x1xf32>
    %cst_29 = arith.constant 1.600000e+01 : f32
    %46 = vector.broadcast %cst_29 : f32 to vector<64x1xf32>
    %47 = arith.divf %45, %46 : vector<64x1xf32>
    %cst_30 = arith.constant 9.99999974E-6 : f32
    %48 = vector.broadcast %cst_30 : f32 to vector<64x1xf32>
    %49 = arith.addf %47, %48 : vector<64x1xf32>
    %50 = math.rsqrt %49 : vector<64x1xf32>
    %51 = vector.broadcast %50 : vector<64x1xf32> to vector<64x16xf32>
    %52 = arith.mulf %42, %51 : vector<64x16xf32>
    %53 = vector.broadcast %4 : vector<1x16xf32> to vector<64x16xf32>
    %54 = arith.mulf %52, %53 : vector<64x16xf32>
    %55 = vector.broadcast %5 : vector<1x16xf32> to vector<64x16xf32>
    %56 = arith.addf %54, %55 : vector<64x16xf32>
    %c0_31 = arith.constant 0 : index
    %c0_32 = arith.constant 0 : index
    %c0_33 = arith.constant 0 : index
    %57 = vector.load %arg17[%c0_31, %c0_32, %c0_33] : memref<1x1x16xf32, #tpu.memory_space<vmem>>, vector<1x1x16xf32>
    %58 = vector.shape_cast %57 : vector<1x1x16xf32> to vector<1x16xf32>
    %59 = arith.truncf %56 : vector<64x16xf32> to vector<64x16xbf16>
    %c0_34 = arith.constant 0 : index
    %c0_35 = arith.constant 0 : index
    %c0_36 = arith.constant 0 : index
    %c0_37 = arith.constant 0 : index
    %60 = vector.load %arg13[%c0_34, %c0_35, %c0_36, %c0_37] : memref<1x4x16x4xbf16, #tpu.memory_space<vmem>>, vector<1x1x16x4xbf16>
    %61 = vector.shape_cast %60 : vector<1x1x16x4xbf16> to vector<16x4xbf16>
    %cst_38 = arith.constant dense<0.000000e+00> : vector<64x4xf32>
    %62 = tpu.matmul %59, %61, %cst_38 {dimension_numbers = #tpu.dot_dimension_numbers<[1], [0], [0], [1], [0, 0, 1, 1], [], []>} : vector<64x16xbf16>, vector<16x4xbf16>, vector<64x4xf32> -> vector<64x4xf32>
    %c0_39 = arith.constant 0 : index
    %c0_40 = arith.constant 0 : index
    %c0_41 = arith.constant 0 : index
    %c0_42 = arith.constant 0 : index
    %63 = vector.load %arg14[%c0_39, %c0_40, %c0_41, %c0_42] : memref<1x4x16x4xbf16, #tpu.memory_space<vmem>>, vector<1x1x16x4xbf16>
    %64 = vector.shape_cast %63 : vector<1x1x16x4xbf16> to vector<16x4xbf16>
    %cst_43 = arith.constant dense<0.000000e+00> : vector<64x4xf32>
    %65 = tpu.matmul %59, %64, %cst_43 {dimension_numbers = #tpu.dot_dimension_numbers<[1], [0], [0], [1], [0, 0, 1, 1], [], []>} : vector<64x16xbf16>, vector<16x4xbf16>, vector<64x4xf32> -> vector<64x4xf32>
    %c0_44 = arith.constant 0 : index
    %c0_45 = arith.constant 0 : index
    %c0_46 = arith.constant 0 : index
    %c0_47 = arith.constant 0 : index
    %66 = vector.load %arg15[%c0_44, %c0_45, %c0_46, %c0_47] : memref<1x4x16x4xbf16, #tpu.memory_space<vmem>>, vector<1x1x16x4xbf16>
    %67 = vector.shape_cast %66 : vector<1x1x16x4xbf16> to vector<16x4xbf16>
    %cst_48 = arith.constant dense<0.000000e+00> : vector<64x4xf32>
    %68 = tpu.matmul %59, %67, %cst_48 {dimension_numbers = #tpu.dot_dimension_numbers<[1], [0], [0], [1], [0, 0, 1, 1], [], []>} : vector<64x16xbf16>, vector<16x4xbf16>, vector<64x4xf32> -> vector<64x4xf32>
    %69 = arith.truncf %62 : vector<64x4xf32> to vector<64x4xbf16>
    %70 = arith.truncf %65 : vector<64x4xf32> to vector<64x4xbf16>
    %cst_49 = arith.constant dense<0.000000e+00> : vector<64x64xf32>
    %71 = tpu.matmul %69, %70, %cst_49 {dimension_numbers = #tpu.dot_dimension_numbers<[1], [1], [0], [0], [0, 0, 1, 0], [], []>} : vector<64x4xbf16>, vector<64x4xbf16>, vector<64x64xf32> -> vector<64x64xf32>
    %cst_50 = arith.constant 5.000000e-01 : f32
    %72 = vector.broadcast %cst_50 : f32 to vector<64x64xf32>
    %73 = arith.mulf %71, %72 : vector<64x64xf32>
    %cst_51 = arith.constant dense<0xFF800000> : vector<64xf32>
    %74 = vector.multi_reduction <maximumf>, %73, %cst_51 [1] : vector<64x64xf32> to vector<64xf32>
    %75 = vector.shape_cast %74 : vector<64xf32> to vector<64x1xf32>
    %76 = vector.broadcast %75 : vector<64x1xf32> to vector<64x64xf32>
    %77 = arith.subf %73, %76 : vector<64x64xf32>
    %78 = math.exp %77 : vector<64x64xf32>
    %cst_52 = arith.constant dense<0.000000e+00> : vector<64xf32>
    %79 = vector.multi_reduction <add>, %78, %cst_52 [1] : vector<64x64xf32> to vector<64xf32>
    %80 = vector.shape_cast %79 : vector<64xf32> to vector<64x1xf32>
    %81 = tpu.reciprocal %80 {approx = true} : vector<64x1xf32> -> vector<64x1xf32>
    %82 = vector.broadcast %81 : vector<64x1xf32> to vector<64x64xf32>
    %83 = arith.mulf %78, %82 : vector<64x64xf32>
    %84 = arith.truncf %83 : vector<64x64xf32> to vector<64x64xbf16>
    %85 = arith.truncf %68 : vector<64x4xf32> to vector<64x4xbf16>
    %cst_53 = arith.constant dense<0.000000e+00> : vector<64x4xf32>
    %86 = tpu.matmul %84, %85, %cst_53 {dimension_numbers = #tpu.dot_dimension_numbers<[1], [0], [0], [1], [0, 0, 1, 1], [], []>} : vector<64x64xbf16>, vector<64x4xbf16>, vector<64x4xf32> -> vector<64x4xf32>
    %87 = arith.truncf %86 : vector<64x4xf32> to vector<64x4xbf16>
    %c0_54 = arith.constant 0 : index
    %c0_55 = arith.constant 0 : index
    %c0_56 = arith.constant 0 : index
    %c0_57 = arith.constant 0 : index
    %88 = vector.load %arg16[%c0_54, %c0_55, %c0_56, %c0_57] : memref<1x4x4x16xbf16, #tpu.memory_space<vmem>>, vector<1x1x4x16xbf16>
    %89 = vector.shape_cast %88 : vector<1x1x4x16xbf16> to vector<4x16xbf16>
    %cst_58 = arith.constant dense<0.000000e+00> : vector<64x16xf32>
    %90 = tpu.matmul %87, %89, %cst_58 {dimension_numbers = #tpu.dot_dimension_numbers<[1], [0], [0], [1], [0, 0, 1, 1], [], []>} : vector<64x4xbf16>, vector<4x16xbf16>, vector<64x16xf32> -> vector<64x16xf32>
    %c0_59 = arith.constant 0 : index
    %c1 = arith.constant 1 : index
    %c0_60 = arith.constant 0 : index
    %c0_61 = arith.constant 0 : index
    %91 = vector.load %arg13[%c0_59, %c1, %c0_60, %c0_61] : memref<1x4x16x4xbf16, #tpu.memory_space<vmem>>, vector<1x1x16x4xbf16>
    %92 = vector.shape_cast %91 : vector<1x1x16x4xbf16> to vector<16x4xbf16>
    %cst_62 = arith.constant dense<0.000000e+00> : vector<64x4xf32>
    %93 = tpu.matmul %59, %92, %cst_62 {dimension_numbers = #tpu.dot_dimension_numbers<[1], [0], [0], [1], [0, 0, 1, 1], [], []>} : vector<64x16xbf16>, vector<16x4xbf16>, vector<64x4xf32> -> vector<64x4xf32>
    %c0_63 = arith.constant 0 : index
    %c1_64 = arith.constant 1 : index
    %c0_65 = arith.constant 0 : index
    %c0_66 = arith.constant 0 : index
    %94 = vector.load %arg14[%c0_63, %c1_64, %c0_65, %c0_66] : memref<1x4x16x4xbf16, #tpu.memory_space<vmem>>, vector<1x1x16x4xbf16>
    %95 = vector.shape_cast %94 : vector<1x1x16x4xbf16> to vector<16x4xbf16>
    %cst_67 = arith.constant dense<0.000000e+00> : vector<64x4xf32>
    %96 = tpu.matmul %59, %95, %cst_67 {dimension_numbers = #tpu.dot_dimension_numbers<[1], [0], [0], [1], [0, 0, 1, 1], [], []>} : vector<64x16xbf16>, vector<16x4xbf16>, vector<64x4xf32> -> vector<64x4xf32>
    %c0_68 = arith.constant 0 : index
    %c1_69 = arith.constant 1 : index
    %c0_70 = arith.constant 0 : index
    %c0_71 = arith.constant 0 : index
    %97 = vector.load %arg15[%c0_68, %c1_69, %c0_70, %c0_71] : memref<1x4x16x4xbf16, #tpu.memory_space<vmem>>, vector<1x1x16x4xbf16>
    %98 = vector.shape_cast %97 : vector<1x1x16x4xbf16> to vector<16x4xbf16>
    %cst_72 = arith.constant dense<0.000000e+00> : vector<64x4xf32>
    %99 = tpu.matmul %59, %98, %cst_72 {dimension_numbers = #tpu.dot_dimension_numbers<[1], [0], [0], [1], [0, 0, 1, 1], [], []>} : vector<64x16xbf16>, vector<16x4xbf16>, vector<64x4xf32> -> vector<64x4xf32>
    %100 = arith.truncf %93 : vector<64x4xf32> to vector<64x4xbf16>
    %101 = arith.truncf %96 : vector<64x4xf32> to vector<64x4xbf16>
    %cst_73 = arith.constant dense<0.000000e+00> : vector<64x64xf32>
    %102 = tpu.matmul %100, %101, %cst_73 {dimension_numbers = #tpu.dot_dimension_numbers<[1], [1], [0], [0], [0, 0, 1, 0], [], []>} : vector<64x4xbf16>, vector<64x4xbf16>, vector<64x64xf32> -> vector<64x64xf32>
    %cst_74 = arith.constant 5.000000e-01 : f32
    %103 = vector.broadcast %cst_74 : f32 to vector<64x64xf32>
    %104 = arith.mulf %102, %103 : vector<64x64xf32>
    %cst_75 = arith.constant dense<0xFF800000> : vector<64xf32>
    %105 = vector.multi_reduction <maximumf>, %104, %cst_75 [1] : vector<64x64xf32> to vector<64xf32>
    %106 = vector.shape_cast %105 : vector<64xf32> to vector<64x1xf32>
    %107 = vector.broadcast %106 : vector<64x1xf32> to vector<64x64xf32>
    %108 = arith.subf %104, %107 : vector<64x64xf32>
    %109 = math.exp %108 : vector<64x64xf32>
    %cst_76 = arith.constant dense<0.000000e+00> : vector<64xf32>
    %110 = vector.multi_reduction <add>, %109, %cst_76 [1] : vector<64x64xf32> to vector<64xf32>
    %111 = vector.shape_cast %110 : vector<64xf32> to vector<64x1xf32>
    %112 = tpu.reciprocal %111 {approx = true} : vector<64x1xf32> -> vector<64x1xf32>
    %113 = vector.broadcast %112 : vector<64x1xf32> to vector<64x64xf32>
    %114 = arith.mulf %109, %113 : vector<64x64xf32>
    %115 = arith.truncf %114 : vector<64x64xf32> to vector<64x64xbf16>
    %116 = arith.truncf %99 : vector<64x4xf32> to vector<64x4xbf16>
    %cst_77 = arith.constant dense<0.000000e+00> : vector<64x4xf32>
    %117 = tpu.matmul %115, %116, %cst_77 {dimension_numbers = #tpu.dot_dimension_numbers<[1], [0], [0], [1], [0, 0, 1, 1], [], []>} : vector<64x64xbf16>, vector<64x4xbf16>, vector<64x4xf32> -> vector<64x4xf32>
    %118 = arith.truncf %117 : vector<64x4xf32> to vector<64x4xbf16>
    %c0_78 = arith.constant 0 : index
    %c1_79 = arith.constant 1 : index
    %c0_80 = arith.constant 0 : index
    %c0_81 = arith.constant 0 : index
    %119 = vector.load %arg16[%c0_78, %c1_79, %c0_80, %c0_81] : memref<1x4x4x16xbf16, #tpu.memory_space<vmem>>, vector<1x1x4x16xbf16>
    %120 = vector.shape_cast %119 : vector<1x1x4x16xbf16> to vector<4x16xbf16>
    %cst_82 = arith.constant dense<0.000000e+00> : vector<64x16xf32>
    %121 = tpu.matmul %118, %120, %cst_82 {dimension_numbers = #tpu.dot_dimension_numbers<[1], [0], [0], [1], [0, 0, 1, 1], [], []>} : vector<64x4xbf16>, vector<4x16xbf16>, vector<64x16xf32> -> vector<64x16xf32>
    %122 = arith.addf %90, %121 : vector<64x16xf32>
    %c0_83 = arith.constant 0 : index
    %c2 = arith.constant 2 : index
    %c0_84 = arith.constant 0 : index
    %c0_85 = arith.constant 0 : index
    %123 = vector.load %arg13[%c0_83, %c2, %c0_84, %c0_85] : memref<1x4x16x4xbf16, #tpu.memory_space<vmem>>, vector<1x1x16x4xbf16>
    %124 = vector.shape_cast %123 : vector<1x1x16x4xbf16> to vector<16x4xbf16>
    %cst_86 = arith.constant dense<0.000000e+00> : vector<64x4xf32>
    %125 = tpu.matmul %59, %124, %cst_86 {dimension_numbers = #tpu.dot_dimension_numbers<[1], [0], [0], [1], [0, 0, 1, 1], [], []>} : vector<64x16xbf16>, vector<16x4xbf16>, vector<64x4xf32> -> vector<64x4xf32>
    %c0_87 = arith.constant 0 : index
    %c2_88 = arith.constant 2 : index
    %c0_89 = arith.constant 0 : index
    %c0_90 = arith.constant 0 : index
    %126 = vector.load %arg14[%c0_87, %c2_88, %c0_89, %c0_90] : memref<1x4x16x4xbf16, #tpu.memory_space<vmem>>, vector<1x1x16x4xbf16>
    %127 = vector.shape_cast %126 : vector<1x1x16x4xbf16> to vector<16x4xbf16>
    %cst_91 = arith.constant dense<0.000000e+00> : vector<64x4xf32>
    %128 = tpu.matmul %59, %127, %cst_91 {dimension_numbers = #tpu.dot_dimension_numbers<[1], [0], [0], [1], [0, 0, 1, 1], [], []>} : vector<64x16xbf16>, vector<16x4xbf16>, vector<64x4xf32> -> vector<64x4xf32>
    %c0_92 = arith.constant 0 : index
    %c2_93 = arith.constant 2 : index
    %c0_94 = arith.constant 0 : index
    %c0_95 = arith.constant 0 : index
    %129 = vector.load %arg15[%c0_92, %c2_93, %c0_94, %c0_95] : memref<1x4x16x4xbf16, #tpu.memory_space<vmem>>, vector<1x1x16x4xbf16>
    %130 = vector.shape_cast %129 : vector<1x1x16x4xbf16> to vector<16x4xbf16>
    %cst_96 = arith.constant dense<0.000000e+00> : vector<64x4xf32>
    %131 = tpu.matmul %59, %130, %cst_96 {dimension_numbers = #tpu.dot_dimension_numbers<[1], [0], [0], [1], [0, 0, 1, 1], [], []>} : vector<64x16xbf16>, vector<16x4xbf16>, vector<64x4xf32> -> vector<64x4xf32>
    %132 = arith.truncf %125 : vector<64x4xf32> to vector<64x4xbf16>
    %133 = arith.truncf %128 : vector<64x4xf32> to vector<64x4xbf16>
    %cst_97 = arith.constant dense<0.000000e+00> : vector<64x64xf32>
    %134 = tpu.matmul %132, %133, %cst_97 {dimension_numbers = #tpu.dot_dimension_numbers<[1], [1], [0], [0], [0, 0, 1, 0], [], []>} : vector<64x4xbf16>, vector<64x4xbf16>, vector<64x64xf32> -> vector<64x64xf32>
    %cst_98 = arith.constant 5.000000e-01 : f32
    %135 = vector.broadcast %cst_98 : f32 to vector<64x64xf32>
    %136 = arith.mulf %134, %135 : vector<64x64xf32>
    %cst_99 = arith.constant dense<0xFF800000> : vector<64xf32>
    %137 = vector.multi_reduction <maximumf>, %136, %cst_99 [1] : vector<64x64xf32> to vector<64xf32>
    %138 = vector.shape_cast %137 : vector<64xf32> to vector<64x1xf32>
    %139 = vector.broadcast %138 : vector<64x1xf32> to vector<64x64xf32>
    %140 = arith.subf %136, %139 : vector<64x64xf32>
    %141 = math.exp %140 : vector<64x64xf32>
    %cst_100 = arith.constant dense<0.000000e+00> : vector<64xf32>
    %142 = vector.multi_reduction <add>, %141, %cst_100 [1] : vector<64x64xf32> to vector<64xf32>
    %143 = vector.shape_cast %142 : vector<64xf32> to vector<64x1xf32>
    %144 = tpu.reciprocal %143 {approx = true} : vector<64x1xf32> -> vector<64x1xf32>
    %145 = vector.broadcast %144 : vector<64x1xf32> to vector<64x64xf32>
    %146 = arith.mulf %141, %145 : vector<64x64xf32>
    %147 = arith.truncf %146 : vector<64x64xf32> to vector<64x64xbf16>
    %148 = arith.truncf %131 : vector<64x4xf32> to vector<64x4xbf16>
    %cst_101 = arith.constant dense<0.000000e+00> : vector<64x4xf32>
    %149 = tpu.matmul %147, %148, %cst_101 {dimension_numbers = #tpu.dot_dimension_numbers<[1], [0], [0], [1], [0, 0, 1, 1], [], []>} : vector<64x64xbf16>, vector<64x4xbf16>, vector<64x4xf32> -> vector<64x4xf32>
    %150 = arith.truncf %149 : vector<64x4xf32> to vector<64x4xbf16>
    %c0_102 = arith.constant 0 : index
    %c2_103 = arith.constant 2 : index
    %c0_104 = arith.constant 0 : index
    %c0_105 = arith.constant 0 : index
    %151 = vector.load %arg16[%c0_102, %c2_103, %c0_104, %c0_105] : memref<1x4x4x16xbf16, #tpu.memory_space<vmem>>, vector<1x1x4x16xbf16>
    %152 = vector.shape_cast %151 : vector<1x1x4x16xbf16> to vector<4x16xbf16>
    %cst_106 = arith.constant dense<0.000000e+00> : vector<64x16xf32>
    %153 = tpu.matmul %150, %152, %cst_106 {dimension_numbers = #tpu.dot_dimension_numbers<[1], [0], [0], [1], [0, 0, 1, 1], [], []>} : vector<64x4xbf16>, vector<4x16xbf16>, vector<64x16xf32> -> vector<64x16xf32>
    %154 = arith.addf %122, %153 : vector<64x16xf32>
    %c0_107 = arith.constant 0 : index
    %c3 = arith.constant 3 : index
    %c0_108 = arith.constant 0 : index
    %c0_109 = arith.constant 0 : index
    %155 = vector.load %arg13[%c0_107, %c3, %c0_108, %c0_109] : memref<1x4x16x4xbf16, #tpu.memory_space<vmem>>, vector<1x1x16x4xbf16>
    %156 = vector.shape_cast %155 : vector<1x1x16x4xbf16> to vector<16x4xbf16>
    %cst_110 = arith.constant dense<0.000000e+00> : vector<64x4xf32>
    %157 = tpu.matmul %59, %156, %cst_110 {dimension_numbers = #tpu.dot_dimension_numbers<[1], [0], [0], [1], [0, 0, 1, 1], [], []>} : vector<64x16xbf16>, vector<16x4xbf16>, vector<64x4xf32> -> vector<64x4xf32>
    %c0_111 = arith.constant 0 : index
    %c3_112 = arith.constant 3 : index
    %c0_113 = arith.constant 0 : index
    %c0_114 = arith.constant 0 : index
    %158 = vector.load %arg14[%c0_111, %c3_112, %c0_113, %c0_114] : memref<1x4x16x4xbf16, #tpu.memory_space<vmem>>, vector<1x1x16x4xbf16>
    %159 = vector.shape_cast %158 : vector<1x1x16x4xbf16> to vector<16x4xbf16>
    %cst_115 = arith.constant dense<0.000000e+00> : vector<64x4xf32>
    %160 = tpu.matmul %59, %159, %cst_115 {dimension_numbers = #tpu.dot_dimension_numbers<[1], [0], [0], [1], [0, 0, 1, 1], [], []>} : vector<64x16xbf16>, vector<16x4xbf16>, vector<64x4xf32> -> vector<64x4xf32>
    %c0_116 = arith.constant 0 : index
    %c3_117 = arith.constant 3 : index
    %c0_118 = arith.constant 0 : index
    %c0_119 = arith.constant 0 : index
    %161 = vector.load %arg15[%c0_116, %c3_117, %c0_118, %c0_119] : memref<1x4x16x4xbf16, #tpu.memory_space<vmem>>, vector<1x1x16x4xbf16>
    %162 = vector.shape_cast %161 : vector<1x1x16x4xbf16> to vector<16x4xbf16>
    %cst_120 = arith.constant dense<0.000000e+00> : vector<64x4xf32>
    %163 = tpu.matmul %59, %162, %cst_120 {dimension_numbers = #tpu.dot_dimension_numbers<[1], [0], [0], [1], [0, 0, 1, 1], [], []>} : vector<64x16xbf16>, vector<16x4xbf16>, vector<64x4xf32> -> vector<64x4xf32>
    %164 = arith.truncf %157 : vector<64x4xf32> to vector<64x4xbf16>
    %165 = arith.truncf %160 : vector<64x4xf32> to vector<64x4xbf16>
    %cst_121 = arith.constant dense<0.000000e+00> : vector<64x64xf32>
    %166 = tpu.matmul %164, %165, %cst_121 {dimension_numbers = #tpu.dot_dimension_numbers<[1], [1], [0], [0], [0, 0, 1, 0], [], []>} : vector<64x4xbf16>, vector<64x4xbf16>, vector<64x64xf32> -> vector<64x64xf32>
    %cst_122 = arith.constant 5.000000e-01 : f32
    %167 = vector.broadcast %cst_122 : f32 to vector<64x64xf32>
    %168 = arith.mulf %166, %167 : vector<64x64xf32>
    %cst_123 = arith.constant dense<0xFF800000> : vector<64xf32>
    %169 = vector.multi_reduction <maximumf>, %168, %cst_123 [1] : vector<64x64xf32> to vector<64xf32>
    %170 = vector.shape_cast %169 : vector<64xf32> to vector<64x1xf32>
    %171 = vector.broadcast %170 : vector<64x1xf32> to vector<64x64xf32>
    %172 = arith.subf %168, %171 : vector<64x64xf32>
    %173 = math.exp %172 : vector<64x64xf32>
    %cst_124 = arith.constant dense<0.000000e+00> : vector<64xf32>
    %174 = vector.multi_reduction <add>, %173, %cst_124 [1] : vector<64x64xf32> to vector<64xf32>
    %175 = vector.shape_cast %174 : vector<64xf32> to vector<64x1xf32>
    %176 = tpu.reciprocal %175 {approx = true} : vector<64x1xf32> -> vector<64x1xf32>
    %177 = vector.broadcast %176 : vector<64x1xf32> to vector<64x64xf32>
    %178 = arith.mulf %173, %177 : vector<64x64xf32>
    %179 = arith.truncf %178 : vector<64x64xf32> to vector<64x64xbf16>
    %180 = arith.truncf %163 : vector<64x4xf32> to vector<64x4xbf16>
    %cst_125 = arith.constant dense<0.000000e+00> : vector<64x4xf32>
    %181 = tpu.matmul %179, %180, %cst_125 {dimension_numbers = #tpu.dot_dimension_numbers<[1], [0], [0], [1], [0, 0, 1, 1], [], []>} : vector<64x64xbf16>, vector<64x4xbf16>, vector<64x4xf32> -> vector<64x4xf32>
    %182 = arith.truncf %181 : vector<64x4xf32> to vector<64x4xbf16>
    %c0_126 = arith.constant 0 : index
    %c3_127 = arith.constant 3 : index
    %c0_128 = arith.constant 0 : index
    %c0_129 = arith.constant 0 : index
    %183 = vector.load %arg16[%c0_126, %c3_127, %c0_128, %c0_129] : memref<1x4x4x16xbf16, #tpu.memory_space<vmem>>, vector<1x1x4x16xbf16>
    %184 = vector.shape_cast %183 : vector<1x1x4x16xbf16> to vector<4x16xbf16>
    %cst_130 = arith.constant dense<0.000000e+00> : vector<64x16xf32>
    %185 = tpu.matmul %182, %184, %cst_130 {dimension_numbers = #tpu.dot_dimension_numbers<[1], [0], [0], [1], [0, 0, 1, 1], [], []>} : vector<64x4xbf16>, vector<4x16xbf16>, vector<64x16xf32> -> vector<64x16xf32>
    %186 = arith.addf %154, %185 : vector<64x16xf32>
    %187 = vector.broadcast %58 : vector<1x16xf32> to vector<64x16xf32>
    %188 = arith.addf %186, %187 : vector<64x16xf32>
    %189 = arith.addf %36, %188 : vector<64x16xf32>
    %c0_131 = arith.constant 0 : index
    %c0_132 = arith.constant 0 : index
    %c0_133 = arith.constant 0 : index
    %c0_134 = arith.constant 0 : index
    %190 = vector.load %arg4[%c0_131, %c0_132, %c0_133, %c0_134] : memref<1x1x64x16xf32, #tpu.memory_space<vmem>>, vector<1x1x64x16xf32>
    %191 = vector.shape_cast %190 : vector<1x1x64x16xf32> to vector<64x16xf32>
    %cst_135 = arith.constant dense<0.000000e+00> : vector<64xf32>
    %192 = vector.multi_reduction <add>, %191, %cst_135 [1] : vector<64x16xf32> to vector<64xf32>
    %193 = vector.shape_cast %192 : vector<64xf32> to vector<64x1xf32>
    %cst_136 = arith.constant 1.600000e+01 : f32
    %194 = vector.broadcast %cst_136 : f32 to vector<64x1xf32>
    %195 = arith.divf %193, %194 : vector<64x1xf32>
    %196 = vector.broadcast %195 : vector<64x1xf32> to vector<64x16xf32>
    %197 = arith.subf %191, %196 : vector<64x16xf32>
    %198 = arith.mulf %197, %197 : vector<64x16xf32>
    %cst_137 = arith.constant dense<0.000000e+00> : vector<64xf32>
    %199 = vector.multi_reduction <add>, %198, %cst_137 [1] : vector<64x16xf32> to vector<64xf32>
    %200 = vector.shape_cast %199 : vector<64xf32> to vector<64x1xf32>
    %cst_138 = arith.constant 1.600000e+01 : f32
    %201 = vector.broadcast %cst_138 : f32 to vector<64x1xf32>
    %202 = arith.divf %200, %201 : vector<64x1xf32>
    %cst_139 = arith.constant 9.99999974E-6 : f32
    %203 = vector.broadcast %cst_139 : f32 to vector<64x1xf32>
    %204 = arith.addf %202, %203 : vector<64x1xf32>
    %205 = math.rsqrt %204 : vector<64x1xf32>
    %206 = vector.broadcast %205 : vector<64x1xf32> to vector<64x16xf32>
    %207 = arith.mulf %197, %206 : vector<64x16xf32>
    %208 = vector.broadcast %2 : vector<1x16xf32> to vector<64x16xf32>
    %209 = arith.mulf %207, %208 : vector<64x16xf32>
    %210 = vector.broadcast %3 : vector<1x16xf32> to vector<64x16xf32>
    %211 = arith.addf %209, %210 : vector<64x16xf32>
    %212 = arith.truncf %211 : vector<64x16xf32> to vector<64x16xbf16>
    %c0_140 = arith.constant 0 : index
    %c0_141 = arith.constant 0 : index
    %c0_142 = arith.constant 0 : index
    %213 = vector.load %arg9[%c0_140, %c0_141, %c0_142] : memref<1x16x16xbf16, #tpu.memory_space<vmem>>, vector<1x16x16xbf16>
    %214 = vector.shape_cast %213 : vector<1x16x16xbf16> to vector<16x16xbf16>
    %cst_143 = arith.constant dense<0.000000e+00> : vector<64x16xf32>
    %215 = tpu.matmul %212, %214, %cst_143 {dimension_numbers = #tpu.dot_dimension_numbers<[1], [0], [0], [1], [0, 0, 1, 1], [], []>} : vector<64x16xbf16>, vector<16x16xbf16>, vector<64x16xf32> -> vector<64x16xf32>
    %216 = arith.addf %189, %215 : vector<64x16xf32>
    %c0_144 = arith.constant 0 : index
    %c0_145 = arith.constant 0 : index
    %c0_146 = arith.constant 0 : index
    %217 = vector.load %arg10[%c0_144, %c0_145, %c0_146] : memref<1x1x16xf32, #tpu.memory_space<vmem>>, vector<1x1x16xf32>
    %218 = vector.shape_cast %217 : vector<1x1x16xf32> to vector<1x16xf32>
    %219 = vector.broadcast %218 : vector<1x16xf32> to vector<64x16xf32>
    %220 = arith.addf %216, %219 : vector<64x16xf32>
    %cst_147 = arith.constant dense<0.000000e+00> : vector<64xf32>
    %221 = vector.multi_reduction <add>, %220, %cst_147 [1] : vector<64x16xf32> to vector<64xf32>
    %222 = vector.shape_cast %221 : vector<64xf32> to vector<64x1xf32>
    %cst_148 = arith.constant 1.600000e+01 : f32
    %223 = vector.broadcast %cst_148 : f32 to vector<64x1xf32>
    %224 = arith.divf %222, %223 : vector<64x1xf32>
    %225 = vector.broadcast %224 : vector<64x1xf32> to vector<64x16xf32>
    %226 = arith.subf %220, %225 : vector<64x16xf32>
    %227 = arith.mulf %226, %226 : vector<64x16xf32>
    %cst_149 = arith.constant dense<0.000000e+00> : vector<64xf32>
    %228 = vector.multi_reduction <add>, %227, %cst_149 [1] : vector<64x16xf32> to vector<64xf32>
    %229 = vector.shape_cast %228 : vector<64xf32> to vector<64x1xf32>
    %cst_150 = arith.constant 1.600000e+01 : f32
    %230 = vector.broadcast %cst_150 : f32 to vector<64x1xf32>
    %231 = arith.divf %229, %230 : vector<64x1xf32>
    %cst_151 = arith.constant 9.99999974E-6 : f32
    %232 = vector.broadcast %cst_151 : f32 to vector<64x1xf32>
    %233 = arith.addf %231, %232 : vector<64x1xf32>
    %234 = math.rsqrt %233 : vector<64x1xf32>
    %235 = vector.broadcast %234 : vector<64x1xf32> to vector<64x16xf32>
    %236 = arith.mulf %226, %235 : vector<64x16xf32>
    %237 = vector.broadcast %4 : vector<1x16xf32> to vector<64x16xf32>
    %238 = arith.mulf %236, %237 : vector<64x16xf32>
    %239 = vector.broadcast %5 : vector<1x16xf32> to vector<64x16xf32>
    %240 = arith.addf %238, %239 : vector<64x16xf32>
    %c0_152 = arith.constant 0 : index
    %c0_153 = arith.constant 0 : index
    %c0_154 = arith.constant 0 : index
    %241 = vector.load %arg22[%c0_152, %c0_153, %c0_154] : memref<1x1x16xf32, #tpu.memory_space<vmem>>, vector<1x1x16xf32>
    %242 = vector.shape_cast %241 : vector<1x1x16xf32> to vector<1x16xf32>
    %243 = arith.truncf %240 : vector<64x16xf32> to vector<64x16xbf16>
    %c0_155 = arith.constant 0 : index
    %c0_156 = arith.constant 0 : index
    %c0_157 = arith.constant 0 : index
    %c0_158 = arith.constant 0 : index
    %244 = vector.load %arg18[%c0_155, %c0_156, %c0_157, %c0_158] : memref<1x4x16x4xbf16, #tpu.memory_space<vmem>>, vector<1x1x16x4xbf16>
    %245 = vector.shape_cast %244 : vector<1x1x16x4xbf16> to vector<16x4xbf16>
    %cst_159 = arith.constant dense<0.000000e+00> : vector<64x4xf32>
    %246 = tpu.matmul %243, %245, %cst_159 {dimension_numbers = #tpu.dot_dimension_numbers<[1], [0], [0], [1], [0, 0, 1, 1], [], []>} : vector<64x16xbf16>, vector<16x4xbf16>, vector<64x4xf32> -> vector<64x4xf32>
    %c0_160 = arith.constant 0 : index
    %c0_161 = arith.constant 0 : index
    %c0_162 = arith.constant 0 : index
    %c0_163 = arith.constant 0 : index
    %247 = vector.load %arg19[%c0_160, %c0_161, %c0_162, %c0_163] : memref<1x4x16x4xbf16, #tpu.memory_space<vmem>>, vector<1x1x16x4xbf16>
    %248 = vector.shape_cast %247 : vector<1x1x16x4xbf16> to vector<16x4xbf16>
    %cst_164 = arith.constant dense<0.000000e+00> : vector<64x4xf32>
    %249 = tpu.matmul %243, %248, %cst_164 {dimension_numbers = #tpu.dot_dimension_numbers<[1], [0], [0], [1], [0, 0, 1, 1], [], []>} : vector<64x16xbf16>, vector<16x4xbf16>, vector<64x4xf32> -> vector<64x4xf32>
    %c0_165 = arith.constant 0 : index
    %c0_166 = arith.constant 0 : index
    %c0_167 = arith.constant 0 : index
    %c0_168 = arith.constant 0 : index
    %250 = vector.load %arg20[%c0_165, %c0_166, %c0_167, %c0_168] : memref<1x4x16x4xbf16, #tpu.memory_space<vmem>>, vector<1x1x16x4xbf16>
    %251 = vector.shape_cast %250 : vector<1x1x16x4xbf16> to vector<16x4xbf16>
    %cst_169 = arith.constant dense<0.000000e+00> : vector<64x4xf32>
    %252 = tpu.matmul %243, %251, %cst_169 {dimension_numbers = #tpu.dot_dimension_numbers<[1], [0], [0], [1], [0, 0, 1, 1], [], []>} : vector<64x16xbf16>, vector<16x4xbf16>, vector<64x4xf32> -> vector<64x4xf32>
    %253 = arith.truncf %246 : vector<64x4xf32> to vector<64x4xbf16>
    %254 = arith.truncf %249 : vector<64x4xf32> to vector<64x4xbf16>
    %cst_170 = arith.constant dense<0.000000e+00> : vector<64x64xf32>
    %255 = tpu.matmul %253, %254, %cst_170 {dimension_numbers = #tpu.dot_dimension_numbers<[1], [1], [0], [0], [0, 0, 1, 0], [], []>} : vector<64x4xbf16>, vector<64x4xbf16>, vector<64x64xf32> -> vector<64x64xf32>
    %cst_171 = arith.constant 5.000000e-01 : f32
    %256 = vector.broadcast %cst_171 : f32 to vector<64x64xf32>
    %257 = arith.mulf %255, %256 : vector<64x64xf32>
    %cst_172 = arith.constant dense<0xFF800000> : vector<64xf32>
    %258 = vector.multi_reduction <maximumf>, %257, %cst_172 [1] : vector<64x64xf32> to vector<64xf32>
    %259 = vector.shape_cast %258 : vector<64xf32> to vector<64x1xf32>
    %260 = vector.broadcast %259 : vector<64x1xf32> to vector<64x64xf32>
    %261 = arith.subf %257, %260 : vector<64x64xf32>
    %262 = math.exp %261 : vector<64x64xf32>
    %cst_173 = arith.constant dense<0.000000e+00> : vector<64xf32>
    %263 = vector.multi_reduction <add>, %262, %cst_173 [1] : vector<64x64xf32> to vector<64xf32>
    %264 = vector.shape_cast %263 : vector<64xf32> to vector<64x1xf32>
    %265 = tpu.reciprocal %264 {approx = true} : vector<64x1xf32> -> vector<64x1xf32>
    %266 = vector.broadcast %265 : vector<64x1xf32> to vector<64x64xf32>
    %267 = arith.mulf %262, %266 : vector<64x64xf32>
    %268 = arith.truncf %267 : vector<64x64xf32> to vector<64x64xbf16>
    %269 = arith.truncf %252 : vector<64x4xf32> to vector<64x4xbf16>
    %cst_174 = arith.constant dense<0.000000e+00> : vector<64x4xf32>
    %270 = tpu.matmul %268, %269, %cst_174 {dimension_numbers = #tpu.dot_dimension_numbers<[1], [0], [0], [1], [0, 0, 1, 1], [], []>} : vector<64x64xbf16>, vector<64x4xbf16>, vector<64x4xf32> -> vector<64x4xf32>
    %271 = arith.truncf %270 : vector<64x4xf32> to vector<64x4xbf16>
    %c0_175 = arith.constant 0 : index
    %c0_176 = arith.constant 0 : index
    %c0_177 = arith.constant 0 : index
    %c0_178 = arith.constant 0 : index
    %272 = vector.load %arg21[%c0_175, %c0_176, %c0_177, %c0_178] : memref<1x4x4x16xbf16, #tpu.memory_space<vmem>>, vector<1x1x4x16xbf16>
    %273 = vector.shape_cast %272 : vector<1x1x4x16xbf16> to vector<4x16xbf16>
    %cst_179 = arith.constant dense<0.000000e+00> : vector<64x16xf32>
    %274 = tpu.matmul %271, %273, %cst_179 {dimension_numbers = #tpu.dot_dimension_numbers<[1], [0], [0], [1], [0, 0, 1, 1], [], []>} : vector<64x4xbf16>, vector<4x16xbf16>, vector<64x16xf32> -> vector<64x16xf32>
    %c0_180 = arith.constant 0 : index
    %c1_181 = arith.constant 1 : index
    %c0_182 = arith.constant 0 : index
    %c0_183 = arith.constant 0 : index
    %275 = vector.load %arg18[%c0_180, %c1_181, %c0_182, %c0_183] : memref<1x4x16x4xbf16, #tpu.memory_space<vmem>>, vector<1x1x16x4xbf16>
    %276 = vector.shape_cast %275 : vector<1x1x16x4xbf16> to vector<16x4xbf16>
    %cst_184 = arith.constant dense<0.000000e+00> : vector<64x4xf32>
    %277 = tpu.matmul %243, %276, %cst_184 {dimension_numbers = #tpu.dot_dimension_numbers<[1], [0], [0], [1], [0, 0, 1, 1], [], []>} : vector<64x16xbf16>, vector<16x4xbf16>, vector<64x4xf32> -> vector<64x4xf32>
    %c0_185 = arith.constant 0 : index
    %c1_186 = arith.constant 1 : index
    %c0_187 = arith.constant 0 : index
    %c0_188 = arith.constant 0 : index
    %278 = vector.load %arg19[%c0_185, %c1_186, %c0_187, %c0_188] : memref<1x4x16x4xbf16, #tpu.memory_space<vmem>>, vector<1x1x16x4xbf16>
    %279 = vector.shape_cast %278 : vector<1x1x16x4xbf16> to vector<16x4xbf16>
    %cst_189 = arith.constant dense<0.000000e+00> : vector<64x4xf32>
    %280 = tpu.matmul %243, %279, %cst_189 {dimension_numbers = #tpu.dot_dimension_numbers<[1], [0], [0], [1], [0, 0, 1, 1], [], []>} : vector<64x16xbf16>, vector<16x4xbf16>, vector<64x4xf32> -> vector<64x4xf32>
    %c0_190 = arith.constant 0 : index
    %c1_191 = arith.constant 1 : index
    %c0_192 = arith.constant 0 : index
    %c0_193 = arith.constant 0 : index
    %281 = vector.load %arg20[%c0_190, %c1_191, %c0_192, %c0_193] : memref<1x4x16x4xbf16, #tpu.memory_space<vmem>>, vector<1x1x16x4xbf16>
    %282 = vector.shape_cast %281 : vector<1x1x16x4xbf16> to vector<16x4xbf16>
    %cst_194 = arith.constant dense<0.000000e+00> : vector<64x4xf32>
    %283 = tpu.matmul %243, %282, %cst_194 {dimension_numbers = #tpu.dot_dimension_numbers<[1], [0], [0], [1], [0, 0, 1, 1], [], []>} : vector<64x16xbf16>, vector<16x4xbf16>, vector<64x4xf32> -> vector<64x4xf32>
    %284 = arith.truncf %277 : vector<64x4xf32> to vector<64x4xbf16>
    %285 = arith.truncf %280 : vector<64x4xf32> to vector<64x4xbf16>
    %cst_195 = arith.constant dense<0.000000e+00> : vector<64x64xf32>
    %286 = tpu.matmul %284, %285, %cst_195 {dimension_numbers = #tpu.dot_dimension_numbers<[1], [1], [0], [0], [0, 0, 1, 0], [], []>} : vector<64x4xbf16>, vector<64x4xbf16>, vector<64x64xf32> -> vector<64x64xf32>
    %cst_196 = arith.constant 5.000000e-01 : f32
    %287 = vector.broadcast %cst_196 : f32 to vector<64x64xf32>
    %288 = arith.mulf %286, %287 : vector<64x64xf32>
    %cst_197 = arith.constant dense<0xFF800000> : vector<64xf32>
    %289 = vector.multi_reduction <maximumf>, %288, %cst_197 [1] : vector<64x64xf32> to vector<64xf32>
    %290 = vector.shape_cast %289 : vector<64xf32> to vector<64x1xf32>
    %291 = vector.broadcast %290 : vector<64x1xf32> to vector<64x64xf32>
    %292 = arith.subf %288, %291 : vector<64x64xf32>
    %293 = math.exp %292 : vector<64x64xf32>
    %cst_198 = arith.constant dense<0.000000e+00> : vector<64xf32>
    %294 = vector.multi_reduction <add>, %293, %cst_198 [1] : vector<64x64xf32> to vector<64xf32>
    %295 = vector.shape_cast %294 : vector<64xf32> to vector<64x1xf32>
    %296 = tpu.reciprocal %295 {approx = true} : vector<64x1xf32> -> vector<64x1xf32>
    %297 = vector.broadcast %296 : vector<64x1xf32> to vector<64x64xf32>
    %298 = arith.mulf %293, %297 : vector<64x64xf32>
    %299 = arith.truncf %298 : vector<64x64xf32> to vector<64x64xbf16>
    %300 = arith.truncf %283 : vector<64x4xf32> to vector<64x4xbf16>
    %cst_199 = arith.constant dense<0.000000e+00> : vector<64x4xf32>
    %301 = tpu.matmul %299, %300, %cst_199 {dimension_numbers = #tpu.dot_dimension_numbers<[1], [0], [0], [1], [0, 0, 1, 1], [], []>} : vector<64x64xbf16>, vector<64x4xbf16>, vector<64x4xf32> -> vector<64x4xf32>
    %302 = arith.truncf %301 : vector<64x4xf32> to vector<64x4xbf16>
    %c0_200 = arith.constant 0 : index
    %c1_201 = arith.constant 1 : index
    %c0_202 = arith.constant 0 : index
    %c0_203 = arith.constant 0 : index
    %303 = vector.load %arg21[%c0_200, %c1_201, %c0_202, %c0_203] : memref<1x4x4x16xbf16, #tpu.memory_space<vmem>>, vector<1x1x4x16xbf16>
    %304 = vector.shape_cast %303 : vector<1x1x4x16xbf16> to vector<4x16xbf16>
    %cst_204 = arith.constant dense<0.000000e+00> : vector<64x16xf32>
    %305 = tpu.matmul %302, %304, %cst_204 {dimension_numbers = #tpu.dot_dimension_numbers<[1], [0], [0], [1], [0, 0, 1, 1], [], []>} : vector<64x4xbf16>, vector<4x16xbf16>, vector<64x16xf32> -> vector<64x16xf32>
    %306 = arith.addf %274, %305 : vector<64x16xf32>
    %c0_205 = arith.constant 0 : index
    %c2_206 = arith.constant 2 : index
    %c0_207 = arith.constant 0 : index
    %c0_208 = arith.constant 0 : index
    %307 = vector.load %arg18[%c0_205, %c2_206, %c0_207, %c0_208] : memref<1x4x16x4xbf16, #tpu.memory_space<vmem>>, vector<1x1x16x4xbf16>
    %308 = vector.shape_cast %307 : vector<1x1x16x4xbf16> to vector<16x4xbf16>
    %cst_209 = arith.constant dense<0.000000e+00> : vector<64x4xf32>
    %309 = tpu.matmul %243, %308, %cst_209 {dimension_numbers = #tpu.dot_dimension_numbers<[1], [0], [0], [1], [0, 0, 1, 1], [], []>} : vector<64x16xbf16>, vector<16x4xbf16>, vector<64x4xf32> -> vector<64x4xf32>
    %c0_210 = arith.constant 0 : index
    %c2_211 = arith.constant 2 : index
    %c0_212 = arith.constant 0 : index
    %c0_213 = arith.constant 0 : index
    %310 = vector.load %arg19[%c0_210, %c2_211, %c0_212, %c0_213] : memref<1x4x16x4xbf16, #tpu.memory_space<vmem>>, vector<1x1x16x4xbf16>
    %311 = vector.shape_cast %310 : vector<1x1x16x4xbf16> to vector<16x4xbf16>
    %cst_214 = arith.constant dense<0.000000e+00> : vector<64x4xf32>
    %312 = tpu.matmul %243, %311, %cst_214 {dimension_numbers = #tpu.dot_dimension_numbers<[1], [0], [0], [1], [0, 0, 1, 1], [], []>} : vector<64x16xbf16>, vector<16x4xbf16>, vector<64x4xf32> -> vector<64x4xf32>
    %c0_215 = arith.constant 0 : index
    %c2_216 = arith.constant 2 : index
    %c0_217 = arith.constant 0 : index
    %c0_218 = arith.constant 0 : index
    %313 = vector.load %arg20[%c0_215, %c2_216, %c0_217, %c0_218] : memref<1x4x16x4xbf16, #tpu.memory_space<vmem>>, vector<1x1x16x4xbf16>
    %314 = vector.shape_cast %313 : vector<1x1x16x4xbf16> to vector<16x4xbf16>
    %cst_219 = arith.constant dense<0.000000e+00> : vector<64x4xf32>
    %315 = tpu.matmul %243, %314, %cst_219 {dimension_numbers = #tpu.dot_dimension_numbers<[1], [0], [0], [1], [0, 0, 1, 1], [], []>} : vector<64x16xbf16>, vector<16x4xbf16>, vector<64x4xf32> -> vector<64x4xf32>
    %316 = arith.truncf %309 : vector<64x4xf32> to vector<64x4xbf16>
    %317 = arith.truncf %312 : vector<64x4xf32> to vector<64x4xbf16>
    %cst_220 = arith.constant dense<0.000000e+00> : vector<64x64xf32>
    %318 = tpu.matmul %316, %317, %cst_220 {dimension_numbers = #tpu.dot_dimension_numbers<[1], [1], [0], [0], [0, 0, 1, 0], [], []>} : vector<64x4xbf16>, vector<64x4xbf16>, vector<64x64xf32> -> vector<64x64xf32>
    %cst_221 = arith.constant 5.000000e-01 : f32
    %319 = vector.broadcast %cst_221 : f32 to vector<64x64xf32>
    %320 = arith.mulf %318, %319 : vector<64x64xf32>
    %cst_222 = arith.constant dense<0xFF800000> : vector<64xf32>
    %321 = vector.multi_reduction <maximumf>, %320, %cst_222 [1] : vector<64x64xf32> to vector<64xf32>
    %322 = vector.shape_cast %321 : vector<64xf32> to vector<64x1xf32>
    %323 = vector.broadcast %322 : vector<64x1xf32> to vector<64x64xf32>
    %324 = arith.subf %320, %323 : vector<64x64xf32>
    %325 = math.exp %324 : vector<64x64xf32>
    %cst_223 = arith.constant dense<0.000000e+00> : vector<64xf32>
    %326 = vector.multi_reduction <add>, %325, %cst_223 [1] : vector<64x64xf32> to vector<64xf32>
    %327 = vector.shape_cast %326 : vector<64xf32> to vector<64x1xf32>
    %328 = tpu.reciprocal %327 {approx = true} : vector<64x1xf32> -> vector<64x1xf32>
    %329 = vector.broadcast %328 : vector<64x1xf32> to vector<64x64xf32>
    %330 = arith.mulf %325, %329 : vector<64x64xf32>
    %331 = arith.truncf %330 : vector<64x64xf32> to vector<64x64xbf16>
    %332 = arith.truncf %315 : vector<64x4xf32> to vector<64x4xbf16>
    %cst_224 = arith.constant dense<0.000000e+00> : vector<64x4xf32>
    %333 = tpu.matmul %331, %332, %cst_224 {dimension_numbers = #tpu.dot_dimension_numbers<[1], [0], [0], [1], [0, 0, 1, 1], [], []>} : vector<64x64xbf16>, vector<64x4xbf16>, vector<64x4xf32> -> vector<64x4xf32>
    %334 = arith.truncf %333 : vector<64x4xf32> to vector<64x4xbf16>
    %c0_225 = arith.constant 0 : index
    %c2_226 = arith.constant 2 : index
    %c0_227 = arith.constant 0 : index
    %c0_228 = arith.constant 0 : index
    %335 = vector.load %arg21[%c0_225, %c2_226, %c0_227, %c0_228] : memref<1x4x4x16xbf16, #tpu.memory_space<vmem>>, vector<1x1x4x16xbf16>
    %336 = vector.shape_cast %335 : vector<1x1x4x16xbf16> to vector<4x16xbf16>
    %cst_229 = arith.constant dense<0.000000e+00> : vector<64x16xf32>
    %337 = tpu.matmul %334, %336, %cst_229 {dimension_numbers = #tpu.dot_dimension_numbers<[1], [0], [0], [1], [0, 0, 1, 1], [], []>} : vector<64x4xbf16>, vector<4x16xbf16>, vector<64x16xf32> -> vector<64x16xf32>
    %338 = arith.addf %306, %337 : vector<64x16xf32>
    %c0_230 = arith.constant 0 : index
    %c3_231 = arith.constant 3 : index
    %c0_232 = arith.constant 0 : index
    %c0_233 = arith.constant 0 : index
    %339 = vector.load %arg18[%c0_230, %c3_231, %c0_232, %c0_233] : memref<1x4x16x4xbf16, #tpu.memory_space<vmem>>, vector<1x1x16x4xbf16>
    %340 = vector.shape_cast %339 : vector<1x1x16x4xbf16> to vector<16x4xbf16>
    %cst_234 = arith.constant dense<0.000000e+00> : vector<64x4xf32>
    %341 = tpu.matmul %243, %340, %cst_234 {dimension_numbers = #tpu.dot_dimension_numbers<[1], [0], [0], [1], [0, 0, 1, 1], [], []>} : vector<64x16xbf16>, vector<16x4xbf16>, vector<64x4xf32> -> vector<64x4xf32>
    %c0_235 = arith.constant 0 : index
    %c3_236 = arith.constant 3 : index
    %c0_237 = arith.constant 0 : index
    %c0_238 = arith.constant 0 : index
    %342 = vector.load %arg19[%c0_235, %c3_236, %c0_237, %c0_238] : memref<1x4x16x4xbf16, #tpu.memory_space<vmem>>, vector<1x1x16x4xbf16>
    %343 = vector.shape_cast %342 : vector<1x1x16x4xbf16> to vector<16x4xbf16>
    %cst_239 = arith.constant dense<0.000000e+00> : vector<64x4xf32>
    %344 = tpu.matmul %243, %343, %cst_239 {dimension_numbers = #tpu.dot_dimension_numbers<[1], [0], [0], [1], [0, 0, 1, 1], [], []>} : vector<64x16xbf16>, vector<16x4xbf16>, vector<64x4xf32> -> vector<64x4xf32>
    %c0_240 = arith.constant 0 : index
    %c3_241 = arith.constant 3 : index
    %c0_242 = arith.constant 0 : index
    %c0_243 = arith.constant 0 : index
    %345 = vector.load %arg20[%c0_240, %c3_241, %c0_242, %c0_243] : memref<1x4x16x4xbf16, #tpu.memory_space<vmem>>, vector<1x1x16x4xbf16>
    %346 = vector.shape_cast %345 : vector<1x1x16x4xbf16> to vector<16x4xbf16>
    %cst_244 = arith.constant dense<0.000000e+00> : vector<64x4xf32>
    %347 = tpu.matmul %243, %346, %cst_244 {dimension_numbers = #tpu.dot_dimension_numbers<[1], [0], [0], [1], [0, 0, 1, 1], [], []>} : vector<64x16xbf16>, vector<16x4xbf16>, vector<64x4xf32> -> vector<64x4xf32>
    %348 = arith.truncf %341 : vector<64x4xf32> to vector<64x4xbf16>
    %349 = arith.truncf %344 : vector<64x4xf32> to vector<64x4xbf16>
    %cst_245 = arith.constant dense<0.000000e+00> : vector<64x64xf32>
    %350 = tpu.matmul %348, %349, %cst_245 {dimension_numbers = #tpu.dot_dimension_numbers<[1], [1], [0], [0], [0, 0, 1, 0], [], []>} : vector<64x4xbf16>, vector<64x4xbf16>, vector<64x64xf32> -> vector<64x64xf32>
    %cst_246 = arith.constant 5.000000e-01 : f32
    %351 = vector.broadcast %cst_246 : f32 to vector<64x64xf32>
    %352 = arith.mulf %350, %351 : vector<64x64xf32>
    %cst_247 = arith.constant dense<0xFF800000> : vector<64xf32>
    %353 = vector.multi_reduction <maximumf>, %352, %cst_247 [1] : vector<64x64xf32> to vector<64xf32>
    %354 = vector.shape_cast %353 : vector<64xf32> to vector<64x1xf32>
    %355 = vector.broadcast %354 : vector<64x1xf32> to vector<64x64xf32>
    %356 = arith.subf %352, %355 : vector<64x64xf32>
    %357 = math.exp %356 : vector<64x64xf32>
    %cst_248 = arith.constant dense<0.000000e+00> : vector<64xf32>
    %358 = vector.multi_reduction <add>, %357, %cst_248 [1] : vector<64x64xf32> to vector<64xf32>
    %359 = vector.shape_cast %358 : vector<64xf32> to vector<64x1xf32>
    %360 = tpu.reciprocal %359 {approx = true} : vector<64x1xf32> -> vector<64x1xf32>
    %361 = vector.broadcast %360 : vector<64x1xf32> to vector<64x64xf32>
    %362 = arith.mulf %357, %361 : vector<64x64xf32>
    %363 = arith.truncf %362 : vector<64x64xf32> to vector<64x64xbf16>
    %364 = arith.truncf %347 : vector<64x4xf32> to vector<64x4xbf16>
    %cst_249 = arith.constant dense<0.000000e+00> : vector<64x4xf32>
    %365 = tpu.matmul %363, %364, %cst_249 {dimension_numbers = #tpu.dot_dimension_numbers<[1], [0], [0], [1], [0, 0, 1, 1], [], []>} : vector<64x64xbf16>, vector<64x4xbf16>, vector<64x4xf32> -> vector<64x4xf32>
    %366 = arith.truncf %365 : vector<64x4xf32> to vector<64x4xbf16>
    %c0_250 = arith.constant 0 : index
    %c3_251 = arith.constant 3 : index
    %c0_252 = arith.constant 0 : index
    %c0_253 = arith.constant 0 : index
    %367 = vector.load %arg21[%c0_250, %c3_251, %c0_252, %c0_253] : memref<1x4x4x16xbf16, #tpu.memory_space<vmem>>, vector<1x1x4x16xbf16>
    %368 = vector.shape_cast %367 : vector<1x1x4x16xbf16> to vector<4x16xbf16>
    %cst_254 = arith.constant dense<0.000000e+00> : vector<64x16xf32>
    %369 = tpu.matmul %366, %368, %cst_254 {dimension_numbers = #tpu.dot_dimension_numbers<[1], [0], [0], [1], [0, 0, 1, 1], [], []>} : vector<64x4xbf16>, vector<4x16xbf16>, vector<64x16xf32> -> vector<64x16xf32>
    %370 = arith.addf %338, %369 : vector<64x16xf32>
    %371 = vector.broadcast %242 : vector<1x16xf32> to vector<64x16xf32>
    %372 = arith.addf %370, %371 : vector<64x16xf32>
    %373 = arith.addf %220, %372 : vector<64x16xf32>
    %c0_255 = arith.constant 0 : index
    %c0_256 = arith.constant 0 : index
    %374 = vector.load %arg23[%c0_255, %c0_256] : memref<1x16xf32, #tpu.memory_space<vmem>>, vector<1x16xf32>
    %c0_257 = arith.constant 0 : index
    %c0_258 = arith.constant 0 : index
    %375 = vector.load %arg24[%c0_257, %c0_258] : memref<1x16xf32, #tpu.memory_space<vmem>>, vector<1x16xf32>
    %cst_259 = arith.constant dense<0.000000e+00> : vector<64xf32>
    %376 = vector.multi_reduction <add>, %373, %cst_259 [1] : vector<64x16xf32> to vector<64xf32>
    %377 = vector.shape_cast %376 : vector<64xf32> to vector<64x1xf32>
    %cst_260 = arith.constant 1.600000e+01 : f32
    %378 = vector.broadcast %cst_260 : f32 to vector<64x1xf32>
    %379 = arith.divf %377, %378 : vector<64x1xf32>
    %380 = vector.broadcast %379 : vector<64x1xf32> to vector<64x16xf32>
    %381 = arith.subf %373, %380 : vector<64x16xf32>
    %382 = arith.mulf %381, %381 : vector<64x16xf32>
    %cst_261 = arith.constant dense<0.000000e+00> : vector<64xf32>
    %383 = vector.multi_reduction <add>, %382, %cst_261 [1] : vector<64x16xf32> to vector<64xf32>
    %384 = vector.shape_cast %383 : vector<64xf32> to vector<64x1xf32>
    %cst_262 = arith.constant 1.600000e+01 : f32
    %385 = vector.broadcast %cst_262 : f32 to vector<64x1xf32>
    %386 = arith.divf %384, %385 : vector<64x1xf32>
    %cst_263 = arith.constant 9.99999974E-6 : f32
    %387 = vector.broadcast %cst_263 : f32 to vector<64x1xf32>
    %388 = arith.addf %386, %387 : vector<64x1xf32>
    %389 = math.rsqrt %388 : vector<64x1xf32>
    %390 = vector.broadcast %389 : vector<64x1xf32> to vector<64x16xf32>
    %391 = arith.mulf %381, %390 : vector<64x16xf32>
    %392 = vector.broadcast %374 : vector<1x16xf32> to vector<64x16xf32>
    %393 = arith.mulf %391, %392 : vector<64x16xf32>
    %394 = vector.broadcast %375 : vector<1x16xf32> to vector<64x16xf32>
    %395 = arith.addf %393, %394 : vector<64x16xf32>
    %396 = arith.truncf %395 : vector<64x16xf32> to vector<64x16xbf16>
    %c0_264 = arith.constant 0 : index
    %c0_265 = arith.constant 0 : index
    %c0_266 = arith.constant 0 : index
    %397 = vector.load %arg25[%c0_264, %c0_265, %c0_266] : memref<1x16x64xbf16, #tpu.memory_space<vmem>>, vector<1x16x64xbf16>
    %398 = vector.shape_cast %397 : vector<1x16x64xbf16> to vector<16x64xbf16>
    %cst_267 = arith.constant dense<0.000000e+00> : vector<64x64xf32>
    %399 = tpu.matmul %396, %398, %cst_267 {dimension_numbers = #tpu.dot_dimension_numbers<[1], [0], [0], [1], [0, 0, 1, 1], [], []>} : vector<64x16xbf16>, vector<16x64xbf16>, vector<64x64xf32> -> vector<64x64xf32>
    %c0_268 = arith.constant 0 : index
    %c0_269 = arith.constant 0 : index
    %c0_270 = arith.constant 0 : index
    %400 = vector.load %arg26[%c0_268, %c0_269, %c0_270] : memref<1x1x64xf32, #tpu.memory_space<vmem>>, vector<1x1x64xf32>
    %401 = vector.shape_cast %400 : vector<1x1x64xf32> to vector<1x64xf32>
    %402 = vector.broadcast %401 : vector<1x64xf32> to vector<64x64xf32>
    %403 = arith.addf %399, %402 : vector<64x64xf32>
    %cst_271 = arith.constant 5.000000e-01 : f32
    %404 = vector.broadcast %cst_271 : f32 to vector<64x64xf32>
    %405 = arith.mulf %404, %403 : vector<64x64xf32>
    %cst_272 = arith.constant 0.707106769 : f32
    %406 = vector.broadcast %cst_272 : f32 to vector<64x64xf32>
    %407 = arith.mulf %403, %406 : vector<64x64xf32>
    %408 = math.erf %407 : vector<64x64xf32>
    %cst_273 = arith.constant 1.000000e+00 : f32
    %409 = vector.broadcast %cst_273 : f32 to vector<64x64xf32>
    %410 = arith.addf %409, %408 : vector<64x64xf32>
    %411 = arith.mulf %405, %410 : vector<64x64xf32>
    %412 = arith.truncf %411 : vector<64x64xf32> to vector<64x64xbf16>
    %c0_274 = arith.constant 0 : index
    %c0_275 = arith.constant 0 : index
    %c0_276 = arith.constant 0 : index
    %413 = vector.load %arg27[%c0_274, %c0_275, %c0_276] : memref<1x64x16xbf16, #tpu.memory_space<vmem>>, vector<1x64x16xbf16>
    %414 = vector.shape_cast %413 : vector<1x64x16xbf16> to vector<64x16xbf16>
    %cst_277 = arith.constant dense<0.000000e+00> : vector<64x16xf32>
    %415 = tpu.matmul %412, %414, %cst_277 {dimension_numbers = #tpu.dot_dimension_numbers<[1], [0], [0], [1], [0, 0, 1, 1], [], []>} : vector<64x64xbf16>, vector<64x16xbf16>, vector<64x16xf32> -> vector<64x16xf32>
    %c0_278 = arith.constant 0 : index
    %c0_279 = arith.constant 0 : index
    %c0_280 = arith.constant 0 : index
    %416 = vector.load %arg28[%c0_278, %c0_279, %c0_280] : memref<1x1x16xf32, #tpu.memory_space<vmem>>, vector<1x1x16xf32>
    %417 = vector.shape_cast %416 : vector<1x1x16xf32> to vector<1x16xf32>
    %418 = vector.broadcast %417 : vector<1x16xf32> to vector<64x16xf32>
    %419 = arith.addf %415, %418 : vector<64x16xf32>
    %420 = arith.addf %373, %419 : vector<64x16xf32>
    %c0_281 = arith.constant 0 : index
    %c0_282 = arith.constant 0 : index
    %c0_283 = arith.constant 0 : index
    %c0_284 = arith.constant 0 : index
    %421 = vector.load %arg29[%c0_281, %c0_282, %c0_283, %c0_284] : memref<1x1x64x16xf32, #tpu.memory_space<vmem>>, vector<1x1x64x16xf32>
    %422 = vector.shape_cast %421 : vector<1x1x64x16xf32> to vector<64x16xf32>
    %423 = vector.shape_cast %420 : vector<64x16xf32> to vector<1x1x64x16xf32>
    tpu.vector_store %arg29[%c0_281, %c0_282, %c0_283, %c0_284], %423 {strides = array<i32>} : memref<1x1x64x16xf32, #tpu.memory_space<vmem>>, vector<1x1x64x16xf32>,
    return
  }
  func.func @transform_0(%arg0: i32, %arg1: i32) -> (i32, i32, i32, i32) {
    %c0_i32 = arith.constant 0 : i32
    %c0_i32_0 = arith.constant 0 : i32
    %c0_i32_1 = arith.constant 0 : i32
    return %arg0, %arg1, %c0_i32, %c0_i32_0 : i32, i32, i32, i32
  }
  func.func @transform_1(%arg0: i32, %arg1: i32) -> (i32, i32, i32, i32) {
    %c0_i32 = arith.constant 0 : i32
    %c0_i32_0 = arith.constant 0 : i32
    %c0_i32_1 = arith.constant 0 : i32
    return %arg0, %arg1, %c0_i32, %c0_i32_0 : i32, i32, i32, i32
  }
  func.func @transform_2(%arg0: i32, %arg1: i32) -> (i32, i32, i32, i32) {
    %c0_i32 = arith.constant 0 : i32
    %c0_i32_0 = arith.constant 0 : i32
    %c0_i32_1 = arith.constant 0 : i32
    return %arg0, %arg1, %c0_i32, %c0_i32_0 : i32, i32, i32, i32
  }
  func.func @transform_3(%arg0: i32, %arg1: i32) -> (i32, i32) {
    %c0_i32 = arith.constant 0 : i32
    %c0_i32_0 = arith.constant 0 : i32
    %c0_i32_1 = arith.constant 0 : i32
    return %c0_i32, %c0_i32_0 : i32, i32
  }
  func.func @transform_4(%arg0: i32, %arg1: i32) -> (i32, i32) {
    %c0_i32 = arith.constant 0 : i32
    %c0_i32_0 = arith.constant 0 : i32
    %c0_i32_1 = arith.constant 0 : i32
    return %c0_i32, %c0_i32_0 : i32, i32
  }
  func.func @transform_5(%arg0: i32, %arg1: i32) -> (i32, i32, i32) {
    %c0_i32 = arith.constant 0 : i32
    %c0_i32_0 = arith.constant 0 : i32
    %c0_i32_1 = arith.constant 0 : i32
    return %arg0, %c0_i32, %c0_i32_0 : i32, i32, i32
  }
  func.func @transform_6(%arg0: i32, %arg1: i32) -> (i32, i32, i32) {
    %c0_i32 = arith.constant 0 : i32
    %c0_i32_0 = arith.constant 0 : i32
    %c0_i32_1 = arith.constant 0 : i32
    return %arg0, %c0_i32, %c0_i32_0 : i32, i32, i32
  }
  func.func @transform_7(%arg0: i32, %arg1: i32) -> (i32, i32, i32) {
    %c0_i32 = arith.constant 0 : i32
    %c0_i32_0 = arith.constant 0 : i32
    %c0_i32_1 = arith.constant 0 : i32
    return %arg0, %c0_i32, %c0_i32_0 : i32, i32, i32
  }
  func.func @transform_8(%arg0: i32, %arg1: i32) -> (i32, i32, i32) {
    %c0_i32 = arith.constant 0 : i32
    %c0_i32_0 = arith.constant 0 : i32
    %c0_i32_1 = arith.constant 0 : i32
    return %arg0, %c0_i32, %c0_i32_0 : i32, i32, i32
  }
  func.func @transform_9(%arg0: i32, %arg1: i32) -> (i32, i32) {
    %c0_i32 = arith.constant 0 : i32
    %c0_i32_0 = arith.constant 0 : i32
    %c0_i32_1 = arith.constant 0 : i32
    return %c0_i32, %c0_i32_0 : i32, i32
  }
  func.func @transform_10(%arg0: i32, %arg1: i32) -> (i32, i32) {
    %c0_i32 = arith.constant 0 : i32
    %c0_i32_0 = arith.constant 0 : i32
    %c0_i32_1 = arith.constant 0 : i32
    return %c0_i32, %c0_i32_0 : i32, i32
  }
  func.func @transform_11(%arg0: i32, %arg1: i32) -> (i32, i32, i32, i32) {
    %c0_i32 = arith.constant 0 : i32
    %c0_i32_0 = arith.constant 0 : i32
    %c0_i32_1 = arith.constant 0 : i32
    %c0_i32_2 = arith.constant 0 : i32
    return %arg0, %c0_i32, %c0_i32_0, %c0_i32_1 : i32, i32, i32, i32
  }
  func.func @transform_12(%arg0: i32, %arg1: i32) -> (i32, i32, i32, i32) {
    %c0_i32 = arith.constant 0 : i32
    %c0_i32_0 = arith.constant 0 : i32
    %c0_i32_1 = arith.constant 0 : i32
    %c0_i32_2 = arith.constant 0 : i32
    return %arg0, %c0_i32, %c0_i32_0, %c0_i32_1 : i32, i32, i32, i32
  }
  func.func @transform_13(%arg0: i32, %arg1: i32) -> (i32, i32, i32, i32) {
    %c0_i32 = arith.constant 0 : i32
    %c0_i32_0 = arith.constant 0 : i32
    %c0_i32_1 = arith.constant 0 : i32
    %c0_i32_2 = arith.constant 0 : i32
    return %arg0, %c0_i32, %c0_i32_0, %c0_i32_1 : i32, i32, i32, i32
  }
  func.func @transform_14(%arg0: i32, %arg1: i32) -> (i32, i32, i32, i32) {
    %c0_i32 = arith.constant 0 : i32
    %c0_i32_0 = arith.constant 0 : i32
    %c0_i32_1 = arith.constant 0 : i32
    %c0_i32_2 = arith.constant 0 : i32
    return %arg0, %c0_i32, %c0_i32_0, %c0_i32_1 : i32, i32, i32, i32
  }
  func.func @transform_15(%arg0: i32, %arg1: i32) -> (i32, i32, i32) {
    %c0_i32 = arith.constant 0 : i32
    %c0_i32_0 = arith.constant 0 : i32
    %c0_i32_1 = arith.constant 0 : i32
    return %arg0, %c0_i32, %c0_i32_0 : i32, i32, i32
  }
  func.func @transform_16(%arg0: i32, %arg1: i32) -> (i32, i32, i32, i32) {
    %c0_i32 = arith.constant 0 : i32
    %c0_i32_0 = arith.constant 0 : i32
    %c0_i32_1 = arith.constant 0 : i32
    %c0_i32_2 = arith.constant 0 : i32
    return %arg0, %c0_i32, %c0_i32_0, %c0_i32_1 : i32, i32, i32, i32
  }
  func.func @transform_17(%arg0: i32, %arg1: i32) -> (i32, i32, i32, i32) {
    %c0_i32 = arith.constant 0 : i32
    %c0_i32_0 = arith.constant 0 : i32
    %c0_i32_1 = arith.constant 0 : i32
    %c0_i32_2 = arith.constant 0 : i32
    return %arg0, %c0_i32, %c0_i32_0, %c0_i32_1 : i32, i32, i32, i32
  }
  func.func @transform_18(%arg0: i32, %arg1: i32) -> (i32, i32, i32, i32) {
    %c0_i32 = arith.constant 0 : i32
    %c0_i32_0 = arith.constant 0 : i32
    %c0_i32_1 = arith.constant 0 : i32
    %c0_i32_2 = arith.constant 0 : i32
    return %arg0, %c0_i32, %c0_i32_0, %c0_i32_1 : i32, i32, i32, i32
  }
  func.func @transform_19(%arg0: i32, %arg1: i32) -> (i32, i32, i32, i32) {
    %c0_i32 = arith.constant 0 : i32
    %c0_i32_0 = arith.constant 0 : i32
    %c0_i32_1 = arith.constant 0 : i32
    %c0_i32_2 = arith.constant 0 : i32
    return %arg0, %c0_i32, %c0_i32_0, %c0_i32_1 : i32, i32, i32, i32
  }
  func.func @transform_20(%arg0: i32, %arg1: i32) -> (i32, i32, i32) {
    %c0_i32 = arith.constant 0 : i32
    %c0_i32_0 = arith.constant 0 : i32
    %c0_i32_1 = arith.constant 0 : i32
    return %arg0, %c0_i32, %c0_i32_0 : i32, i32, i32
  }
  func.func @transform_21(%arg0: i32, %arg1: i32) -> (i32, i32) {
    %c0_i32 = arith.constant 0 : i32
    %c0_i32_0 = arith.constant 0 : i32
    %c0_i32_1 = arith.constant 0 : i32
    return %c0_i32, %c0_i32_0 : i32, i32
  }
  func.func @transform_22(%arg0: i32, %arg1: i32) -> (i32, i32) {
    %c0_i32 = arith.constant 0 : i32
    %c0_i32_0 = arith.constant 0 : i32
    %c0_i32_1 = arith.constant 0 : i32
    return %c0_i32, %c0_i32_0 : i32, i32
  }
  func.func @transform_23(%arg0: i32, %arg1: i32) -> (i32, i32, i32) {
    %c0_i32 = arith.constant 0 : i32
    %c0_i32_0 = arith.constant 0 : i32
    %c0_i32_1 = arith.constant 0 : i32
    return %arg0, %c0_i32, %c0_i32_0 : i32, i32, i32
  }
  func.func @transform_24(%arg0: i32, %arg1: i32) -> (i32, i32, i32) {
    %c0_i32 = arith.constant 0 : i32
    %c0_i32_0 = arith.constant 0 : i32
    %c0_i32_1 = arith.constant 0 : i32
    return %arg0, %c0_i32, %c0_i32_0 : i32, i32, i32
  }
  func.func @transform_25(%arg0: i32, %arg1: i32) -> (i32, i32, i32) {
    %c0_i32 = arith.constant 0 : i32
    %c0_i32_0 = arith.constant 0 : i32
    %c0_i32_1 = arith.constant 0 : i32
    return %arg0, %c0_i32, %c0_i32_0 : i32, i32, i32
  }
  func.func @transform_26(%arg0: i32, %arg1: i32) -> (i32, i32, i32) {
    %c0_i32 = arith.constant 0 : i32
    %c0_i32_0 = arith.constant 0 : i32
    %c0_i32_1 = arith.constant 0 : i32
    return %arg0, %c0_i32, %c0_i32_0 : i32, i32, i32
  }
  func.func @transform_27(%arg0: i32, %arg1: i32) -> (i32, i32, i32, i32) {
    %c0_i32 = arith.constant 0 : i32
    %c0_i32_0 = arith.constant 0 : i32
    %c0_i32_1 = arith.constant 0 : i32
    return %arg0, %arg1, %c0_i32, %c0_i32_0 : i32, i32, i32, i32
  }
}

</mosaic_0001>

<bundles_post_ra>
// kernel: squeeze.9
= control target key start
LH: loop header
LB: loop body
LE: loop exit
PB: predicated region body
PF: predicated region fallthrough
CT: control target
= control target key end

     0   :  { %s177_s8 = smov 96   ;;  %s178_s9 = smov 112   ;;  %vm3_vm0 = vcmask 130048   ;;  %s328_s0 = inlined_call_operand.vmem [shape: f32[1,2,8,128], index: 0, kind: input, shape index: {}]   ;;  %s329_s1 = inlined_call_operand.vmem [shape: f32[2,8,8,16], index: 1, kind: output, shape index: {}]  }
   0x1   :  { %v30_v0 = vld [vmem:[%s328_s0] sm:$0xff]   ;;  %s179_s10 = smov 80   ;;  %v142_v1 = vld [vmem:[%s328_s0 + $0x8] sm:$0xff]   ;;  %s180_s20 = smov 64  }
   0x2   :  { %31 = vrot.lane.b32.xlu1 %v30_v0, %s177_s8  ;;  %14 = vrot.lane.b32.xlu0 %v30_v0, %s178_s9  ;;  %4 = vst.msk [vmem:[%s329_s1] ss:$8 sm:$0xf] %vm3_vm0, %v30_v0   ;;  %s181_s21 = smov 48   ;;  %s182_s22 = smov 32  }
   0x3   :  { %48 = vrot.lane.b32.xlu2 %v30_v0, %s179_s10  ;;  %5 = vst.msk [vmem:[%s329_s1] ss:$8 sm:$0xf0] %vm3_vm0, %v30_v0   ;;  %s183_s23 = smov 16  }
   0x4   :  { %133 = vst.msk [vmem:[%s329_s1 + $0x40] ss:$8 sm:$0xf] %vm3_vm0, %v142_v1  }
   0x5   :  { %134 = vst.msk [vmem:[%s329_s1 + $0x40] ss:$8 sm:$0xf0] %vm3_vm0, %v142_v1  }
   0xa   :  { %40 = vrot.lane.b32.xlu1 %v142_v1, %s177_s8  ;;  %23 = vrot.lane.b32.xlu0 %v142_v1, %s178_s9 }
   0xb   :  { %57 = vrot.lane.b32.xlu2 %v142_v1, %s179_s10 }
  0x12   :  { %74 = vrot.lane.b32.xlu1 %v142_v1, %s180_s20  ;;  %65 = vrot.lane.b32.xlu0 %v30_v0, %s180_s20 }
  0x13   :  { %82 = vrot.lane.b32.xlu2 %v30_v0, %s181_s21 }
  0x1a   :  { %99 = vrot.lane.b32.xlu1 %v30_v0, %s182_s22  ;;  %91 = vrot.lane.b32.xlu0 %v142_v1, %s181_s21 }
  0x1b   :  { %108 = vrot.lane.b32.xlu2 %v142_v1, %s182_s22 }
  0x22   :  { %125 = vrot.lane.b32.xlu1 %v142_v1, %s183_s23  ;;  %116 = vrot.lane.b32.xlu0 %v30_v0, %s183_s23 }
  0x5d   :  { %v49_v2 = vpop.permute.xlu2 %48  }
  0x5e   :  { %145 = vst.msk [vmem:[%s329_s1 + $0x3] ss:$8 sm:$0xf] %vm3_vm0, %v49_v2  }
  0x5f   :  { %146 = vst.msk [vmem:[%s329_s1 + $0x3] ss:$8 sm:$0xf0] %vm3_vm0, %v49_v2  }
  0x65   :  { %v58_v3 = vpop.permute.xlu2 %57  }
  0x66   :  { %148 = vst.msk [vmem:[%s329_s1 + $0x43] ss:$8 sm:$0xf] %vm3_vm0, %v58_v3  }
  0x67   :  { %149 = vst.msk [vmem:[%s329_s1 + $0x43] ss:$8 sm:$0xf0] %vm3_vm0, %v58_v3  }
  0x6d   :  { %v83_v4 = vpop.permute.xlu2 %82  }
  0x6e   :  { %155 = vst.msk [vmem:[%s329_s1 + $0x5] ss:$8 sm:$0xf] %vm3_vm0, %v83_v4  }
  0x6f   :  { %156 = vst.msk [vmem:[%s329_s1 + $0x5] ss:$8 sm:$0xf0] %vm3_vm0, %v83_v4  }
  0x74   :  { %v32_v5 = vpop.permute.xlu1 %31   ;;  %v15_v6 = vpop.permute.xlu0 %14  }
  0x75   :  { %140 = vst.msk [vmem:[%s329_s1 + $0x2] ss:$8 sm:$0xf] %vm3_vm0, %v32_v5   ;;  %v109_v7 = vpop.permute.xlu2 %108  }
  0x76   :  { %141 = vst.msk [vmem:[%s329_s1 + $0x2] ss:$8 sm:$0xf0] %vm3_vm0, %v32_v5  }
  0x77   :  { %135 = vst.msk [vmem:[%s329_s1 + $0x1] ss:$8 sm:$0xf] %vm3_vm0, %v15_v6  }
  0x78   :  { %136 = vst.msk [vmem:[%s329_s1 + $0x1] ss:$8 sm:$0xf0] %vm3_vm0, %v15_v6  }
  0x79   :  { %163 = vst.msk [vmem:[%s329_s1 + $0x46] ss:$8 sm:$0xf] %vm3_vm0, %v109_v7  }
  0x7a   :  { %164 = vst.msk [vmem:[%s329_s1 + $0x46] ss:$8 sm:$0xf0] %vm3_vm0, %v109_v7  }
  0x7c   :  { %v41_v8 = vpop.permute.xlu1 %40   ;;  %v24_v9 = vpop.permute.xlu0 %23  }
  0x7d   :  { %143 = vst.msk [vmem:[%s329_s1 + $0x42] ss:$8 sm:$0xf] %vm3_vm0, %v41_v8  }
  0x7e   :  { %144 = vst.msk [vmem:[%s329_s1 + $0x42] ss:$8 sm:$0xf0] %vm3_vm0, %v41_v8  }
  0x7f   :  { %138 = vst.msk [vmem:[%s329_s1 + $0x41] ss:$8 sm:$0xf] %vm3_vm0, %v24_v9  }
  0x80   :  { %139 = vst.msk [vmem:[%s329_s1 + $0x41] ss:$8 sm:$0xf0] %vm3_vm0, %v24_v9  }
  0x84   :  { %v75_v10 = vpop.permute.xlu1 %74   ;;  %v66_v11 = vpop.permute.xlu0 %65  }
  0x85   :  { %153 = vst.msk [vmem:[%s329_s1 + $0x44] ss:$8 sm:$0xf] %vm3_vm0, %v75_v10  }
  0x86   :  { %154 = vst.msk [vmem:[%s329_s1 + $0x44] ss:$8 sm:$0xf0] %vm3_vm0, %v75_v10  }
  0x87   :  { %150 = vst.msk [vmem:[%s329_s1 + $0x4] ss:$8 sm:$0xf] %vm3_vm0, %v66_v11  }
  0x88   :  { %151 = vst.msk [vmem:[%s329_s1 + $0x4] ss:$8 sm:$0xf0] %vm3_vm0, %v66_v11  }
  0x8c   :  { %v100_v12 = vpop.permute.xlu1 %99   ;;  %v92_v13 = vpop.permute.xlu0 %91  }
  0x8d   :  { %160 = vst.msk [vmem:[%s329_s1 + $0x6] ss:$8 sm:$0xf] %vm3_vm0, %v100_v12  }
  0x8e   :  { %161 = vst.msk [vmem:[%s329_s1 + $0x6] ss:$8 sm:$0xf0] %vm3_vm0, %v100_v12  }
  0x8f   :  { %158 = vst.msk [vmem:[%s329_s1 + $0x45] ss:$8 sm:$0xf] %vm3_vm0, %v92_v13  }
  0x90   :  { %159 = vst.msk [vmem:[%s329_s1 + $0x45] ss:$8 sm:$0xf0] %vm3_vm0, %v92_v13  }
  0x94   :  { %v126_v14 = vpop.permute.xlu1 %125   ;;  %v117_v15 = vpop.permute.xlu0 %116  }
  0x95   :  { %168 = vst.msk [vmem:[%s329_s1 + $0x47] ss:$8 sm:$0xf] %vm3_vm0, %v126_v14  }
  0x96   :  { %169 = vst.msk [vmem:[%s329_s1 + $0x47] ss:$8 sm:$0xf0] %vm3_vm0, %v126_v14  }
  0x97   :  { %165 = vst.msk [vmem:[%s329_s1 + $0x7] ss:$8 sm:$0xf] %vm3_vm0, %v117_v15  }
  0x98   :  { %166 = vst.msk [vmem:[%s329_s1 + $0x7] ss:$8 sm:$0xf0] %vm3_vm0, %v117_v15  }

// kernel: squeeze.8
= control target key start
LH: loop header
LB: loop body
LE: loop exit
PB: predicated region body
PF: predicated region fallthrough
CT: control target
= control target key end

     0   :  { %vm516_vm0 = vcmask 1047556   ;;  %s1245_s15 = smov 8   ;;  %vm518_vm1 = vcmask 64512   ;;  %vm695_vm2 = vcmask 130112   ;;  %s1848_s0 = inlined_call_operand.vmem [shape: f32[1,2,8,128], index: 0, kind: input, shape index: {}]   ;;  %s1849_s1 = inlined_call_operand.vmem [shape: f32[16,2,8,2,4], index: 1, kind: output, shape index: {}]  }
   0x1   :  { %v1206_v0 = vld [vmem:[%s1848_s0 + $0xe] sm:$0x3]  ;;  %v1207_v1 = vld [vmem:[%s1848_s0 + $0xc] sm:$0x3]  ;;  %v1208_v2 = vld [vmem:[%s1848_s0 + $0xa] sm:$0x3] }
   0x2   :  { %487 = vst [vmem:[#allocation1 + $0x38] sm:$0x3] %v1206_v0  ;;  %v1209_v3 = vld [vmem:[%s1848_s0 + $0x8] sm:$0x3]  ;;  %v1210_v4 = vld [vmem:[%s1848_s0 + $0x6] sm:$0x3] }
   0x3   :  { %491 = vst [vmem:[#allocation1 + $0x30] sm:$0x3] %v1207_v1  ;;  %v1211_v5 = vld [vmem:[%s1848_s0 + $0x4] sm:$0x3]  ;;  %v1212_v6 = vld [vmem:[%s1848_s0 + $0x2] sm:$0x3] }
   0x4   :  { %495 = vst [vmem:[#allocation1 + $0x28] sm:$0x3] %v1208_v2  ;;  %v512_v7 = vld [vmem:[%s1848_s0] sm:$0x3]  ;;  %v1190_v8 = vld [vmem:[%s1848_s0 + $0x2e] sm:$0x3] }
   0x5   :  { %499 = vst [vmem:[#allocation1 + $0x20] sm:$0x3] %v1209_v3  ;;  %v1191_v9 = vld [vmem:[%s1848_s0 + $0x2c] sm:$0x3]  ;;  %v1192_v10 = vld [vmem:[%s1848_s0 + $0x2a] sm:$0x3] }
   0x6   :  { %503 = vst [vmem:[#allocation1 + $0x18] sm:$0x3] %v1210_v4  ;;  %v1193_v11 = vld [vmem:[%s1848_s0 + $0x28] sm:$0x3]  ;;  %v1194_v12 = vld [vmem:[%s1848_s0 + $0x26] sm:$0x3] }
   0x7   :  { %507 = vst [vmem:[#allocation1 + $0x10] sm:$0x3] %v1211_v5  ;;  %v1195_v13 = vld [vmem:[%s1848_s0 + $0x24] sm:$0x3]  ;;  %v1196_v14 = vld [vmem:[%s1848_s0 + $0x22] sm:$0x3] }
   0x8   :  { %511 = vst [vmem:[#allocation1 + $0x8] sm:$0x3] %v1212_v6  ;;  %v1197_v15 = vld [vmem:[%s1848_s0 + $0x20] sm:$0x3]  ;;  %v1174_v17 = vld [vmem:[%s1848_s0 + $0x4e] sm:$0x3] }
   0x9   :  { %513 = vst [vmem:[#allocation1] sm:$0x3] %v512_v7  ;;  %v1175_v18 = vld [vmem:[%s1848_s0 + $0x4c] sm:$0x3]  ;;  %v1176_v21 = vld [vmem:[%s1848_s0 + $0x4a] sm:$0x3] }
   0xa   :  { %423 = vst [vmem:[#allocation1 + $0xb8] sm:$0x3] %v1190_v8  ;;  %v1177_v22 = vld [vmem:[%s1848_s0 + $0x48] sm:$0x3]  ;;  %v1178_v23 = vld [vmem:[%s1848_s0 + $0x46] sm:$0x3] }
   0xb   :  { %427 = vst [vmem:[#allocation1 + $0xb0] sm:$0x3] %v1191_v9  ;;  %v1179_v24 = vld [vmem:[%s1848_s0 + $0x44] sm:$0x3]  ;;  %v1180_v25 = vld [vmem:[%s1848_s0 + $0x42] sm:$0x3] }
   0xc   :  { %431 = vst [vmem:[#allocation1 + $0xa8] sm:$0x3] %v1192_v10  ;;  %v690_v16 = vld [vmem:[#allocation1 + $0x1] ss:$8 sm:$0xf0]  }
   0xd   :  { %435 = vst [vmem:[#allocation1 + $0xa0] sm:$0x3] %v1193_v11  ;;  %v1181_v26 = vld [vmem:[%s1848_s0 + $0x40] sm:$0x3]  ;;  %v1158_v28 = vld [vmem:[%s1848_s0 + $0x6e] sm:$0x3] }
   0xe   :  { %439 = vst [vmem:[#allocation1 + $0x98] sm:$0x3] %v1194_v12  ;;  %v1159_v29 = vld [vmem:[%s1848_s0 + $0x6c] sm:$0x3]  ;;  %v1160_v32 = vld [vmem:[%s1848_s0 + $0x6a] sm:$0x3] }
   0xf   :  { %443 = vst [vmem:[#allocation1 + $0x90] sm:$0x3] %v1195_v13  ;;  %v1161_v33 = vld [vmem:[%s1848_s0 + $0x68] sm:$0x3]  ;;  %v1162_v34 = vld [vmem:[%s1848_s0 + $0x66] sm:$0x3] }
  0x10   :  { %v688_v19 = vld [vmem:[#allocation1 + $0x1] ss:$8 sm:$0xf]   ;;  %447 = vst [vmem:[#allocation1 + $0x88] sm:$0x3] %v1196_v14 }
  0x11   :  { %v692_v20 = vsel %vm516_vm0, %v690_v16, %v688_v19  ;;  %451 = vst [vmem:[#allocation1 + $0x80] sm:$0x3] %v1197_v15  ;;  %v1163_v35 = vld [vmem:[%s1848_s0 + $0x64] sm:$0x3]  ;;  %v1164_v36 = vld [vmem:[%s1848_s0 + $0x62] sm:$0x3] }
  0x12   :  { %693 = vrot.lane.b32.xlu0 %v692_v20, %s1245_s15  ;;  %359 = vst [vmem:[#allocation1 + $0x138] sm:$0x3] %v1174_v17  ;;  %v1165_v37 = vld [vmem:[%s1848_s0 + $0x60] sm:$0x3]  ;;  %v1110_v39 = vld [vmem:[%s1848_s0 + $0xce] sm:$0x3] }
  0x13   :  { %363 = vst [vmem:[#allocation1 + $0x130] sm:$0x3] %v1175_v18  ;;  %v1111_v40 = vld [vmem:[%s1848_s0 + $0xcc] sm:$0x3]  ;;  %v1112_v43 = vld [vmem:[%s1848_s0 + $0xca] sm:$0x3] }
  0x14   :  { %367 = vst [vmem:[#allocation1 + $0x128] sm:$0x3] %v1176_v21  ;;  %v702_v27 = vld [vmem:[#allocation1 + $0x81] ss:$8 sm:$0xf0]  }
  0x15   :  { %371 = vst [vmem:[#allocation1 + $0x120] sm:$0x3] %v1177_v22  ;;  %v1113_v44 = vld [vmem:[%s1848_s0 + $0xc8] sm:$0x3]  ;;  %v1114_v45 = vld [vmem:[%s1848_s0 + $0xc6] sm:$0x3] }
  0x16   :  { %375 = vst [vmem:[#allocation1 + $0x118] sm:$0x3] %v1178_v23  ;;  %v1115_v46 = vld [vmem:[%s1848_s0 + $0xc4] sm:$0x3]  ;;  %v1116_v47 = vld [vmem:[%s1848_s0 + $0xc2] sm:$0x3] }
  0x17   :  { %379 = vst [vmem:[#allocation1 + $0x110] sm:$0x3] %v1179_v24  ;;  %v1117_v48 = vld [vmem:[%s1848_s0 + $0xc0] sm:$0x3]  ;;  %v1182_v50 = vld [vmem:[%s1848_s0 + $0x3e] sm:$0x3] }
  0x18   :  { %v700_v30 = vld [vmem:[#allocation1 + $0x81] ss:$8 sm:$0xf]   ;;  %383 = vst [vmem:[#allocation1 + $0x108] sm:$0x3] %v1180_v25 }
  0x19   :  { %v704_v31 = vsel %vm516_vm0, %v702_v27, %v700_v30  ;;  %387 = vst [vmem:[#allocation1 + $0x100] sm:$0x3] %v1181_v26  ;;  %v1183_v51 = vld [vmem:[%s1848_s0 + $0x3c] sm:$0x3]  ;;  %v1184_v54 = vld [vmem:[%s1848_s0 + $0x3a] sm:$0x3] }
  0x1a   :  { %705 = vrot.lane.b32.xlu0 %v704_v31, %s1245_s15  ;;  %295 = vst [vmem:[#allocation1 + $0x1b8] sm:$0x3] %v1158_v28  ;;  %v1185_v55 = vld [vmem:[%s1848_s0 + $0x38] sm:$0x3]  ;;  %v1186_v56 = vld [vmem:[%s1848_s0 + $0x36] sm:$0x3] }
  0x1b   :  { %299 = vst [vmem:[#allocation1 + $0x1b0] sm:$0x3] %v1159_v29  ;;  %v1187_v57 = vld [vmem:[%s1848_s0 + $0x34] sm:$0x3]  ;;  %v1188_v58 = vld [vmem:[%s1848_s0 + $0x32] sm:$0x3] }
  0x1c   :  { %303 = vst [vmem:[#allocation1 + $0x1a8] sm:$0x3] %v1160_v32  ;;  %v715_v38 = vld [vmem:[#allocation1 + $0x101] ss:$8 sm:$0xf0]  }
  0x1d   :  { %307 = vst [vmem:[#allocation1 + $0x1a0] sm:$0x3] %v1161_v33  ;;  %v1189_v59 = vld [vmem:[%s1848_s0 + $0x30] sm:$0x3]  ;;  %v1094_v61 = vld [vmem:[%s1848_s0 + $0xee] sm:$0x3] }
  0x1e   :  { %311 = vst [vmem:[#allocation1 + $0x198] sm:$0x3] %v1162_v34  ;;  %v1095_v62 = vld [vmem:[%s1848_s0 + $0xec] sm:$0x3]  ;;  %v1096_v1 = vld [vmem:[%s1848_s0 + $0xea] sm:$0x3] }
  0x1f   :  { %315 = vst [vmem:[#allocation1 + $0x190] sm:$0x3] %v1163_v35  ;;  %v1097_v2 = vld [vmem:[%s1848_s0 + $0xe8] sm:$0x3]  ;;  %v1098_v3 = vld [vmem:[%s1848_s0 + $0xe6] sm:$0x3] }
  0x20   :  { %v713_v41 = vld [vmem:[#allocation1 + $0x101] ss:$8 sm:$0xf]   ;;  %319 = vst [vmem:[#allocation1 + $0x188] sm:$0x3] %v1164_v36 }
  0x21   :  { %v717_v42 = vsel %vm516_vm0, %v715_v38, %v713_v41  ;;  %323 = vst [vmem:[#allocation1 + $0x180] sm:$0x3] %v1165_v37  ;;  %v1099_v4 = vld [vmem:[%s1848_s0 + $0xe4] sm:$0x3]  ;;  %v1100_v5 = vld [vmem:[%s1848_s0 + $0xe2] sm:$0x3] }
  0x22   :  { %718 = vrot.lane.b32.xlu1 %v717_v42, %s1245_s15  ;;  %103 = vst [vmem:[#allocation1 + $0x338] sm:$0x3] %v1110_v39  ;;  %v1101_v6 = vld [vmem:[%s1848_s0 + $0xe0] sm:$0x3]  ;;  %v1142_v8 = vld [vmem:[%s1848_s0 + $0x8e] sm:$0x3] }
  0x23   :  { %107 = vst [vmem:[#allocation1 + $0x330] sm:$0x3] %v1111_v40  ;;  %v1143_v9 = vld [vmem:[%s1848_s0 + $0x8c] sm:$0x3]  ;;  %v1144_v12 = vld [vmem:[%s1848_s0 + $0x8a] sm:$0x3] }
  0x24   :  { %111 = vst [vmem:[#allocation1 + $0x328] sm:$0x3] %v1112_v43  ;;  %v728_v49 = vld [vmem:[#allocation1 + $0x181] ss:$8 sm:$0xf0]  }
  0x25   :  { %115 = vst [vmem:[#allocation1 + $0x320] sm:$0x3] %v1113_v44  ;;  %v1145_v13 = vld [vmem:[%s1848_s0 + $0x88] sm:$0x3]  ;;  %v1146_v14 = vld [vmem:[%s1848_s0 + $0x86] sm:$0x3] }
  0x26   :  { %119 = vst [vmem:[#allocation1 + $0x318] sm:$0x3] %v1114_v45  ;;  %v1147_v15 = vld [vmem:[%s1848_s0 + $0x84] sm:$0x3]  ;;  %v1148_v16 = vld [vmem:[%s1848_s0 + $0x82] sm:$0x3] }
  0x27   :  { %123 = vst [vmem:[#allocation1 + $0x310] sm:$0x3] %v1115_v46  ;;  %v1149_v17 = vld [vmem:[%s1848_s0 + $0x80] sm:$0x3]  ;;  %v1134_v19 = vld [vmem:[%s1848_s0 + $0x9e] sm:$0x3] }
  0x28   :  { %v726_v52 = vld [vmem:[#allocation1 + $0x181] ss:$8 sm:$0xf]   ;;  %127 = vst [vmem:[#allocation1 + $0x308] sm:$0x3] %v1116_v47 }
  0x29   :  { %v730_v53 = vsel %vm516_vm0, %v728_v49, %v726_v52  ;;  %131 = vst [vmem:[#allocation1 + $0x300] sm:$0x3] %v1117_v48  ;;  %v1135_v20 = vld [vmem:[%s1848_s0 + $0x9c] sm:$0x3]  ;;  %v1136_v23 = vld [vmem:[%s1848_s0 + $0x9a] sm:$0x3] }
  0x2a   :  { %731 = vrot.lane.b32.xlu1 %v730_v53, %s1245_s15  ;;  %391 = vst [vmem:[#allocation1 + $0xf8] sm:$0x3] %v1182_v50  ;;  %v1137_v24 = vld [vmem:[%s1848_s0 + $0x98] sm:$0x3]  ;;  %v1138_v25 = vld [vmem:[%s1848_s0 + $0x96] sm:$0x3] }
  0x2b   :  { %395 = vst [vmem:[#allocation1 + $0xf0] sm:$0x3] %v1183_v51  ;;  %v1139_v26 = vld [vmem:[%s1848_s0 + $0x94] sm:$0x3]  ;;  %v1140_v27 = vld [vmem:[%s1848_s0 + $0x92] sm:$0x3] }
  0x2c   :  { %399 = vst [vmem:[#allocation1 + $0xe8] sm:$0x3] %v1184_v54  ;;  %v767_v60 = vld [vmem:[#allocation1 + $0x301] ss:$8 sm:$0xf0]  }
  0x2d   :  { %403 = vst [vmem:[#allocation1 + $0xe0] sm:$0x3] %v1185_v55  ;;  %v1141_v28 = vld [vmem:[%s1848_s0 + $0x90] sm:$0x3]  ;;  %v1166_v30 = vld [vmem:[%s1848_s0 + $0x5e] sm:$0x3] }
  0x2e   :  { %407 = vst [vmem:[#allocation1 + $0xd8] sm:$0x3] %v1186_v56  ;;  %v1167_v31 = vld [vmem:[%s1848_s0 + $0x5c] sm:$0x3]  ;;  %v1168_v34 = vld [vmem:[%s1848_s0 + $0x5a] sm:$0x3] }
  0x2f   :  { %411 = vst [vmem:[#allocation1 + $0xd0] sm:$0x3] %v1187_v57  ;;  %v1169_v35 = vld [vmem:[%s1848_s0 + $0x58] sm:$0x3]  ;;  %v1170_v36 = vld [vmem:[%s1848_s0 + $0x56] sm:$0x3] }
  0x30   :  { %v765_v63 = vld [vmem:[#allocation1 + $0x301] ss:$8 sm:$0xf]   ;;  %415 = vst [vmem:[#allocation1 + $0xc8] sm:$0x3] %v1188_v58 }
  0x31   :  { %v769_v0 = vsel %vm516_vm0, %v767_v60, %v765_v63  ;;  %419 = vst [vmem:[#allocation1 + $0xc0] sm:$0x3] %v1189_v59  ;;  %v1171_v37 = vld [vmem:[%s1848_s0 + $0x54] sm:$0x3]  ;;  %v1172_v38 = vld [vmem:[%s1848_s0 + $0x52] sm:$0x3] }
  0x32   :  { %770 = vrot.lane.b32.xlu0 %v769_v0, %s1245_s15  ;;  %39 = vst [vmem:[#allocation1 + $0x3b8] sm:$0x3] %v1094_v61  ;;  %v1173_v39 = vld [vmem:[%s1848_s0 + $0x50] sm:$0x3]  ;;  %v1126_v41 = vld [vmem:[%s1848_s0 + $0xae] sm:$0x3] }
  0x33   :  { %43 = vst [vmem:[#allocation1 + $0x3b0] sm:$0x3] %v1095_v62  ;;  %v1127_v42 = vld [vmem:[%s1848_s0 + $0xac] sm:$0x3]  ;;  %v1128_v45 = vld [vmem:[%s1848_s0 + $0xaa] sm:$0x3] }
  0x34   :  { %47 = vst [vmem:[#allocation1 + $0x3a8] sm:$0x3] %v1096_v1  ;;  %v806_v7 = vld [vmem:[#allocation1 + $0xc1] ss:$8 sm:$0xf0]  }
  0x35   :  { %51 = vst [vmem:[#allocation1 + $0x3a0] sm:$0x3] %v1097_v2  ;;  %v1129_v46 = vld [vmem:[%s1848_s0 + $0xa8] sm:$0x3]  ;;  %v1130_v47 = vld [vmem:[%s1848_s0 + $0xa6] sm:$0x3] }
  0x36   :  { %55 = vst [vmem:[#allocation1 + $0x398] sm:$0x3] %v1098_v3  ;;  %v1131_v48 = vld [vmem:[%s1848_s0 + $0xa4] sm:$0x3]  ;;  %v1132_v49 = vld [vmem:[%s1848_s0 + $0xa2] sm:$0x3] }
  0x37   :  { %59 = vst [vmem:[#allocation1 + $0x390] sm:$0x3] %v1099_v4  ;;  %v1133_v50 = vld [vmem:[%s1848_s0 + $0xa0] sm:$0x3]  ;;  %v1118_v52 = vld [vmem:[%s1848_s0 + $0xbe] sm:$0x3] }
  0x38   :  { %v804_v10 = vld [vmem:[#allocation1 + $0xc1] ss:$8 sm:$0xf]   ;;  %63 = vst [vmem:[#allocation1 + $0x388] sm:$0x3] %v1100_v5 }
  0x39   :  { %v808_v11 = vsel %vm516_vm0, %v806_v7, %v804_v10  ;;  %67 = vst [vmem:[#allocation1 + $0x380] sm:$0x3] %v1101_v6  ;;  %v1119_v53 = vld [vmem:[%s1848_s0 + $0xbc] sm:$0x3]  ;;  %v1120_v56 = vld [vmem:[%s1848_s0 + $0xba] sm:$0x3] }
  0x3a   :  { %809 = vrot.lane.b32.xlu0 %v808_v11, %s1245_s15  ;;  %231 = vst [vmem:[#allocation1 + $0x238] sm:$0x3] %v1142_v8  ;;  %v1121_v57 = vld [vmem:[%s1848_s0 + $0xb8] sm:$0x3]  ;;  %v1122_v58 = vld [vmem:[%s1848_s0 + $0xb6] sm:$0x3] }
  0x3b   :  { %235 = vst [vmem:[#allocation1 + $0x230] sm:$0x3] %v1143_v9  ;;  %v1123_v59 = vld [vmem:[%s1848_s0 + $0xb4] sm:$0x3]  ;;  %v1124_v60 = vld [vmem:[%s1848_s0 + $0xb2] sm:$0x3] }
  0x3c   :  { %239 = vst [vmem:[#allocation1 + $0x228] sm:$0x3] %v1144_v12  ;;  %v780_v18 = vld [vmem:[#allocation1 + $0x381] ss:$8 sm:$0xf0]  }
  0x3d   :  { %243 = vst [vmem:[#allocation1 + $0x220] sm:$0x3] %v1145_v13  ;;  %v1125_v61 = vld [vmem:[%s1848_s0 + $0xb0] sm:$0x3]  ;;  %v1086_v63 = vld [vmem:[%s1848_s0 + $0xfe] sm:$0x3] }
  0x3e   :  { %247 = vst [vmem:[#allocation1 + $0x218] sm:$0x3] %v1146_v14  ;;  %v1087_v0 = vld [vmem:[%s1848_s0 + $0xfc] sm:$0x3]  ;;  %v1088_v3 = vld [vmem:[%s1848_s0 + $0xfa] sm:$0x3] }
  0x3f   :  { %251 = vst [vmem:[#allocation1 + $0x210] sm:$0x3] %v1147_v15  ;;  %v1089_v4 = vld [vmem:[%s1848_s0 + $0xf8] sm:$0x3]  ;;  %v1090_v5 = vld [vmem:[%s1848_s0 + $0xf6] sm:$0x3] }
  0x40   :  { %v778_v21 = vld [vmem:[#allocation1 + $0x381] ss:$8 sm:$0xf]   ;;  %255 = vst [vmem:[#allocation1 + $0x208] sm:$0x3] %v1148_v16 }
  0x41   :  { %v782_v22 = vsel %vm516_vm0, %v780_v18, %v778_v21  ;;  %259 = vst [vmem:[#allocation1 + $0x200] sm:$0x3] %v1149_v17  ;;  %v1091_v6 = vld [vmem:[%s1848_s0 + $0xf4] sm:$0x3]  ;;  %v1092_v7 = vld [vmem:[%s1848_s0 + $0xf2] sm:$0x3] }
  0x42   :  { %783 = vrot.lane.b32.xlu1 %v782_v22, %s1245_s15  ;;  %199 = vst [vmem:[#allocation1 + $0x278] sm:$0x3] %v1134_v19  ;;  %v1093_v8 = vld [vmem:[%s1848_s0 + $0xf0] sm:$0x3]  ;;  %v1198_v10 = vld [vmem:[%s1848_s0 + $0x1e] sm:$0x3] }
  0x43   :  { %203 = vst [vmem:[#allocation1 + $0x270] sm:$0x3] %v1135_v20  ;;  %v1199_v11 = vld [vmem:[%s1848_s0 + $0x1c] sm:$0x3]  ;;  %v1200_v14 = vld [vmem:[%s1848_s0 + $0x1a] sm:$0x3] }
  0x44   :  { %207 = vst [vmem:[#allocation1 + $0x268] sm:$0x3] %v1136_v23  ;;  %v741_v29 = vld [vmem:[#allocation1 + $0x201] ss:$8 sm:$0xf0]  }
  0x45   :  { %211 = vst [vmem:[#allocation1 + $0x260] sm:$0x3] %v1137_v24  ;;  %v1201_v15 = vld [vmem:[%s1848_s0 + $0x18] sm:$0x3]  ;;  %v1202_v16 = vld [vmem:[%s1848_s0 + $0x16] sm:$0x3] }
  0x46   :  { %215 = vst [vmem:[#allocation1 + $0x258] sm:$0x3] %v1138_v25  ;;  %v1203_v17 = vld [vmem:[%s1848_s0 + $0x14] sm:$0x3]  ;;  %v1204_v18 = vld [vmem:[%s1848_s0 + $0x12] sm:$0x3] }
  0x47   :  { %219 = vst [vmem:[#allocation1 + $0x250] sm:$0x3] %v1139_v26  ;;  %v1205_v19 = vld [vmem:[%s1848_s0 + $0x10] sm:$0x3]  ;;  %v1150_v21 = vld [vmem:[%s1848_s0 + $0x7e] sm:$0x3] }
  0x48   :  { %v739_v32 = vld [vmem:[#allocation1 + $0x201] ss:$8 sm:$0xf]   ;;  %223 = vst [vmem:[#allocation1 + $0x248] sm:$0x3] %v1140_v27 }
  0x49   :  { %v743_v33 = vsel %vm516_vm0, %v741_v29, %v739_v32  ;;  %227 = vst [vmem:[#allocation1 + $0x240] sm:$0x3] %v1141_v28  ;;  %v1151_v22 = vld [vmem:[%s1848_s0 + $0x7c] sm:$0x3]  ;;  %v1152_v25 = vld [vmem:[%s1848_s0 + $0x7a] sm:$0x3] }
  0x4a   :  { %744 = vrot.lane.b32.xlu2 %v743_v33, %s1245_s15  ;;  %327 = vst [vmem:[#allocation1 + $0x178] sm:$0x3] %v1166_v30  ;;  %v1153_v26 = vld [vmem:[%s1848_s0 + $0x78] sm:$0x3]  ;;  %v1154_v27 = vld [vmem:[%s1848_s0 + $0x76] sm:$0x3] }
  0x4b   :  { %331 = vst [vmem:[#allocation1 + $0x170] sm:$0x3] %v1167_v31  ;;  %v1155_v28 = vld [vmem:[%s1848_s0 + $0x74] sm:$0x3]  ;;  %v1156_v29 = vld [vmem:[%s1848_s0 + $0x72] sm:$0x3] }
  0x4c   :  { %335 = vst [vmem:[#allocation1 + $0x168] sm:$0x3] %v1168_v34  ;;  %v845_v40 = vld [vmem:[#allocation1 + $0x241] ss:$8 sm:$0xf0]  }
  0x4d   :  { %339 = vst [vmem:[#allocation1 + $0x160] sm:$0x3] %v1169_v35  ;;  %v1157_v30 = vld [vmem:[%s1848_s0 + $0x70] sm:$0x3]  ;;  %v1102_v31 = vld [vmem:[%s1848_s0 + $0xde] sm:$0x3] }
  0x4e   :  { %343 = vst [vmem:[#allocation1 + $0x158] sm:$0x3] %v1170_v36  ;;  %v1103_v33 = vld [vmem:[%s1848_s0 + $0xdc] sm:$0x3]  ;;  %v1104_v34 = vld [vmem:[%s1848_s0 + $0xda] sm:$0x3] }
  0x4f   :  { %347 = vst [vmem:[#allocation1 + $0x150] sm:$0x3] %v1171_v37  ;;  %v1105_v37 = vld [vmem:[%s1848_s0 + $0xd8] sm:$0x3] }
  0x50   :  { %v843_v43 = vld [vmem:[#allocation1 + $0x241] ss:$8 sm:$0xf]   ;;  %351 = vst [vmem:[#allocation1 + $0x148] sm:$0x3] %v1172_v38 }
  0x51   :  { %v847_v44 = vsel %vm516_vm0, %v845_v40, %v843_v43  ;;  %355 = vst [vmem:[#allocation1 + $0x140] sm:$0x3] %v1173_v39  ;;  %v1106_v38 = vld [vmem:[%s1848_s0 + $0xd6] sm:$0x3]  ;;  %v1107_v39 = vld [vmem:[%s1848_s0 + $0xd4] sm:$0x3] }
  0x52   :  { %848 = vrot.lane.b32.xlu0 %v847_v44, %s1245_s15  ;;  %167 = vst [vmem:[#allocation1 + $0x2b8] sm:$0x3] %v1126_v41  ;;  %v514_v40 = vld [vmem:[#allocation1] ss:$8 sm:$0xf]  }
  0x53   :  { %171 = vst [vmem:[#allocation1 + $0x2b0] sm:$0x3] %v1127_v42  ;;  %v1108_v41 = vld [vmem:[%s1848_s0 + $0xd2] sm:$0x3]  ;;  %v1109_v43 = vld [vmem:[%s1848_s0 + $0xd0] sm:$0x3] }
  0x54   :  { %175 = vst [vmem:[#allocation1 + $0x2a8] sm:$0x3] %v1128_v45  ;;  %v819_v51 = vld [vmem:[#allocation1 + $0x141] ss:$8 sm:$0xf0]  }
  0x55   :  { %179 = vst [vmem:[#allocation1 + $0x2a0] sm:$0x3] %v1129_v46  ;;  %v515_v42 = vld [vmem:[#allocation1] ss:$8 sm:$0xf0]  }
  0x56   :  { %183 = vst [vmem:[#allocation1 + $0x298] sm:$0x3] %v1130_v47  ;;  %v534_v44 = vld [vmem:[#allocation1 + $0x80] ss:$8 sm:$0xf]   ;;  %v517_v47 = vsel %vm516_vm0, %v515_v42, %v514_v40 }
  0x57   :  { %187 = vst [vmem:[#allocation1 + $0x290] sm:$0x3] %v1131_v48  ;;  %v536_v45 = vld [vmem:[#allocation1 + $0x80] ss:$8 sm:$0xf0]  }
  0x58   :  { %v817_v54 = vld [vmem:[#allocation1 + $0x141] ss:$8 sm:$0xf]   ;;  %191 = vst [vmem:[#allocation1 + $0x288] sm:$0x3] %v1132_v49 }
  0x59   :  { %v821_v55 = vsel %vm516_vm0, %v819_v51, %v817_v54  ;;  %195 = vst [vmem:[#allocation1 + $0x280] sm:$0x3] %v1133_v50  ;;  %v538_v50 = vsel %vm516_vm0, %v536_v45, %v534_v44  ;;  %v556_v51 = vld [vmem:[#allocation1 + $0x100] ss:$8 sm:$0xf]  }
  0x5a   :  { %822 = vrot.lane.b32.xlu1 %v821_v55, %s1245_s15  ;;  %135 = vst [vmem:[#allocation1 + $0x2f8] sm:$0x3] %v1118_v52  ;;  %v558_v52 = vld [vmem:[#allocation1 + $0x100] ss:$8 sm:$0xf0]  }
  0x5b   :  { %139 = vst [vmem:[#allocation1 + $0x2f0] sm:$0x3] %v1119_v53  ;;  %v600_v54 = vld [vmem:[#allocation1 + $0x200] ss:$8 sm:$0xf]   ;;  %v560_v55 = vsel %vm516_vm0, %v558_v52, %v556_v51 }
  0x5c   :  { %143 = vst [vmem:[#allocation1 + $0x2e8] sm:$0x3] %v1120_v56  ;;  %v754_v62 = vld [vmem:[#allocation1 + $0x281] ss:$8 sm:$0xf0]  }
  0x5d   :  { %147 = vst [vmem:[#allocation1 + $0x2e0] sm:$0x3] %v1121_v57  ;;  %v602_v56 = vld [vmem:[#allocation1 + $0x200] ss:$8 sm:$0xf0]  }
  0x5e   :  { %151 = vst [vmem:[#allocation1 + $0x2d8] sm:$0x3] %v1122_v58  ;;  %v604_v58 = vsel %vm516_vm0, %v602_v56, %v600_v54  ;;  %v611_v40 = vld [vmem:[#allocation1 + $0x240] ss:$8 sm:$0xf]  }
  0x5f   :  { %155 = vst [vmem:[#allocation1 + $0x2d0] sm:$0x3] %v1123_v59  ;;  %v567_v45 = vld [vmem:[#allocation1 + $0x140] ss:$8 sm:$0xf]  }
  0x60   :  { %v752_v1 = vld [vmem:[#allocation1 + $0x281] ss:$8 sm:$0xf]   ;;  %159 = vst [vmem:[#allocation1 + $0x2c8] sm:$0x3] %v1124_v60 }
  0x61   :  { %v756_v2 = vsel %vm516_vm0, %v754_v62, %v752_v1  ;;  %163 = vst [vmem:[#allocation1 + $0x2c0] sm:$0x3] %v1125_v61  ;;  %v580_v1 = vld [vmem:[#allocation1 + $0x180] ss:$8 sm:$0xf0]  }
  0x62   :  { %757 = vrot.lane.b32.xlu2 %v756_v2, %s1245_s15  ;;  %7 = vst [vmem:[#allocation1 + $0x3f8] sm:$0x3] %v1086_v63 }
  0x63   :  { %11 = vst [vmem:[#allocation1 + $0x3f0] sm:$0x3] %v1087_v0  ;;  %v578_v0 = vld [vmem:[#allocation1 + $0x180] ss:$8 sm:$0xf]  }
  0x64   :  { %15 = vst [vmem:[#allocation1 + $0x3e8] sm:$0x3] %v1088_v3  ;;  %v858_v9 = vld [vmem:[#allocation1 + $0x2c1] ss:$8 sm:$0xf0]   ;;  %v582_v2 = vsel %vm516_vm0, %v580_v1, %v578_v0 }
  0x65   :  { %19 = vst [vmem:[#allocation1 + $0x3e0] sm:$0x3] %v1089_v4  ;;  %v635_v56 = vld [vmem:[#allocation1 + $0x2c0] ss:$8 sm:$0xf0]  }
  0x66   :  { %23 = vst [vmem:[#allocation1 + $0x3d8] sm:$0x3] %v1090_v5 }
  0x67   :  { %27 = vst [vmem:[#allocation1 + $0x3d0] sm:$0x3] %v1091_v6  ;;  %v622_v6 = vld [vmem:[#allocation1 + $0x280] ss:$8 sm:$0xf]  }
  0x68   :  { %v856_v12 = vld [vmem:[#allocation1 + $0x2c1] ss:$8 sm:$0xf]   ;;  %31 = vst [vmem:[#allocation1 + $0x3c8] sm:$0x3] %v1092_v7 }
  0x69   :  { %v860_v13 = vsel %vm516_vm0, %v858_v9, %v856_v12  ;;  %35 = vst [vmem:[#allocation1 + $0x3c0] sm:$0x3] %v1093_v8  ;;  %v624_v9 = vld [vmem:[#allocation1 + $0x280] ss:$8 sm:$0xf0]  }
  0x6a   :  { %861 = vrot.lane.b32.xlu1 %v860_v13, %s1245_s15  ;;  %455 = vst [vmem:[#allocation1 + $0x78] sm:$0x3] %v1198_v10 }
  0x6b   :  { %459 = vst [vmem:[#allocation1 + $0x70] sm:$0x3] %v1199_v11  ;;  %v626_v11 = vsel %vm516_vm0, %v624_v9, %v622_v6 }
  0x6c   :  { %463 = vst [vmem:[#allocation1 + $0x68] sm:$0x3] %v1200_v14  ;;  %v884_v20 = vld [vmem:[#allocation1 + $0x3c1] ss:$8 sm:$0xf0]  }
  0x6d   :  { %467 = vst [vmem:[#allocation1 + $0x60] sm:$0x3] %v1201_v15 }
  0x6e   :  { %471 = vst [vmem:[#allocation1 + $0x58] sm:$0x3] %v1202_v16  ;;  %v644_v16 = vld [vmem:[#allocation1 + $0x300] ss:$8 sm:$0xf]  }
  0x6f   :  { %475 = vst [vmem:[#allocation1 + $0x50] sm:$0x3] %v1203_v17  ;;  %v646_v17 = vld [vmem:[#allocation1 + $0x300] ss:$8 sm:$0xf0]  }
  0x70   :  { %v882_v23 = vld [vmem:[#allocation1 + $0x3c1] ss:$8 sm:$0xf]   ;;  %479 = vst [vmem:[#allocation1 + $0x48] sm:$0x3] %v1204_v18  ;;  %v648_v18 = vsel %vm516_vm0, %v646_v17, %v644_v16 }
  0x71   :  { %v886_v24 = vsel %vm516_vm0, %v884_v20, %v882_v23  ;;  %483 = vst [vmem:[#allocation1 + $0x40] sm:$0x3] %v1205_v19 }
  0x72   :  { %887 = vrot.lane.b32.xlu0 %v886_v24, %s1245_s15  ;;  %263 = vst [vmem:[#allocation1 + $0x1f8] sm:$0x3] %v1150_v21  ;;  %v545_v24 = vld [vmem:[#allocation1 + $0xc0] ss:$8 sm:$0xf]  }
  0x73   :  { %267 = vst [vmem:[#allocation1 + $0x1f0] sm:$0x3] %v1151_v22 }
  0x74   :  { %271 = vst [vmem:[#allocation1 + $0x1e8] sm:$0x3] %v1152_v25  ;;  %v793_v32 = vld [vmem:[#allocation1 + $0x41] ss:$8 sm:$0xf0]  }
  0x75   :  { %275 = vst [vmem:[#allocation1 + $0x1e0] sm:$0x3] %v1153_v26  ;;  %v525_v20 = vld [vmem:[#allocation1 + $0x40] ss:$8 sm:$0xf0]  }
  0x76   :  { %279 = vst [vmem:[#allocation1 + $0x1d8] sm:$0x3] %v1154_v27  ;;  %v547_v25 = vld [vmem:[#allocation1 + $0xc0] ss:$8 sm:$0xf0]  }
  0x77   :  { %283 = vst [vmem:[#allocation1 + $0x1d0] sm:$0x3] %v1155_v28  ;;  %v549_v26 = vsel %vm516_vm0, %v547_v25, %v545_v24  ;;  %v666_v27 = vld [vmem:[#allocation1 + $0x380] ss:$8 sm:$0xf]  }
  0x78   :  { %v791_v35 = vld [vmem:[#allocation1 + $0x41] ss:$8 sm:$0xf]   ;;  %287 = vst [vmem:[#allocation1 + $0x1c8] sm:$0x3] %v1156_v29 }
  0x79   :  { %v795_v36 = vsel %vm516_vm0, %v793_v32, %v791_v35  ;;  %291 = vst [vmem:[#allocation1 + $0x1c0] sm:$0x3] %v1157_v30  ;;  %v523_v19 = vld [vmem:[#allocation1 + $0x40] ss:$8 sm:$0xf]  }
  0x7a   :  { %796 = vrot.lane.b32.xlu2 %v795_v36, %s1245_s15  ;;  %71 = vst [vmem:[#allocation1 + $0x378] sm:$0x3] %v1102_v31  ;;  %v527_v23 = vsel %vm516_vm0, %v525_v20, %v523_v19  ;;  %v668_v30 = vld [vmem:[#allocation1 + $0x380] ss:$8 sm:$0xf0]  }
  0x7b   :  { %75 = vst [vmem:[#allocation1 + $0x370] sm:$0x3] %v1103_v33  ;;  %v670_v33 = vsel %vm516_vm0, %v668_v30, %v666_v27 }
  0x7c   :  { %79 = vst [vmem:[#allocation1 + $0x368] sm:$0x3] %v1104_v34  ;;  %v832_v46 = vld [vmem:[#allocation1 + $0x1c1] ss:$8 sm:$0xf0]  }
  0x7d   :  { %83 = vst [vmem:[#allocation1 + $0x360] sm:$0x3] %v1105_v37  ;;  %v591_v36 = vld [vmem:[#allocation1 + $0x1c0] ss:$8 sm:$0xf0]  }
  0x7e   :  { %87 = vst [vmem:[#allocation1 + $0x358] sm:$0x3] %v1106_v38 }
  0x7f   :  { %91 = vst [vmem:[#allocation1 + $0x350] sm:$0x3] %v1107_v39 }
  0x80   :  { %v830_v48 = vld [vmem:[#allocation1 + $0x1c1] ss:$8 sm:$0xf]   ;;  %95 = vst [vmem:[#allocation1 + $0x348] sm:$0x3] %v1108_v41 }
  0x81   :  { %v834_v49 = vsel %vm516_vm0, %v832_v46, %v830_v48  ;;  %99 = vst [vmem:[#allocation1 + $0x340] sm:$0x3] %v1109_v43  ;;  %v589_v35 = vld [vmem:[#allocation1 + $0x1c0] ss:$8 sm:$0xf]  }
  0x82   :  { %835 = vrot.lane.b32.xlu2 %v834_v49, %s1245_s15  ;;  %519 = vst.msk [vmem:[#allocation0] sm:$0xf] %vm518_vm1, %v517_v47   ;;  %v593_v38 = vsel %vm516_vm0, %v591_v36, %v589_v35  ;;  %v613_v41 = vld [vmem:[#allocation1 + $0x240] ss:$8 sm:$0xf0]  }
  0x83   :  { %521 = vst.msk [vmem:[#allocation0 + $0x4] sm:$0xf0] %vm518_vm1, %v517_v47   ;;  %v569_v46 = vld [vmem:[#allocation1 + $0x140] ss:$8 sm:$0xf0]   ;;  %v615_v48 = vsel %vm516_vm0, %v613_v41, %v611_v40 }
  0x84   :  { %v694_v53 = vpop.permute.xlu0 %693   ;;  %541 = vst.msk [vmem:[#allocation0 + $0x20] sm:$0xf] %vm518_vm1, %v538_v50   ;;  %v871_v57 = vld [vmem:[#allocation1 + $0x341] ss:$8 sm:$0xf0]  }
  0x85   :  { %696 = vst.msk [vmem:[#allocation0] sm:$0xf] %vm695_vm2, %v694_v53   ;;  %v657_v52 = vld [vmem:[#allocation1 + $0x340] ss:$8 sm:$0xf0]  }
  0x86   :  { %698 = vst.msk [vmem:[#allocation0 + $0x4] sm:$0xf0] %vm695_vm2, %v694_v53  }
  0x87   :  { %543 = vst.msk [vmem:[#allocation0 + $0x24] sm:$0xf0] %vm518_vm1, %v538_v50   ;;  %v571_v50 = vsel %vm516_vm0, %v569_v46, %v567_v45 }
  0x88   :  { %v869_v59 = vld [vmem:[#allocation1 + $0x341] ss:$8 sm:$0xf]   ;;  %563 = vst.msk [vmem:[#allocation0 + $0x40] sm:$0xf] %vm518_vm1, %v560_v55  }
  0x89   :  { %v873_v60 = vsel %vm516_vm0, %v871_v57, %v869_v59  ;;  %565 = vst.msk [vmem:[#allocation0 + $0x44] sm:$0xf0] %vm518_vm1, %v560_v55   ;;  %v655_v51 = vld [vmem:[#allocation1 + $0x340] ss:$8 sm:$0xf]  }
  0x8a   :  { %874 = vrot.lane.b32.xlu2 %v873_v60, %s1245_s15  ;;  %607 = vst.msk [vmem:[#allocation0 + $0x80] sm:$0xf] %vm518_vm1, %v604_v58   ;;  %v659_v54 = vsel %vm516_vm0, %v657_v52, %v655_v51  ;;  %v633_v55 = vld [vmem:[#allocation1 + $0x2c0] ss:$8 sm:$0xf]  }
  0x8b   :  { %609 = vst.msk [vmem:[#allocation0 + $0x84] sm:$0xf0] %vm518_vm1, %v604_v58   ;;  %v677_v60 = vld [vmem:[#allocation1 + $0x3c0] ss:$8 sm:$0xf]  }
  0x8c   :  { %v896_v61 = vld [vmem:[#allocation0] sm:$0xf]  ;;  %v706_v62 = vpop.permute.xlu0 %705   ;;  %585 = vst.msk [vmem:[#allocation0 + $0x60] sm:$0xf] %vm518_vm1, %v582_v2  }
  0x8d   :  { %899 = vst [vmem:[%s1849_s1] sm:$0xf] %v896_v61  ;;  %v901_v63 = vld [vmem:[#allocation0 + $0x8] sm:$0xf] }
  0x8e   :  { %1213 = vst [vmem:[%s1849_s1 + $0x4] sm:$0xf] %v901_v63  ;;  %v679_v61 = vld [vmem:[#allocation1 + $0x3c0] ss:$8 sm:$0xf0]   ;;  %v637_v63 = vsel %vm516_vm0, %v635_v56, %v633_v55 }
  0x8f   :  { %709 = vst.msk [vmem:[#allocation0 + $0x20] sm:$0xf] %vm695_vm2, %v706_v62   ;;  %v681_v1 = vsel %vm516_vm0, %v679_v61, %v677_v60 }
  0x90   :  { %711 = vst.msk [vmem:[#allocation0 + $0x24] sm:$0xf0] %vm695_vm2, %v706_v62  }
  0x91   :  { %587 = vst.msk [vmem:[#allocation0 + $0x64] sm:$0xf0] %vm518_vm1, %v582_v2  }
  0x92   :  { %629 = vst.msk [vmem:[#allocation0 + $0xa0] sm:$0xf] %vm518_vm1, %v626_v11  }
  0x93   :  { %631 = vst.msk [vmem:[#allocation0 + $0xa4] sm:$0xf0] %vm518_vm1, %v626_v11  }
  0x94   :  { %v719_v3 = vpop.permute.xlu1 %718   ;;  %651 = vst.msk [vmem:[#allocation0 + $0xc0] sm:$0xf] %vm518_vm1, %v648_v18  }
  0x95   :  { %722 = vst.msk [vmem:[#allocation0 + $0x40] sm:$0xf] %vm695_vm2, %v719_v3  }
  0x96   :  { %v919_v4 = vld [vmem:[#allocation0 + $0x20] sm:$0xf]  ;;  %724 = vst.msk [vmem:[#allocation0 + $0x44] sm:$0xf0] %vm695_vm2, %v719_v3  }
  0x97   :  { %1216 = vst [vmem:[%s1849_s1 + $0x10] sm:$0xf] %v919_v4  ;;  %v925_v5 = vld [vmem:[#allocation0 + $0x28] sm:$0xf] }
  0x98   :  { %1217 = vst [vmem:[%s1849_s1 + $0x14] sm:$0xf] %v925_v5 }
  0x99   :  { %653 = vst.msk [vmem:[#allocation0 + $0xc4] sm:$0xf0] %vm518_vm1, %v648_v18  }
  0x9a   :  { %530 = vst.msk [vmem:[#allocation0 + $0x10] sm:$0xf] %vm518_vm1, %v527_v23  }
  0x9b   :  { %532 = vst.msk [vmem:[#allocation0 + $0x14] sm:$0xf0] %vm518_vm1, %v527_v23  }
  0x9c   :  { %v943_v7 = vld [vmem:[#allocation0 + $0x40] sm:$0xf]  ;;  %v732_v8 = vpop.permute.xlu1 %731   ;;  %552 = vst.msk [vmem:[#allocation0 + $0x30] sm:$0xf] %vm518_vm1, %v549_v26  }
  0x9d   :  { %1220 = vst [vmem:[%s1849_s1 + $0x20] sm:$0xf] %v943_v7  ;;  %v949_v10 = vld [vmem:[#allocation0 + $0x48] sm:$0xf] }
  0x9e   :  { %1221 = vst [vmem:[%s1849_s1 + $0x24] sm:$0xf] %v949_v10 }
  0x9f   :  { %735 = vst.msk [vmem:[#allocation0 + $0x60] sm:$0xf] %vm695_vm2, %v732_v8  }
  0xa0   :  { %737 = vst.msk [vmem:[#allocation0 + $0x64] sm:$0xf0] %vm695_vm2, %v732_v8  }
  0xa1   :  { %554 = vst.msk [vmem:[#allocation0 + $0x34] sm:$0xf0] %vm518_vm1, %v549_v26  }
  0xa2   :  { %673 = vst.msk [vmem:[#allocation0 + $0xe0] sm:$0xf] %vm518_vm1, %v670_v33  }
  0xa3   :  { %675 = vst.msk [vmem:[#allocation0 + $0xe4] sm:$0xf0] %vm518_vm1, %v670_v33  }
  0xa4   :  { %v745_v12 = vpop.permute.xlu2 %744   ;;  %v771_v14 = vpop.permute.xlu0 %770   ;;  %596 = vst.msk [vmem:[#allocation0 + $0x70] sm:$0xf] %vm518_vm1, %v593_v38  }
  0xa5   :  { %748 = vst.msk [vmem:[#allocation0 + $0x80] sm:$0xf] %vm695_vm2, %v745_v12  }
  0xa6   :  { %750 = vst.msk [vmem:[#allocation0 + $0x84] sm:$0xf0] %vm695_vm2, %v745_v12   ;;  %v967_v13 = vld [vmem:[#allocation0 + $0x60] sm:$0xf] }
  0xa7   :  { %1224 = vst [vmem:[%s1849_s1 + $0x30] sm:$0xf] %v967_v13  ;;  %v973_v15 = vld [vmem:[#allocation0 + $0x68] sm:$0xf] }
  0xa8   :  { %1225 = vst [vmem:[%s1849_s1 + $0x34] sm:$0xf] %v973_v15 }
  0xa9   :  { %774 = vst.msk [vmem:[#allocation0 + $0xc0] sm:$0xf] %vm695_vm2, %v771_v14  }
  0xaa   :  { %776 = vst.msk [vmem:[#allocation0 + $0xc4] sm:$0xf0] %vm695_vm2, %v771_v14  }
  0xab   :  { %598 = vst.msk [vmem:[#allocation0 + $0x74] sm:$0xf0] %vm518_vm1, %v593_v38  }
  0xac   :  { %v991_v21 = vld [vmem:[#allocation0 + $0x80] sm:$0xf]  ;;  %v810_v28 = vpop.permute.xlu0 %809   ;;  %618 = vst.msk [vmem:[#allocation0 + $0x90] sm:$0xf] %vm518_vm1, %v615_v48  }
  0xad   :  { %1228 = vst [vmem:[%s1849_s1 + $0x40] sm:$0xf] %v991_v21  ;;  %v997_v22 = vld [vmem:[#allocation0 + $0x88] sm:$0xf] }
  0xae   :  { %1229 = vst [vmem:[%s1849_s1 + $0x44] sm:$0xf] %v997_v22 }
  0xaf   :  { %813 = vst.msk [vmem:[#allocation0 + $0x30] sm:$0xf] %vm695_vm2, %v810_v28  }
  0xb0   :  { %v1039_v31 = vld [vmem:[#allocation0 + $0xc0] sm:$0xf]  ;;  %815 = vst.msk [vmem:[#allocation0 + $0x34] sm:$0xf0] %vm695_vm2, %v810_v28  }
  0xb1   :  { %1236 = vst [vmem:[%s1849_s1 + $0x60] sm:$0xf] %v1039_v31  ;;  %v1045_v32 = vld [vmem:[#allocation0 + $0xc8] sm:$0xf] }
  0xb2   :  { %1237 = vst [vmem:[%s1849_s1 + $0x64] sm:$0xf] %v1045_v32 }
  0xb3   :  { %620 = vst.msk [vmem:[#allocation0 + $0x94] sm:$0xf0] %vm518_vm1, %v615_v48  }
  0xb4   :  { %v784_v29 = vpop.permute.xlu1 %783   ;;  %574 = vst.msk [vmem:[#allocation0 + $0x50] sm:$0xf] %vm518_vm1, %v571_v50  }
  0xb5   :  { %787 = vst.msk [vmem:[#allocation0 + $0xe0] sm:$0xf] %vm695_vm2, %v784_v29  }
  0xb6   :  { %v931_v37 = vld [vmem:[#allocation0 + $0x30] sm:$0xf]  ;;  %789 = vst.msk [vmem:[#allocation0 + $0xe4] sm:$0xf0] %vm695_vm2, %v784_v29  }
  0xb7   :  { %1218 = vst [vmem:[%s1849_s1 + $0x18] sm:$0xf] %v931_v37  ;;  %v937_v39 = vld [vmem:[#allocation0 + $0x38] sm:$0xf] }
  0xb8   :  { %1219 = vst [vmem:[%s1849_s1 + $0x1c] sm:$0xf] %v937_v39 }
  0xb9   :  { %576 = vst.msk [vmem:[#allocation0 + $0x54] sm:$0xf0] %vm518_vm1, %v571_v50  }
  0xba   :  { %662 = vst.msk [vmem:[#allocation0 + $0xd0] sm:$0xf] %vm518_vm1, %v659_v54  }
  0xbb   :  { %664 = vst.msk [vmem:[#allocation0 + $0xd4] sm:$0xf0] %vm518_vm1, %v659_v54  }
  0xbc   :  { %v758_v34 = vpop.permute.xlu2 %757   ;;  %v1063_v47 = vld [vmem:[#allocation0 + $0xe0] sm:$0xf]  ;;  %640 = vst.msk [vmem:[#allocation0 + $0xb0] sm:$0xf] %vm518_vm1, %v637_v63  }
  0xbd   :  { %761 = vst.msk [vmem:[#allocation0 + $0xa0] sm:$0xf] %vm695_vm2, %v758_v34   ;;  %v1069_v49 = vld [vmem:[#allocation0 + $0xe8] sm:$0xf] }
  0xbe   :  { %763 = vst.msk [vmem:[#allocation0 + $0xa4] sm:$0xf0] %vm695_vm2, %v758_v34  }
  0xbf   :  { %1240 = vst [vmem:[%s1849_s1 + $0x70] sm:$0xf] %v1063_v47 }
  0xc0   :  { %1241 = vst [vmem:[%s1849_s1 + $0x74] sm:$0xf] %v1069_v49 }
  0xc1   :  { %642 = vst.msk [vmem:[#allocation0 + $0xb4] sm:$0xf0] %vm518_vm1, %v637_v63  }
  0xc2   :  { %684 = vst.msk [vmem:[#allocation0 + $0xf0] sm:$0xf] %vm518_vm1, %v681_v1  }
  0xc3   :  { %686 = vst.msk [vmem:[#allocation0 + $0xf4] sm:$0xf0] %vm518_vm1, %v681_v1  }
  0xc4   :  { %v1015_v42 = vld [vmem:[#allocation0 + $0xa0] sm:$0xf]  ;;  %v849_v43 = vpop.permute.xlu0 %848  }
  0xc5   :  { %1232 = vst [vmem:[%s1849_s1 + $0x50] sm:$0xf] %v1015_v42  ;;  %v1021_v44 = vld [vmem:[#allocation0 + $0xa8] sm:$0xf] }
  0xc6   :  { %1233 = vst [vmem:[%s1849_s1 + $0x54] sm:$0xf] %v1021_v44 }
  0xc7   :  { %852 = vst.msk [vmem:[#allocation0 + $0x90] sm:$0xf] %vm695_vm2, %v849_v43  }
  0xc8   :  { %854 = vst.msk [vmem:[#allocation0 + $0x94] sm:$0xf0] %vm695_vm2, %v849_v43  }
  0xcc   :  { %v823_v53 = vpop.permute.xlu1 %822  }
  0xcd   :  { %826 = vst.msk [vmem:[#allocation0 + $0x50] sm:$0xf] %vm695_vm2, %v823_v53  }
  0xce   :  { %828 = vst.msk [vmem:[#allocation0 + $0x54] sm:$0xf0] %vm695_vm2, %v823_v53   ;;  %v1003_v57 = vld [vmem:[#allocation0 + $0x90] sm:$0xf] }
  0xcf   :  { %1230 = vst [vmem:[%s1849_s1 + $0x48] sm:$0xf] %v1003_v57  ;;  %v1009_v58 = vld [vmem:[#allocation0 + $0x98] sm:$0xf] }
  0xd0   :  { %1231 = vst [vmem:[%s1849_s1 + $0x4c] sm:$0xf] %v1009_v58 }
  0xd4   :  { %v797_v59 = vpop.permute.xlu2 %796   ;;  %v955_v62 = vld [vmem:[#allocation0 + $0x50] sm:$0xf] }
  0xd5   :  { %800 = vst.msk [vmem:[#allocation0 + $0x10] sm:$0xf] %vm695_vm2, %v797_v59   ;;  %v961_v0 = vld [vmem:[#allocation0 + $0x58] sm:$0xf] }
  0xd6   :  { %802 = vst.msk [vmem:[#allocation0 + $0x14] sm:$0xf0] %vm695_vm2, %v797_v59  }
  0xd7   :  { %1222 = vst [vmem:[%s1849_s1 + $0x28] sm:$0xf] %v955_v62 }
  0xd8   :  { %1223 = vst [vmem:[%s1849_s1 + $0x2c] sm:$0xf] %v961_v0 }
  0xdc   :  { %v907_v2 = vld [vmem:[#allocation0 + $0x10] sm:$0xf]  ;;  %v836_v3 = vpop.permute.xlu2 %835   ;;  %v862_v4 = vpop.permute.xlu1 %861  }
  0xdd   :  { %1214 = vst [vmem:[%s1849_s1 + $0x8] sm:$0xf] %v907_v2  ;;  %v913_v5 = vld [vmem:[#allocation0 + $0x18] sm:$0xf] }
  0xde   :  { %1215 = vst [vmem:[%s1849_s1 + $0xc] sm:$0xf] %v913_v5 }
  0xdf   :  { %839 = vst.msk [vmem:[#allocation0 + $0x70] sm:$0xf] %vm695_vm2, %v836_v3  }
  0xe0   :  { %841 = vst.msk [vmem:[#allocation0 + $0x74] sm:$0xf0] %vm695_vm2, %v836_v3  }
  0xe1   :  { %865 = vst.msk [vmem:[#allocation0 + $0xb0] sm:$0xf] %vm695_vm2, %v862_v4  }
  0xe2   :  { %867 = vst.msk [vmem:[#allocation0 + $0xb4] sm:$0xf0] %vm695_vm2, %v862_v4  }
  0xe4   :  { %v875_v6 = vpop.permute.xlu2 %874   ;;  %v888_v7 = vpop.permute.xlu0 %887  }
  0xe5   :  { %878 = vst.msk [vmem:[#allocation0 + $0xd0] sm:$0xf] %vm695_vm2, %v875_v6  }
  0xe6   :  { %v979_v8 = vld [vmem:[#allocation0 + $0x70] sm:$0xf]  ;;  %880 = vst.msk [vmem:[#allocation0 + $0xd4] sm:$0xf0] %vm695_vm2, %v875_v6  }
  0xe7   :  { %1226 = vst [vmem:[%s1849_s1 + $0x38] sm:$0xf] %v979_v8  ;;  %v985_v9 = vld [vmem:[#allocation0 + $0x78] sm:$0xf] }
  0xe8   :  { %1227 = vst [vmem:[%s1849_s1 + $0x3c] sm:$0xf] %v985_v9  ;;  %v1027_v10 = vld [vmem:[#allocation0 + $0xb0] sm:$0xf] }
  0xe9   :  { %1234 = vst [vmem:[%s1849_s1 + $0x58] sm:$0xf] %v1027_v10  ;;  %v1033_v11 = vld [vmem:[#allocation0 + $0xb8] sm:$0xf] }
  0xea   :  { %1235 = vst [vmem:[%s1849_s1 + $0x5c] sm:$0xf] %v1033_v11 }
  0xeb   :  { %891 = vst.msk [vmem:[#allocation0 + $0xf0] sm:$0xf] %vm695_vm2, %v888_v7  }
  0xec   :  { %v1051_v12 = vld [vmem:[#allocation0 + $0xd0] sm:$0xf]  ;;  %893 = vst.msk [vmem:[#allocation0 + $0xf4] sm:$0xf0] %vm695_vm2, %v888_v7  }
  0xed   :  { %1238 = vst [vmem:[%s1849_s1 + $0x68] sm:$0xf] %v1051_v12  ;;  %v1057_v13 = vld [vmem:[#allocation0 + $0xd8] sm:$0xf] }
  0xee   :  { %1239 = vst [vmem:[%s1849_s1 + $0x6c] sm:$0xf] %v1057_v13 }
  0xf2   :  { %v1075_v14 = vld [vmem:[#allocation0 + $0xf0] sm:$0xf] }
  0xf3   :  { %1242 = vst [vmem:[%s1849_s1 + $0x78] sm:$0xf] %v1075_v14  ;;  %v1081_v15 = vld [vmem:[#allocation0 + $0xf8] sm:$0xf] }
  0xf4   :  { %1243 = vst [vmem:[%s1849_s1 + $0x7c] sm:$0xf] %v1081_v15 }

// kernel: _lambda_.2
= control target key start
LH: loop header
LB: loop body
LE: loop exit
PB: predicated region body
PF: predicated region fallthrough
CT: control target
= control target key end

     0   :  { %s4274_s0 = inlined_call_operand.vmem [shape: f32[2,2,8,128], index: 0, kind: input, shape index: {}, may-alias: {0,14}]   ;;  %s4275_s1 = inlined_call_operand.vmem [shape: f32[1,128], index: 1, kind: input, shape index: {}, may-alias: {1,8}]   ;;  %s4276_s2 = inlined_call_operand.vmem [shape: f32[1,128], index: 2, kind: input, shape index: {}, may-alias: {2,9}]   ;;  %s4277_s3 = inlined_call_operand.hbm [shape: bf16[2,2,128,64], index: 3, kind: input, shape index: {}]   ;;  %s4278_s4 = inlined_call_operand.hbm [shape: bf16[2,2,128,64], index: 4, kind: input, shape index: {}]   ;;  %s4279_s5 = inlined_call_operand.hbm [shape: bf16[2,2,128,64], index: 5, kind: input, shape index: {}]   ;;  %s4280_s6 = inlined_call_operand.hbm [shape: bf16[2,2,64,128], index: 6, kind: input, shape index: {}]   ;;  %s4281_s7 = inlined_call_operand.vmem [shape: f32[2,1,128], index: 7, kind: input, shape index: {}]   ;;  %s4282_s8 = inlined_call_operand.vmem [shape: f32[1,128], index: 8, kind: input, shape index: {}, may-alias: {1,8}]   ;;  %s4283_s9 = inlined_call_operand.vmem [shape: f32[1,128], index: 9, kind: input, shape index: {}, may-alias: {2,9}]   ;;  %s4284_s10 = inlined_call_operand.hbm [shape: bf16[2,128,512], index: 10, kind: input, shape index: {}]   ;;  %s4285_s11 = inlined_call_operand.vmem [shape: f32[2,1,512], index: 11, kind: input, shape index: {}]   ;;  %s4286_s12 = inlined_call_operand.hbm [shape: bf16[2,512,128], index: 12, kind: input, shape index: {}]   ;;  %s4287_s13 = inlined_call_operand.vmem [shape: f32[2,1,128], index: 13, kind: input, shape index: {}]   ;;  %s4288_s14 = inlined_call_operand.vmem [shape: f32[2,2,8,128], index: 14, kind: output, shape index: {}, may-alias: {0,14}]  }
   0x1   :  { %4295 = sst [smem:[#allocation21_spill]] %s4275_s1 }
   0x2   :  { %4296 = sst [smem:[#allocation22_spill]] %s4276_s2 }
   0x3   :  { %4297 = sst [smem:[#allocation23_spill]] %s4277_s3 }
   0x4   :  { %4298 = sst [smem:[#allocation24_spill]] %s4278_s4 }
   0x5   :  { %4299 = sst [smem:[#allocation25_spill]] %s4280_s6 }
   0x6   :  { %4300 = sst [smem:[#allocation26_spill]] %s4281_s7 }
   0x7   :  { %4301 = sst [smem:[#allocation27_spill]] %s4282_s8 }
   0x8   :  { %4302 = sst [smem:[#allocation28_spill]] %s4283_s9 }
   0x9   :  { %4303 = sst [smem:[#allocation29_spill]] %s4285_s11 }
   0xa   :  { %4304 = sst [smem:[#allocation30_spill]] %s4287_s13 }
   0xb   :  { %4305 = sst [smem:[#allocation31_spill]] %s4288_s14 }
   0xc   :  { %19 = vsyncpa [#allocation3], 0 }
   0xd   :  { %21 = vsyncpa [#allocation3 + $0x1], 0 }
   0xe   :  { %22 = vsyncpa [#allocation5], 0 }
   0xf   :  { %24 = vsyncpa [#allocation5 + $0x1], 0 }
  0x10   :  { %25 = vsyncpa [#allocation8], 0 }
  0x11   :  { %27 = vsyncpa [#allocation8 + $0x1], 0 }
  0x12   :  { %28 = vsyncpa [#allocation11], 0 }
  0x13   :  { %30 = vsyncpa [#allocation11 + $0x1], 0  ;;  %s3716_s29 = smov 0   ;;  %s3718_s30 = smov 0  }
  0x14   :  { %s3720_s15 = smov 0   ;;  %s3722_s16 = smov 0  }
  0x15   :  { %s3724_s17 = smov 0   ;;  %s3726_s18 = smov 0  }
  0x16   :  { %s3728_s19 = smov 0   ;;  %s3730_s20 = smov 0  }
  0x17 LB: > { %4306 = sst [smem:[#allocation16_spill]] %s3614_s15  ;;  %s4289_s21 = sadd.s32 4294967295, %s3634_s20   ;;  %s3634_s20 = sphi %s3730_s20, %s36_s20   ;;  %s3630_s19 = sphi %s3728_s19, %s4335_s19   ;;  %s3626_s18 = sphi %s3726_s18, %s4330_s18   ;;  %s3622_s17 = sphi %s3724_s17, %s4334_s17   ;;  %s3618_s16 = sphi %s3722_s16, %s4329_s16   ;;  %s3614_s15 = sphi %s3720_s15, %s4328_s15   ;;  %s3610_s30 = sphi %s3718_s30, %s4333_s30   ;;  %s3606_s29 = sphi %s3716_s29, %s4332_s29  }
  0x18   : > { %4307 = sst [smem:[#allocation17_spill]] %s3626_s18  ;;  %s45_s22 = sadd.s32 1, %s3626_s18 }
  0x19   : > { %p46_p0 = scmp.ge.s32.totalorder %s45_s22, 2  ;;  %s48_s23 = sadd.s32 1, %s3630_s19 }
  0x1a   : > { %s125_s24 = sadd.s32 1, %s3614_s15  ;;  %p132_p1 = scmp.ne.s32.totalorder %s3614_s15, %s3610_s30 }
  0x1b   : > { %s4337_s22 = smov (%p46_p0, %s45_s22), 0  ;;  %s4339_s23 = smov (!%p46_p0, %s48_s23), %s3630_s19 }
  0x1c   : > { %4308 = sst [smem:[#allocation18_spill]] %s4337_s22  ;;  %p133_p2 = scmp.eq.s32.totalorder %s3634_s20, 0 }
  0x1d   : > { %p138_p3 = scmp.ne.s32.totalorder %s3610_s30, %s3606_s29  ;;  %p50_p4 = scmp.ge.s32.totalorder %s4339_s23, 2 }
  0x1e   : > { %p139_p5 = scmp.eq.s32.totalorder %s4289_s21, 0  ;;  %p134_p6 = por %p133_p2, %p132_p1 }
  0x1f   : > { %s4341_s23 = smov (%p50_p4, %s4339_s23), 0  ;;  %p3278_p8 = scmp.lt.s32.totalorder %s3634_s20, 4 }
  0x20   : > { %4309 = sst [smem:[#allocation19_spill]] %s4341_s23  ;;  %p3769_p7 = por %p139_p5, %p138_p3 }
  0x21   : > { %s122_s26 = ssub.s32 %s3630_s19, %s4341_s23  ;;  %s3777_s27 = sand.u32 1, %s3614_s15  }
  0x22   : > { %p123_p9 = scmp.eq.s32.totalorder %s122_s26, 0  ;;  %s3780_s28 = sshll.u32 %s3777_s27, 7 }
  0x23   : > { %s3783_s29 = sshll.u32 %s3630_s19, 7  ;;  %p3785_p10 = pnand %p3278_p8, %p134_p6 }
  0x24   : > { %s3790_s22 = scalar_select %p123_p9, %s3614_s15, %s125_s24  }
  0x25   : > { %s485_s23 = sand.u32 1, %s3634_s20   ;;  %s4313_s4 = sld [smem:[#allocation24_spill]] }
  0x26   : > { %4312 = sst [smem:[#allocation20_spill]] %s3790_s22  ;;  %s489_s11 = scalar_lea.vmem [#allocation4], %s3780_s28 }
  0x27   : > { %s497_s13 = sshll.u32 %s489_s11, 4  ;;  %p2561_p11 = scmp.ge.s32.totalorder %s3634_s20, 1  ;;  %s498_s13 = int_to_ptr.vmem [resolvable:$true] %s497_s13 }
  0x28   : > { %s3799_s8 = scalar_lea.sflag [#allocation5], %s485_s23  ;;  %s4294_s7 = smov 64  }
  0x29   : > { %s3637_s2 = smov 4   ;;  %p612_p12 = scmp.lt.s32.totalorder %s3634_s20, 5 }
  0x2a   : > { %s2552_s14 = sshll.u32 %s3777_s27, 6  ;;  %s3124_s11 = sshll.u32 %s3630_s19, 6 }
  0x2b   : > { %s494_s26 = scalar_lea.hbm %s4313_s4, %s3783_s29  ;;  %p3810_p13 = pnand %p2561_p11, %p612_p12 }
  0x2c   : > { %s495_s9 = sshll.u32 %s494_s26, 4  ;;  %s4315_s6 = sld [smem:[#allocation25_spill]]  ;;  %s496_s9 = int_to_ptr.hbm [resolvable:$true] %s495_s9 }
  0x2d   : > { %3265 = dma.hbm_to_vmem [thread:$0]  (!%p3785_p10), %s496_s9, 2048, %s498_s13, %s3799_s8, %s4294_s7, %s4294_s7, %s3637_s2  }
  0x2e   : > { %s533_s22 = scalar_lea.vmem [#allocation7], %s2552_s14  ;;  %s3817_s9 = scalar_lea.sflag [#allocation8], %s485_s23 }
  0x2f   : > { %s541_s15 = sshll.u32 %s533_s22, 4  ;;  %s4316_s3 = sld [smem:[#allocation23_spill]]  ;;  %s542_s15 = int_to_ptr.vmem [resolvable:$true] %s541_s15 }
  0x30   : > { %s464_s23 = scalar_lea.sflag [#allocation3], %s3777_s27  ;;  %s511_s13 = scalar_lea.vmem [#allocation6], %s3780_s28 }
  0x31   : > { %s519_s24 = sshll.u32 %s511_s13, 4  ;;  %s3639_s26 = smov 16   ;;  %s520_s24 = int_to_ptr.vmem [resolvable:$true] %s519_s24 }
  0x32   : > { %s538_s4 = scalar_lea.hbm %s4315_s6, %s3124_s11 }
  0x33   : > { %s539_s1 = sshll.u32 %s538_s4, 4  ;;  %s467_s4 = scalar_lea.vmem [#allocation2], %s3780_s28  ;;  %s540_s1 = int_to_ptr.hbm [resolvable:$true] %s539_s1 }
  0x34   : > { %3271 = dma.hbm_to_vmem [thread:$0]  (!%p3785_p10), %s540_s1, 1024, %s542_s15, %s3817_s9, %s4294_s7, %s4294_s7, %s3637_s2  }
  0x35   : > { %s472_s14 = scalar_lea.hbm %s4316_s3, %s3783_s29  ;;  %s475_s11 = sshll.u32 %s467_s4, 4  ;;  %s476_s11 = int_to_ptr.vmem [resolvable:$true] %s475_s11 }
  0x36   : > { %s473_s22 = sshll.u32 %s472_s14, 4  ;;  %s516_s1 = scalar_lea.hbm %s4279_s5, %s3783_s29  ;;  %s474_s22 = int_to_ptr.hbm [resolvable:$true] %s473_s22 }
  0x37   : > { %3262 = dma.hbm_to_vmem [thread:$0]  (!%p3785_p10), %s474_s22, 2048, %s476_s11, %s464_s23, %s4294_s7, %s4294_s7, %s3637_s2  }
  0x38   : > { %s517_s15 = sshll.u32 %s516_s1, 4  ;;  %s2555_s14 = sshll.u32 %s3777_s27, 8  ;;  %s518_s15 = int_to_ptr.hbm [resolvable:$true] %s517_s15 }
  0x39   : > { %3268 = dma.hbm_to_vmem [thread:$0]  (!%p3785_p10), %s518_s15, 2048, %s520_s24, %s3799_s8, %s4294_s7, %s4294_s7, %s3637_s2  }
  0x3a   : > { %s3125_s4 = sshll.u32 %s3630_s19, 8  ;;  %s561_s11 = scalar_lea.vmem [#allocation9], %s2555_s14 }
  0x3b   : > { %s566_s6 = scalar_lea.hbm %s4284_s10, %s3125_s4  ;;  %s569_s23 = sshll.u32 %s561_s11, 4  ;;  %s570_s23 = int_to_ptr.vmem [resolvable:$true] %s569_s23 }
  0x3c   : > { %s567_s29 = sshll.u32 %s566_s6, 4  ;;  %s3638_s28 = smov 256   ;;  %s568_s29 = int_to_ptr.hbm [resolvable:$true] %s567_s29 }
  0x3d   : > { %3274 = dma.hbm_to_vmem [thread:$0]  (!%p3785_p10), %s568_s29, 4096, %s570_s23, %s3817_s9, %s3638_s28, %s3638_s28, %s3639_s26  }
  0x3e   : > { %s595_s8 = scalar_lea.hbm %s4286_s12, %s3125_s4  ;;  %s590_s15 = scalar_lea.vmem [#allocation10], %s2555_s14 }
  0x3f   : > { %s598_s24 = sshll.u32 %s590_s15, 4  ;;  %s596_s7 = sshll.u32 %s595_s8, 4  ;;  %s599_s24 = int_to_ptr.vmem [resolvable:$true] %s598_s24  ;;  %s597_s7 = int_to_ptr.hbm [resolvable:$true] %s596_s7 }
  0x40   : > { %s587_s3 = scalar_lea.sflag [#allocation11], %s3777_s27  ;;  %s4317_s22 = smov 64  }
  0x41   : > { %3277 = dma.hbm_to_vmem [thread:$0]  (!%p3785_p10), %s597_s7, 4096, %s599_s24, %s587_s3, %s4317_s22, %s4317_s22, %s3637_s2  }
  0x42   : > { %616 = sbr.rel (%p3810_p13) target bundleno = 2294 (0x8f6), region = 76  ;;  %s618_s9 = sand.u32 (!%p3810_p13), 1, %s3610_s30  }
  0x43   : > { %s2562_s6 = sshll.u32 (!%p3810_p13), %s618_s9, 7  ;;  %s619_s29 = scalar_lea.sflag (!%p3810_p13), [#allocation3], %s618_s9 }
  0x44   : > { %s3867_s4 = scalar_lea.vmem (!%p3810_p13), [#allocation2], %s2562_s6 }
  0x47   : > { %3589 = dma.done.wait (%p3769_p7), %s619_s29, 2048  }
  0x48   : > { %3591 = vsyncadd (%p3769_p7), %s619_s29, 4294965248  ;;  %s4318_s21 = sadd.s32 4294967295, %s3634_s20   ;;  %s3875_s7 = scalar_lea.vmem [#allocation4], %s2562_s6 }
  0x49   : > { %s628_s27 = sand.u32 1, %s4318_s21  }
  0x4a   : > { %s629_s2 = scalar_lea.sflag [#allocation5], %s628_s27 }
  0x4b   : > { %3593 = dma.done.wait (%p3769_p7), %s629_s2, 4096  }
  0x4c   : > { %3595 = vsyncadd (%p3769_p7), %s629_s2, 4294963200  ;;  %s2565_s18 = sshll.u32 %s618_s9, 6  ;;  %s3881_s14 = scalar_lea.vmem [#allocation6], %s2562_s6 }
  0x4d   : > { %s649_s11 = scalar_lea.sflag [#allocation8], %s628_s27  ;;  %s3883_s23 = scalar_lea.vmem [#allocation7], %s2565_s18 }
  0x4e   : > { %3597 = dma.done.wait (%p3769_p7), %s649_s11, 5120  }
  0x4f   : > { %3599 = vsyncadd (%p3769_p7), %s649_s11, 4294962176  ;;  %s2566_s28 = sshll.u32 %s618_s9, 8  ;;  %s669_s1 = scalar_lea.sflag [#allocation11], %s618_s9 }
  0x50   : > { %s3889_s26 = scalar_lea.vmem [#allocation9], %s2566_s28  ;;  %s3891_s13 = scalar_lea.vmem [#allocation10], %s2566_s28 }
  0x51   : > { %3601 = dma.done.wait (%p3769_p7), %s669_s1, 4096  }
  0x52   : > { %3603 = vsyncadd (%p3769_p7), %s669_s1, 4294963200  ;;  %p764_p0 = scmp.lt.s32.totalorder %s3622_s17, 1  ;;  %p766_p1 = scmp.lt.s32.totalorder %s3618_s16, 1  ;;  %v3640_v1 = vmov 128.0   ;;  %v3134_v2 = vld [vmem:[%s3867_s4 + $0x38] sm:$0xff]  ;;  %v3133_v4 = vld [vmem:[%s3867_s4 + $0x30] sm:$0xff] }
  0x53   : > { %3354 = vrcp.f32 %v3640_v1  ;;  %v3142_v3 = vld [vmem:[%s3875_s7 + $0x38] sm:$0xff]  ;;  %895 = vmatpush.bf16.msra.mxu0 %v3134_v2  ;;  %v3141_v5 = vld [vmem:[%s3875_s7 + $0x30] sm:$0xff]  ;;  %v3132_v8 = vld [vmem:[%s3867_s4 + $0x28] sm:$0xff]  ;;  %s4319_s6 = sld [smem:[#allocation21_spill]]  ;;  %vm1064_vm4 = vcmask 523264   ;;  %vm1102_vm5 = vcmask 1043456  }
  0x54   : > { %s4343_s17 = smov (!%p764_p0, %s3622_s17), 1  ;;  %s4345_s16 = smov (!%p766_p1, %s3618_s16), 1  ;;  %972 = vmatpush.bf16.msra.mxu1 %v3142_v3  ;;  %v3150_v6 = vld [vmem:[%s3881_s14 + $0x38] sm:$0xff]  ;;  %v3140_v9 = vld [vmem:[%s3875_s7 + $0x28] sm:$0xff]  ;;  %v3131_v11 = vld [vmem:[%s3867_s4 + $0x20] sm:$0xff]  ;;  %vm1085_vm6 = vcmask 64512  }
  0x55   : > { %s2568_s8 = sshll.u32 %s4343_s17, 1  ;;  %1049 = vmatpush.bf16.msra.mxu2 %v3150_v6  ;;  %v3139_v12 = vld [vmem:[%s3875_s7 + $0x20] sm:$0xff]  ;;  %v3130_v21 = vld [vmem:[%s3867_s4 + $0x18] sm:$0xff]  ;;  %v3149_v23 = vld [vmem:[%s3881_s14 + $0x30] sm:$0xff]  ;;  %s4320_s27 = sld [smem:[#allocation22_spill]] }
  0x56   : > { %s3904_s15 = sadd.s32 %s2568_s8, %s4345_s16  ;;  %v3138_v22 = vld [vmem:[%s3875_s7 + $0x18] sm:$0xff]  ;;  %v3129_v24 = vld [vmem:[%s3867_s4 + $0x10] sm:$0xff]  ;;  %v3148_v26 = vld [vmem:[%s3881_s14 + $0x28] sm:$0xff]  ;;  %s4323_s1 = sld [smem:[#allocation28_spill]] }
  0x57   : > { %s2569_s25 = sshll.u32 %s3904_s15, 3  ;;  %896 = vmatpush.bf16.msra.mxu0 %v3133_v4  ;;  %v3137_v25 = vld [vmem:[%s3875_s7 + $0x10] sm:$0xff]  ;;  %v3128_v27 = vld [vmem:[%s3867_s4 + $0x8] sm:$0xff]  ;;  %v3147_v29 = vld [vmem:[%s3881_s14 + $0x20] sm:$0xff]  ;;  %s4324_s3 = sld [smem:[#allocation30_spill]] }
  0x58   : > { %s771_s22 = scalar_lea.vmem %s4274_s0, %s2569_s25  ;;  %973 = vmatpush.bf16.msra.mxu1 %v3141_v5  ;;  %v3136_v28 = vld [vmem:[%s3875_s7 + $0x8] sm:$0xff]  ;;  %v3127_v30 = vld [vmem:[%s3867_s4] sm:$0xff]  ;;  %v3146_v32 = vld [vmem:[%s3881_s14 + $0x18] sm:$0xff]  ;;  %s2570_s16 = sshll.u32 %s4343_s17, 2 }
  0x59   : > { %v3912_v0 = vld [vmem:[%s771_s22] sm:$0xff]  ;;  %v3355_v7 = vpop.eup %3354  ;;  %1050 = vmatpush.bf16.msra.mxu2 %v3149_v23  ;;  %v3170_v33 = vld [vmem:[%s3875_s7 + $0x78] sm:$0xff]  ;;  %v3145_v35 = vld [vmem:[%s3881_s14 + $0x10] sm:$0xff]  ;;  %s4325_s29 = sld [smem:[#allocation29_spill]] }
  0x5a   : > { %794 = vadd.xlane.f32.xlu0 %v3912_v0  ;;  %v797_v10 = vmul.f32 128.0, %v3355_v7  ;;  %vm801_vm0 = vweird.f32 %v3355_v7  ;;  %v3135_v31 = vld [vmem:[%s3875_s7] sm:$0xff]  ;;  %v3178_v34 = vld [vmem:[%s3881_s14 + $0x78] sm:$0xff]  ;;  %v3169_v36 = vld [vmem:[%s3875_s7 + $0x70] sm:$0xff] }
  0x5b   : > { %897 = vmatpush.bf16.msra.mxu0 %v3132_v8  ;;  %v3177_v37 = vld [vmem:[%s3881_s14 + $0x70] sm:$0xff]  ;;  %v3144_v38 = vld [vmem:[%s3881_s14 + $0x8] sm:$0xff]  ;;  %v3143_v41 = vld [vmem:[%s3881_s14] sm:$0xff] }
  0x5c   : > { %974 = vmatpush.bf16.msra.mxu1 %v3140_v9  ;;  %v798_v13 = vsub.f32 1.0, %v797_v10  ;;  %v3168_v39 = vld [vmem:[%s3875_s7 + $0x68] sm:$0xff]  ;;  %v3167_v42 = vld [vmem:[%s3875_s7 + $0x60] sm:$0xff]  ;;  %v3166_v44 = vld [vmem:[%s3875_s7 + $0x58] sm:$0xff] }
  0x5d   : > { %1051 = vmatpush.bf16.msra.mxu2 %v3148_v26  ;;  %v3176_v40 = vld [vmem:[%s3881_s14 + $0x68] sm:$0xff]  ;;  %v3175_v43 = vld [vmem:[%s3881_s14 + $0x60] sm:$0xff]  ;;  %v3174_v45 = vld [vmem:[%s3881_s14 + $0x58] sm:$0xff]  ;;  %s781_s22 = scalar_lea.vmem %s4324_s3, %s4343_s17 }
  0x5e   : > { %v799_v14 = vmul.f32 %v3355_v7, %v798_v13  ;;  %v3165_v48 = vld [vmem:[%s3875_s7 + $0x50] sm:$0xff]  ;;  %v3164_v51 = vld [vmem:[%s3875_s7 + $0x48] sm:$0xff]  ;;  %v3163_v53 = vld [vmem:[%s3875_s7 + $0x40] sm:$0xff]  ;;  %s4321_s7 = sld [smem:[#allocation26_spill]] }
  0x5f   : > { %898 = vmatpush.bf16.msra.mxu0 %v3131_v11  ;;  %v3173_v49 = vld [vmem:[%s3881_s14 + $0x50] sm:$0xff]  ;;  %v3172_v52 = vld [vmem:[%s3881_s14 + $0x48] sm:$0xff]  ;;  %v3171_v54 = vld [vmem:[%s3881_s14 + $0x40] sm:$0xff]  ;;  %s778_s21 = scalar_lea.vmem %s4325_s29, %s2570_s16 }
  0x60   : > { %975 = vmatpush.bf16.msra.mxu1 %v3139_v12  ;;  %v800_v15 = vadd.f32 %v3355_v7, %v799_v14  ;;  %v3348_v61 = vld [vmem:[%s4319_s6] ss:$0 sm:$0xff] }
  0x61   : > { %1052 = vmatpush.bf16.msra.mxu2 %v3147_v29  ;;  %v3349_v63 = vld [vmem:[%s4320_s27] ss:$0 sm:$0xff]  ;;  %v3162_v29 = vld [vmem:[%s3867_s4 + $0x78] sm:$0xff] }
  0x62   : > { %v3924_v16 = vsel %vm801_vm0, %v3355_v7, %v800_v15 }
  0x63   : > { %899 = vmatpush.bf16.msra.mxu0 %v3130_v21 }
  0x64   : > { %976 = vmatpush.bf16.msra.mxu1 %v3138_v22  ;;  %s774_s18 = scalar_lea.vmem %s4321_s7, %s4343_s17  ;;  %s4326_s7 = sld [smem:[#allocation31_spill]] }
  0x65   : > { %1053 = vmatpush.bf16.msra.mxu2 %v3146_v32 }
  0x67   : > { %900 = vmatpush.bf16.msra.mxu0 %v3129_v24 }
  0x68   : > { %977 = vmatpush.bf16.msra.mxu1 %v3137_v25 }
  0x69   : > { %1054 = vmatpush.bf16.msra.mxu2 %v3145_v35  ;;  %v3161_v35 = vld [vmem:[%s3867_s4 + $0x70] sm:$0xff] }
  0x6b   : > { %901 = vmatpush.bf16.msra.mxu0 %v3128_v27 }
  0x6c   : > { %978 = vmatpush.bf16.msra.mxu1 %v3136_v28 }
  0x6d   : > { %1055 = vmatpush.bf16.msra.mxu2 %v3144_v38  ;;  %v3158_v38 = vld [vmem:[%s3867_s4 + $0x58] sm:$0xff] }
  0x6f   : > { %902 = vmatpush.bf16.msra.mxu0 %v3127_v30 }
  0x70   : > { %979 = vmatpush.bf16.msra.mxu1 %v3135_v31 }
  0x71   : > { %1056 = vmatpush.bf16.msra.mxu2 %v3143_v41  ;;  %v3155_v41 = vld [vmem:[%s3867_s4 + $0x40] sm:$0xff] }
  0x73   : > { %1271 = vmatpush.bf16.msrb.mxu0 %v3170_v33 }
  0x74   : > { %1349 = vmatpush.bf16.msrb.mxu1 %v3178_v34 }
  0x77   : > { %1272 = vmatpush.bf16.msrb.mxu0 %v3169_v36  ;;  %v3160_v36 = vld [vmem:[%s3867_s4 + $0x68] sm:$0xff] }
  0x78   : > { %1350 = vmatpush.bf16.msrb.mxu1 %v3177_v37  ;;  %v3159_v37 = vld [vmem:[%s3867_s4 + $0x60] sm:$0xff] }
  0x7b   : > { %1273 = vmatpush.bf16.msrb.mxu0 %v3168_v39  ;;  %v3157_v39 = vld [vmem:[%s3867_s4 + $0x50] sm:$0xff] }
  0x7c   : > { %1351 = vmatpush.bf16.msrb.mxu1 %v3176_v40  ;;  %v3156_v40 = vld [vmem:[%s3867_s4 + $0x48] sm:$0xff] }
  0x7f   : > { %1274 = vmatpush.bf16.msrb.mxu0 %v3167_v42  ;;  %v3154_v42 = vld [vmem:[%s3883_s23 + $0x18] sm:$0xff] }
  0x80   : > { %1352 = vmatpush.bf16.msrb.mxu1 %v3175_v43  ;;  %v3153_v43 = vld [vmem:[%s3883_s23 + $0x10] sm:$0xff] }
  0x83   : > { %1275 = vmatpush.bf16.msrb.mxu0 %v3166_v44 }
  0x84   : > { %1353 = vmatpush.bf16.msrb.mxu1 %v3174_v45  ;;  %v3152_v45 = vld [vmem:[%s3883_s23 + $0x8] sm:$0xff] }
  0x87   : > { %1276 = vmatpush.bf16.msrb.mxu0 %v3165_v48 }
  0x88   : > { %1354 = vmatpush.bf16.msrb.mxu1 %v3173_v49  ;;  %v3151_v49 = vld [vmem:[%s3883_s23] sm:$0xff] }
  0x8b   : > { %1277 = vmatpush.bf16.msrb.mxu0 %v3164_v51 }
  0x8c   : > { %1355 = vmatpush.bf16.msrb.mxu1 %v3172_v52 }
  0x8f   : > { %1278 = vmatpush.bf16.msrb.mxu0 %v3163_v53 }
  0x90   : > { %1356 = vmatpush.bf16.msrb.mxu1 %v3171_v54 }
  0xcd   : > { %v795_v17 = vpop.xlane.xlu0 %794 }
  0xce   : > { %v803_v18 = vmul.f32 %v3924_v16, %v795_v17 }
  0xd0   : > { %v3928_v19 = vsub.f32 %v3912_v0, %v803_v18 }
  0xd2   : > { %v805_v20 = vmul.f32 %v3928_v19, %v3928_v19 }
  0xd4   : > { %806 = vadd.xlane.f32.xlu0 %v805_v20 }
 0x147   : > { %v807_v46 = vpop.xlane.xlu0 %806 }
 0x148   : > { %v808_v47 = vmul.f32 %v807_v46, %v3924_v16 }
 0x14a   : > { %v809_v50 = vadd.f32 1e-05, %v808_v47 }
 0x14c   : > { %3356 = vrsqrt.f32 %v809_v50  ;;  %vm816_vm2 = vweird.f32 %v809_v50 }
 0x152   : > { %v3357_v55 = vpop.eup %3356 }
 0x153   : > { %v811_v56 = vmul.f32 %v3357_v55, %v809_v50  ;;  %vm817_vm1 = vweird.f32 %v3357_v55 }
 0x154   : > { %vm818_vm3 = vmor %vm816_vm2, %vm817_vm1 }
 0x155   : > { %v812_v57 = vmul.f32 %v3357_v55, %v811_v56 }
 0x157   : > { %v813_v58 = vmul.f32 0.5, %v812_v57 }
 0x159   : > { %v814_v59 = vsub.f32 1.5, %v813_v58 }
 0x15b   : > { %v815_v60 = vmul.f32 %v3357_v55, %v814_v59 }
 0x15d   : > { %v819_v62 = vsel %vm818_vm3, %v3357_v55, %v815_v60 }
 0x15e   : > { %v820_v1 = vmul.f32 %v819_v62, %v3928_v19 }
 0x160   : > { %v824_v2 = vmul.f32 %v3348_v61, %v820_v1 }
 0x162   : > { %v828_v3 = vadd.f32 %v3349_v63, %v824_v2 }
 0x164   : > { %v3971_v4 = vpack.c.bf16 %v828_v3, %v828_v3 }
 0x166   : > { %903 = vmatmul.bf16.vlgmr.msra.gmra.mxu0 %v3971_v4  ;;  %980 = vmatmul.bf16.vlgmr.msra.gmra.mxu1 %v3971_v4 }
 0x167   : > { %1057 = vmatmul.bf16.vlgmr.msra.gmra.mxu2 %v3971_v4  ;;  %1497 = vmatpush.bf16.msra.mxu0 %v3154_v42  ;;  %v2965_v42 = vld [vmem:[%s3889_s26 + $0xc8] sm:$0xf] }
 0x16b   : > { %1498 = vmatpush.bf16.msra.mxu0 %v3153_v43  ;;  %v3210_v43 = vld [vmem:[%s3889_s26 + $0xd4] sm:$0xf0] }
 0x16f   : > { %1499 = vmatpush.bf16.msra.mxu0 %v3152_v45  ;;  %v2966_v45 = vor.u32 %v3210_v43, %v2965_v42  ;;  %v3190_v42 = vld [vmem:[%s3889_s26 + $0x34] sm:$0xf0] }
 0x173   : > { %1500 = vmatpush.bf16.msra.mxu0 %v3151_v49  ;;  %v2941_v49 = vld [vmem:[%s3889_s26 + $0xa0] sm:$0xf] }
 0x176   : > { %1279 = vmatmul.bf16.vlgmr.msrb.gmra.mxu0 %v3971_v4  ;;  %1357 = vmatmul.bf16.vlgmr.msrb.gmra.mxu1 %v3971_v4 }
 0x1e3   : > { %v904_v5 = vpop.f32.mrf.mxu0  ;;  %v981_v6 = vpop.f32.mrf.mxu1 }
 0x1e4   : > { %v1063_v7 = vpack.c.bf16 %v981_v6, %v981_v6  ;;  %v1062_v13 = vpack.c.bf16 %v904_v5, %v904_v5  ;;  %v3181_v5 = vld [vmem:[%s3883_s23 + $0x30] sm:$0xff]  ;;  %v3180_v6 = vld [vmem:[%s3883_s23 + $0x28] sm:$0xff] }
 0x1e6   : > { %v1069_v8 = vsel %vm1064_vm4, %v1063_v7, 0  ;;  %v3179_v7 = vld [vmem:[%s3883_s23 + $0x20] sm:$0xff] }
 0x1e7   : > { %1078 = vmatpush.bf16.xpose.msra.mxu3 %v1069_v8 }
 0x1ea   : > { %v1058_v9 = vpop.f32.mrf.mxu2 }
 0x1eb   : > { %v1098_v10 = vpack.c.bf16 %v1058_v9, %v1058_v9  ;;  %v906_v11 = vpop.f32.mrf.mxu0  ;;  %v983_v12 = vpop.f32.mrf.mxu1 }
 0x1ed   : > { %v1104_v14 = vsel %vm1102_vm5, %v1098_v10, 0 }
 0x1ee   : > { %2669 = vmatmul.msk.bf16.vlgmr.msra.gmra.mxu3 %vm1064_vm4, %v1062_v13 }
 0x1ef   : > { %1113 = vmatpush.bf16.msrb.mxu3 %v1104_v14 }
 0x1f2   : > { %v1060_v15 = vpop.f32.mrf.mxu2 }
 0x1f3   : > { %v1280_v17 = vpop.f32.mrf.mxu0  ;;  %v1358_v18 = vpop.f32.mrf.mxu1  ;;  %1193 = vmatpush.bf16.msra.mxu3 %v3162_v29  ;;  %v3350_v15 = vld [vmem:[%s774_s18] ss:$0 sm:$0xff]  ;;  %s789_s18 = scalar_lea.vmem %s4326_s7, %s2569_s25 }
 0x1f4   : > { %v1363_v19 = vpack.c.bf16 %v1280_v17, %v1280_v17  ;;  %v1396_v20 = vpack.c.bf16 %v1358_v18, %v1358_v18 }
 0x1f6   : > { %v1401_v21 = vsel %vm1102_vm5, %v1396_v20, 0  ;;  %v1368_v22 = vsel %vm1064_vm4, %v1363_v19, 0 }
 0x1f7   : > { %1377 = vmatpush.bf16.xpose.msrb.mxu2 %v1368_v22  ;;  %1194 = vmatpush.bf16.msra.mxu3 %v3161_v35  ;;  %v2973_v22 = vld [vmem:[%s3889_s26 + $0xe0] sm:$0xf] }
 0x1fb   : > { %v1282_v23 = vpop.f32.mrf.mxu0  ;;  %v1360_v24 = vpop.f32.mrf.mxu1  ;;  %1195 = vmatpush.bf16.msra.mxu3 %v3160_v36 }
 0x1fc   : > { %v3213_v23 = vld [vmem:[%s3889_s26 + $0xec] sm:$0xf0]  ;;  %v3211_v24 = vld [vmem:[%s3889_s26 + $0xe4] sm:$0xf] }
 0x1ff   : > { %1410 = vmatpush.bf16.msra.mxu2 %v1401_v21  ;;  %1196 = vmatpush.bf16.msra.mxu3 %v3159_v37  ;;  %v2957_v37 = vld [vmem:[%s3889_s26 + $0xc0] sm:$0xf] }
 0x203   : > { %1197 = vmatpush.bf16.msra.mxu3 %v3158_v38  ;;  %v3209_v38 = vld [vmem:[%s3889_s26 + $0xcc] sm:$0xf0] }
 0x207   : > { %1198 = vmatpush.bf16.msra.mxu3 %v3157_v39  ;;  %v3207_v39 = vld [vmem:[%s3889_s26 + $0xc4] sm:$0xf] }
 0x20b   : > { %1199 = vmatpush.bf16.msra.mxu3 %v3156_v40  ;;  %v2958_v40 = vor.u32 %v3209_v38, %v2957_v37  ;;  %v3189_v37 = vld [vmem:[%s3889_s26 + $0x2c] sm:$0xf0]  ;;  %v3187_v38 = vld [vmem:[%s3889_s26 + $0x24] sm:$0xf] }
 0x20f   : > { %1200 = vmatpush.bf16.msra.mxu3 %v3155_v41  ;;  %v2959_v41 = vld [vmem:[%s3889_s26 + $0xd0] sm:$0xf0] }
 0x271   : > { %v1080_v25 = vpop.f32.mrf.mxu3 }
 0x272   : > { %v1084_v26 = vmul.f32 0.125, %v1080_v25  ;;  %v2974_v25 = vor.u32 %v3213_v23, %v2973_v22  ;;  %v2919_v22 = vld [vmem:[%s3889_s26 + $0x78] sm:$0xf0] }
 0x274   : > { %v1086_v27 = vsel %vm1085_vm6, %v1084_v26, -inf  ;;  %1744 = vmatpush.bf16.msra.mxu1 %v2974_v25  ;;  %v3193_v25 = vld [vmem:[%s3889_s26 + $0x4c] sm:$0xf0] }
 0x275   : > { %1087 = vmax.xlane.f32.xlu1 %v1086_v27  ;;  %v2981_v27 = vld [vmem:[%s3889_s26 + $0xe8] sm:$0xf] }
 0x278   : > { %1745 = vmatpush.bf16.msra.mxu1 %v2958_v40  ;;  %v2879_v40 = vld [vmem:[%s3889_s26 + $0x30] sm:$0xf0] }
 0x279   : > { %v1082_v28 = vpop.f32.mrf.mxu3  ;;  %v2882_v43 = vor.u32 %v3187_v38, %v2879_v40 }
 0x27a   : > { %v3214_v28 = vld [vmem:[%s3889_s26 + $0xf4] sm:$0xf0] }
 0x2e8   : > { %v1088_v30 = vpop.xlane.xlu1 %1087 }
 0x2e9   : > { %v1089_v31 = vsub.f32 %v1084_v26, %v1088_v30  ;;  %v2975_v26 = vld [vmem:[%s3889_s26 + $0xf0] sm:$0xf0]  ;;  %v2982_v30 = vor.u32 %v3214_v28, %v2981_v27 }
 0x2ea   : > { %v2978_v29 = vor.u32 %v3211_v24, %v2975_v26  ;;  %v2893_v24 = vld [vmem:[%s3889_s26 + $0x40] sm:$0xf]  ;;  %v3191_v26 = vld [vmem:[%s3889_s26 + $0x44] sm:$0xf]  ;;  %v2895_v28 = vld [vmem:[%s3889_s26 + $0x50] sm:$0xf0] }
 0x2eb   : > { %v1090_v32 = vmul.f32 1.442695, %v1089_v31  ;;  %v3212_v31 = vld [vmem:[%s3889_s26 + $0xec] sm:$0xf]  ;;  %v2894_v27 = vor.u32 %v3193_v25, %v2893_v24  ;;  %v3222_v24 = vld [vmem:[%s3891_s13 + $0x38] sm:$0xff] }
 0x2ec   : > { %v3246_v25 = vld [vmem:[%s3891_s13 + $0xf8] sm:$0xff] }
 0x2ed   : > { %3358 = vpow2.f32 %v1090_v32  ;;  %v2983_v32 = vld [vmem:[%s3889_s26 + $0xf8] sm:$0xf0] }
 0x2f3   : > { %v3359_v33 = vpop.eup %3358 }
 0x2f4   : > { %v1092_v34 = vsel %vm1085_vm6, %v3359_v33, 0.0 }
 0x2f5   : > { %1093 = vadd.xlane.f32.xlu1 %v1092_v34 }
 0x368   : > { %v1094_v44 = vpop.xlane.xlu1 %1093 }
 0x369   : > { %3360 = vrcp.f32 %v1094_v44  ;;  %v2962_v44 = vor.u32 %v3207_v39, %v2959_v41  ;;  %v2885_v41 = vld [vmem:[%s3889_s26 + $0x28] sm:$0xf] }
 0x36f   : > { %v3361_v46 = vpop.eup %3360 }
 0x370   : > { %v1096_v47 = vmul.f32 %v3361_v46, %v3359_v33  ;;  %v3208_v46 = vld [vmem:[%s3889_s26 + $0xcc] sm:$0xf] }
 0x372   : > { %v1097_v48 = vpack.c.bf16 %v1096_v47, %v1096_v47  ;;  %v2967_v47 = vld [vmem:[%s3889_s26 + $0xd8] sm:$0xf0] }
 0x374   : > { %2670 = vmatmul.msk.bf16.vlgmr.msrb.gmra.mxu3 %vm1085_vm6, %v1097_v48  ;;  %v2970_v48 = vor.u32 %v3208_v46, %v2967_v47  ;;  %v2887_v46 = vld [vmem:[%s3889_s26 + $0x38] sm:$0xf0]  ;;  %v2861_v47 = vld [vmem:[%s3889_s26] sm:$0xf] }
 0x384   : > { %1201 = vmatmul.bf16.vlgmr.msra.gmra.mxu3 %v3971_v4  ;;  %v3182_v4 = vld [vmem:[%s3883_s23 + $0x38] sm:$0xff]  ;;  %s4322_s23 = sld [smem:[#allocation27_spill]] }
 0x385   : > { %1457 = vmatpush.bf16.msrb.mxu3 %v3182_v4  ;;  %v3202_v4 = vld [vmem:[%s3889_s26 + $0x94] sm:$0xf0] }
 0x389   : > { %1458 = vmatpush.bf16.msrb.mxu3 %v3181_v5 }
 0x38d   : > { %1459 = vmatpush.bf16.msrb.mxu3 %v3180_v6 }
 0x391   : > { %1460 = vmatpush.bf16.msrb.mxu3 %v3179_v7  ;;  %v3200_v7 = vld [vmem:[%s3889_s26 + $0x8c] sm:$0xf] }
 0x395   : > { %1770 = vmatpush.bf16.msra.mxu3 %v2982_v30  ;;  %v3194_v30 = vld [vmem:[%s3889_s26 + $0x54] sm:$0xf0] }
 0x399   : > { %1771 = vmatpush.bf16.msra.mxu3 %v2966_v45  ;;  %v3188_v45 = vld [vmem:[%s3889_s26 + $0x2c] sm:$0xf] }
 0x3f7   : > { %v1115_v50 = vpop.f32.mrf.mxu3 }
 0x3f8   : > { %v1119_v51 = vpack.c.bf16 %v1115_v50, %v1115_v50  ;;  %v3205_v50 = vld [vmem:[%s3889_s26 + $0xac] sm:$0xf0] }
 0x3fa   : > { %2858 = vmatmul.msk.bf16.vlgmr.msra.gmra.mxu0 %vm1064_vm4, %v1119_v51  ;;  %v3203_v51 = vld [vmem:[%s3889_s26 + $0xa4] sm:$0xf] }
 0x3ff   : > { %v1117_v52 = vpop.f32.mrf.mxu3 }
 0x400   : > { %v2942_v52 = vor.u32 %v3205_v50, %v2941_v49  ;;  %v3185_v49 = vld [vmem:[%s3889_s26 + $0xc] sm:$0xf0]  ;;  %v3183_v50 = vld [vmem:[%s3889_s26 + $0x4] sm:$0xf] }
 0x402   : > { %1746 = vmatpush.bf16.msra.mxu1 %v2942_v52  ;;  %v2862_v52 = vor.u32 %v3185_v49, %v2861_v47 }
 0x407   : > { %v1202_v53 = vpop.f32.mrf.mxu3 }
 0x408   : > { %v1362_v54 = vpack.c.bf16 %v1202_v53, %v1202_v53  ;;  %v2943_v53 = vld [vmem:[%s3889_s26 + $0xb0] sm:$0xf0] }
 0x40a   : > { %2815 = vmatmul.msk.bf16.vlgmr.msrb.gmra.mxu2 %vm1064_vm4, %v1362_v54  ;;  %v2949_v54 = vld [vmem:[%s3889_s26 + $0xa8] sm:$0xf] }
 0x40b   : > { %1757 = vmatpush.bf16.msrb.mxu2 %v2978_v29  ;;  %v2901_v29 = vld [vmem:[%s3889_s26 + $0x48] sm:$0xf] }
 0x40f   : > { %v1204_v55 = vpop.f32.mrf.mxu3  ;;  %1758 = vmatpush.bf16.msrb.mxu2 %v2962_v44  ;;  %v2886_v44 = vor.u32 %v3190_v42, %v2885_v41 }
 0x410   : > { %v3206_v55 = vld [vmem:[%s3889_s26 + $0xb4] sm:$0xf0] }
 0x477   : > { %v1502_v56 = vpop.f32.mrf.mxu0 }
 0x47f   : > { %v1504_v57 = vpop.f32.mrf.mxu0 }
 0x480   : > { %v2950_v57 = vor.u32 %v3206_v55, %v2949_v54  ;;  %v2869_v54 = vld [vmem:[%s3889_s26 + $0x8] sm:$0xf]  ;;  %v3186_v55 = vld [vmem:[%s3889_s26 + $0x14] sm:$0xf0] }
 0x482   : > { %1772 = vmatpush.bf16.msra.mxu3 %v2950_v57  ;;  %v2870_v57 = vor.u32 %v3186_v55, %v2869_v54  ;;  %v3244_v54 = vld [vmem:[%s3891_s13 + $0xe8] sm:$0xff] }
 0x48d   : > { %v1379_v58 = vpop.f32.mrf.mxu2 }
 0x48e   : > { %v1383_v59 = vmul.f32 0.125, %v1379_v58  ;;  %v3204_v58 = vld [vmem:[%s3889_s26 + $0xac] sm:$0xf] }
 0x490   : > { %v1384_v60 = vsel %vm1085_vm6, %v1383_v59, -inf }
 0x491   : > { %1385 = vmax.xlane.f32.xlu2 %v1384_v60 }
 0x495   : > { %v1381_v61 = vpop.f32.mrf.mxu2 }
 0x496   : > { %v2925_v61 = vld [vmem:[%s3889_s26 + $0x80] sm:$0xf] }
 0x504   : > { %v1386_v62 = vpop.xlane.xlu2 %1385 }
 0x505   : > { %v1387_v63 = vsub.f32 %v1383_v59, %v1386_v62  ;;  %v2951_v59 = vld [vmem:[%s3889_s26 + $0xb8] sm:$0xf0]  ;;  %v3201_v62 = vld [vmem:[%s3889_s26 + $0x8c] sm:$0xf0] }
 0x506   : > { %v2954_v60 = vor.u32 %v3204_v58, %v2951_v59  ;;  %v2871_v58 = vld [vmem:[%s3889_s26 + $0x18] sm:$0xf0] }
 0x507   : > { %v1388_v1 = vmul.f32 1.442695, %v1387_v63  ;;  %v3199_v63 = vld [vmem:[%s3889_s26 + $0x84] sm:$0xf] }
 0x509   : > { %3362 = vpow2.f32 %v1388_v1  ;;  %v2926_v1 = vor.u32 %v3201_v62, %v2925_v61 }
 0x50b   : > { %1747 = vmatpush.bf16.msra.mxu1 %v2926_v1 }
 0x50f   : > { %v3363_v2 = vpop.eup %3362 }
 0x510   : > { %v1390_v3 = vsel %vm1085_vm6, %v3363_v2, 0.0 }
 0x511   : > { %1391 = vadd.xlane.f32.xlu2 %v1390_v3  ;;  %v2933_v3 = vld [vmem:[%s3889_s26 + $0x88] sm:$0xf] }
 0x512   : > { %v2934_v6 = vor.u32 %v3202_v4, %v2933_v3 }
 0x514   : > { %1773 = vmatpush.bf16.msra.mxu3 %v2934_v6  ;;  %v3351_v6 = vld [vmem:[%s4322_s23] ss:$0 sm:$0xff] }
 0x584   : > { %v1392_v8 = vpop.xlane.xlu2 %1391 }
 0x585   : > { %3364 = vrcp.f32 %v1392_v8  ;;  %v2935_v8 = vld [vmem:[%s3889_s26 + $0x98] sm:$0xf0] }
 0x58b   : > { %v3365_v9 = vpop.eup %3364 }
 0x58c   : > { %v1394_v10 = vmul.f32 %v3365_v9, %v3363_v2  ;;  %v2927_v2 = vld [vmem:[%s3889_s26 + $0x90] sm:$0xf0]  ;;  %v2938_v9 = vor.u32 %v3200_v7, %v2935_v8  ;;  %v3352_v8 = vld [vmem:[%s4323_s1] ss:$0 sm:$0xff] }
 0x58d   : > { %v2930_v5 = vor.u32 %v3199_v63, %v2927_v2 }
 0x58e   : > { %v1395_v11 = vpack.c.bf16 %v1394_v10, %v1394_v10  ;;  %v2909_v10 = vld [vmem:[%s3889_s26 + $0x60] sm:$0xf] }
 0x590   : > { %2816 = vmatmul.msk.bf16.vlgmr.msra.gmra.mxu2 %vm1085_vm6, %v1395_v11  ;;  %v3197_v11 = vld [vmem:[%s3889_s26 + $0x6c] sm:$0xf0] }
 0x613   : > { %v1412_v12 = vpop.f32.mrf.mxu2 }
 0x614   : > { %v1416_v13 = vpack.c.bf16 %v1412_v12, %v1412_v12  ;;  %v3195_v12 = vld [vmem:[%s3889_s26 + $0x64] sm:$0xf] }
 0x616   : > { %2841 = vmatmul.msk.bf16.vlgmr.msrb.gmra.mxu3 %vm1064_vm4, %v1416_v13  ;;  %v2910_v13 = vor.u32 %v3197_v11, %v2909_v10 }
 0x618   : > { %1748 = vmatpush.bf16.msra.mxu1 %v2910_v13 }
 0x61b   : > { %v1414_v14 = vpop.f32.mrf.mxu2 }
 0x61c   : > { %v2911_v14 = vld [vmem:[%s3889_s26 + $0x70] sm:$0xf0]  ;;  %1749 = vmatpush.bf16.msra.mxu1 %v2894_v27 }
 0x699   : > { %v1462_v17 = vpop.f32.mrf.mxu3 }
 0x69a   : > { %v1503_v18 = vadd.f32 %v1502_v56, %v1462_v17  ;;  %v2946_v56 = vor.u32 %v3203_v51, %v2943_v53  ;;  %v3198_v17 = vld [vmem:[%s3889_s26 + $0x74] sm:$0xf0]  ;;  %v2863_v51 = vld [vmem:[%s3889_s26 + $0x10] sm:$0xf0] }
 0x69b   : > { %v2866_v53 = vor.u32 %v3183_v50, %v2863_v51 }
 0x69c   : > { %v1509_v19 = vadd.f32 %v3350_v15, %v1503_v18  ;;  %1759 = vmatpush.bf16.msrb.mxu2 %v2946_v56  ;;  %v2917_v15 = vld [vmem:[%s3889_s26 + $0x68] sm:$0xf]  ;;  %v2914_v18 = vor.u32 %v3195_v12, %v2911_v14  ;;  %v3184_v56 = vld [vmem:[%s3889_s26 + $0xc] sm:$0xf] }
 0x69d   : > { %v2874_v59 = vor.u32 %v3184_v56, %v2871_v58 }
 0x69e   : > { %v4012_v20 = vadd.f32 %v1509_v19, %v3912_v0  ;;  %v2986_v0 = vor.u32 %v3212_v31, %v2983_v32  ;;  %v2918_v19 = vor.u32 %v3198_v17, %v2917_v15  ;;  %v2898_v31 = vor.u32 %v3191_v26, %v2895_v28 }
 0x69f   : > { %v2902_v32 = vor.u32 %v3194_v30, %v2901_v29 }
 0x6a0   : > { %1513 = vadd.xlane.f32.xlu0 %v4012_v20  ;;  %1783 = vmatpush.bf16.msrb.mxu0 %v2986_v0  ;;  %v3192_v0 = vld [vmem:[%s3889_s26 + $0x4c] sm:$0xf] }
 0x6a1   : > { %v1464_v21 = vpop.f32.mrf.mxu3  ;;  %1760 = vmatpush.bf16.msrb.mxu2 %v2930_v5  ;;  %1774 = vmatpush.bf16.msra.mxu3 %v2918_v19 }
 0x6a2   : > { %v3196_v21 = vld [vmem:[%s3889_s26 + $0x6c] sm:$0xf] }
 0x6a3   : > { %v2922_v23 = vor.u32 %v3196_v21, %v2919_v22 }
 0x6a4   : > { %1784 = vmatpush.bf16.msrb.mxu0 %v2970_v48  ;;  %v2890_v48 = vor.u32 %v3188_v45, %v2887_v46  ;;  %v3230_v45 = vld [vmem:[%s3891_s13 + $0x78] sm:$0xff] }
 0x6a5   : > { %1761 = vmatpush.bf16.msrb.mxu2 %v2914_v18  ;;  %1775 = vmatpush.bf16.msra.mxu3 %v2902_v32 }
 0x6a8   : > { %1785 = vmatpush.bf16.msrb.mxu0 %v2954_v60 }
 0x6a9   : > { %1762 = vmatpush.bf16.msrb.mxu2 %v2898_v31  ;;  %1776 = vmatpush.bf16.msra.mxu3 %v2886_v44 }
 0x6ac   : > { %1786 = vmatpush.bf16.msrb.mxu0 %v2938_v9 }
 0x6ad   : > { %1763 = vmatpush.bf16.msrb.mxu2 %v2882_v43  ;;  %1777 = vmatpush.bf16.msra.mxu3 %v2870_v57 }
 0x6b0   : > { %1787 = vmatpush.bf16.msrb.mxu0 %v2922_v23 }
 0x6b1   : > { %1764 = vmatpush.bf16.msrb.mxu2 %v2866_v53  ;;  %v3220_v53 = vld [vmem:[%s3891_s13 + $0x28] sm:$0xff] }
 0x6b5   : > { %2249 = vmatpush.bf16.msra.mxu2 %v3230_v45 }
 0x713   : > { %v1514_v33 = vpop.xlane.xlu0 %1513 }
 0x714   : > { %v1515_v34 = vmul.f32 %v1514_v33, %v3924_v16  ;;  %v2903_v33 = vld [vmem:[%s3889_s26 + $0x58] sm:$0xf0] }
 0x716   : > { %v4025_v35 = vsub.f32 %v4012_v20, %v1515_v34  ;;  %v2906_v34 = vor.u32 %v3192_v0, %v2903_v33 }
 0x718   : > { %v1517_v36 = vmul.f32 %v4025_v35, %v4025_v35  ;;  %1788 = vmatpush.bf16.msrb.mxu0 %v2906_v34  ;;  %v3221_v34 = vld [vmem:[%s3891_s13 + $0x30] sm:$0xff] }
 0x71a   : > { %1518 = vadd.xlane.f32.xlu1 %v1517_v36  ;;  %v2877_v36 = vld [vmem:[%s3889_s26 + $0x20] sm:$0xf] }
 0x71b   : > { %v2878_v39 = vor.u32 %v3189_v37, %v2877_v36  ;;  %v3245_v36 = vld [vmem:[%s3891_s13 + $0xf0] sm:$0xff] }
 0x71c   : > { %1789 = vmatpush.bf16.msrb.mxu0 %v2890_v48 }
 0x71d   : > { %1750 = vmatpush.bf16.msra.mxu1 %v2878_v39 }
 0x720   : > { %1790 = vmatpush.bf16.msrb.mxu0 %v2874_v59 }
 0x721   : > { %1751 = vmatpush.bf16.msra.mxu1 %v2862_v52  ;;  %v3238_v52 = vld [vmem:[%s3891_s13 + $0xb8] sm:$0xff] }
 0x722   : > { %2262 = vmatpush.bf16.msrb.mxu3 %v3238_v52 }
 0x724   : > { %2275 = vmatpush.bf16.msra.mxu0 %v3246_v25 }
 0x725   : > { %2236 = vmatpush.bf16.msrb.mxu1 %v3222_v24 }
 0x728   : > { %2276 = vmatpush.bf16.msra.mxu0 %v3245_v36 }
 0x729   : > { %2237 = vmatpush.bf16.msrb.mxu1 %v3221_v34  ;;  %v3242_v34 = vld [vmem:[%s3891_s13 + $0xd8] sm:$0xff] }
 0x72c   : > { %2277 = vmatpush.bf16.msra.mxu0 %v3244_v54 }
 0x72d   : > { %2238 = vmatpush.bf16.msrb.mxu1 %v3220_v53 }
 0x78d   : > { %v1519_v60 = vpop.xlane.xlu1 %1518 }
 0x78e   : > { %v1520_v61 = vmul.f32 %v1519_v60, %v3924_v16  ;;  %v3229_v60 = vld [vmem:[%s3891_s13 + $0x70] sm:$0xff] }
 0x78f   : > { %2250 = vmatpush.bf16.msra.mxu2 %v3229_v60 }
 0x790   : > { %v1521_v62 = vadd.f32 1e-05, %v1520_v61 }
 0x792   : > { %3366 = vrsqrt.f32 %v1521_v62  ;;  %vm1528_vm8 = vweird.f32 %v1521_v62 }
 0x798   : > { %v3367_v63 = vpop.eup %3366 }
 0x799   : > { %v1523_v1 = vmul.f32 %v3367_v63, %v1521_v62  ;;  %vm1529_vm7 = vweird.f32 %v3367_v63 }
 0x79a   : > { %vm1530_vm9 = vmor %vm1528_vm8, %vm1529_vm7 }
 0x79b   : > { %v1524_v2 = vmul.f32 %v3367_v63, %v1523_v1  ;;  %v3237_v1 = vld [vmem:[%s3891_s13 + $0xb0] sm:$0xff] }
 0x79c   : > { %2263 = vmatpush.bf16.msrb.mxu3 %v3237_v1 }
 0x79d   : > { %v1525_v3 = vmul.f32 0.5, %v1524_v2 }
 0x79f   : > { %v1526_v4 = vsub.f32 1.5, %v1525_v3 }
 0x7a1   : > { %v1527_v5 = vmul.f32 %v3367_v63, %v1526_v4 }
 0x7a3   : > { %v1531_v7 = vsel %vm1530_vm9, %v3367_v63, %v1527_v5 }
 0x7a4   : > { %v1532_v16 = vmul.f32 %v1531_v7, %v4025_v35  ;;  %v1574_v35 = vld [vmem:[%s778_s21] sm:$0xf] }
 0x7a5   : > { %v1576_v12 = vperm.slane %v1574_v35, 0  ;;  %v1579_v13 = vperm.slane %v1574_v35, 3  ;;  %v1577_v21 = vperm.slane %v1574_v35, 1  ;;  %v1578_v23 = vperm.slane %v1574_v35, 2 }
 0x7a6   : > { %v1536_v9 = vmul.f32 %v3351_v6, %v1532_v16 }
 0x7a8   : > { %v1540_v10 = vadd.f32 %v3352_v8, %v1536_v9  ;;  %v3219_v8 = vld [vmem:[%s3891_s13 + $0x20] sm:$0xff] }
 0x7a9   : > { %v3243_v9 = vld [vmem:[%s3891_s13 + $0xe0] sm:$0xff]  ;;  %2239 = vmatpush.bf16.msrb.mxu1 %v3219_v8 }
 0x7aa   : > { %v1541_v11 = vpack.c.bf16 %v1540_v10, %v1540_v10  ;;  %2278 = vmatpush.bf16.msra.mxu0 %v3243_v9  ;;  %v3215_v9 = vld [vmem:[%s3891_s13] sm:$0xff] }
 0x7ac   : > { %1752 = vmatmul.bf16.vlgmr.msra.gmra.mxu1 %v1541_v11  ;;  %1765 = vmatmul.bf16.vlgmr.msrb.gmra.mxu2 %v1541_v11 }
 0x7ad   : > { %1778 = vmatmul.bf16.vlgmr.msra.gmra.mxu3 %v1541_v11  ;;  %1791 = vmatmul.bf16.vlgmr.msrb.gmra.mxu0 %v1541_v11 }
 0x7ae   : > { %2279 = vmatpush.bf16.msra.mxu0 %v3242_v34 }
 0x829   : > { %v1753_v14 = vpop.f32.mrf.mxu1 }
 0x82a   : > { %v4101_v15 = vadd.f32 %v1753_v14, %v1576_v12  ;;  %v1792_v17 = vpop.f32.mrf.mxu0  ;;  %v3228_v12 = vld [vmem:[%s3891_s13 + $0x68] sm:$0xff] }
 0x82b   : > { %v4103_v18 = vadd.f32 %v1792_v17, %v1579_v13  ;;  %v3236_v13 = vld [vmem:[%s3891_s13 + $0xa8] sm:$0xff]  ;;  %2251 = vmatpush.bf16.msra.mxu2 %v3228_v12  ;;  %v3239_v12 = vld [vmem:[%s3891_s13 + $0xc0] sm:$0xff] }
 0x82c   : > { %v4106_v19 = vmul.f32 0.70710677, %v4101_v15  ;;  %2264 = vmatpush.bf16.msrb.mxu3 %v3236_v13 }
 0x82d   : > { %v4109_v22 = vmul.f32 0.70710677, %v4103_v18 }
 0x82e   : > { %v1804_v26 = vmul.f32 %v4106_v19, %v4106_v19 }
 0x82f   : > { %v1924_v27 = vmul.f32 %v4109_v22, %v4109_v22  ;;  %v1766_v28 = vpop.f32.mrf.mxu2 }
 0x830   : > { %v4117_v29 = vmin.f32 %v1804_v26, 16.0  ;;  %v4119_v30 = vadd.f32 %v1766_v28, %v1577_v21  ;;  %v1779_v31 = vpop.f32.mrf.mxu3 }
 0x831   : > { %v4121_v32 = vmin.f32 %v1924_v27, 16.0  ;;  %v4123_v0 = vadd.f32 %v1779_v31, %v1578_v23  ;;  %v1755_v33 = vpop.f32.mrf.mxu1 }
 0x832   : > { %v1806_v37 = vmul.f32 2.1237322e-06, %v4117_v29  ;;  %v1817_v38 = vmul.f32 3.8918573e-05, %v4117_v29  ;;  %v1794_v39 = vpop.f32.mrf.mxu0  ;;  %v4132_v42 = vmul.f32 0.70710677, %v4119_v30 }
 0x833   : > { %v1926_v40 = vmul.f32 2.1237322e-06, %v4121_v32  ;;  %v1937_v41 = vmul.f32 3.8918573e-05, %v4121_v32  ;;  %v4138_v49 = vmul.f32 0.70710677, %v4123_v0 }
 0x834   : > { %v1807_v43 = vadd.f32 0.00028619796, %v1806_v37  ;;  %v1818_v44 = vadd.f32 0.001143296, %v1817_v38  ;;  %v1844_v48 = vmul.f32 %v4132_v42, %v4132_v42  ;;  %v3218_v33 = vld [vmem:[%s3891_s13 + $0x18] sm:$0xff]  ;;  %v3227_v38 = vld [vmem:[%s3891_s13 + $0x60] sm:$0xff] }
 0x835   : > { %v1927_v46 = vadd.f32 0.00028619796, %v1926_v40  ;;  %v1938_v47 = vadd.f32 0.001143296, %v1937_v41  ;;  %v1884_v58 = vmul.f32 %v4138_v49, %v4138_v49  ;;  %2240 = vmatpush.bf16.msrb.mxu1 %v3218_v33  ;;  %v3235_v41 = vld [vmem:[%s3891_s13 + $0xa0] sm:$0xff]  ;;  %2252 = vmatpush.bf16.msra.mxu2 %v3227_v38 }
 0x836   : > { %v1808_v50 = vmul.f32 %v1807_v43, %v4117_v29  ;;  %v1819_v51 = vmul.f32 %v1818_v44, %v4117_v29  ;;  %v4147_v57 = vmin.f32 %v1844_v48, 16.0  ;;  %2265 = vmatpush.bf16.msrb.mxu3 %v3235_v41  ;;  %v3223_v38 = vld [vmem:[%s3891_s13 + $0x40] sm:$0xff] }
 0x837   : > { %v1928_v55 = vmul.f32 %v1927_v46, %v4121_v32  ;;  %v1939_v56 = vmul.f32 %v1938_v47, %v4121_v32  ;;  %v1768_v59 = vpop.f32.mrf.mxu2  ;;  %v4157_v16 = vmin.f32 %v1884_v58, 16.0  ;;  %v3217_v46 = vld [vmem:[%s3891_s13 + $0x10] sm:$0xff]  ;;  %v3234_v58 = vld [vmem:[%s3891_s13 + $0x98] sm:$0xff] }
 0x838   : > { %v1809_v61 = vadd.f32 0.0036580483, %v1808_v50  ;;  %v1820_v62 = vadd.f32 0.014752088, %v1819_v51  ;;  %v1781_v63 = vpop.f32.mrf.mxu3  ;;  %v1846_v4 = vmul.f32 2.1237322e-06, %v4147_v57 }
 0x839   : > { %v1929_v2 = vadd.f32 0.0036580483, %v1928_v55  ;;  %v1940_v3 = vadd.f32 0.014752088, %v1939_v56  ;;  %v1857_v7 = vmul.f32 3.8918573e-05, %v4147_v57  ;;  %2241 = vmatpush.bf16.msrb.mxu1 %v3217_v46 }
 0x83a   : > { %v1810_v5 = vmul.f32 %v1809_v61, %v4117_v29  ;;  %v1821_v6 = vmul.f32 %v1820_v62, %v4117_v29  ;;  %v1847_v35 = vadd.f32 0.00028619796, %v1846_v4  ;;  %v1886_v28 = vmul.f32 2.1237322e-06, %v4157_v16  ;;  %v3241_v47 = vld [vmem:[%s3891_s13 + $0xd0] sm:$0xff]  ;;  %v3226_v55 = vld [vmem:[%s3891_s13 + $0x58] sm:$0xff]  ;;  %2266 = vmatpush.bf16.msrb.mxu3 %v3234_v58 }
 0x83b   : > { %v1930_v10 = vmul.f32 %v1929_v2, %v4121_v32  ;;  %v1941_v11 = vmul.f32 %v1940_v3, %v4121_v32  ;;  %v1858_v21 = vadd.f32 0.001143296, %v1857_v7  ;;  %v1897_v31 = vmul.f32 3.8918573e-05, %v4157_v16  ;;  %2280 = vmatpush.bf16.msra.mxu0 %v3241_v47  ;;  %v3216_v62 = vld [vmem:[%s3891_s13 + $0x8] sm:$0xff]  ;;  %2253 = vmatpush.bf16.msra.mxu2 %v3226_v55 }
 0x83c   : > { %v1811_v14 = vadd.f32 0.05243302, %v1810_v5  ;;  %v1822_v17 = vadd.f32 0.112945676, %v1821_v6  ;;  %v1848_v25 = vmul.f32 %v1847_v35, %v4147_v57  ;;  %v1887_v51 = vadd.f32 0.00028619796, %v1886_v28 }
 0x83d   : > { %v1931_v23 = vadd.f32 0.05243302, %v1930_v10  ;;  %v1942_v24 = vadd.f32 0.112945676, %v1941_v11  ;;  %v1859_v27 = vmul.f32 %v1858_v21, %v4147_v57  ;;  %v1898_v52 = vadd.f32 0.001143296, %v1897_v31  ;;  %2242 = vmatpush.bf16.msrb.mxu1 %v3216_v62 }
 0x83e   : > { %v1823_v26 = vmul.f32 %v1822_v17, %v4117_v29  ;;  %v1812_v36 = vmul.f32 %v1811_v14, %v4117_v29  ;;  %v1849_v45 = vadd.f32 0.0036580483, %v1848_v25  ;;  %v3240_v63 = vld [vmem:[%s3891_s13 + $0xc8] sm:$0xff]  ;;  %v1888_v3 = vmul.f32 %v1887_v51, %v4157_v16  ;;  %v3225_v5 = vld [vmem:[%s3891_s13 + $0x50] sm:$0xff] }
 0x83f   : > { %v1943_v37 = vmul.f32 %v1942_v24, %v4121_v32  ;;  %v1860_v40 = vadd.f32 0.014752088, %v1859_v27  ;;  %v1932_v43 = vmul.f32 %v1931_v23, %v4121_v32  ;;  %v1899_v61 = vmul.f32 %v1898_v52, %v4157_v16  ;;  %v3233_v6 = vld [vmem:[%s3891_s13 + $0x90] sm:$0xff]  ;;  %2281 = vmatpush.bf16.msra.mxu0 %v3240_v63  ;;  %2254 = vmatpush.bf16.msra.mxu2 %v3225_v5  ;;  %v3224_v17 = vld [vmem:[%s3891_s13 + $0x48] sm:$0xff] }
 0x840   : > { %v1824_v39 = vadd.f32 0.4994258, %v1823_v26  ;;  %v1813_v53 = vadd.f32 0.18741608, %v1812_v36  ;;  %v1850_v2 = vmul.f32 %v1849_v45, %v4147_v57  ;;  %v1889_v35 = vadd.f32 0.0036580483, %v1888_v3  ;;  %2267 = vmatpush.bf16.msrb.mxu3 %v3233_v6 }
 0x841   : > { %v1944_v44 = vadd.f32 0.4994258, %v1943_v37  ;;  %v1861_v50 = vmul.f32 %v1860_v40, %v4147_v57  ;;  %v1933_v1 = vadd.f32 0.18741608, %v1932_v43  ;;  %v1900_v8 = vadd.f32 0.014752088, %v1899_v61  ;;  %2243 = vmatpush.bf16.msrb.mxu1 %v3215_v9 }
 0x842   : > { %v1825_v48 = vmul.f32 %v1824_v39, %v4117_v29  ;;  %v1814_v4 = vmul.f32 %v1813_v53, %v4117_v29  ;;  %v1851_v11 = vadd.f32 0.05243302, %v1850_v2  ;;  %v3232_v23 = vld [vmem:[%s3891_s13 + $0x88] sm:$0xff]  ;;  %v1890_v37 = vmul.f32 %v1889_v35, %v4157_v16 }
 0x843   : > { %v1945_v54 = vmul.f32 %v1944_v44, %v4121_v32  ;;  %v1862_v60 = vadd.f32 0.112945676, %v1861_v50  ;;  %v1934_v10 = vmul.f32 %v1933_v1, %v4121_v32  ;;  %v1901_v14 = vmul.f32 %v1900_v8, %v4157_v16  ;;  %2282 = vmatpush.bf16.msra.mxu0 %v3239_v12  ;;  %2255 = vmatpush.bf16.msra.mxu2 %v3224_v17  ;;  %v3231_v44 = vld [vmem:[%s3891_s13 + $0x80] sm:$0xff] }
 0x844   : > { %v4183_v56 = vadd.f32 1.0, %v1825_v48  ;;  %v1815_v29 = vadd.f32 1.1283791, %v1814_v4  ;;  %v1852_v28 = vmul.f32 %v1851_v11, %v4147_v57  ;;  %2268 = vmatpush.bf16.msrb.mxu3 %v3232_v23  ;;  %v1891_v52 = vadd.f32 0.05243302, %v1890_v37 }
 0x845   : > { %v4186_v59 = vadd.f32 1.0, %v1945_v54  ;;  %v1863_v7 = vmul.f32 %v1862_v60, %v4147_v57  ;;  %v1935_v32 = vadd.f32 1.1283791, %v1934_v10  ;;  %v1902_v31 = vadd.f32 0.112945676, %v1901_v14 }
 0x846   : > { %3368 = vrcp.f32 %v4183_v56  ;;  %v1816_v33 = vmul.f32 %v1815_v29, %v4106_v19  ;;  %v1836_v39 = vand.u32 2147483647, %v4183_v56  ;;  %v1838_v40 = vand.u32 2147483648, %v4183_v56 }
 0x847   : > { %3370 = vrcp.f32 %v4186_v59  ;;  %v1864_v13 = vadd.f32 0.4994258, %v1863_v7  ;;  %v1903_v43 = vmul.f32 %v1902_v31, %v4157_v16  ;;  %v1958_v46 = vand.u32 2147483648, %v4186_v59  ;;  %2256 = vmatpush.bf16.msra.mxu2 %v3223_v38 }
 0x848   : > { %v1956_v47 = vand.u32 2147483647, %v4186_v59  ;;  %vm1832_vm12 = vweird.f32 %v4183_v56  ;;  %v1853_v51 = vadd.f32 0.18741608, %v1852_v28  ;;  %v1839_v53 = vor.u32 1.1754944e-38, %v1838_v40  ;;  %2269 = vmatpush.bf16.msrb.mxu3 %v3231_v44 }
 0x849   : > { %v1865_v26 = vmul.f32 %v1864_v13, %v4147_v57  ;;  %v1904_v48 = vadd.f32 0.4994258, %v1903_v43  ;;  %vm1952_vm14 = vweird.f32 %v4186_v59  ;;  %vm1837_vm15 = vcmp.eq.f32.partialorder %v1836_v39, 8.507059e+37 }
 0x84a   : > { %v1936_v60 = vmul.f32 %v1935_v32, %v4109_v22  ;;  %v1959_v61 = vor.u32 1.1754944e-38, %v1958_v46  ;;  %vm1957_vm1 = vcmp.eq.f32.partialorder %v1956_v47, 8.507059e+37  ;;  %v1854_v4 = vmul.f32 %v1853_v51, %v4147_v57 }
 0x84b   : > { %v4210_v36 = vadd.f32 1.0, %v1865_v26  ;;  %v1905_v55 = vmul.f32 %v1904_v48, %v4157_v16  ;;  %v1796_v22 = vmul.f32 0.5, %v4101_v15  ;;  %v1799_v8 = vmul.f32 0.5, %v4103_v18 }
 0x84c   : > { %v3369_v21 = vpop.eup %3368  ;;  %v1855_v35 = vadd.f32 1.1283791, %v1854_v4  ;;  %v1798_v51 = vmul.f32 0.5, %v4123_v0 }
 0x84d   : > { %v3371_v24 = vpop.eup %3370  ;;  %v1828_v25 = vmul.f32 %v3369_v21, %v4183_v56  ;;  %vm1833_vm10 = vweird.f32 %v3369_v21  ;;  %3372 = vrcp.f32 %v4210_v36  ;;  %v1906_v56 = vadd.f32 1.0, %v1905_v55 }
 0x84e   : > { %v1948_v27 = vmul.f32 %v3371_v24, %v4186_v59  ;;  %vm1953_vm11 = vweird.f32 %v3371_v24  ;;  %vm1834_vm13 = vmor %vm1832_vm12, %vm1833_vm10  ;;  %v1892_v59 = vmul.f32 %v1891_v52, %v4157_v16  ;;  %v1878_v12 = vand.u32 2147483648, %v4210_v36 }
 0x84f   : > { %v1829_v34 = vsub.f32 1.0, %v1828_v25  ;;  %vm1954_vm0 = vmor %vm1952_vm14, %vm1953_vm11  ;;  %3374 = vrcp.f32 %v1906_v56  ;;  %v1876_v14 = vand.u32 2147483647, %v4210_v36  ;;  %vm1872_vm3 = vweird.f32 %v4210_v36 }
 0x850   : > { %v1949_v41 = vsub.f32 1.0, %v1948_v27  ;;  %v1893_v29 = vadd.f32 0.18741608, %v1892_v59  ;;  %v1879_v18 = vor.u32 1.1754944e-38, %v1878_v12  ;;  %v1856_v27 = vmul.f32 %v1855_v35, %v4132_v42 }
 0x851   : > { %v1830_v45 = vmul.f32 %v3369_v21, %v1829_v34  ;;  %vm1877_vm5 = vcmp.eq.f32.partialorder %v1876_v14, 8.507059e+37  ;;  %v1918_v37 = vand.u32 2147483648, %v1906_v56  ;;  %vm1912_vm7 = vweird.f32 %v1906_v56 }
 0x852   : > { %v1950_v19 = vmul.f32 %v3371_v24, %v1949_v41  ;;  %v1894_v25 = vmul.f32 %v1893_v29, %v4157_v16  ;;  %v1797_v16 = vmul.f32 0.5, %v4119_v30 }
 0x853   : > { %v1831_v50 = vadd.f32 %v3369_v21, %v1830_v45  ;;  %v3373_v1 = vpop.eup %3372  ;;  %v1919_v42 = vor.u32 1.1754944e-38, %v1918_v37 }
 0x854   : > { %v1951_v54 = vadd.f32 %v3371_v24, %v1950_v19  ;;  %v1868_v6 = vmul.f32 %v3373_v1, %v4210_v36  ;;  %vm1873_vm2 = vweird.f32 %v3373_v1  ;;  %v1895_v38 = vadd.f32 1.1283791, %v1894_v25 }
 0x855   : > { %v1835_v58 = vsel %vm1834_vm13, %v3369_v21, %v1831_v50  ;;  %v3375_v21 = vpop.eup %3374  ;;  %vm1874_vm4 = vmor %vm1872_vm3, %vm1873_vm2  ;;  %v1916_v36 = vand.u32 2147483647, %v1906_v56 }
 0x856   : > { %v1840_v62 = vsel %vm1837_vm15, %v1839_v53, %v1835_v58  ;;  %v1955_v63 = vsel %vm1954_vm0, %v3371_v24, %v1951_v54  ;;  %v1869_v10 = vsub.f32 1.0, %v1868_v6  ;;  %v1908_v26 = vmul.f32 %v3375_v21, %v1906_v56 }
 0x857   : > { %v1841_v2 = vmul.f32 %v1840_v62, %v1816_v33  ;;  %v1960_v3 = vsel %vm1957_vm1, %v1959_v61, %v1955_v63  ;;  %vm1913_vm6 = vweird.f32 %v3375_v21  ;;  %v1896_v44 = vmul.f32 %v1895_v38, %v4138_v49 }
 0x858   : > { %v1961_v5 = vmul.f32 %v1960_v3, %v1936_v60  ;;  %v1870_v57 = vmul.f32 %v3373_v1, %v1869_v10  ;;  %v1909_v33 = vsub.f32 1.0, %v1908_v26  ;;  %vm1914_vm8 = vmor %vm1912_vm7, %vm1913_vm6  ;;  %vm1917_vm9 = vcmp.eq.f32.partialorder %v1916_v36, 8.507059e+37  ;;  %v3353_v60 = vld [vmem:[%s781_s22] ss:$0 sm:$0xff] }
 0x859   : > { %v2987_v7 = vclamps-f32 %v1841_v2, 1.0 }
 0x85a   : > { %v2990_v9 = vclamps-f32 %v1961_v5, 1.0  ;;  %v1871_v24 = vadd.f32 %v3373_v1, %v1870_v57  ;;  %v1910_v39 = vmul.f32 %v3375_v21, %v1909_v33 }
 0x85b   : > { %v1964_v11 = vadd.f32 1.0, %v2987_v7 }
 0x85c   : > { %v1967_v13 = vadd.f32 1.0, %v2990_v9  ;;  %v1875_v28 = vsel %vm1874_vm4, %v3373_v1, %v1871_v24  ;;  %v1911_v41 = vadd.f32 %v3375_v21, %v1910_v39 }
 0x85d   : > { %v1968_v17 = vmul.f32 %v1964_v11, %v1796_v22  ;;  %v1880_v31 = vsel %vm1877_vm5, %v1879_v18, %v1875_v28 }
 0x85e   : > { %v1971_v23 = vmul.f32 %v1967_v13, %v1799_v8  ;;  %v1881_v34 = vmul.f32 %v1880_v31, %v1856_v27  ;;  %v1915_v45 = vsel %vm1914_vm8, %v3375_v21, %v1911_v41 }
 0x85f   : > { %v1972_v15 = vpack.c.bf16 %v1968_v17, %v1968_v17  ;;  %v1920_v19 = vsel %vm1917_vm9, %v1919_v42, %v1915_v45 }
 0x860   : > { %v1975_v32 = vpack.c.bf16 %v1971_v23, %v1971_v23  ;;  %v2988_v40 = vclamps-f32 %v1881_v34, 1.0  ;;  %v1921_v47 = vmul.f32 %v1920_v19, %v1896_v44 }
 0x861   : > { %2244 = vmatmul.bf16.vlgmr.msrb.gmra.mxu1 %v1972_v15 }
 0x862   : > { %2283 = vmatmul.bf16.vlgmr.msra.gmra.mxu0 %v1975_v32  ;;  %v1965_v43 = vadd.f32 1.0, %v2988_v40  ;;  %v2989_v50 = vclamps-f32 %v1921_v47, 1.0 }
 0x864   : > { %v1969_v46 = vmul.f32 %v1965_v43, %v1797_v16  ;;  %v1966_v52 = vadd.f32 1.0, %v2989_v50 }
 0x866   : > { %v1973_v48 = vpack.c.bf16 %v1969_v46, %v1969_v46  ;;  %v1970_v53 = vmul.f32 %v1966_v52, %v1798_v51 }
 0x868   : > { %2257 = vmatmul.bf16.vlgmr.msra.gmra.mxu2 %v1973_v48  ;;  %v1974_v30 = vpack.c.bf16 %v1970_v53, %v1970_v53 }
 0x86a   : > { %2270 = vmatmul.bf16.vlgmr.msrb.gmra.mxu3 %v1974_v30 }
 0x8de   : > { %v2245_v54 = vpop.f32.mrf.mxu1 }
 0x8df   : > { %v2284_v55 = vpop.f32.mrf.mxu0  ;;  %v2246_v62 = vadd.f32 %v3353_v60, %v2245_v54 }
 0x8e6   : > { %v2247_v58 = vpop.f32.mrf.mxu1 }
 0x8e7   : > { %v2286_v49 = vpop.f32.mrf.mxu0 }
 0x8eb   : > { %v2258_v61 = vpop.f32.mrf.mxu2 }
 0x8ec   : > { %v2259_v63 = vadd.f32 %v2258_v61, %v2246_v62 }
 0x8ed   : > { %v2271_v56 = vpop.f32.mrf.mxu3 }
 0x8ee   : > { %v2272_v1 = vadd.f32 %v2271_v56, %v2259_v63 }
 0x8f0   : > { %v2285_v2 = vadd.f32 %v2284_v55, %v2272_v1 }
 0x8f2   : > { %v2288_v3 = vadd.f32 %v2285_v2, %v4012_v20 }
 0x8f3   : > { %v2260_v0 = vpop.f32.mrf.mxu2 }
 0x8f4   : > { %2289 = vst [vmem:[%s789_s18] sm:$0xff] %v2288_v3 }
 0x8f5   : > { %v2273_v4 = vpop.f32.mrf.mxu3 }
 0x8f6 PF: > { %s36_s20 = sadd.s32 1, %s3634_s20   ;;  %s4327_s17 = sld [smem:[#allocation16_spill]] }
 0x8f7   : > { %p33_p2 = scmp.ge.s32.totalorder %s36_s20, 6   ;;  %s4328_s15 = sld [smem:[#allocation20_spill]] }
 0x8f8   : > { %s4329_s16 = sld [smem:[#allocation17_spill]]  ;;  %s4332_s29 = smov %s3610_s30 }
 0x8f9   : > { %s4330_s18 = sld [smem:[#allocation18_spill]] }
 0x8fa   : > { %s4331_s14 = sld [smem:[#allocation19_spill]] }
 0x8fc   : > { %s4333_s30 = smov %s4327_s17  ;;  %s4334_s17 = smov %s3630_s19 }
 0x8fd   :  { %35 = sbr.rel (!%p33_p2) target bundleno = 23 (0x17), region = 193 }
 0x900   : > { %s4335_s19 = smov %s4331_s14 }
 0x902   :  { %2317 = vsyncpa [#allocation3], 1 }
 0x903   :  { %2319 = vsyncpa [#allocation3 + $0x1], 1 }
 0x904   :  { %2320 = vsyncpa [#allocation5], 1 }
 0x905   :  { %2322 = vsyncpa [#allocation5 + $0x1], 1 }
 0x906   :  { %2323 = vsyncpa [#allocation8], 1 }
 0x907   :  { %2325 = vsyncpa [#allocation8 + $0x1], 1 }
 0x908   :  { %2326 = vsyncpa [#allocation11], 1 }
 0x909   :  { %2328 = vsyncpa [#allocation11 + $0x1], 1 }

// kernel: _lambda_.3
= control target key start
LH: loop header
LB: loop body
LE: loop exit
PB: predicated region body
PF: predicated region fallthrough
CT: control target
= control target key end

     0   :  { %s7376_s30 = smov 0   ;;  %s9231_s0 = inlined_call_operand.vmem [shape: f32[2,2,64,16], index: 0, kind: input, shape index: {}, may-alias: {0,27}]   ;;  %s9232_s1 = inlined_call_operand.vmem [shape: f32[2,2,64,16], index: 1, kind: input, shape index: {}]   ;;  %s9233_s2 = inlined_call_operand.vmem [shape: f32[2,2,64,16], index: 2, kind: input, shape index: {}]   ;;  %s9234_s3 = inlined_call_operand.vmem [shape: f32[1,16], index: 3, kind: input, shape index: {}, may-alias: {3,9,21}]   ;;  %s9235_s4 = inlined_call_operand.vmem [shape: f32[1,16], index: 4, kind: input, shape index: {}, may-alias: {4,10,22}]   ;;  %s9236_s5 = inlined_call_operand.vmem [shape: bf16[2,16,16], index: 5, kind: input, shape index: {}]   ;;  %s9237_s6 = inlined_call_operand.vmem [shape: f32[2,1,16], index: 6, kind: input, shape index: {}]   ;;  %s9238_s7 = inlined_call_operand.vmem [shape: bf16[2,16,16], index: 7, kind: input, shape index: {}]   ;;  %s9239_s8 = inlined_call_operand.vmem [shape: f32[2,1,16], index: 8, kind: input, shape index: {}]   ;;  %s9240_s9 = inlined_call_operand.vmem [shape: f32[1,16], index: 9, kind: input, shape index: {}, may-alias: {3,9,21}]   ;;  %s9241_s10 = inlined_call_operand.vmem [shape: f32[1,16], index: 10, kind: input, shape index: {}, may-alias: {4,10,22}]   ;;  %s9242_s11 = inlined_call_operand.vmem [shape: bf16[2,4,16,4], index: 11, kind: input, shape index: {}]   ;;  %s9243_s12 = inlined_call_operand.vmem [shape: bf16[2,4,16,4], index: 12, kind: input, shape index: {}]   ;;  %s9244_s13 = inlined_call_operand.vmem [shape: bf16[2,4,16,4], index: 13, kind: input, shape index: {}]   ;;  %s9245_s14 = inlined_call_operand.vmem [shape: bf16[2,4,4,16], index: 14, kind: input, shape index: {}]   ;;  %s9246_s15 = inlined_call_operand.vmem [shape: f32[2,1,16], index: 15, kind: input, shape index: {}]   ;;  %s9247_s16 = inlined_call_operand.vmem [shape: bf16[2,4,16,4], index: 16, kind: input, shape index: {}]   ;;  %s9248_s17 = inlined_call_operand.vmem [shape: bf16[2,4,16,4], index: 17, kind: input, shape index: {}]   ;;  %s9249_s18 = inlined_call_operand.vmem [shape: bf16[2,4,16,4], index: 18, kind: input, shape index: {}]   ;;  %s9250_s19 = inlined_call_operand.vmem [shape: bf16[2,4,4,16], index: 19, kind: input, shape index: {}]   ;;  %s9251_s20 = inlined_call_operand.vmem [shape: f32[2,1,16], index: 20, kind: input, shape index: {}]   ;;  %s9252_s21 = inlined_call_operand.vmem [shape: f32[1,16], index: 21, kind: input, shape index: {}, may-alias: {3,9,21}]   ;;  %s9253_s22 = inlined_call_operand.vmem [shape: f32[1,16], index: 22, kind: input, shape index: {}, may-alias: {4,10,22}]   ;;  %s9254_s23 = inlined_call_operand.vmem [shape: bf16[2,16,64], index: 23, kind: input, shape index: {}]   ;;  %s9255_s24 = inlined_call_operand.vmem [shape: f32[2,1,64], index: 24, kind: input, shape index: {}]   ;;  %s9256_s25 = inlined_call_operand.vmem [shape: bf16[2,64,16], index: 25, kind: input, shape index: {}]   ;;  %s9257_s26 = inlined_call_operand.vmem [shape: f32[2,1,16], index: 26, kind: input, shape index: {}]   ;;  %s9258_s27 = inlined_call_operand.vmem [shape: f32[2,2,64,16], index: 27, kind: output, shape index: {}, may-alias: {0,27}]  }
   0x1   :  { %9270 = sst [smem:[#allocation7_spill]] %s9231_s0 }
   0x2   :  { %9271 = sst [smem:[#allocation8_spill]] %s9232_s1 }
   0x3   :  { %9272 = sst [smem:[#allocation9_spill]] %s9233_s2 }
   0x4   :  { %9273 = sst [smem:[#allocation10_spill]] %s9234_s3 }
   0x5   :  { %9274 = sst [smem:[#allocation11_spill]] %s9235_s4  ;;  %s7372_s4 = smov 0  }
   0x6   :  { %9275 = sst [smem:[#allocation12_spill]] %s9236_s5 }
   0x7   :  { %9276 = sst [smem:[#allocation13_spill]] %s9237_s6 }
   0x8   :  { %9277 = sst [smem:[#allocation14_spill]] %s9238_s7  ;;  %s7370_s7 = smov 0  }
   0x9   :  { %9278 = sst [smem:[#allocation15_spill]] %s9239_s8  ;;  %s7374_s8 = smov 0  }
   0xa   :  { %9279 = sst [smem:[#allocation16_spill]] %s9240_s9  ;;  %s7378_s9 = smov 0  }
   0xb   :  { %9280 = sst [smem:[#allocation17_spill]] %s9241_s10 }
   0xc   :  { %9281 = sst [smem:[#allocation18_spill]] %s9242_s11 }
   0xd   :  { %9282 = sst [smem:[#allocation19_spill]] %s9243_s12 }
   0xe   :  { %9283 = sst [smem:[#allocation20_spill]] %s9258_s27 }
   0xf LB: > { %9284 = sst [smem:[#allocation2_spill]] %s7219_s8  ;;  %s46_s5 = sadd.s32 1, %s7219_s8  ;;  %s7227_s9 = sphi %s7378_s9, %s37_s9   ;;  %s7223_s30 = sphi %s7376_s30, %s9308_s30   ;;  %s7219_s8 = sphi %s7374_s8, %s9307_s8   ;;  %s7215_s4 = sphi %s7372_s4, %s9306_s4   ;;  %s7211_s7 = sphi %s7370_s7, %s9305_s7  }
  0x10   : > { %9285 = sst [smem:[#allocation3_spill]] %s7223_s30  ;;  %s49_s28 = sadd.s32 1, %s7223_s30 }
  0x11   : > { %9286 = sst [smem:[#allocation4_spill]] %s7227_s9  ;;  %p47_p0 = scmp.ge.s32.totalorder %s46_s5, 2 }
  0x12   : > { %p6314_p1 = scmp.ge.s32.totalorder %s7227_s9, 1  ;;  %p957_p2 = scmp.lt.s32.totalorder %s7227_s9, 5 }
  0x13   : > { %s9310_s5 = smov (%p47_p0, %s46_s5), 0  ;;  %s9312_s28 = smov (!%p47_p0, %s49_s28), %s7223_s30 }
  0x14   : > { %9287 = sst [smem:[#allocation5_spill]] %s9310_s5  ;;  %p958_p3 = pnand %p6314_p1, %p957_p2 }
  0x15   : > { %p51_p4 = scmp.ge.s32.totalorder %s9312_s28, 2  ;;  %p1133_p5 = scmp.lt.s32.totalorder (!%p958_p3), %s7215_s4, 1 }
  0x16   : > { %961 = sbr.rel (%p958_p3) target bundleno = 7181 (0x1c0d), region = 128  ;;  %p1135_p6 = scmp.lt.s32.totalorder (!%p958_p3), %s7211_s7, 1 }
  0x17   : > { %s9314_s28 = smov (%p51_p4, %s9312_s28), 0  ;;  %s9289_s2 = sld [smem:[#allocation8_spill]] (!%p958_p3) }
  0x18   : > { %9288 = sst [smem:[#allocation6_spill]] %s9314_s28 }
  0x19   : > { %s9297_s12 = sld [smem:[#allocation19_spill]] (!%p958_p3) }
  0x1a   : > { %s9298_s5 = sld [smem:[#allocation16_spill]] (!%p958_p3) }
  0x1b   : > { %s9316_s4 = smov (!%p1133_p5, %s7215_s4), 1  ;;  %s9318_s7 = smov (!%p1135_p6, %s7211_s7), 1  ;;  %vm1268_vm0 = vcmask 130048   ;;  %v7229_v14 = vmov 16.0  }
  0x1c   : > { %s6316_s0 = sshll.u32 %s9316_s4, 4  ;;  %s6315_s10 = sshll.u32 %s9318_s7, 3  ;;  %6831 = vrcp.f32 %v7229_v14 }
  0x1d   : > { %s1139_s29 = sadd.s32 %s6316_s0, %s6315_s10  ;;  %s7472_s7 = sshll.u32 %s9316_s4, 3 }
  0x1e   : > { %s7403_s1 = sshll.u32 %s1139_s29, 3  ;;  %s9290_s29 = sld [smem:[#allocation12_spill]] }
  0x1f   : > { %s7409_s3 = scalar_lea.vmem %s9289_s2, %s7403_s1  ;;  %s9293_s2 = sld [smem:[#allocation13_spill]] }
  0x20   : > { %v1264_v0 = vld [vmem:[%s7409_s3 + $0x20] sm:$0xff]  ;;  %v1262_v1 = vld [vmem:[%s7409_s3 + $0x10] sm:$0xff]  ;;  %v1265_v6 = vld [vmem:[%s7409_s3 + $0x28] sm:$0xff]  ;;  %s9296_s0 = sld [smem:[#allocation18_spill]]  ;;  %s7831_s9 = scalar_lea.vmem %s9245_s14, %s7472_s7 }
  0x21   : > { %v1260_v2 = vld [vmem:[%s7409_s3] sm:$0xff]  ;;  %v1281_v3 = vsel %vm1268_vm0, %v1264_v0, 0.0  ;;  %v1275_v4 = vsel %vm1268_vm0, %v1262_v1, 0.0  ;;  %v1263_v7 = vld [vmem:[%s7409_s3 + $0x18] sm:$0xff]  ;;  %v1261_v8 = vld [vmem:[%s7409_s3 + $0x8] sm:$0xff]  ;;  %v1284_v9 = vsel %vm1268_vm0, %v1265_v6, 0.0  ;;  %s1198_s8 = scalar_lea.vmem %s9246_s15, %s9316_s4 }
  0x22   : > { %v1269_v5 = vsel %vm1268_vm0, %v1260_v2, 0.0  ;;  %1282 = vadd.xlane.f32.xlu2 %v1281_v3  ;;  %1276 = vadd.xlane.f32.xlu1 %v1275_v4  ;;  %v1278_v10 = vsel %vm1268_vm0, %v1263_v7, 0.0  ;;  %v1272_v11 = vsel %vm1268_vm0, %v1261_v8, 0.0  ;;  %v1266_v12 = vld [vmem:[%s7409_s3 + $0x30] sm:$0xff]  ;;  %v6832_v15 = vpop.eup %6831  ;;  %v1267_v36 = vld [vmem:[%s7409_s3 + $0x38] sm:$0xff]  ;;  %s9291_s3 = sld [smem:[#allocation10_spill]] }
  0x23   : > { %1270 = vadd.xlane.f32.xlu0 %v1269_v5  ;;  %v1287_v13 = vsel %vm1268_vm0, %v1266_v12, 0.0  ;;  %v1294_v16 = vmul.f32 16.0, %v6832_v15  ;;  %vm1298_vm1 = vweird.f32 %v6832_v15  ;;  %v1290_v41 = vsel %vm1268_vm0, %v1267_v36, 0.0 }
  0x24   : > { %s1164_s6 = scalar_lea.vmem %s9290_s29, %s7472_s7  ;;  %s9292_s29 = sld [smem:[#allocation11_spill]] }
  0x25   : > { %v1295_v17 = vsub.f32 1.0, %v1294_v16  ;;  %v6747_v61 = vld [vmem:[%s1164_s6] sm:$0xff]  ;;  %s9294_s6 = sld [smem:[#allocation7_spill]]  ;;  %s9295_s30 = scalar_lea.vmem %s9293_s2, %s9316_s4 }
  0x26   : > { %1505 = vmatpush.bf16.msra.mxu0 %v6747_v61 }
  0x27   : > { %v1296_v18 = vmul.f32 %v6832_v15, %v1295_v17 }
  0x29   : > { %v1297_v19 = vadd.f32 %v6832_v15, %v1296_v18 }
  0x2a   : > { %1285 = vadd.xlane.f32.xlu2 %v1284_v9  ;;  %1279 = vadd.xlane.f32.xlu1 %v1278_v10 }
  0x2b   : > { %1273 = vadd.xlane.f32.xlu0 %v1272_v11  ;;  %v7425_v20 = vsel %vm1298_vm1, %v6832_v15, %v1297_v19  ;;  %s7554_s11 = scalar_lea.vmem %s9294_s6, %s7403_s1  ;;  %s9299_s6 = sld [smem:[#allocation17_spill]] }
  0x32   : > { %1288 = vadd.xlane.f32.xlu2 %v1287_v13 }
  0x95   : > { %v1283_v21 = vpop.xlane.xlu2 %1282  ;;  %v1277_v22 = vpop.xlane.xlu1 %1276 }
  0x96   : > { %v1271_v23 = vpop.xlane.xlu0 %1270  ;;  %v1304_v32 = vmul.f32 %v7425_v20, %v1283_v21  ;;  %v1302_v33 = vmul.f32 %v7425_v20, %v1277_v22 }
  0x97   : > { %v1300_v24 = vmul.f32 %v7425_v20, %v1271_v23 }
  0x98   : > { %v7444_v39 = vsub.f32 %v1264_v0, %v1304_v32  ;;  %v7446_v40 = vsub.f32 %v1262_v1, %v1302_v33 }
  0x99   : > { %v7428_v25 = vsub.f32 %v1260_v2, %v1300_v24 }
  0x9a   : > { %v1320_v48 = vmul.f32 %v7444_v39, %v7444_v39  ;;  %v1318_v49 = vmul.f32 %v7446_v40, %v7446_v40 }
  0x9b   : > { %v1316_v26 = vmul.f32 %v7428_v25, %v7428_v25 }
  0x9c   : > { %v1336_v53 = vsel %vm1268_vm0, %v1320_v48, 0.0  ;;  %v1330_v54 = vsel %vm1268_vm0, %v1318_v49, 0.0 }
  0x9d   : > { %v1286_v27 = vpop.xlane.xlu2 %1285  ;;  %v1280_v28 = vpop.xlane.xlu1 %1279  ;;  %v1324_v29 = vsel %vm1268_vm0, %v1316_v26, 0.0 }
  0x9e   : > { %v1303_v30 = vmul.f32 %v7425_v20, %v1280_v28  ;;  %1325 = vadd.xlane.f32.xlu0 %v1324_v29  ;;  %v1274_v31 = vpop.xlane.xlu0 %1273  ;;  %v1305_v47 = vmul.f32 %v7425_v20, %v1286_v27 }
  0x9f   : > { %v1301_v34 = vmul.f32 %v7425_v20, %v1274_v31 }
  0xa0   : > { %v7437_v35 = vsub.f32 %v1263_v7, %v1303_v30  ;;  %v7463_v52 = vsub.f32 %v1265_v6, %v1305_v47 }
  0xa1   : > { %v7440_v37 = vsub.f32 %v1261_v8, %v1301_v34 }
  0xa2   : > { %v1319_v38 = vmul.f32 %v7437_v35, %v7437_v35  ;;  %v1321_v56 = vmul.f32 %v7463_v52, %v7463_v52 }
  0xa3   : > { %v1317_v42 = vmul.f32 %v7440_v37, %v7440_v37 }
  0xa4   : > { %v1333_v43 = vsel %vm1268_vm0, %v1319_v38, 0.0  ;;  %v1339_v57 = vsel %vm1268_vm0, %v1321_v56, 0.0 }
  0xa5   : > { %v1289_v44 = vpop.xlane.xlu2 %1288  ;;  %1334 = vadd.xlane.f32.xlu2 %v1333_v43  ;;  %v1327_v45 = vsel %vm1268_vm0, %v1317_v42, 0.0  ;;  %v7505_v43 = vld [vmem:[%s9291_s3] ss:$0 sm:$0xff] }
  0xa6   : > { %v1306_v46 = vmul.f32 %v7425_v20, %v1289_v44  ;;  %1291 = vadd.xlane.f32.xlu0 %v1290_v41  ;;  %1328 = vadd.xlane.f32.xlu1 %v1327_v45 }
  0xa8   : > { %v7459_v50 = vsub.f32 %v1266_v12, %v1306_v46 }
  0xaa   : > { %v1322_v51 = vmul.f32 %v7459_v50, %v7459_v50 }
  0xac   : > { %v1342_v55 = vsel %vm1268_vm0, %v1322_v51, 0.0 }
  0xad   : > { %1343 = vadd.xlane.f32.xlu2 %v1342_v55 }
  0xae   : > { %1337 = vadd.xlane.f32.xlu0 %v1336_v53  ;;  %1331 = vadd.xlane.f32.xlu1 %v1330_v54 }
  0xb6   : > { %1340 = vadd.xlane.f32.xlu1 %v1339_v57 }
 0x111   : > { %v1326_v58 = vpop.xlane.xlu0 %1325 }
 0x112   : > { %v1348_v59 = vmul.f32 %v1326_v58, %v7425_v20 }
 0x114   : > { %v1356_v60 = vadd.f32 1e-05, %v1348_v59 }
 0x116   : > { %6833 = vrsqrt.f32 %v1356_v60  ;;  %vm1370_vm3 = vweird.f32 %v1356_v60 }
 0x118   : > { %v1335_v62 = vpop.xlane.xlu2 %1334 }
 0x119   : > { %v1351_v63 = vmul.f32 %v1335_v62, %v7425_v20  ;;  %v1329_v0 = vpop.xlane.xlu1 %1328  ;;  %v1292_v1 = vpop.xlane.xlu0 %1291 }
 0x11a   : > { %v1349_v2 = vmul.f32 %v1329_v0, %v7425_v20  ;;  %v1307_v3 = vmul.f32 %v7425_v20, %v1292_v1 }
 0x11b   : > { %v7482_v4 = vadd.f32 1e-05, %v1351_v63 }
 0x11c   : > { %v6834_v5 = vpop.eup %6833  ;;  %v1357_v6 = vadd.f32 1e-05, %v1349_v2  ;;  %v7484_v7 = vsub.f32 %v1267_v36, %v1307_v3 }
 0x11d   : > { %v1365_v8 = vmul.f32 %v6834_v5, %v1356_v60  ;;  %6835 = vrsqrt.f32 %v7482_v4  ;;  %vm1371_vm2 = vweird.f32 %v6834_v5  ;;  %vm1400_vm10 = vweird.f32 %v7482_v4 }
 0x11e   : > { %6837 = vrsqrt.f32 %v1357_v6  ;;  %v1323_v9 = vmul.f32 %v7484_v7, %v7484_v7  ;;  %vm1372_vm4 = vmor %vm1370_vm3, %vm1371_vm2  ;;  %vm1380_vm6 = vweird.f32 %v1357_v6 }
 0x11f   : > { %v1366_v10 = vmul.f32 %v6834_v5, %v1365_v8 }
 0x120   : > { %v1345_v11 = vsel %vm1268_vm0, %v1323_v9, 0.0 }
 0x121   : > { %v1367_v12 = vmul.f32 0.5, %v1366_v10  ;;  %v1332_v13 = vpop.xlane.xlu1 %1331  ;;  %1346 = vadd.xlane.f32.xlu0 %v1345_v11  ;;  %v1338_v15 = vpop.xlane.xlu0 %1337 }
 0x122   : > { %v1350_v14 = vmul.f32 %v1332_v13, %v7425_v20  ;;  %v1352_v22 = vmul.f32 %v1338_v15, %v7425_v20 }
 0x123   : > { %v7491_v16 = vpop.eup %6835  ;;  %v1368_v17 = vsub.f32 1.5, %v1367_v12 }
 0x124   : > { %v6838_v18 = vpop.eup %6837  ;;  %v1358_v19 = vadd.f32 1e-05, %v1350_v14  ;;  %v1395_v24 = vmul.f32 %v7491_v16, %v7482_v4  ;;  %v7496_v28 = vadd.f32 1e-05, %v1352_v22  ;;  %vm1401_vm11 = vweird.f32 %v7491_v16 }
 0x125   : > { %v1375_v21 = vmul.f32 %v6838_v18, %v1357_v6  ;;  %v1369_v23 = vmul.f32 %v6834_v5, %v1368_v17  ;;  %vm1381_vm5 = vweird.f32 %v6838_v18  ;;  %vm1402_vm13 = vmor %vm1400_vm10, %vm1401_vm11 }
 0x126   : > { %6839 = vrsqrt.f32 %v1358_v19  ;;  %v1396_v31 = vmul.f32 %v7491_v16, %v1395_v24  ;;  %vm1382_vm7 = vmor %vm1380_vm6, %vm1381_vm5  ;;  %vm1390_vm8 = vweird.f32 %v1358_v19  ;;  %vm1410_vm1 = vweird.f32 %v7496_v28 }
 0x127   : > { %v1376_v26 = vmul.f32 %v6838_v18, %v1375_v21  ;;  %v1373_v30 = vsel %vm1372_vm4, %v6834_v5, %v1369_v23  ;;  %6841 = vrsqrt.f32 %v7496_v28 }
 0x128   : > { %v1444_v42 = vmul.f32 %v1373_v30, %v7428_v25  ;;  %v1397_v44 = vmul.f32 0.5, %v1396_v31  ;;  %v7512_v25 = vld [vmem:[%s9292_s29] ss:$0 sm:$0xff] }
 0x129   : > { %v1377_v27 = vmul.f32 0.5, %v1376_v26  ;;  %v1341_v29 = vpop.xlane.xlu1 %1340  ;;  %v1344_v26 = vpop.xlane.xlu2 %1343 }
 0x12a   : > { %v1353_v32 = vmul.f32 %v1341_v29, %v7425_v20  ;;  %v1455_v49 = vmul.f32 %v7505_v43, %v1444_v42  ;;  %v1398_v51 = vsub.f32 1.5, %v1397_v44 }
 0x12b   : > { %v1378_v33 = vsub.f32 1.5, %v1377_v27  ;;  %v1354_v27 = vmul.f32 %v1344_v26, %v7425_v20 }
 0x12c   : > { %v6840_v34 = vpop.eup %6839  ;;  %v1361_v36 = vadd.f32 1e-05, %v1353_v32  ;;  %v1466_v58 = vadd.f32 %v7512_v25, %v1455_v49  ;;  %v1399_v59 = vmul.f32 %v7491_v16, %v1398_v51 }
 0x12d   : > { %v1379_v38 = vmul.f32 %v6838_v18, %v1378_v33  ;;  %v1385_v41 = vmul.f32 %v6840_v34, %v1358_v19  ;;  %vm1391_vm9 = vweird.f32 %v6840_v34  ;;  %v6842_v54 = vpop.eup %6841 }
 0x12e   : > { %6843 = vrsqrt.f32 %v1361_v36  ;;  %vm1392_vm12 = vmor %vm1390_vm8, %vm1391_vm9  ;;  %v1405_v60 = vmul.f32 %v6842_v54, %v7496_v28  ;;  %v1403_v1 = vsel %vm1402_vm13, %v7491_v16, %v1399_v59  ;;  %vm1420_vm14 = vweird.f32 %v1361_v36  ;;  %v1249_v59 = vld [vmem:[%s7554_s11 + $0x8] sm:$0xff] }
 0x12f   : > { %v1383_v45 = vsel %vm1382_vm7, %v6838_v18, %v1379_v38  ;;  %v1386_v46 = vmul.f32 %v6840_v34, %v1385_v41  ;;  %v1447_v5 = vmul.f32 %v1403_v1, %v7437_v35  ;;  %vm1411_vm2 = vweird.f32 %v6842_v54 }
 0x130   : > { %v1445_v47 = vmul.f32 %v1383_v45, %v7440_v37  ;;  %v1406_v2 = vmul.f32 %v6842_v54, %v1405_v60  ;;  %vm1412_vm4 = vmor %vm1410_vm1, %vm1411_vm2  ;;  %v1362_v28 = vadd.f32 1e-05, %v1354_v27 }
 0x131   : > { %v1387_v48 = vmul.f32 0.5, %v1386_v46  ;;  %v1458_v10 = vmul.f32 %v7505_v43, %v1447_v5  ;;  %v1251_v5 = vld [vmem:[%s7554_s11 + $0x18] sm:$0xff] }
 0x132   : > { %v1456_v53 = vmul.f32 %v7505_v43, %v1445_v47  ;;  %v1407_v6 = vmul.f32 0.5, %v1406_v2  ;;  %6845 = vrsqrt.f32 %v1362_v28  ;;  %vm1430_vm5 = vweird.f32 %v1362_v28 }
 0x133   : > { %v1388_v55 = vsub.f32 1.5, %v1387_v48 }
 0x134   : > { %v1467_v37 = vadd.f32 %v7512_v25, %v1456_v53  ;;  %v6844_v56 = vpop.eup %6843  ;;  %v1408_v11 = vsub.f32 1.5, %v1407_v6 }
 0x135   : > { %v1389_v57 = vmul.f32 %v6840_v34, %v1388_v55  ;;  %v1415_v61 = vmul.f32 %v6844_v56, %v1361_v36  ;;  %vm1421_vm15 = vweird.f32 %v6844_v56 }
 0x136   : > { %v1474_v62 = vpack.c.bf16 %v1467_v37, %v1466_v58  ;;  %vm1422_vm3 = vmor %vm1420_vm14, %vm1421_vm15  ;;  %v1409_v14 = vmul.f32 %v6842_v54, %v1408_v11  ;;  %v1252_v11 = vld [vmem:[%s7554_s11 + $0x20] sm:$0xff] }
 0x137   : > { %v1393_v63 = vsel %vm1392_vm12, %v6840_v34, %v1389_v57  ;;  %v1416_v0 = vmul.f32 %v6844_v56, %v1415_v61 }
 0x138   : > { %6355 = vmatmul.msk.bf16.vlgmr.msra.gmra.mxu0 %vm1268_vm0, %v1474_v62  ;;  %v1446_v3 = vmul.f32 %v1393_v63, %v7446_v40  ;;  %v1469_v40 = vadd.f32 %v7512_v25, %v1458_v10  ;;  %v1413_v16 = vsel %vm1412_vm4, %v6842_v54, %v1409_v14  ;;  %v6846_v29 = vpop.eup %6845 }
 0x139   : > { %v1417_v4 = vmul.f32 0.5, %v1416_v0  ;;  %v1448_v18 = vmul.f32 %v1413_v16, %v7444_v39  ;;  %vm1431_vm6 = vweird.f32 %v6846_v29  ;;  %v1250_v0 = vld [vmem:[%s7554_s11 + $0x10] sm:$0xff] }
 0x13a   : > { %v1457_v8 = vmul.f32 %v7505_v43, %v1446_v3  ;;  %vm1432_vm7 = vmor %vm1430_vm5, %vm1431_vm6 }
 0x13b   : > { %v1418_v9 = vsub.f32 1.5, %v1417_v4  ;;  %v1459_v21 = vmul.f32 %v7505_v43, %v1448_v18 }
 0x13c   : > { %v1468_v12 = vadd.f32 %v7512_v25, %v1457_v8 }
 0x13d   : > { %v1419_v13 = vmul.f32 %v6844_v56, %v1418_v9  ;;  %v1470_v23 = vadd.f32 %v7512_v25, %v1459_v21 }
 0x13e   : > { %v1475_v35 = vpack.c.bf16 %v1469_v40, %v1468_v12 }
 0x13f   : > { %v1423_v15 = vsel %vm1422_vm3, %v6844_v56, %v1419_v13 }
 0x140   : > { %v1449_v17 = vmul.f32 %v1423_v15, %v7463_v52  ;;  %v1425_v52 = vmul.f32 %v6846_v29, %v1362_v28 }
 0x142   : > { %v1460_v19 = vmul.f32 %v7505_v43, %v1449_v17  ;;  %v1426_v30 = vmul.f32 %v6846_v29, %v1425_v52 }
 0x144   : > { %v1471_v22 = vadd.f32 %v7512_v25, %v1460_v19  ;;  %v1427_v33 = vmul.f32 0.5, %v1426_v30  ;;  %v1254_v19 = vld [vmem:[%s7554_s11 + $0x30] sm:$0xff]  ;;  %v1255_v30 = vld [vmem:[%s7554_s11 + $0x38] sm:$0xff] }
 0x146   : > { %v1476_v24 = vpack.c.bf16 %v1471_v22, %v1470_v23  ;;  %v1428_v34 = vsub.f32 1.5, %v1427_v33 }
 0x148   : > { %6356 = vmatmul.msk.bf16.gmra.mxu0 %vm1268_vm0, %v1475_v35  ;;  %v1429_v38 = vmul.f32 %v6846_v29, %v1428_v34  ;;  %v1253_v35 = vld [vmem:[%s7554_s11 + $0x28] sm:$0xff] }
 0x14a   : > { %v1433_v44 = vsel %vm1432_vm7, %v6846_v29, %v1429_v38 }
 0x14b   : > { %v1450_v47 = vmul.f32 %v1433_v44, %v7459_v50 }
 0x14d   : > { %v1461_v53 = vmul.f32 %v7505_v43, %v1450_v47 }
 0x14f   : > { %v1472_v55 = vadd.f32 %v7512_v25, %v1461_v53 }
 0x158   : > { %6357 = vmatmul.msk.bf16.gmra.mxu0 %vm1268_vm0, %v1476_v24 }
 0x194   : > { %v1347_v39 = vpop.xlane.xlu0 %1346 }
 0x195   : > { %v1355_v31 = vmul.f32 %v1347_v39, %v7425_v20 }
 0x197   : > { %v1363_v32 = vadd.f32 1e-05, %v1355_v31 }
 0x199   : > { %6847 = vrsqrt.f32 %v1363_v32  ;;  %vm1440_vm9 = vweird.f32 %v1363_v32 }
 0x19f   : > { %v6848_v36 = vpop.eup %6847 }
 0x1a0   : > { %v1435_v41 = vmul.f32 %v6848_v36, %v1363_v32  ;;  %vm1441_vm8 = vweird.f32 %v6848_v36 }
 0x1a1   : > { %vm1442_vm10 = vmor %vm1440_vm9, %vm1441_vm8 }
 0x1a2   : > { %v1436_v42 = vmul.f32 %v6848_v36, %v1435_v41 }
 0x1a4   : > { %v1437_v45 = vmul.f32 0.5, %v1436_v42 }
 0x1a6   : > { %v1438_v46 = vsub.f32 1.5, %v1437_v45 }
 0x1a8   : > { %v1439_v48 = vmul.f32 %v6848_v36, %v1438_v46 }
 0x1aa   : > { %v1443_v49 = vsel %vm1442_vm10, %v6848_v36, %v1439_v48 }
 0x1ab   : > { %v1451_v51 = vmul.f32 %v1443_v49, %v7484_v7  ;;  %v1248_v7 = vld [vmem:[%s7554_s11] sm:$0xff] }
 0x1ad   : > { %v1462_v54 = vmul.f32 %v7505_v43, %v1451_v51  ;;  %v6821_v43 = vld [vmem:[%s9295_s30] ss:$0 sm:$0xff]  ;;  %s7645_s30 = sshll.u32 %s9316_s4, 5 }
 0x1ae   : > { %s7651_s10 = scalar_lea.vmem %s9296_s0, %s7645_s30  ;;  %s7657_s2 = scalar_lea.vmem %s9297_s12, %s7645_s30 }
 0x1af   : > { %v1473_v37 = vadd.f32 %v7512_v25, %v1462_v54  ;;  %s7663_s27 = scalar_lea.vmem %s9244_s13, %s7645_s30  ;;  %s8418_s12 = scalar_lea.vmem %s9249_s18, %s7645_s30 }
 0x1b0   : > { %s1226_s0 = scalar_lea.vmem %s9254_s23, %s7472_s7  ;;  %s9044_s11 = scalar_lea.vmem %s9256_s25, %s7645_s30 }
 0x1b1   : > { %v1477_v50 = vpack.c.bf16 %v1473_v37, %v1472_v55 }
 0x1b3   : > { %6358 = vmatmul.msk.bf16.gmra.mxu0 %vm1268_vm0, %v1477_v50 }
 0x1b5   : > { %v1507_v56 = vpop.f32.mrf.mxu0 }
 0x1b6   : > { %v1527_v57 = vadd.f32 %v1507_v56, %v1248_v7 }
 0x1b8   : > { %v7563_v25 = vadd.f32 %v6821_v43, %v1527_v57 }
 0x1ba   : > { %v1547_v58 = vsel %vm1268_vm0, %v7563_v25, 0.0 }
 0x1bb   : > { %1548 = vadd.xlane.f32.xlu1 %v1547_v58 }
 0x1bd   : > { %v1509_v60 = vpop.f32.mrf.mxu0 }
 0x1be   : > { %v1528_v61 = vadd.f32 %v1509_v60, %v1249_v59 }
 0x1c0   : > { %v7568_v62 = vadd.f32 %v6821_v43, %v1528_v61 }
 0x1c2   : > { %v1550_v63 = vsel %vm1268_vm0, %v7568_v62, 0.0 }
 0x1c3   : > { %1551 = vadd.xlane.f32.xlu2 %v1550_v63 }
 0x1c5   : > { %v1512_v1 = vpop.f32.mrf.mxu0 }
 0x1c6   : > { %v1529_v2 = vadd.f32 %v1512_v1, %v1250_v0 }
 0x1c8   : > { %v7573_v3 = vadd.f32 %v6821_v43, %v1529_v2 }
 0x1ca   : > { %v1553_v4 = vsel %vm1268_vm0, %v7573_v3, 0.0 }
 0x1cb   : > { %1554 = vadd.xlane.f32.xlu0 %v1553_v4 }
 0x1cd   : > { %v1514_v6 = vpop.f32.mrf.mxu0 }
 0x1ce   : > { %v1530_v8 = vadd.f32 %v1514_v6, %v1251_v5  ;;  %v6748_v5 = vld [vmem:[%s7651_s10] sm:$0xff] }
 0x1cf   : > { %v6749_v6 = vld [vmem:[%s7657_s2] sm:$0xff]  ;;  %1777 = vmatpush.bf16.msra.mxu1 %v6748_v5 }
 0x1d0   : > { %v7578_v9 = vadd.f32 %v6821_v43, %v1530_v8  ;;  %v6750_v8 = vld [vmem:[%s7663_s27] sm:$0xff]  ;;  %1814 = vmatpush.bf16.msra.mxu2 %v6749_v6 }
 0x1d1   : > { %1851 = vmatpush.bf16.msra.mxu3 %v6750_v8 }
 0x1d2   : > { %v1556_v10 = vsel %vm1268_vm0, %v7578_v9, 0.0 }
 0x1d3   : > { %1557 = vadd.xlane.f32.xlu1 %v1556_v10 }
 0x1d5   : > { %v1517_v12 = vpop.f32.mrf.mxu0 }
 0x1d6   : > { %v1531_v13 = vadd.f32 %v1517_v12, %v1252_v11 }
 0x1d8   : > { %v7583_v40 = vadd.f32 %v6821_v43, %v1531_v13 }
 0x1da   : > { %v1559_v14 = vsel %vm1268_vm0, %v7583_v40, 0.0 }
 0x1db   : > { %1560 = vadd.xlane.f32.xlu2 %v1559_v14 }
 0x1dd   : > { %v1519_v15 = vpop.f32.mrf.mxu0 }
 0x1de   : > { %v1532_v16 = vadd.f32 %v1519_v15, %v1253_v35 }
 0x1e0   : > { %v7588_v17 = vadd.f32 %v6821_v43, %v1532_v16 }
 0x1e2   : > { %v1562_v18 = vsel %vm1268_vm0, %v7588_v17, 0.0 }
 0x1e3   : > { %1563 = vadd.xlane.f32.xlu0 %v1562_v18 }
 0x22e   : > { %v1549_v21 = vpop.xlane.xlu1 %1548 }
 0x22f   : > { %v1571_v22 = vmul.f32 %v1549_v21, %v7425_v20 }
 0x230   : > { %v1522_v23 = vpop.f32.mrf.mxu0 }
 0x231   : > { %v1533_v24 = vadd.f32 %v1522_v23, %v1254_v19  ;;  %v7595_v26 = vsub.f32 %v7563_v25, %v1571_v22 }
 0x233   : > { %v7597_v27 = vadd.f32 %v6821_v43, %v1533_v24  ;;  %v1587_v28 = vmul.f32 %v7595_v26, %v7595_v26 }
 0x235   : > { %v1565_v29 = vsel %vm1268_vm0, %v7597_v27, 0.0  ;;  %v1595_v52 = vsel %vm1268_vm0, %v1587_v28, 0.0 }
 0x236   : > { %1566 = vadd.xlane.f32.xlu0 %v1565_v29  ;;  %v1552_v39 = vpop.xlane.xlu2 %1551  ;;  %1596 = vadd.xlane.f32.xlu1 %v1595_v52 }
 0x237   : > { %v1572_v31 = vmul.f32 %v1552_v39, %v7425_v20 }
 0x238   : > { %v1524_v32 = vpop.f32.mrf.mxu0 }
 0x239   : > { %v1534_v33 = vadd.f32 %v1524_v32, %v1255_v30  ;;  %v7607_v34 = vsub.f32 %v7568_v62, %v1572_v31 }
 0x23b   : > { %v7609_v36 = vadd.f32 %v6821_v43, %v1534_v33  ;;  %v1588_v38 = vmul.f32 %v7607_v34, %v7607_v34 }
 0x23d   : > { %v1568_v41 = vsel %vm1268_vm0, %v7609_v36, 0.0  ;;  %v1598_v42 = vsel %vm1268_vm0, %v1588_v38, 0.0 }
 0x23e   : > { %v1555_v44 = vpop.xlane.xlu0 %1554  ;;  %1599 = vadd.xlane.f32.xlu2 %v1598_v42  ;;  %1569 = vadd.xlane.f32.xlu1 %v1568_v41 }
 0x23f   : > { %v1573_v45 = vmul.f32 %v1555_v44, %v7425_v20 }
 0x241   : > { %v7618_v46 = vsub.f32 %v7573_v3, %v1573_v45 }
 0x243   : > { %v1589_v47 = vmul.f32 %v7618_v46, %v7618_v46 }
 0x245   : > { %v1601_v48 = vsel %vm1268_vm0, %v1589_v47, 0.0 }
 0x246   : > { %1602 = vadd.xlane.f32.xlu2 %v1601_v48  ;;  %v1558_v49 = vpop.xlane.xlu1 %1557 }
 0x247   : > { %v1574_v51 = vmul.f32 %v1558_v49, %v7425_v20  ;;  %v7689_v49 = vld [vmem:[%s9298_s5] ss:$0 sm:$0xff] }
 0x249   : > { %v7625_v53 = vsub.f32 %v7578_v9, %v1574_v51 }
 0x24b   : > { %v1590_v54 = vmul.f32 %v7625_v53, %v7625_v53 }
 0x24d   : > { %v1604_v55 = vsel %vm1268_vm0, %v1590_v54, 0.0 }
 0x24e   : > { %v1561_v37 = vpop.xlane.xlu2 %1560  ;;  %1605 = vadd.xlane.f32.xlu0 %v1604_v55 }
 0x24f   : > { %v1575_v50 = vmul.f32 %v1561_v37, %v7425_v20 }
 0x251   : > { %v7632_v7 = vsub.f32 %v7583_v40, %v1575_v50 }
 0x253   : > { %v1591_v43 = vmul.f32 %v7632_v7, %v7632_v7 }
 0x255   : > { %v1607_v56 = vsel %vm1268_vm0, %v1591_v43, 0.0 }
 0x256   : > { %v1564_v57 = vpop.xlane.xlu0 %1563  ;;  %1608 = vadd.xlane.f32.xlu1 %v1607_v56  ;;  %v7695_v56 = vld [vmem:[%s9299_s6] ss:$0 sm:$0xff] }
 0x257   : > { %v1576_v58 = vmul.f32 %v1564_v57, %v7425_v20 }
 0x259   : > { %v7639_v59 = vsub.f32 %v7588_v17, %v1576_v58 }
 0x25b   : > { %v1592_v60 = vmul.f32 %v7639_v59, %v7639_v59 }
 0x25d   : > { %v1610_v61 = vsel %vm1268_vm0, %v1592_v60, 0.0 }
 0x25e   : > { %1611 = vadd.xlane.f32.xlu2 %v1610_v61 }
 0x2a9   : > { %v1567_v63 = vpop.xlane.xlu0 %1566  ;;  %v1597_v1 = vpop.xlane.xlu1 %1596 }
 0x2aa   : > { %v1577_v0 = vmul.f32 %v1567_v63, %v7425_v20  ;;  %v1619_v2 = vmul.f32 %v1597_v1, %v7425_v20 }
 0x2ac   : > { %v7668_v4 = vsub.f32 %v7597_v27, %v1577_v0  ;;  %v1627_v10 = vadd.f32 1e-05, %v1619_v2 }
 0x2ae   : > { %v1593_v11 = vmul.f32 %v7668_v4, %v7668_v4  ;;  %6849 = vrsqrt.f32 %v1627_v10  ;;  %vm1641_vm12 = vweird.f32 %v1627_v10 }
 0x2b0   : > { %v1613_v12 = vsel %vm1268_vm0, %v1593_v11, 0.0 }
 0x2b1   : > { %1614 = vadd.xlane.f32.xlu0 %v1613_v12  ;;  %v1600_v13 = vpop.xlane.xlu2 %1599  ;;  %v1570_v14 = vpop.xlane.xlu1 %1569 }
 0x2b2   : > { %v1620_v35 = vmul.f32 %v1600_v13, %v7425_v20  ;;  %v1578_v15 = vmul.f32 %v1570_v14, %v7425_v20 }
 0x2b4   : > { %v6850_v16 = vpop.eup %6849  ;;  %v1628_v18 = vadd.f32 1e-05, %v1620_v35  ;;  %v7679_v19 = vsub.f32 %v7609_v36, %v1578_v15 }
 0x2b5   : > { %v1636_v21 = vmul.f32 %v6850_v16, %v1627_v10  ;;  %vm1642_vm11 = vweird.f32 %v6850_v16 }
 0x2b6   : > { %6851 = vrsqrt.f32 %v1628_v18  ;;  %v1594_v22 = vmul.f32 %v7679_v19, %v7679_v19  ;;  %vm1643_vm13 = vmor %vm1641_vm12, %vm1642_vm11  ;;  %vm1651_vm15 = vweird.f32 %v1628_v18 }
 0x2b7   : > { %v1637_v23 = vmul.f32 %v6850_v16, %v1636_v21 }
 0x2b8   : > { %v1616_v24 = vsel %vm1268_vm0, %v1594_v22, 0.0 }
 0x2b9   : > { %v1638_v28 = vmul.f32 0.5, %v1637_v23  ;;  %v1603_v29 = vpop.xlane.xlu2 %1602  ;;  %1617 = vadd.xlane.f32.xlu1 %v1616_v24 }
 0x2ba   : > { %v1621_v52 = vmul.f32 %v1603_v29, %v7425_v20 }
 0x2bb   : > { %v1639_v30 = vsub.f32 1.5, %v1638_v28 }
 0x2bc   : > { %v6852_v39 = vpop.eup %6851  ;;  %v1629_v31 = vadd.f32 1e-05, %v1621_v52 }
 0x2bd   : > { %v1640_v32 = vmul.f32 %v6850_v16, %v1639_v30  ;;  %v1646_v33 = vmul.f32 %v6852_v39, %v1628_v18  ;;  %vm1652_vm14 = vweird.f32 %v6852_v39 }
 0x2be   : > { %6853 = vrsqrt.f32 %v1629_v31  ;;  %vm1653_vm1 = vmor %vm1651_vm15, %vm1652_vm14  ;;  %vm1661_vm3 = vweird.f32 %v1629_v31 }
 0x2bf   : > { %v1647_v38 = vmul.f32 %v6852_v39, %v1646_v33  ;;  %v1644_v41 = vsel %vm1643_vm13, %v6850_v16, %v1640_v32 }
 0x2c0   : > { %v1715_v51 = vmul.f32 %v1644_v41, %v7595_v26 }
 0x2c1   : > { %v1648_v42 = vmul.f32 0.5, %v1647_v38  ;;  %v1606_v44 = vpop.xlane.xlu0 %1605 }
 0x2c2   : > { %v1622_v45 = vmul.f32 %v1606_v44, %v7425_v20  ;;  %v1726_v57 = vmul.f32 %v7689_v49, %v1715_v51 }
 0x2c3   : > { %v1649_v47 = vsub.f32 1.5, %v1648_v42 }
 0x2c4   : > { %v6854_v48 = vpop.eup %6853  ;;  %v1630_v54 = vadd.f32 1e-05, %v1622_v45  ;;  %v1737_v2 = vadd.f32 %v7695_v56, %v1726_v57 }
 0x2c5   : > { %v1650_v55 = vmul.f32 %v6852_v39, %v1649_v47  ;;  %v1656_v37 = vmul.f32 %v6854_v48, %v1629_v31  ;;  %vm1662_vm2 = vweird.f32 %v6854_v48 }
 0x2c6   : > { %6855 = vrsqrt.f32 %v1630_v54  ;;  %vm1663_vm4 = vmor %vm1661_vm3, %vm1662_vm2  ;;  %vm1671_vm6 = vweird.f32 %v1630_v54 }
 0x2c7   : > { %v1654_v50 = vsel %vm1653_vm1, %v6852_v39, %v1650_v55  ;;  %v1657_v43 = vmul.f32 %v6854_v48, %v1656_v37 }
 0x2c8   : > { %v1716_v58 = vmul.f32 %v1654_v50, %v7607_v34 }
 0x2c9   : > { %v1658_v60 = vmul.f32 0.5, %v1657_v43  ;;  %v1609_v61 = vpop.xlane.xlu1 %1608 }
 0x2ca   : > { %v1727_v26 = vmul.f32 %v7689_v49, %v1716_v58  ;;  %v1623_v63 = vmul.f32 %v1609_v61, %v7425_v20 }
 0x2cb   : > { %v1659_v0 = vsub.f32 1.5, %v1658_v60 }
 0x2cc   : > { %v6856_v1 = vpop.eup %6855  ;;  %v1738_v5 = vadd.f32 %v7695_v56, %v1727_v26  ;;  %v1631_v6 = vadd.f32 1e-05, %v1623_v63 }
 0x2cd   : > { %v1660_v8 = vmul.f32 %v6854_v48, %v1659_v0  ;;  %v1666_v10 = vmul.f32 %v6856_v1, %v1630_v54  ;;  %vm1672_vm5 = vweird.f32 %v6856_v1 }
 0x2ce   : > { %v7703_v11 = vpack.c.bf16 %v1738_v5, %v1737_v2  ;;  %6857 = vrsqrt.f32 %v1631_v6  ;;  %vm1673_vm7 = vmor %vm1671_vm6, %vm1672_vm5  ;;  %vm1681_vm9 = vweird.f32 %v1631_v6  ;;  %vm1881_vm5 = vcmask 31744  }
 0x2cf   : > { %v1667_v34 = vmul.f32 %v6856_v1, %v1666_v10  ;;  %v1664_v12 = vsel %vm1663_vm4, %v6854_v48, %v1660_v8  ;;  %v6751_v8 = vld [vmem:[%s7651_s10 + $0x8] sm:$0xff]  ;;  %vm1943_vm6 = vcmask 523264  }
 0x2d0   : > { %6363 = vmatmul.msk.bf16.vlgmr.msra.gmra.mxu1 %vm1268_vm0, %v7703_v11  ;;  %6371 = vmatmul.msk.bf16.vlgmr.msra.gmra.mxu2 %vm1268_vm0, %v7703_v11  ;;  %v1717_v18 = vmul.f32 %v1664_v12, %v7618_v46  ;;  %v6752_v10 = vld [vmem:[%s7657_s2 + $0x8] sm:$0xff] }
 0x2d1   : > { %v1668_v13 = vmul.f32 0.5, %v1667_v34  ;;  %6379 = vmatmul.msk.bf16.vlgmr.msra.gmra.mxu3 %vm1268_vm0, %v7703_v11  ;;  %v1612_v14 = vpop.xlane.xlu2 %1611  ;;  %2102 = vmatpush.bf16.msrb.mxu2 %v6751_v8 }
 0x2d2   : > { %v1624_v35 = vmul.f32 %v1612_v14, %v7425_v20  ;;  %v1728_v29 = vmul.f32 %v7689_v49, %v1717_v18  ;;  %2140 = vmatpush.bf16.msrb.mxu3 %v6752_v10 }
 0x2d3   : > { %v1669_v15 = vsub.f32 1.5, %v1668_v13 }
 0x2d4   : > { %v6858_v16 = vpop.eup %6857  ;;  %v1632_v21 = vadd.f32 1e-05, %v1624_v35  ;;  %v1739_v33 = vadd.f32 %v7695_v56, %v1728_v29 }
 0x2d5   : > { %v1670_v22 = vmul.f32 %v6856_v1, %v1669_v15  ;;  %v1676_v23 = vmul.f32 %v6858_v16, %v1631_v6  ;;  %vm1682_vm8 = vweird.f32 %v6858_v16 }
 0x2d6   : > { %6859 = vrsqrt.f32 %v1632_v21  ;;  %vm1683_vm10 = vmor %vm1681_vm9, %vm1682_vm8  ;;  %vm1691_vm12 = vweird.f32 %v1632_v21 }
 0x2d7   : > { %v1674_v24 = vsel %vm1673_vm7, %v6856_v1, %v1670_v22  ;;  %v1677_v28 = vmul.f32 %v6858_v16, %v1676_v23  ;;  %vm2424_vm7 = vcmask 1041408  }
 0x2d8   : > { %v1718_v52 = vmul.f32 %v1674_v24, %v7625_v53 }
 0x2d9   : > { %v1678_v30 = vmul.f32 0.5, %v1677_v28 }
 0x2da   : > { %v1729_v39 = vmul.f32 %v7689_v49, %v1718_v52 }
 0x2db   : > { %v1679_v31 = vsub.f32 1.5, %v1678_v30 }
 0x2dc   : > { %v6860_v32 = vpop.eup %6859  ;;  %v1740_v46 = vadd.f32 %v7695_v56, %v1729_v39 }
 0x2dd   : > { %v1680_v38 = vmul.f32 %v6858_v16, %v1679_v31  ;;  %v1686_v41 = vmul.f32 %v6860_v32, %v1632_v21  ;;  %vm1692_vm11 = vweird.f32 %v6860_v32 }
 0x2de   : > { %v7718_v42 = vpack.c.bf16 %v1740_v46, %v1739_v33  ;;  %vm1693_vm13 = vmor %vm1691_vm12, %vm1692_vm11 }
 0x2df   : > { %v1687_v44 = vmul.f32 %v6860_v32, %v1686_v41  ;;  %v1684_v53 = vsel %vm1683_vm10, %v6858_v16, %v1680_v38 }
 0x2e0   : > { %6364 = vmatmul.msk.bf16.gmra.mxu1 %vm1268_vm0, %v7718_v42  ;;  %6372 = vmatmul.msk.bf16.gmra.mxu2 %vm1268_vm0, %v7718_v42  ;;  %v1719_v48 = vmul.f32 %v1684_v53, %v7632_v7 }
 0x2e1   : > { %v1688_v45 = vmul.f32 0.5, %v1687_v44  ;;  %6380 = vmatmul.msk.bf16.gmra.mxu3 %vm1268_vm0, %v7718_v42 }
 0x2e2   : > { %v1730_v55 = vmul.f32 %v7689_v49, %v1719_v48 }
 0x2e3   : > { %v1689_v47 = vsub.f32 1.5, %v1688_v45 }
 0x2e4   : > { %v1741_v43 = vadd.f32 %v7695_v56, %v1730_v55 }
 0x2e5   : > { %v1690_v51 = vmul.f32 %v6860_v32, %v1689_v47 }
 0x2e7   : > { %v1694_v54 = vsel %vm1693_vm13, %v6860_v32, %v1690_v51 }
 0x2e8   : > { %v1720_v37 = vmul.f32 %v1694_v54, %v7639_v59 }
 0x2ea   : > { %v1731_v50 = vmul.f32 %v7689_v49, %v1720_v37 }
 0x2ec   : > { %v1742_v57 = vadd.f32 %v7695_v56, %v1731_v50 }
 0x2ee   : > { %v7732_v58 = vpack.c.bf16 %v1742_v57, %v1741_v43 }
 0x2f0   : > { %6365 = vmatmul.msk.bf16.gmra.mxu1 %vm1268_vm0, %v7732_v58  ;;  %6373 = vmatmul.msk.bf16.gmra.mxu2 %vm1268_vm0, %v7732_v58 }
 0x2f1   : > { %6381 = vmatmul.msk.bf16.gmra.mxu3 %vm1268_vm0, %v7732_v58 }
 0x324   : > { %v1615_v7 = vpop.xlane.xlu0 %1614 }
 0x325   : > { %v1625_v59 = vmul.f32 %v1615_v7, %v7425_v20 }
 0x327   : > { %v1633_v60 = vadd.f32 1e-05, %v1625_v59 }
 0x329   : > { %6861 = vrsqrt.f32 %v1633_v60  ;;  %vm1701_vm15 = vweird.f32 %v1633_v60 }
 0x32c   : > { %v1618_v61 = vpop.xlane.xlu1 %1617 }
 0x32d   : > { %v1626_v26 = vmul.f32 %v1618_v61, %v7425_v20 }
 0x32f   : > { %v6862_v63 = vpop.eup %6861  ;;  %v1634_v1 = vadd.f32 1e-05, %v1626_v26 }
 0x330   : > { %v1696_v0 = vmul.f32 %v6862_v63, %v1633_v60  ;;  %vm1702_vm14 = vweird.f32 %v6862_v63 }
 0x331   : > { %6863 = vrsqrt.f32 %v1634_v1  ;;  %vm1703_vm1 = vmor %vm1701_vm15, %vm1702_vm14  ;;  %vm1711_vm3 = vweird.f32 %v1634_v1 }
 0x332   : > { %v1697_v2 = vmul.f32 %v6862_v63, %v1696_v0 }
 0x334   : > { %v1698_v5 = vmul.f32 0.5, %v1697_v2 }
 0x336   : > { %v1699_v6 = vsub.f32 1.5, %v1698_v5 }
 0x337   : > { %v6864_v34 = vpop.eup %6863 }
 0x338   : > { %v1700_v12 = vmul.f32 %v6862_v63, %v1699_v6  ;;  %v1706_v13 = vmul.f32 %v6864_v34, %v1634_v1  ;;  %vm1712_vm2 = vweird.f32 %v6864_v34 }
 0x339   : > { %vm1713_vm4 = vmor %vm1711_vm3, %vm1712_vm2 }
 0x33a   : > { %v1707_v14 = vmul.f32 %v6864_v34, %v1706_v13  ;;  %v1704_v35 = vsel %vm1703_vm1, %v6862_v63, %v1700_v12 }
 0x33b   : > { %v1721_v18 = vmul.f32 %v1704_v35, %v7668_v4 }
 0x33c   : > { %v1708_v15 = vmul.f32 0.5, %v1707_v14 }
 0x33d   : > { %v1732_v23 = vmul.f32 %v7689_v49, %v1721_v18  ;;  %v6753_v18 = vld [vmem:[%s7663_s27 + $0x8] sm:$0xff] }
 0x33e   : > { %v1709_v16 = vsub.f32 1.5, %v1708_v15 }
 0x33f   : > { %v1743_v29 = vadd.f32 %v7695_v56, %v1732_v23 }
 0x340   : > { %v1710_v21 = vmul.f32 %v6864_v34, %v1709_v16 }
 0x342   : > { %v1714_v22 = vsel %vm1713_vm4, %v6864_v34, %v1710_v21 }
 0x343   : > { %v1722_v24 = vmul.f32 %v1714_v22, %v7679_v19 }
 0x345   : > { %v1733_v28 = vmul.f32 %v7689_v49, %v1722_v24 }
 0x347   : > { %v1744_v52 = vadd.f32 %v7695_v56, %v1733_v28 }
 0x349   : > { %v7750_v30 = vpack.c.bf16 %v1744_v52, %v1743_v29 }
 0x34b   : > { %6366 = vmatmul.msk.bf16.gmra.mxu1 %vm1268_vm0, %v7750_v30  ;;  %6374 = vmatmul.msk.bf16.gmra.mxu2 %vm1268_vm0, %v7750_v30 }
 0x34c   : > { %6382 = vmatmul.msk.bf16.gmra.mxu3 %vm1268_vm0, %v7750_v30 }
 0x34d   : > { %v1779_v57 = vpop.f32.mrf.mxu1 }
 0x353   : > { %v1816_v4 = vpop.f32.mrf.mxu2 }
 0x354   : > { %v1853_v19 = vpop.f32.mrf.mxu3 }
 0x355   : > { %v1781_v0 = vpop.f32.mrf.mxu1 }
 0x356   : > { %v1873_v8 = vpack.c.bf16 %v1781_v0, %v1779_v57 }
 0x35b   : > { %6397 = vmatmul.msk.bf16.vlgmr.msrb.gmra.mxu2 %vm1268_vm0, %v7703_v11  ;;  %v1818_v49 = vpop.f32.mrf.mxu2 }
 0x35c   : > { %6407 = vmatmul.msk.bf16.vlgmr.msrb.gmra.mxu3 %vm1268_vm0, %v7703_v11  ;;  %v1855_v56 = vpop.f32.mrf.mxu3  ;;  %v1877_v1 = vpack.c.bf16 %v1818_v49, %v1816_v4 }
 0x35d   : > { %v2036_v60 = vpack.c.bf16 %v1855_v56, %v1853_v19  ;;  %v1784_v6 = vpop.f32.mrf.mxu1 }
 0x35e   : > { %v1895_v5 = vsel %vm1881_vm5, %v1877_v1, 0 }
 0x363   : > { %v1821_v39 = vpop.f32.mrf.mxu2 }
 0x364   : > { %v1858_v31 = vpop.f32.mrf.mxu3 }
 0x365   : > { %v1786_v34 = vpop.f32.mrf.mxu1 }
 0x366   : > { %v1874_v13 = vpack.c.bf16 %v1786_v34, %v1784_v6 }
 0x36b   : > { %6398 = vmatmul.msk.bf16.gmra.mxu2 %vm1268_vm0, %v7718_v42  ;;  %v1823_v32 = vpop.f32.mrf.mxu2 }
 0x36c   : > { %6408 = vmatmul.msk.bf16.gmra.mxu3 %vm1268_vm0, %v7718_v42  ;;  %v1860_v33 = vpop.f32.mrf.mxu3  ;;  %v1878_v61 = vpack.c.bf16 %v1823_v32, %v1821_v39 }
 0x36d   : > { %v2037_v7 = vpack.c.bf16 %v1860_v33, %v1858_v31  ;;  %v1789_v35 = vpop.f32.mrf.mxu1 }
 0x36e   : > { %v1898_v63 = vsel %vm1881_vm5, %v1878_v61, 0 }
 0x373   : > { %v1826_v46 = vpop.f32.mrf.mxu2 }
 0x374   : > { %v1863_v38 = vpop.f32.mrf.mxu3 }
 0x375   : > { %v1791_v16 = vpop.f32.mrf.mxu1 }
 0x376   : > { %v1875_v21 = vpack.c.bf16 %v1791_v16, %v1789_v35 }
 0x37b   : > { %6399 = vmatmul.msk.bf16.gmra.mxu2 %vm1268_vm0, %v7732_v58  ;;  %v1828_v41 = vpop.f32.mrf.mxu2 }
 0x37c   : > { %6409 = vmatmul.msk.bf16.gmra.mxu3 %vm1268_vm0, %v7732_v58  ;;  %v1865_v44 = vpop.f32.mrf.mxu3  ;;  %v1879_v50 = vpack.c.bf16 %v1828_v41, %v1826_v46 }
 0x37d   : > { %v2038_v37 = vpack.c.bf16 %v1865_v44, %v1863_v38 }
 0x37e   : > { %v1901_v59 = vsel %vm1881_vm5, %v1879_v50, 0 }
 0x38b   : > { %6400 = vmatmul.msk.bf16.gmra.mxu2 %vm1268_vm0, %v7750_v30 }
 0x38c   : > { %6410 = vmatmul.msk.bf16.gmra.mxu3 %vm1268_vm0, %v7750_v30 }
 0x3c8   : > { %v1794_v24 = vpop.f32.mrf.mxu1 }
 0x3ce   : > { %v1831_v53 = vpop.f32.mrf.mxu2 }
 0x3cf   : > { %v1868_v45 = vpop.f32.mrf.mxu3 }
 0x3d0   : > { %v1796_v4 = vpop.f32.mrf.mxu1 }
 0x3d1   : > { %v1876_v49 = vpack.c.bf16 %v1796_v4, %v1794_v24 }
 0x3d6   : > { %v1833_v47 = vpop.f32.mrf.mxu2 }
 0x3d7   : > { %v1880_v48 = vpack.c.bf16 %v1833_v47, %v1831_v53  ;;  %v1870_v51 = vpop.f32.mrf.mxu3 }
 0x3d8   : > { %v2039_v54 = vpack.c.bf16 %v1870_v51, %v1868_v45 }
 0x3d9   : > { %v1904_v55 = vsel %vm1881_vm5, %v1880_v48, 0 }
 0x3da   : > { %2056 = vmatpush.bf16.msrb.mxu1 %v2039_v54  ;;  %1910 = vmatpush.bf16.xpose.msrb.mxu0 %v1904_v55 }
 0x3de   : > { %2057 = vmatpush.bf16.msrb.mxu1 %v2038_v37 }
 0x3df   : > { %v2142_v43 = vpop.f32.mrf.mxu3 }
 0x3e2   : > { %2058 = vmatpush.bf16.msrb.mxu1 %v2037_v7  ;;  %1911 = vmatpush.bf16.xpose.msrb.mxu0 %v1901_v59 }
 0x3e6   : > { %2059 = vmatpush.bf16.msrb.mxu1 %v2036_v60 }
 0x3e7   : > { %v2144_v26 = vpop.f32.mrf.mxu3 }
 0x3e8   : > { %v2204_v39 = vpack.c.bf16 %v2144_v26, %v2142_v43 }
 0x3ea   : > { %1912 = vmatpush.bf16.xpose.msrb.mxu0 %v1898_v63  ;;  %v2221_v31 = vsel %vm1881_vm5, %v2204_v39, 0 }
 0x3ef   : > { %v2147_v2 = vpop.f32.mrf.mxu3 }
 0x3f2   : > { %1913 = vmatpush.bf16.xpose.msrb.mxu0 %v1895_v5 }
 0x3f7   : > { %v2149_v10 = vpop.f32.mrf.mxu3 }
 0x3f8   : > { %v2205_v19 = vpack.c.bf16 %v2149_v10, %v2147_v2 }
 0x3f9   : > { %6383 = vmatmul.msk.bf16.vlgmr.msrb.gmra.mxu0 %vm1881_vm5, %v1873_v8 }
 0x3fa   : > { %2178 = vmatpush.bf16.msra.mxu0 %v6753_v18  ;;  %v2224_v56 = vsel %vm1881_vm5, %v2205_v19, 0 }
 0x3ff   : > { %v2152_v12 = vpop.f32.mrf.mxu3 }
 0x407   : > { %v2154_v14 = vpop.f32.mrf.mxu3 }
 0x408   : > { %v2206_v29 = vpack.c.bf16 %v2154_v14, %v2152_v12 }
 0x409   : > { %6384 = vmatmul.msk.bf16.gmra.mxu0 %vm1881_vm5, %v1874_v13 }
 0x40a   : > { %v2227_v52 = vsel %vm1881_vm5, %v2206_v29, 0 }
 0x40f   : > { %v2157_v15 = vpop.f32.mrf.mxu3 }
 0x417   : > { %v2159_v22 = vpop.f32.mrf.mxu3 }
 0x418   : > { %v2207_v23 = vpack.c.bf16 %v2159_v22, %v2157_v15 }
 0x419   : > { %6385 = vmatmul.msk.bf16.gmra.mxu0 %vm1881_vm5, %v1875_v21 }
 0x41a   : > { %v2230_v28 = vsel %vm1881_vm5, %v2207_v23, 0 }
 0x41b   : > { %2236 = vmatpush.bf16.xpose.msra.mxu1 %v2230_v28 }
 0x423   : > { %2237 = vmatpush.bf16.xpose.msra.mxu1 %v2227_v52 }
 0x429   : > { %6386 = vmatmul.msk.bf16.gmra.mxu0 %vm1881_vm5, %v1876_v49 }
 0x42b   : > { %2238 = vmatpush.bf16.xpose.msra.mxu1 %v2224_v56 }
 0x433   : > { %2239 = vmatpush.bf16.xpose.msra.mxu1 %v2221_v31 }
 0x439   : > { %6417 = vmatmul.msk.bf16.vlgmr.msra.gmra.mxu0 %vm1268_vm0, %v7703_v11 }
 0x449   : > { %6418 = vmatmul.msk.bf16.gmra.mxu0 %vm1268_vm0, %v7718_v42 }
 0x459   : > { %6419 = vmatmul.msk.bf16.gmra.mxu0 %vm1268_vm0, %v7732_v58 }
 0x469   : > { %6420 = vmatmul.msk.bf16.gmra.mxu0 %vm1268_vm0, %v7750_v30 }
 0x476   : > { %v1915_v32 = vpop.f32.mrf.mxu0 }
 0x477   : > { %v1935_v33 = vmul.f32 0.5, %v1915_v32 }
 0x479   : > { %v1944_v46 = vsel %vm1943_vm6, %v1935_v33, -inf }
 0x47a   : > { %1945 = vmax.xlane.f32.xlu2 %v1944_v46 }
 0x47e   : > { %v1917_v38 = vpop.f32.mrf.mxu0 }
 0x47f   : > { %v1936_v41 = vmul.f32 0.5, %v1917_v38 }
 0x481   : > { %v1947_v44 = vsel %vm1943_vm6, %v1936_v41, -inf }
 0x482   : > { %1948 = vmax.xlane.f32.xlu0 %v1947_v44 }
 0x486   : > { %v1920_v53 = vpop.f32.mrf.mxu0 }
 0x487   : > { %v1937_v45 = vmul.f32 0.5, %v1920_v53 }
 0x489   : > { %v1950_v47 = vsel %vm1943_vm6, %v1937_v45, -inf }
 0x48a   : > { %1951 = vmax.xlane.f32.xlu1 %v1950_v47 }
 0x48e   : > { %v1922_v48 = vpop.f32.mrf.mxu0 }
 0x48f   : > { %v1938_v51 = vmul.f32 0.5, %v1922_v48 }
 0x491   : > { %v1953_v54 = vsel %vm1943_vm6, %v1938_v51, -inf }
 0x492   : > { %1954 = vmax.xlane.f32.xlu2 %v1953_v54 }
 0x496   : > { %v1925_v55 = vpop.f32.mrf.mxu0 }
 0x497   : > { %v1939_v37 = vmul.f32 0.5, %v1925_v55 }
 0x499   : > { %v1956_v50 = vsel %vm1943_vm6, %v1939_v37, -inf }
 0x49a   : > { %1957 = vmax.xlane.f32.xlu0 %v1956_v50 }
 0x49e   : > { %v1927_v43 = vpop.f32.mrf.mxu0 }
 0x49f   : > { %v1940_v57 = vmul.f32 0.5, %v1927_v43 }
 0x4a1   : > { %v1959_v7 = vsel %vm1943_vm6, %v1940_v57, -inf }
 0x4a2   : > { %1960 = vmax.xlane.f32.xlu1 %v1959_v7 }
 0x4a6   : > { %v1930_v59 = vpop.f32.mrf.mxu0 }
 0x4a7   : > { %v7801_v60 = vmul.f32 0.5, %v1930_v59 }
 0x4a9   : > { %v1962_v61 = vsel %vm1943_vm6, %v7801_v60, -inf }
 0x4aa   : > { %1963 = vmax.xlane.f32.xlu2 %v1962_v61 }
 0x4ae   : > { %v1932_v26 = vpop.f32.mrf.mxu0 }
 0x4af   : > { %v7805_v63 = vmul.f32 0.5, %v1932_v26 }
 0x4b1   : > { %v1965_v0 = vsel %vm1943_vm6, %v7805_v63, -inf }
 0x4b2   : > { %1966 = vmax.xlane.f32.xlu0 %v1965_v0 }
 0x4b6   : > { %v2180_v1 = vpop.f32.mrf.mxu0 }
 0x4be   : > { %v2182_v2 = vpop.f32.mrf.mxu0 }
 0x4bf   : > { %v2361_v29 = vpack.c.bf16 %v2182_v2, %v2180_v1 }
 0x4c6   : > { %v2185_v5 = vpop.f32.mrf.mxu0 }
 0x4ce   : > { %v2187_v6 = vpop.f32.mrf.mxu0 }
 0x4cf   : > { %v2362_v22 = vpack.c.bf16 %v2187_v6, %v2185_v5 }
 0x4d6   : > { %v2190_v8 = vpop.f32.mrf.mxu0 }
 0x4de   : > { %v2192_v10 = vpop.f32.mrf.mxu0 }
 0x4df   : > { %v2363_v16 = vpack.c.bf16 %v2192_v10, %v2190_v8 }
 0x4e6   : > { %v2195_v34 = vpop.f32.mrf.mxu0 }
 0x4ed   : > { %v1946_v12 = vpop.xlane.xlu2 %1945 }
 0x4ee   : > { %v1968_v13 = vsub.f32 %v1935_v33, %v1946_v12  ;;  %v2197_v14 = vpop.f32.mrf.mxu0 }
 0x4ef   : > { %v2364_v35 = vpack.c.bf16 %v2197_v14, %v2195_v34 }
 0x4f0   : > { %v1976_v15 = vmul.f32 1.442695, %v1968_v13 }
 0x4f1   : > { %2381 = vmatpush.bf16.msra.mxu2 %v2364_v35 }
 0x4f2   : > { %6865 = vpow2.f32 %v1976_v15 }
 0x4f5   : > { %v1949_v18 = vpop.xlane.xlu0 %1948  ;;  %2382 = vmatpush.bf16.msra.mxu2 %v2363_v16 }
 0x4f6   : > { %v1969_v21 = vsub.f32 %v1936_v41, %v1949_v18 }
 0x4f8   : > { %v6866_v23 = vpop.eup %6865  ;;  %v1978_v24 = vmul.f32 1.442695, %v1969_v21 }
 0x4f9   : > { %2383 = vmatpush.bf16.msra.mxu2 %v2362_v22  ;;  %v1992_v28 = vsel %vm1943_vm6, %v6866_v23, 0.0 }
 0x4fa   : > { %6867 = vpow2.f32 %v1978_v24  ;;  %1993 = vadd.xlane.f32.xlu1 %v1992_v28 }
 0x4fd   : > { %v1952_v52 = vpop.xlane.xlu1 %1951  ;;  %2384 = vmatpush.bf16.msra.mxu2 %v2361_v29 }
 0x4fe   : > { %v1970_v4 = vsub.f32 %v1937_v45, %v1952_v52 }
 0x500   : > { %v6868_v19 = vpop.eup %6867  ;;  %v1980_v49 = vmul.f32 1.442695, %v1970_v4 }
 0x501   : > { %v1995_v56 = vsel %vm1943_vm6, %v6868_v19, 0.0 }
 0x502   : > { %6869 = vpow2.f32 %v1980_v49  ;;  %1996 = vadd.xlane.f32.xlu2 %v1995_v56  ;;  %v2104_v56 = vpop.f32.mrf.mxu2 }
 0x505   : > { %v1955_v39 = vpop.xlane.xlu2 %1954 }
 0x506   : > { %v1971_v31 = vsub.f32 %v1938_v51, %v1955_v39 }
 0x508   : > { %v6870_v32 = vpop.eup %6869  ;;  %v1982_v33 = vmul.f32 1.442695, %v1971_v31 }
 0x509   : > { %v1998_v46 = vsel %vm1943_vm6, %v6870_v32, 0.0 }
 0x50a   : > { %6871 = vpow2.f32 %v1982_v33  ;;  %1999 = vadd.xlane.f32.xlu0 %v1998_v46 }
 0x50d   : > { %v1958_v38 = vpop.xlane.xlu0 %1957 }
 0x50e   : > { %v1972_v41 = vsub.f32 %v1939_v37, %v1958_v38  ;;  %v2106_v38 = vpop.f32.mrf.mxu2 }
 0x510   : > { %v6872_v44 = vpop.eup %6871  ;;  %v1984_v53 = vmul.f32 1.442695, %v1972_v41 }
 0x511   : > { %v2001_v45 = vsel %vm1943_vm6, %v6872_v44, 0.0 }
 0x512   : > { %6873 = vpow2.f32 %v1984_v53  ;;  %2002 = vadd.xlane.f32.xlu1 %v2001_v45 }
 0x515   : > { %v1961_v47 = vpop.xlane.xlu1 %1960 }
 0x516   : > { %v1973_v48 = vsub.f32 %v1940_v57, %v1961_v47  ;;  %v2109_v41 = vpop.f32.mrf.mxu2 }
 0x518   : > { %v6874_v54 = vpop.eup %6873  ;;  %v1986_v55 = vmul.f32 1.442695, %v1973_v48 }
 0x519   : > { %v2004_v51 = vsel %vm1943_vm6, %v6874_v54, 0.0 }
 0x51a   : > { %6875 = vpow2.f32 %v1986_v55  ;;  %2005 = vadd.xlane.f32.xlu2 %v2004_v51 }
 0x51d   : > { %v1964_v50 = vpop.xlane.xlu2 %1963 }
 0x51e   : > { %v1974_v43 = vsub.f32 %v7801_v60, %v1964_v50  ;;  %v2111_v53 = vpop.f32.mrf.mxu2  ;;  %v2085_v50 = vld [vmem:[%s7831_s9] sm:$0x3] }
 0x51f   : > { %v2201_v47 = vpack.c.bf16 %v2111_v53, %v2109_v41 }
 0x520   : > { %v6876_v7 = vpop.eup %6875  ;;  %v1988_v59 = vmul.f32 1.442695, %v1974_v43  ;;  %v2470_v43 = vsel %vm2424_vm7, %v2085_v50, 0 }
 0x521   : > { %v2007_v37 = vsel %vm1943_vm6, %v6876_v7, 0.0  ;;  %2479 = vmatpush.bf16.msrb.mxu0 %v2470_v43 }
 0x522   : > { %6877 = vpow2.f32 %v1988_v59  ;;  %2008 = vadd.xlane.f32.xlu0 %v2007_v37 }
 0x525   : > { %v1967_v61 = vpop.xlane.xlu0 %1966 }
 0x526   : > { %v1975_v26 = vsub.f32 %v7805_v63, %v1967_v61  ;;  %v2114_v45 = vpop.f32.mrf.mxu2 }
 0x528   : > { %v6878_v0 = vpop.eup %6877  ;;  %v1990_v57 = vmul.f32 1.442695, %v1975_v26 }
 0x529   : > { %v2010_v1 = vsel %vm1943_vm6, %v6878_v0, 0.0 }
 0x52a   : > { %6879 = vpow2.f32 %v1990_v57  ;;  %2011 = vadd.xlane.f32.xlu1 %v2010_v1 }
 0x52e   : > { %v2116_v48 = vpop.f32.mrf.mxu2 }
 0x52f   : > { %v2202_v55 = vpack.c.bf16 %v2116_v48, %v2114_v45 }
 0x530   : > { %v6880_v2 = vpop.eup %6879 }
 0x531   : > { %v2013_v5 = vsel %vm1943_vm6, %v6880_v2, 0.0 }
 0x532   : > { %2014 = vadd.xlane.f32.xlu2 %v2013_v5 }
 0x536   : > { %v2119_v51 = vpop.f32.mrf.mxu2 }
 0x56d   : > { %v1994_v60 = vpop.xlane.xlu1 %1993 }
 0x56e   : > { %6881 = vrcp.f32 %v1994_v60 }
 0x574   : > { %v6882_v8 = vpop.eup %6881 }
 0x575   : > { %v1997_v6 = vpop.xlane.xlu2 %1996  ;;  %v2024_v34 = vmul.f32 %v6882_v8, %v6866_v23 }
 0x576   : > { %6883 = vrcp.f32 %v1997_v6 }
 0x57c   : > { %v6884_v10 = vpop.eup %6883 }
 0x57d   : > { %v2025_v12 = vmul.f32 %v6884_v10, %v6868_v19  ;;  %v2000_v63 = vpop.xlane.xlu0 %1999 }
 0x57e   : > { %6885 = vrcp.f32 %v2000_v63 }
 0x57f   : > { %v2032_v13 = vpack.c.bf16 %v2025_v12, %v2024_v34 }
 0x581   : > { %6387 = vmatmul.msk.bf16.vlgmr.msrb.gmra.mxu1 %vm1943_vm6, %v2032_v13 }
 0x584   : > { %v6886_v35 = vpop.eup %6885 }
 0x585   : > { %v2003_v14 = vpop.xlane.xlu1 %2002  ;;  %v2026_v16 = vmul.f32 %v6886_v35, %v6870_v32 }
 0x586   : > { %6887 = vrcp.f32 %v2003_v14 }
 0x58c   : > { %v6888_v15 = vpop.eup %6887 }
 0x58d   : > { %v2027_v18 = vmul.f32 %v6888_v15, %v6872_v44  ;;  %v2006_v22 = vpop.xlane.xlu2 %2005  ;;  %v2200_v44 = vpack.c.bf16 %v2106_v38, %v2104_v56 }
 0x58e   : > { %6889 = vrcp.f32 %v2006_v22 }
 0x58f   : > { %v2033_v21 = vpack.c.bf16 %v2027_v18, %v2026_v16 }
 0x591   : > { %6388 = vmatmul.msk.bf16.gmra.mxu1 %vm1943_vm6, %v2033_v21 }
 0x594   : > { %v6890_v23 = vpop.eup %6889 }
 0x595   : > { %v2009_v24 = vpop.xlane.xlu0 %2008  ;;  %v2028_v29 = vmul.f32 %v6890_v23, %v6874_v54  ;;  %v6754_v54 = vld [vmem:[%s7651_s10 + $0x10] sm:$0xff] }
 0x596   : > { %6891 = vrcp.f32 %v2009_v24  ;;  %2517 = vmatpush.bf16.msrb.mxu1 %v6754_v54 }
 0x59c   : > { %v6892_v28 = vpop.eup %6891 }
 0x59d   : > { %v2029_v52 = vmul.f32 %v6892_v28, %v6876_v7  ;;  %v2012_v19 = vpop.xlane.xlu1 %2011  ;;  %v2121_v7 = vpop.f32.mrf.mxu2 }
 0x59e   : > { %6893 = vrcp.f32 %v2012_v19  ;;  %v2203_v59 = vpack.c.bf16 %v2121_v7, %v2119_v51 }
 0x59f   : > { %v2034_v4 = vpack.c.bf16 %v2029_v52, %v2028_v29 }
 0x5a1   : > { %6389 = vmatmul.msk.bf16.gmra.mxu1 %vm1943_vm6, %v2034_v4 }
 0x5a4   : > { %v6894_v39 = vpop.eup %6893 }
 0x5a5   : > { %v2015_v49 = vpop.xlane.xlu2 %2014  ;;  %v2030_v32 = vmul.f32 %v6894_v39, %v6878_v0 }
 0x5a6   : > { %6895 = vrcp.f32 %v2015_v49 }
 0x5ac   : > { %v6896_v31 = vpop.eup %6895 }
 0x5ad   : > { %v2031_v33 = vmul.f32 %v6896_v31, %v6880_v2 }
 0x5af   : > { %v2035_v46 = vpack.c.bf16 %v2031_v33, %v2030_v32 }
 0x5b1   : > { %6390 = vmatmul.msk.bf16.gmra.mxu1 %vm1943_vm6, %v2035_v46 }
 0x5c1   : > { %6421 = vmatmul.msk.bf16.vlgmr.msra.gmra.mxu1 %vm1881_vm5, %v2200_v44 }
 0x5d1   : > { %6422 = vmatmul.msk.bf16.gmra.mxu1 %vm1881_vm5, %v2201_v47 }
 0x5e1   : > { %6423 = vmatmul.msk.bf16.gmra.mxu1 %vm1881_vm5, %v2202_v55 }
 0x5f1   : > { %6424 = vmatmul.msk.bf16.gmra.mxu1 %vm1881_vm5, %v2203_v59 }
 0x5fe   : > { %v2061_v37 = vpop.f32.mrf.mxu1 }
 0x601   : > { %6444 = vmatmul.msk.bf16.vlgmr.msrb.gmra.mxu1 %vm1268_vm0, %v7703_v11 }
 0x606   : > { %v2063_v61 = vpop.f32.mrf.mxu1 }
 0x607   : > { %v2081_v26 = vpack.c.bf16 %v2063_v61, %v2061_v37 }
 0x609   : > { %6434 = vmatmul.msk.bf16.vlgmr.msrb.gmra.mxu0 %vm1881_vm5, %v2081_v26 }
 0x60e   : > { %v2066_v0 = vpop.f32.mrf.mxu1 }
 0x611   : > { %6445 = vmatmul.msk.bf16.gmra.mxu1 %vm1268_vm0, %v7718_v42 }
 0x616   : > { %v2068_v57 = vpop.f32.mrf.mxu1 }
 0x617   : > { %v2082_v1 = vpack.c.bf16 %v2068_v57, %v2066_v0 }
 0x619   : > { %6435 = vmatmul.msk.bf16.gmra.mxu0 %vm1881_vm5, %v2082_v1 }
 0x61e   : > { %v2071_v2 = vpop.f32.mrf.mxu1 }
 0x621   : > { %6446 = vmatmul.msk.bf16.gmra.mxu1 %vm1268_vm0, %v7732_v58 }
 0x626   : > { %v2073_v5 = vpop.f32.mrf.mxu1 }
 0x627   : > { %v2083_v60 = vpack.c.bf16 %v2073_v5, %v2071_v2 }
 0x629   : > { %6436 = vmatmul.msk.bf16.gmra.mxu0 %vm1881_vm5, %v2083_v60 }
 0x62e   : > { %v2076_v6 = vpop.f32.mrf.mxu1 }
 0x631   : > { %6447 = vmatmul.msk.bf16.gmra.mxu1 %vm1268_vm0, %v7750_v30 }
 0x636   : > { %v2078_v8 = vpop.f32.mrf.mxu1 }
 0x637   : > { %v2084_v10 = vpack.c.bf16 %v2078_v8, %v2076_v6 }
 0x639   : > { %6437 = vmatmul.msk.bf16.gmra.mxu0 %vm1881_vm5, %v2084_v10 }
 0x63e   : > { %v2241_v34 = vpop.f32.mrf.mxu1 }
 0x63f   : > { %v2261_v12 = vmul.f32 0.5, %v2241_v34 }
 0x641   : > { %v2269_v13 = vsel %vm1943_vm6, %v2261_v12, -inf }
 0x642   : > { %2270 = vmax.xlane.f32.xlu0 %v2269_v13 }
 0x646   : > { %v2243_v63 = vpop.f32.mrf.mxu1 }
 0x647   : > { %v2262_v14 = vmul.f32 0.5, %v2243_v63 }
 0x649   : > { %v2272_v35 = vsel %vm1943_vm6, %v2262_v14, -inf }
 0x64a   : > { %2273 = vmax.xlane.f32.xlu1 %v2272_v35 }
 0x64e   : > { %v2246_v15 = vpop.f32.mrf.mxu1 }
 0x64f   : > { %v2263_v16 = vmul.f32 0.5, %v2246_v15 }
 0x651   : > { %v2275_v18 = vsel %vm1943_vm6, %v2263_v16, -inf }
 0x652   : > { %2276 = vmax.xlane.f32.xlu2 %v2275_v18 }
 0x656   : > { %v2248_v21 = vpop.f32.mrf.mxu1 }
 0x657   : > { %v2264_v22 = vmul.f32 0.5, %v2248_v21 }
 0x659   : > { %v2278_v24 = vsel %vm1943_vm6, %v2264_v22, -inf }
 0x65a   : > { %2279 = vmax.xlane.f32.xlu0 %v2278_v24 }
 0x65e   : > { %v2251_v23 = vpop.f32.mrf.mxu1 }
 0x65f   : > { %v2265_v28 = vmul.f32 0.5, %v2251_v23 }
 0x661   : > { %v2281_v29 = vsel %vm1943_vm6, %v2265_v28, -inf }
 0x662   : > { %2282 = vmax.xlane.f32.xlu1 %v2281_v29 }
 0x666   : > { %v2253_v52 = vpop.f32.mrf.mxu1 }
 0x667   : > { %v2266_v4 = vmul.f32 0.5, %v2253_v52 }
 0x669   : > { %v2284_v19 = vsel %vm1943_vm6, %v2266_v4, -inf }
 0x66a   : > { %2285 = vmax.xlane.f32.xlu2 %v2284_v19 }
 0x66e   : > { %v2256_v49 = vpop.f32.mrf.mxu1 }
 0x66f   : > { %v2267_v56 = vmul.f32 0.5, %v2256_v49 }
 0x671   : > { %v2287_v39 = vsel %vm1943_vm6, %v2267_v56, -inf }
 0x672   : > { %2288 = vmax.xlane.f32.xlu0 %v2287_v39 }
 0x676   : > { %v2258_v31 = vpop.f32.mrf.mxu1 }
 0x677   : > { %v2268_v32 = vmul.f32 0.5, %v2258_v31  ;;  %v6755_v31 = vld [vmem:[%s7657_s2 + $0x10] sm:$0xff] }
 0x678   : > { %2555 = vmatpush.bf16.msrb.mxu2 %v6755_v31 }
 0x679   : > { %v2290_v33 = vsel %vm1943_vm6, %v2268_v32, -inf }
 0x67a   : > { %2291 = vmax.xlane.f32.xlu1 %v2290_v33 }
 0x6b5   : > { %v2271_v46 = vpop.xlane.xlu0 %2270 }
 0x6b6   : > { %v2293_v38 = vsub.f32 %v2261_v12, %v2271_v46 }
 0x6b8   : > { %v2301_v41 = vmul.f32 1.442695, %v2293_v38 }
 0x6ba   : > { %6897 = vpow2.f32 %v2301_v41 }
 0x6bd   : > { %v2274_v44 = vpop.xlane.xlu1 %2273 }
 0x6be   : > { %v2294_v53 = vsub.f32 %v2262_v14, %v2274_v44 }
 0x6c0   : > { %v6898_v45 = vpop.eup %6897  ;;  %v2303_v47 = vmul.f32 1.442695, %v2294_v53 }
 0x6c1   : > { %v2317_v48 = vsel %vm1943_vm6, %v6898_v45, 0.0 }
 0x6c2   : > { %6899 = vpow2.f32 %v2303_v47  ;;  %2318 = vadd.xlane.f32.xlu2 %v2317_v48 }
 0x6c5   : > { %v2277_v54 = vpop.xlane.xlu2 %2276 }
 0x6c6   : > { %v2295_v55 = vsub.f32 %v2263_v16, %v2277_v54 }
 0x6c8   : > { %v6900_v51 = vpop.eup %6899  ;;  %v2305_v50 = vmul.f32 1.442695, %v2295_v55 }
 0x6c9   : > { %v2320_v43 = vsel %vm1943_vm6, %v6900_v51, 0.0 }
 0x6ca   : > { %6901 = vpow2.f32 %v2305_v50  ;;  %2321 = vadd.xlane.f32.xlu0 %v2320_v43 }
 0x6cd   : > { %v2280_v7 = vpop.xlane.xlu0 %2279 }
 0x6ce   : > { %v2296_v59 = vsub.f32 %v2264_v22, %v2280_v7 }
 0x6d0   : > { %v6902_v37 = vpop.eup %6901  ;;  %v2307_v61 = vmul.f32 1.442695, %v2296_v59 }
 0x6d1   : > { %v2323_v26 = vsel %vm1943_vm6, %v6902_v37, 0.0 }
 0x6d2   : > { %6903 = vpow2.f32 %v2307_v61  ;;  %2324 = vadd.xlane.f32.xlu1 %v2323_v26 }
 0x6d5   : > { %v2283_v0 = vpop.xlane.xlu1 %2282 }
 0x6d6   : > { %v2297_v57 = vsub.f32 %v2265_v28, %v2283_v0  ;;  %v6429_v0 = vld [vmem:[%s7831_s9 + $0x2] sm:$0x3] }
 0x6d8   : > { %v6904_v1 = vpop.eup %6903  ;;  %v2309_v2 = vmul.f32 1.442695, %v2297_v57  ;;  %v2426_v57 = vsel %vm2424_vm7, %v6429_v0, 0 }
 0x6d9   : > { %v2326_v5 = vsel %vm1943_vm6, %v6904_v1, 0.0  ;;  %2435 = vmatpush.bf16.msra.mxu3 %v2426_v57 }
 0x6da   : > { %6905 = vpow2.f32 %v2309_v2  ;;  %2327 = vadd.xlane.f32.xlu2 %v2326_v5 }
 0x6dd   : > { %v2286_v60 = vpop.xlane.xlu2 %2285 }
 0x6de   : > { %v2298_v6 = vsub.f32 %v2266_v4, %v2286_v60 }
 0x6e0   : > { %v6906_v8 = vpop.eup %6905  ;;  %v2311_v10 = vmul.f32 1.442695, %v2298_v6 }
 0x6e1   : > { %v2329_v34 = vsel %vm1943_vm6, %v6906_v8, 0.0 }
 0x6e2   : > { %6907 = vpow2.f32 %v2311_v10  ;;  %2330 = vadd.xlane.f32.xlu0 %v2329_v34  ;;  %v6756_v34 = vld [vmem:[%s7663_s27 + $0x10] sm:$0xff] }
 0x6e3   : > { %2593 = vmatpush.bf16.msrb.mxu3 %v6756_v34 }
 0x6e5   : > { %v2289_v12 = vpop.xlane.xlu0 %2288 }
 0x6e6   : > { %v2299_v13 = vsub.f32 %v2267_v56, %v2289_v12 }
 0x6e8   : > { %v6908_v63 = vpop.eup %6907  ;;  %v2313_v14 = vmul.f32 1.442695, %v2299_v13 }
 0x6e9   : > { %v2332_v35 = vsel %vm1943_vm6, %v6908_v63, 0.0 }
 0x6ea   : > { %6909 = vpow2.f32 %v2313_v14  ;;  %2333 = vadd.xlane.f32.xlu1 %v2332_v35 }
 0x6ed   : > { %v2292_v15 = vpop.xlane.xlu1 %2291 }
 0x6ee   : > { %v2300_v16 = vsub.f32 %v2268_v32, %v2292_v15 }
 0x6f0   : > { %v6910_v18 = vpop.eup %6909  ;;  %v2315_v21 = vmul.f32 1.442695, %v2300_v16 }
 0x6f1   : > { %v2335_v22 = vsel %vm1943_vm6, %v6910_v18, 0.0 }
 0x6f2   : > { %6911 = vpow2.f32 %v2315_v21  ;;  %2336 = vadd.xlane.f32.xlu2 %v2335_v22 }
 0x6f8   : > { %v6912_v24 = vpop.eup %6911 }
 0x6f9   : > { %v2338_v23 = vsel %vm1943_vm6, %v6912_v24, 0.0 }
 0x6fa   : > { %2339 = vadd.xlane.f32.xlu0 %v2338_v23 }
 0x735   : > { %v2319_v28 = vpop.xlane.xlu2 %2318 }
 0x736   : > { %6913 = vrcp.f32 %v2319_v28 }
 0x73c   : > { %v6914_v52 = vpop.eup %6913 }
 0x73d   : > { %v2322_v29 = vpop.xlane.xlu0 %2321  ;;  %v2349_v19 = vmul.f32 %v6914_v52, %v6898_v45 }
 0x73e   : > { %6915 = vrcp.f32 %v2322_v29 }
 0x744   : > { %v6916_v4 = vpop.eup %6915 }
 0x745   : > { %v2350_v49 = vmul.f32 %v6916_v4, %v6900_v51  ;;  %v2325_v39 = vpop.xlane.xlu1 %2324 }
 0x746   : > { %6917 = vrcp.f32 %v2325_v39 }
 0x747   : > { %v2357_v56 = vpack.c.bf16 %v2350_v49, %v2349_v19  ;;  %v2519_v49 = vpop.f32.mrf.mxu1 }
 0x749   : > { %6425 = vmatmul.msk.bf16.vlgmr.msra.gmra.mxu2 %vm1943_vm6, %v2357_v56 }
 0x74c   : > { %v6918_v33 = vpop.eup %6917 }
 0x74d   : > { %v2328_v32 = vpop.xlane.xlu2 %2327  ;;  %v2351_v38 = vmul.f32 %v6918_v33, %v6902_v37 }
 0x74e   : > { %6919 = vrcp.f32 %v2328_v32 }
 0x74f   : > { %v2521_v31 = vpop.f32.mrf.mxu1 }
 0x754   : > { %v6920_v46 = vpop.eup %6919 }
 0x755   : > { %v2352_v41 = vmul.f32 %v6920_v46, %v6904_v1  ;;  %v2331_v53 = vpop.xlane.xlu0 %2330 }
 0x756   : > { %6921 = vrcp.f32 %v2331_v53  ;;  %v2615_v53 = vpack.c.bf16 %v2521_v31, %v2519_v49 }
 0x757   : > { %v2358_v44 = vpack.c.bf16 %v2352_v41, %v2351_v38  ;;  %v2524_v41 = vpop.f32.mrf.mxu1 }
 0x759   : > { %6426 = vmatmul.msk.bf16.gmra.mxu2 %vm1943_vm6, %v2358_v44 }
 0x75c   : > { %v6922_v47 = vpop.eup %6921 }
 0x75d   : > { %v2334_v45 = vpop.xlane.xlu1 %2333  ;;  %v2353_v54 = vmul.f32 %v6922_v47, %v6906_v8 }
 0x75e   : > { %6923 = vrcp.f32 %v2334_v45 }
 0x75f   : > { %v2526_v45 = vpop.f32.mrf.mxu1 }
 0x764   : > { %v6924_v48 = vpop.eup %6923 }
 0x765   : > { %v2354_v55 = vmul.f32 %v6924_v48, %v6908_v63  ;;  %v2337_v50 = vpop.xlane.xlu2 %2336 }
 0x766   : > { %6925 = vrcp.f32 %v2337_v50 }
 0x767   : > { %v2359_v51 = vpack.c.bf16 %v2354_v55, %v2353_v54  ;;  %v2529_v54 = vpop.f32.mrf.mxu1  ;;  %v2616_v55 = vpack.c.bf16 %v2526_v45, %v2524_v41 }
 0x769   : > { %6427 = vmatmul.msk.bf16.gmra.mxu2 %vm1943_vm6, %v2359_v51 }
 0x76c   : > { %v6926_v7 = vpop.eup %6925 }
 0x76d   : > { %v2340_v43 = vpop.xlane.xlu0 %2339  ;;  %v2355_v37 = vmul.f32 %v6926_v7, %v6910_v18  ;;  %v6758_v7 = vld [vmem:[%s7657_s2 + $0x18] sm:$0xff] }
 0x76e   : > { %6927 = vrcp.f32 %v2340_v43 }
 0x76f   : > { %v2531_v50 = vpop.f32.mrf.mxu1 }
 0x774   : > { %v6928_v59 = vpop.eup %6927 }
 0x775   : > { %v2356_v61 = vmul.f32 %v6928_v59, %v6912_v24  ;;  %v6757_v24 = vld [vmem:[%s7651_s10 + $0x18] sm:$0xff]  ;;  %v2617_v59 = vpack.c.bf16 %v2531_v50, %v2529_v54  ;;  %s9300_s10 = sld [smem:[#allocation9_spill]] }
 0x777   : > { %v2360_v26 = vpack.c.bf16 %v2356_v61, %v2355_v37  ;;  %v2534_v37 = vpop.f32.mrf.mxu1 }
 0x779   : > { %6428 = vmatmul.msk.bf16.gmra.mxu2 %vm1943_vm6, %v2360_v26 }
 0x77b   : > { %s8073_s28 = scalar_lea.vmem %s9300_s10, %s7403_s1  ;;  %s9301_s10 = sld [smem:[#allocation14_spill]] }
 0x77f   : > { %v2536_v26 = vpop.f32.mrf.mxu1 }
 0x780   : > { %v2618_v57 = vpack.c.bf16 %v2536_v26, %v2534_v37 }
 0x789   : > { %6454 = vmatmul.msk.bf16.vlgmr.msrb.gmra.mxu2 %vm1268_vm0, %v7703_v11 }
 0x799   : > { %6455 = vmatmul.msk.bf16.gmra.mxu2 %vm1268_vm0, %v7718_v42 }
 0x7a9   : > { %6456 = vmatmul.msk.bf16.gmra.mxu2 %vm1268_vm0, %v7732_v58 }
 0x7b9   : > { %6457 = vmatmul.msk.bf16.gmra.mxu2 %vm1268_vm0, %v7750_v30 }
 0x7cc   : > { %v2386_v1 = vpop.f32.mrf.mxu2 }
 0x7d4   : > { %v2388_v2 = vpop.f32.mrf.mxu2 }
 0x7d5   : > { %v2406_v5 = vpack.c.bf16 %v2388_v2, %v2386_v1  ;;  %v7925_v1 = vpop.f32.mrf.mxu0 }
 0x7d7   : > { %6430 = vmatmul.msk.bf16.vlgmr.msra.gmra.mxu3 %vm1881_vm5, %v2406_v5 }
 0x7d8   : > { %2895 = vmatpush.bf16.msra.mxu3 %v6757_v24 }
 0x7dc   : > { %v2391_v60 = vpop.f32.mrf.mxu2 }
 0x7dd   : > { %v7928_v5 = vpop.f32.mrf.mxu0 }
 0x7e4   : > { %v2393_v6 = vpop.f32.mrf.mxu2 }
 0x7e5   : > { %v2407_v8 = vpack.c.bf16 %v2393_v6, %v2391_v60  ;;  %v7932_v6 = vpop.f32.mrf.mxu0 }
 0x7e7   : > { %6431 = vmatmul.msk.bf16.gmra.mxu3 %vm1881_vm5, %v2407_v8 }
 0x7ec   : > { %v2396_v10 = vpop.f32.mrf.mxu2 }
 0x7ed   : > { %v7934_v34 = vpop.f32.mrf.mxu0 }
 0x7f4   : > { %v2398_v12 = vpop.f32.mrf.mxu2 }
 0x7f5   : > { %v2408_v13 = vpack.c.bf16 %v2398_v12, %v2396_v10 }
 0x7f7   : > { %6432 = vmatmul.msk.bf16.gmra.mxu3 %vm1881_vm5, %v2408_v13  ;;  %v7938_v13 = vpop.f32.mrf.mxu0 }
 0x7fc   : > { %v2401_v63 = vpop.f32.mrf.mxu2 }
 0x804   : > { %v2403_v14 = vpop.f32.mrf.mxu2 }
 0x805   : > { %v2409_v35 = vpack.c.bf16 %v2403_v14, %v2401_v63  ;;  %v7942_v14 = vpop.f32.mrf.mxu0 }
 0x807   : > { %6433 = vmatmul.msk.bf16.gmra.mxu3 %vm1881_vm5, %v2409_v35 }
 0x80c   : > { %v2557_v15 = vpop.f32.mrf.mxu2 }
 0x814   : > { %v2559_v16 = vpop.f32.mrf.mxu2 }
 0x815   : > { %v2619_v46 = vpack.c.bf16 %v2559_v16, %v2557_v15  ;;  %v7944_v15 = vpop.f32.mrf.mxu0 }
 0x817   : > { %6464 = vmatmul.msk.bf16.vlgmr.msrb.gmra.mxu3 %vm1268_vm0, %v7703_v11  ;;  %v2636_v38 = vsel %vm1881_vm5, %v2619_v46, 0 }
 0x81c   : > { %v2562_v18 = vpop.f32.mrf.mxu2 }
 0x81d   : > { %v7948_v24 = vpop.f32.mrf.mxu0 }
 0x824   : > { %v2564_v21 = vpop.f32.mrf.mxu2 }
 0x825   : > { %v2620_v39 = vpack.c.bf16 %v2564_v21, %v2562_v18 }
 0x827   : > { %6465 = vmatmul.msk.bf16.gmra.mxu3 %vm1268_vm0, %v7718_v42  ;;  %v2639_v32 = vsel %vm1881_vm5, %v2620_v39, 0 }
 0x82c   : > { %v2567_v22 = vpop.f32.mrf.mxu2 }
 0x834   : > { %v2569_v23 = vpop.f32.mrf.mxu2 }
 0x835   : > { %v2621_v19 = vpack.c.bf16 %v2569_v23, %v2567_v22 }
 0x837   : > { %6466 = vmatmul.msk.bf16.gmra.mxu3 %vm1268_vm0, %v7732_v58  ;;  %v2642_v56 = vsel %vm1881_vm5, %v2621_v19, 0 }
 0x83c   : > { %v2572_v28 = vpop.f32.mrf.mxu2 }
 0x844   : > { %v2574_v29 = vpop.f32.mrf.mxu2 }
 0x845   : > { %v2622_v52 = vpack.c.bf16 %v2574_v29, %v2572_v28 }
 0x847   : > { %6467 = vmatmul.msk.bf16.gmra.mxu3 %vm1268_vm0, %v7750_v30  ;;  %v2645_v4 = vsel %vm1881_vm5, %v2622_v52, 0 }
 0x848   : > { %2651 = vmatpush.bf16.xpose.msra.mxu0 %v2645_v4 }
 0x850   : > { %2652 = vmatpush.bf16.xpose.msra.mxu0 %v2642_v56 }
 0x857   : > { %6487 = vmatmul.msk.bf16.vlgmr.msra.gmra.mxu3 %vm1268_vm0, %v7703_v11 }
 0x858   : > { %2653 = vmatpush.bf16.xpose.msra.mxu0 %v2639_v32 }
 0x85a   : > { %v7898_v33 = vpop.f32.mrf.mxu3 }
 0x860   : > { %2654 = vmatpush.bf16.xpose.msra.mxu0 %v2636_v38 }
 0x862   : > { %v7901_v44 = vpop.f32.mrf.mxu3 }
 0x867   : > { %6468 = vmatmul.msk.bf16.vlgmr.msra.gmra.mxu0 %vm1881_vm5, %v2615_v53  ;;  %6488 = vmatmul.msk.bf16.gmra.mxu3 %vm1268_vm0, %v7718_v42 }
 0x868   : > { %2933 = vmatpush.bf16.msrb.mxu0 %v6758_v7 }
 0x86a   : > { %v7906_v47 = vpop.f32.mrf.mxu3 }
 0x872   : > { %v7908_v48 = vpop.f32.mrf.mxu3 }
 0x877   : > { %6469 = vmatmul.msk.bf16.gmra.mxu0 %vm1881_vm5, %v2616_v55  ;;  %6489 = vmatmul.msk.bf16.gmra.mxu3 %vm1268_vm0, %v7732_v58 }
 0x87a   : > { %v7913_v51 = vpop.f32.mrf.mxu3 }
 0x882   : > { %v7915_v43 = vpop.f32.mrf.mxu3 }
 0x887   : > { %6470 = vmatmul.msk.bf16.gmra.mxu0 %vm1881_vm5, %v2617_v59  ;;  %6490 = vmatmul.msk.bf16.gmra.mxu3 %vm1268_vm0, %v7750_v30 }
 0x88a   : > { %v7921_v61 = vpop.f32.mrf.mxu3 }
 0x892   : > { %v7923_v0 = vpop.f32.mrf.mxu3 }
 0x897   : > { %6471 = vmatmul.msk.bf16.gmra.mxu0 %vm1881_vm5, %v2618_v57 }
 0x89a   : > { %v2595_v2 = vpop.f32.mrf.mxu3 }
 0x8a2   : > { %v2597_v60 = vpop.f32.mrf.mxu3 }
 0x8a3   : > { %v2776_v23 = vpack.c.bf16 %v2597_v60, %v2595_v2 }
 0x8a7   : > { %6497 = vmatmul.msk.bf16.vlgmr.msrb.gmra.mxu0 %vm1268_vm0, %v7703_v11 }
 0x8aa   : > { %v2600_v8 = vpop.f32.mrf.mxu3 }
 0x8b2   : > { %v2602_v10 = vpop.f32.mrf.mxu3 }
 0x8b3   : > { %v2777_v22 = vpack.c.bf16 %v2602_v10, %v2600_v8 }
 0x8b7   : > { %6498 = vmatmul.msk.bf16.gmra.mxu0 %vm1268_vm0, %v7718_v42 }
 0x8ba   : > { %v2605_v12 = vpop.f32.mrf.mxu3 }
 0x8c2   : > { %v2607_v63 = vpop.f32.mrf.mxu3 }
 0x8c3   : > { %v2778_v21 = vpack.c.bf16 %v2607_v63, %v2605_v12  ;;  %v6476_v63 = vld [vmem:[%s7831_s9 + $0x4] sm:$0x3] }
 0x8c7   : > { %6499 = vmatmul.msk.bf16.gmra.mxu0 %vm1268_vm0, %v7732_v58 }
 0x8ca   : > { %v2610_v35 = vpop.f32.mrf.mxu3 }
 0x8d2   : > { %v2612_v16 = vpop.f32.mrf.mxu3 }
 0x8d3   : > { %v2779_v18 = vpack.c.bf16 %v2612_v16, %v2610_v35  ;;  %v2840_v35 = vsel %vm2424_vm7, %v6476_v63, 0 }
 0x8d4   : > { %2849 = vmatpush.bf16.msra.mxu2 %v2840_v35 }
 0x8d5   : > { %2796 = vmatpush.bf16.msra.mxu1 %v2779_v18 }
 0x8d7   : > { %6500 = vmatmul.msk.bf16.gmra.mxu0 %vm1268_vm0, %v7750_v30 }
 0x8d9   : > { %2797 = vmatpush.bf16.msra.mxu1 %v2778_v21 }
 0x8dd   : > { %2798 = vmatpush.bf16.msra.mxu1 %v2777_v22 }
 0x8e1   : > { %2799 = vmatpush.bf16.msra.mxu1 %v2776_v23 }
 0x8e4   : > { %v2656_v28 = vpop.f32.mrf.mxu0 }
 0x8e5   : > { %v2676_v29 = vmul.f32 0.5, %v2656_v28 }
 0x8e7   : > { %v2684_v52 = vsel %vm1943_vm6, %v2676_v29, -inf }
 0x8e8   : > { %2685 = vmax.xlane.f32.xlu1 %v2684_v52 }
 0x8ec   : > { %v2658_v4 = vpop.f32.mrf.mxu0 }
 0x8ed   : > { %v2677_v19 = vmul.f32 0.5, %v2658_v4 }
 0x8ef   : > { %v2687_v49 = vsel %vm1943_vm6, %v2677_v19, -inf }
 0x8f0   : > { %2688 = vmax.xlane.f32.xlu2 %v2687_v49 }
 0x8f4   : > { %v2661_v56 = vpop.f32.mrf.mxu0 }
 0x8f5   : > { %v2678_v39 = vmul.f32 0.5, %v2661_v56 }
 0x8f7   : > { %v2690_v31 = vsel %vm1943_vm6, %v2678_v39, -inf }
 0x8f8   : > { %2691 = vmax.xlane.f32.xlu0 %v2690_v31 }
 0x8fc   : > { %v2663_v32 = vpop.f32.mrf.mxu0 }
 0x8fd   : > { %v2679_v46 = vmul.f32 0.5, %v2663_v32 }
 0x8ff   : > { %v2693_v38 = vsel %vm1943_vm6, %v2679_v46, -inf }
 0x900   : > { %2694 = vmax.xlane.f32.xlu1 %v2693_v38 }
 0x904   : > { %v2666_v41 = vpop.f32.mrf.mxu0 }
 0x905   : > { %v7954_v53 = vmul.f32 0.5, %v2666_v41 }
 0x907   : > { %v2696_v45 = vsel %vm1943_vm6, %v7954_v53, -inf }
 0x908   : > { %2697 = vmax.xlane.f32.xlu2 %v2696_v45 }
 0x90c   : > { %v2668_v54 = vpop.f32.mrf.mxu0 }
 0x90d   : > { %v7958_v55 = vmul.f32 0.5, %v2668_v54 }
 0x90f   : > { %v2699_v50 = vsel %vm1943_vm6, %v7958_v55, -inf }
 0x910   : > { %2700 = vmax.xlane.f32.xlu0 %v2699_v50 }
 0x914   : > { %v2671_v7 = vpop.f32.mrf.mxu0 }
 0x915   : > { %v7962_v59 = vmul.f32 0.5, %v2671_v7 }
 0x917   : > { %v2702_v37 = vsel %vm1943_vm6, %v7962_v59, -inf }
 0x918   : > { %2703 = vmax.xlane.f32.xlu1 %v2702_v37 }
 0x91c   : > { %v2673_v26 = vpop.f32.mrf.mxu0 }
 0x91d   : > { %v7966_v57 = vmul.f32 0.5, %v2673_v26 }
 0x91f   : > { %v2705_v2 = vsel %vm1943_vm6, %v7966_v57, -inf }
 0x920   : > { %2706 = vmax.xlane.f32.xlu2 %v2705_v2 }
 0x924   : > { %v2935_v60 = vpop.f32.mrf.mxu0 }
 0x92c   : > { %v2937_v8 = vpop.f32.mrf.mxu0 }
 0x92d   : > { %v2997_v63 = vpack.c.bf16 %v2937_v8, %v2935_v60 }
 0x934   : > { %v2940_v10 = vpop.f32.mrf.mxu0 }
 0x93c   : > { %v2942_v12 = vpop.f32.mrf.mxu0 }
 0x944   : > { %v2945_v16 = vpop.f32.mrf.mxu0 }
 0x94c   : > { %v2947_v18 = vpop.f32.mrf.mxu0 }
 0x94d   : > { %v2999_v56 = vpack.c.bf16 %v2947_v18, %v2945_v16 }
 0x94f   : > { %v3020_v54 = vsel %vm1881_vm5, %v2999_v56, 0 }
 0x954   : > { %v2950_v21 = vpop.f32.mrf.mxu0 }
 0x95b   : > { %v2686_v22 = vpop.xlane.xlu1 %2685 }
 0x95c   : > { %v2708_v23 = vsub.f32 %v2676_v29, %v2686_v22  ;;  %v2952_v28 = vpop.f32.mrf.mxu0  ;;  %v2998_v29 = vpack.c.bf16 %v2942_v12, %v2940_v10  ;;  %v3014_v22 = vsel %vm1881_vm5, %v2997_v63, 0 }
 0x95d   : > { %v3000_v52 = vpack.c.bf16 %v2952_v28, %v2950_v21 }
 0x95e   : > { %v2716_v4 = vmul.f32 1.442695, %v2708_v23 }
 0x95f   : > { %v3023_v49 = vsel %vm1881_vm5, %v3000_v52, 0 }
 0x960   : > { %6929 = vpow2.f32 %v2716_v4  ;;  %3029 = vmatpush.bf16.xpose.msrb.mxu2 %v3023_v49 }
 0x963   : > { %v2689_v31 = vpop.xlane.xlu2 %2688 }
 0x964   : > { %v2709_v32 = vsub.f32 %v2677_v19, %v2689_v31  ;;  %v3017_v19 = vsel %vm1881_vm5, %v2998_v29, 0 }
 0x966   : > { %v7973_v38 = vpop.eup %6929  ;;  %v2718_v41 = vmul.f32 1.442695, %v2709_v32 }
 0x967   : > { %v2732_v45 = vsel %vm1943_vm6, %v7973_v38, 0.0 }
 0x968   : > { %6931 = vpow2.f32 %v2718_v41  ;;  %2733 = vadd.xlane.f32.xlu0 %v2732_v45  ;;  %3030 = vmatpush.bf16.xpose.msrb.mxu2 %v3020_v54 }
 0x96b   : > { %v2692_v50 = vpop.xlane.xlu0 %2691 }
 0x96c   : > { %v2710_v7 = vsub.f32 %v2678_v39, %v2692_v50 }
 0x96e   : > { %v6932_v37 = vpop.eup %6931  ;;  %v2720_v26 = vmul.f32 1.442695, %v2710_v7 }
 0x96f   : > { %v2735_v2 = vsel %vm1943_vm6, %v6932_v37, 0.0 }
 0x970   : > { %6933 = vpow2.f32 %v2720_v26  ;;  %2736 = vadd.xlane.f32.xlu1 %v2735_v2  ;;  %3031 = vmatpush.bf16.xpose.msrb.mxu2 %v3017_v19 }
 0x973   : > { %v2695_v35 = vpop.xlane.xlu1 %2694 }
 0x974   : > { %v2711_v16 = vsub.f32 %v2679_v46, %v2695_v35 }
 0x976   : > { %v6934_v18 = vpop.eup %6933  ;;  %v2722_v21 = vmul.f32 1.442695, %v2711_v16 }
 0x977   : > { %v2738_v10 = vsel %vm1943_vm6, %v6934_v18, 0.0 }
 0x978   : > { %6935 = vpow2.f32 %v2722_v21  ;;  %3032 = vmatpush.bf16.xpose.msrb.mxu2 %v3014_v22  ;;  %2739 = vadd.xlane.f32.xlu2 %v2738_v10 }
 0x97b   : > { %v2698_v39 = vpop.xlane.xlu2 %2697 }
 0x97c   : > { %v2712_v12 = vsub.f32 %v7954_v53, %v2698_v39 }
 0x97e   : > { %v6936_v23 = vpop.eup %6935  ;;  %v2724_v28 = vmul.f32 1.442695, %v2712_v12 }
 0x97f   : > { %v2741_v52 = vsel %vm1943_vm6, %v6936_v23, 0.0 }
 0x980   : > { %6937 = vpow2.f32 %v2724_v28  ;;  %2742 = vadd.xlane.f32.xlu0 %v2741_v52 }
 0x983   : > { %v2701_v60 = vpop.xlane.xlu0 %2700 }
 0x984   : > { %v2713_v46 = vsub.f32 %v7958_v55, %v2701_v60 }
 0x986   : > { %v6938_v8 = vpop.eup %6937  ;;  %v2726_v4 = vmul.f32 1.442695, %v2713_v46  ;;  %v6759_v46 = vld [vmem:[%s7663_s27 + $0x18] sm:$0xff] }
 0x987   : > { %v2744_v49 = vsel %vm1943_vm6, %v6938_v8, 0.0  ;;  %2971 = vmatpush.bf16.msrb.mxu1 %v6759_v46 }
 0x988   : > { %6939 = vpow2.f32 %v2726_v4  ;;  %2745 = vadd.xlane.f32.xlu1 %v2744_v49 }
 0x98b   : > { %v2704_v56 = vpop.xlane.xlu1 %2703 }
 0x98c   : > { %v2714_v31 = vsub.f32 %v7962_v59, %v2704_v56 }
 0x98e   : > { %v6940_v32 = vpop.eup %6939  ;;  %v2728_v53 = vmul.f32 1.442695, %v2714_v31 }
 0x98f   : > { %v2747_v41 = vsel %vm1943_vm6, %v6940_v32, 0.0 }
 0x990   : > { %6941 = vpow2.f32 %v2728_v53  ;;  %2748 = vadd.xlane.f32.xlu2 %v2747_v41 }
 0x993   : > { %v2707_v45 = vpop.xlane.xlu2 %2706 }
 0x994   : > { %v2715_v54 = vsub.f32 %v7966_v57, %v2707_v45 }
 0x996   : > { %v6942_v29 = vpop.eup %6941  ;;  %v2730_v55 = vmul.f32 1.442695, %v2715_v54 }
 0x997   : > { %v2750_v50 = vsel %vm1943_vm6, %v6942_v29, 0.0 }
 0x998   : > { %6943 = vpow2.f32 %v2730_v55  ;;  %2751 = vadd.xlane.f32.xlu0 %v2750_v50 }
 0x99e   : > { %v6944_v7 = vpop.eup %6943 }
 0x99f   : > { %v2753_v26 = vsel %vm1943_vm6, %v6944_v7, 0.0 }
 0x9a0   : > { %2754 = vadd.xlane.f32.xlu1 %v2753_v26 }
 0x9db   : > { %v2734_v59 = vpop.xlane.xlu0 %2733 }
 0x9dc   : > { %6945 = vrcp.f32 %v2734_v59 }
 0x9e2   : > { %v6946_v19 = vpop.eup %6945 }
 0x9e3   : > { %v2737_v2 = vpop.xlane.xlu1 %2736  ;;  %v2764_v35 = vmul.f32 %v6946_v19, %v7973_v38 }
 0x9e4   : > { %6947 = vrcp.f32 %v2737_v2 }
 0x9ea   : > { %v6948_v63 = vpop.eup %6947 }
 0x9eb   : > { %v2765_v57 = vmul.f32 %v6948_v63, %v6932_v37  ;;  %v2740_v21 = vpop.xlane.xlu2 %2739 }
 0x9ec   : > { %6949 = vrcp.f32 %v2740_v21 }
 0x9ed   : > { %v2772_v16 = vpack.c.bf16 %v2765_v57, %v2764_v35 }
 0x9ef   : > { %6472 = vmatmul.msk.bf16.vlgmr.msra.gmra.mxu1 %vm1943_vm6, %v2772_v16 }
 0x9f2   : > { %v6950_v10 = vpop.eup %6949 }
 0x9f3   : > { %v2743_v22 = vpop.xlane.xlu0 %2742  ;;  %v2766_v12 = vmul.f32 %v6950_v10, %v6934_v18 }
 0x9f4   : > { %6951 = vrcp.f32 %v2743_v22 }
 0x9fa   : > { %v6952_v39 = vpop.eup %6951 }
 0x9fb   : > { %v2767_v28 = vmul.f32 %v6952_v39, %v6936_v23  ;;  %v2746_v60 = vpop.xlane.xlu1 %2745 }
 0x9fc   : > { %6953 = vrcp.f32 %v2746_v60 }
 0x9fd   : > { %v2773_v52 = vpack.c.bf16 %v2767_v28, %v2766_v12 }
 0x9ff   : > { %6473 = vmatmul.msk.bf16.gmra.mxu1 %vm1943_vm6, %v2773_v52 }
 0xa02   : > { %v6954_v37 = vpop.eup %6953 }
 0xa03   : > { %v2749_v38 = vpop.xlane.xlu2 %2748  ;;  %v2768_v49 = vmul.f32 %v6954_v37, %v6938_v8 }
 0xa04   : > { %6955 = vrcp.f32 %v2749_v38 }
 0xa0a   : > { %v6956_v4 = vpop.eup %6955 }
 0xa0b   : > { %v2769_v56 = vmul.f32 %v6956_v4, %v6940_v32  ;;  %v2752_v53 = vpop.xlane.xlu0 %2751 }
 0xa0c   : > { %6957 = vrcp.f32 %v2752_v53 }
 0xa0d   : > { %v2774_v31 = vpack.c.bf16 %v2769_v56, %v2768_v49 }
 0xa0f   : > { %6474 = vmatmul.msk.bf16.gmra.mxu1 %vm1943_vm6, %v2774_v31 }
 0xa12   : > { %v6958_v23 = vpop.eup %6957 }
 0xa13   : > { %v2755_v18 = vpop.xlane.xlu1 %2754  ;;  %v2770_v45 = vmul.f32 %v6958_v23, %v6942_v29 }
 0xa14   : > { %6959 = vrcp.f32 %v2755_v18 }
 0xa1a   : > { %v6960_v41 = vpop.eup %6959 }
 0xa1b   : > { %v2771_v54 = vmul.f32 %v6960_v41, %v6944_v7 }
 0xa1d   : > { %v2775_v55 = vpack.c.bf16 %v2771_v54, %v2770_v45  ;;  %v2482_v45 = vadd.f32 %v7925_v1, %v7898_v33  ;;  %v2497_v1 = vadd.f32 %v7944_v15, %v7921_v61 }
 0xa1f   : > { %6475 = vmatmul.msk.bf16.gmra.mxu1 %vm1943_vm6, %v2775_v55 }
 0xa2f   : > { %6507 = vmatmul.msk.bf16.vlgmr.msrb.gmra.mxu1 %vm1268_vm0, %v7703_v11 }
 0xa3f   : > { %6508 = vmatmul.msk.bf16.gmra.mxu1 %vm1268_vm0, %v7718_v42  ;;  %v2897_v42 = vpop.f32.mrf.mxu3 }
 0xa4f   : > { %6509 = vmatmul.msk.bf16.gmra.mxu1 %vm1268_vm0, %v7732_v58 }
 0xa5f   : > { %6510 = vmatmul.msk.bf16.gmra.mxu1 %vm1268_vm0, %v7750_v30  ;;  %v2899_v30 = vpop.f32.mrf.mxu3 }
 0xa60   : > { %v2993_v21 = vpack.c.bf16 %v2899_v30, %v2897_v42 }
 0xa67   : > { %v2902_v57 = vpop.f32.mrf.mxu3 }
 0xa6c   : > { %v2801_v8 = vpop.f32.mrf.mxu1 }
 0xa6f   : > { %v2904_v22 = vpop.f32.mrf.mxu3 }
 0xa70   : > { %v2994_v28 = vpack.c.bf16 %v2904_v22, %v2902_v57 }
 0xa74   : > { %v2803_v32 = vpop.f32.mrf.mxu1 }
 0xa75   : > { %v2821_v50 = vpack.c.bf16 %v2803_v32, %v2801_v8  ;;  %v2487_v32 = vadd.f32 %v7932_v6, %v7906_v47 }
 0xa77   : > { %6477 = vmatmul.msk.bf16.vlgmr.msra.gmra.mxu2 %vm1881_vm5, %v2821_v50  ;;  %v2907_v39 = vpop.f32.mrf.mxu3 }
 0xa7c   : > { %v2806_v29 = vpop.f32.mrf.mxu1 }
 0xa7f   : > { %v2909_v60 = vpop.f32.mrf.mxu3 }
 0xa80   : > { %v2995_v38 = vpack.c.bf16 %v2909_v60, %v2907_v39 }
 0xa84   : > { %v2808_v7 = vpop.f32.mrf.mxu1 }
 0xa85   : > { %v2822_v26 = vpack.c.bf16 %v2808_v7, %v2806_v29 }
 0xa87   : > { %6478 = vmatmul.msk.bf16.gmra.mxu2 %vm1881_vm5, %v2822_v26  ;;  %v2912_v37 = vpop.f32.mrf.mxu3  ;;  %v2492_v26 = vadd.f32 %v7938_v13, %v7913_v51 }
 0xa8c   : > { %v2811_v11 = vpop.f32.mrf.mxu1 }
 0xa8f   : > { %v2914_v49 = vpop.f32.mrf.mxu3 }
 0xa90   : > { %v2996_v31 = vpack.c.bf16 %v2914_v49, %v2912_v37 }
 0xa94   : > { %v2813_v59 = vpop.f32.mrf.mxu1 }
 0xa95   : > { %v2823_v2 = vpack.c.bf16 %v2813_v59, %v2811_v11 }
 0xa97   : > { %6479 = vmatmul.msk.bf16.gmra.mxu2 %vm1881_vm5, %v2823_v2 }
 0xa9c   : > { %v2816_v58 = vpop.f32.mrf.mxu1 }
 0xaa4   : > { %v2818_v19 = vpop.f32.mrf.mxu1 }
 0xaa5   : > { %v2824_v63 = vpack.c.bf16 %v2818_v19, %v2816_v58 }
 0xaa7   : > { %6480 = vmatmul.msk.bf16.gmra.mxu2 %vm1881_vm5, %v2824_v63 }
 0xaac   : > { %v2973_v35 = vpop.f32.mrf.mxu1 }
 0xab4   : > { %v2975_v16 = vpop.f32.mrf.mxu1 }
 0xab5   : > { %v3154_v41 = vpack.c.bf16 %v2975_v16, %v2973_v35 }
 0xab7   : > { %6511 = vmatmul.msk.bf16.vlgmr.msrb.gmra.mxu2 %vm1881_vm5, %v2993_v21 }
 0xabc   : > { %v2978_v10 = vpop.f32.mrf.mxu1 }
 0xac4   : > { %v2980_v12 = vpop.f32.mrf.mxu1 }
 0xac5   : > { %v3155_v23 = vpack.c.bf16 %v2980_v12, %v2978_v10 }
 0xac7   : > { %6512 = vmatmul.msk.bf16.gmra.mxu2 %vm1881_vm5, %v2994_v28 }
 0xacc   : > { %v2983_v52 = vpop.f32.mrf.mxu1 }
 0xad4   : > { %v2985_v46 = vpop.f32.mrf.mxu1 }
 0xad5   : > { %v3156_v18 = vpack.c.bf16 %v2985_v46, %v2983_v52 }
 0xad7   : > { %6513 = vmatmul.msk.bf16.gmra.mxu2 %vm1881_vm5, %v2995_v38 }
 0xadc   : > { %v2988_v4 = vpop.f32.mrf.mxu1 }
 0xae4   : > { %v2990_v56 = vpop.f32.mrf.mxu1 }
 0xae5   : > { %v3157_v53 = vpack.c.bf16 %v2990_v56, %v2988_v4 }
 0xae7   : > { %6514 = vmatmul.msk.bf16.gmra.mxu2 %vm1881_vm5, %v2996_v31  ;;  %3174 = vmatpush.bf16.msrb.mxu3 %v3157_v53 }
 0xaeb   : > { %3175 = vmatpush.bf16.msrb.mxu3 %v3156_v18 }
 0xaef   : > { %3176 = vmatpush.bf16.msrb.mxu3 %v3155_v23 }
 0xaf3   : > { %3177 = vmatpush.bf16.msrb.mxu3 %v3154_v41 }
 0xafa   : > { %v2851_v54 = vpop.f32.mrf.mxu2 }
 0xafb   : > { %v8015_v55 = vadd.f32 %v2851_v54, %v2482_v45 }
 0xb02   : > { %v8017_v8 = vpop.f32.mrf.mxu2 }
 0xb0a   : > { %v2856_v50 = vpop.f32.mrf.mxu2 }
 0xb0b   : > { %v8021_v29 = vadd.f32 %v2856_v50, %v2487_v32 }
 0xb12   : > { %v8023_v7 = vpop.f32.mrf.mxu2 }
 0xb1a   : > { %v2861_v11 = vpop.f32.mrf.mxu2 }
 0xb1b   : > { %v8027_v59 = vadd.f32 %v2861_v11, %v2492_v26 }
 0xb22   : > { %v8029_v33 = vpop.f32.mrf.mxu2 }
 0xb2a   : > { %v2866_v2 = vpop.f32.mrf.mxu2 }
 0xb2b   : > { %v8033_v42 = vadd.f32 %v2866_v2, %v2497_v1 }
 0xb32   : > { %v8035_v47 = vpop.f32.mrf.mxu2 }
 0xb3a   : > { %v3034_v6 = vpop.f32.mrf.mxu2 }
 0xb3b   : > { %v3054_v58 = vmul.f32 0.5, %v3034_v6 }
 0xb3d   : > { %v3062_v19 = vsel %vm1943_vm6, %v3054_v58, -inf }
 0xb3e   : > { %3063 = vmax.xlane.f32.xlu2 %v3062_v19 }
 0xb42   : > { %v3036_v63 = vpop.f32.mrf.mxu2 }
 0xb43   : > { %v3055_v51 = vmul.f32 0.5, %v3036_v63 }
 0xb45   : > { %v3065_v13 = vsel %vm1943_vm6, %v3055_v51, -inf }
 0xb46   : > { %3066 = vmax.xlane.f32.xlu0 %v3065_v13 }
 0xb4a   : > { %v3039_v30 = vpop.f32.mrf.mxu2 }
 0xb4b   : > { %v3056_v35 = vmul.f32 0.5, %v3039_v30 }
 0xb4d   : > { %v3068_v57 = vsel %vm1943_vm6, %v3056_v35, -inf }
 0xb4e   : > { %3069 = vmax.xlane.f32.xlu1 %v3068_v57 }
 0xb52   : > { %v3041_v61 = vpop.f32.mrf.mxu2 }
 0xb53   : > { %v3057_v15 = vmul.f32 0.5, %v3041_v61 }
 0xb55   : > { %v3071_v16 = vsel %vm1943_vm6, %v3057_v15, -inf }
 0xb56   : > { %3072 = vmax.xlane.f32.xlu2 %v3071_v16 }
 0xb5a   : > { %v3044_v21 = vpop.f32.mrf.mxu2 }
 0xb5b   : > { %v3058_v22 = vmul.f32 0.5, %v3044_v21 }
 0xb5d   : > { %v3074_v10 = vsel %vm1943_vm6, %v3058_v22, -inf }
 0xb5e   : > { %3075 = vmax.xlane.f32.xlu0 %v3074_v10 }
 0xb62   : > { %v3046_v39 = vpop.f32.mrf.mxu2 }
 0xb63   : > { %v3059_v12 = vmul.f32 0.5, %v3046_v39 }
 0xb65   : > { %v3077_v28 = vsel %vm1943_vm6, %v3059_v12, -inf }
 0xb66   : > { %3078 = vmax.xlane.f32.xlu1 %v3077_v28 }
 0xb6a   : > { %v3049_v52 = vpop.f32.mrf.mxu2 }
 0xb6b   : > { %v3060_v60 = vmul.f32 0.5, %v3049_v52 }
 0xb6d   : > { %v3080_v46 = vsel %vm1943_vm6, %v3060_v60, -inf }
 0xb6e   : > { %3081 = vmax.xlane.f32.xlu2 %v3080_v46 }
 0xb72   : > { %v3051_v38 = vpop.f32.mrf.mxu2 }
 0xb73   : > { %v3061_v37 = vmul.f32 0.5, %v3051_v38 }
 0xb75   : > { %v3083_v4 = vsel %vm1943_vm6, %v3061_v37, -inf }
 0xb76   : > { %3084 = vmax.xlane.f32.xlu0 %v3083_v4 }
 0xbb1   : > { %v3064_v49 = vpop.xlane.xlu2 %3063 }
 0xbb2   : > { %v3086_v56 = vsub.f32 %v3054_v58, %v3064_v49 }
 0xbb4   : > { %v3094_v31 = vmul.f32 1.442695, %v3086_v56 }
 0xbb6   : > { %6961 = vpow2.f32 %v3094_v31  ;;  %v8085_v31 = vld [vmem:[%s8073_s28 + $0x8] sm:$0xff] }
 0xbb9   : > { %v3067_v53 = vpop.xlane.xlu0 %3066 }
 0xbba   : > { %v3087_v18 = vsub.f32 %v3055_v51, %v3067_v53  ;;  %v8088_v53 = vld [vmem:[%s8073_s28 + $0x18] sm:$0xff] }
 0xbbc   : > { %v8045_v23 = vpop.eup %6961  ;;  %v3096_v41 = vmul.f32 1.442695, %v3087_v18  ;;  %v3293_v18 = vsel %vm1268_vm0, %v8088_v53, 0.0 }
 0xbbd   : > { %v3110_v45 = vsel %vm1943_vm6, %v8045_v23, 0.0 }
 0xbbe   : > { %6963 = vpow2.f32 %v3096_v41  ;;  %3111 = vadd.xlane.f32.xlu1 %v3110_v45 }
 0xbc1   : > { %v3070_v54 = vpop.xlane.xlu1 %3069 }
 0xbc2   : > { %v3088_v32 = vsub.f32 %v3056_v35, %v3070_v54  ;;  %v8099_v54 = vld [vmem:[%s8073_s28 + $0x20] sm:$0xff] }
 0xbc4   : > { %v8049_v50 = vpop.eup %6963  ;;  %v3098_v26 = vmul.f32 1.442695, %v3088_v32  ;;  %v8102_v32 = vld [vmem:[%s8073_s28 + $0x10] sm:$0xff] }
 0xbc5   : > { %v3113_v11 = vsel %vm1943_vm6, %v8049_v50, 0.0 }
 0xbc6   : > { %6965 = vpow2.f32 %v3098_v26  ;;  %3114 = vadd.xlane.f32.xlu2 %v3113_v11  ;;  %v3296_v26 = vsel %vm1268_vm0, %v8099_v54, 0.0  ;;  %v3290_v11 = vsel %vm1268_vm0, %v8102_v32, 0.0 }
 0xbc9   : > { %v3073_v1 = vpop.xlane.xlu2 %3072 }
 0xbca   : > { %v3089_v2 = vsub.f32 %v3057_v15, %v3073_v1  ;;  %v8109_v1 = vld [vmem:[%s8073_s28 + $0x28] sm:$0xff] }
 0xbcc   : > { %v8053_v6 = vpop.eup %6965  ;;  %v3100_v58 = vmul.f32 1.442695, %v3089_v2  ;;  %v3299_v2 = vsel %vm1268_vm0, %v8109_v1, 0.0 }
 0xbcd   : > { %v3116_v19 = vsel %vm1943_vm6, %v8053_v6, 0.0 }
 0xbce   : > { %6967 = vpow2.f32 %v3100_v58  ;;  %3117 = vadd.xlane.f32.xlu0 %v3116_v19  ;;  %v8114_v58 = vld [vmem:[%s8073_s28 + $0x30] sm:$0xff] }
 0xbcf   : > { %v3302_v19 = vsel %vm1268_vm0, %v8114_v58, 0.0 }
 0xbd1   : > { %v3076_v63 = vpop.xlane.xlu0 %3075 }
 0xbd2   : > { %v3090_v51 = vsub.f32 %v3058_v22, %v3076_v63 }
 0xbd4   : > { %v8057_v13 = vpop.eup %6967  ;;  %v3102_v30 = vmul.f32 1.442695, %v3090_v51 }
 0xbd5   : > { %v3119_v35 = vsel %vm1943_vm6, %v8057_v13, 0.0 }
 0xbd6   : > { %6969 = vpow2.f32 %v3102_v30  ;;  %3120 = vadd.xlane.f32.xlu1 %v3119_v35 }
 0xbd9   : > { %v3079_v57 = vpop.xlane.xlu1 %3078 }
 0xbda   : > { %v3091_v61 = vsub.f32 %v3059_v12, %v3079_v57  ;;  %v8076_v12 = vld [vmem:[%s8073_s28] sm:$0xff] }
 0xbdb   : > { %v3284_v38 = vsel %vm1268_vm0, %v8076_v12, 0.0 }
 0xbdc   : > { %v8061_v15 = vpop.eup %6969  ;;  %v3104_v16 = vmul.f32 1.442695, %v3091_v61 }
 0xbdd   : > { %v3122_v21 = vsel %vm1943_vm6, %v8061_v15, 0.0 }
 0xbde   : > { %6971 = vpow2.f32 %v3104_v16  ;;  %3123 = vadd.xlane.f32.xlu2 %v3122_v21 }
 0xbe1   : > { %v3082_v22 = vpop.xlane.xlu2 %3081 }
 0xbe2   : > { %v3092_v10 = vsub.f32 %v3060_v60, %v3082_v22 }
 0xbe4   : > { %v8065_v39 = vpop.eup %6971  ;;  %v3106_v28 = vmul.f32 1.442695, %v3092_v10 }
 0xbe5   : > { %v3125_v52 = vsel %vm1943_vm6, %v8065_v39, 0.0 }
 0xbe6   : > { %6973 = vpow2.f32 %v3106_v28  ;;  %3126 = vadd.xlane.f32.xlu0 %v3125_v52 }
 0xbe9   : > { %v3085_v46 = vpop.xlane.xlu0 %3084 }
 0xbea   : > { %v3093_v60 = vsub.f32 %v3061_v37, %v3085_v46  ;;  %v3287_v37 = vsel %vm1268_vm0, %v8085_v31, 0.0 }
 0xbec   : > { %v8080_v4 = vpop.eup %6973  ;;  %v3108_v49 = vmul.f32 1.442695, %v3093_v60 }
 0xbed   : > { %v3128_v56 = vsel %vm1943_vm6, %v8080_v4, 0.0 }
 0xbee   : > { %6975 = vpow2.f32 %v3108_v49  ;;  %3129 = vadd.xlane.f32.xlu1 %v3128_v56  ;;  %3285 = vadd.xlane.f32.xlu0 %v3284_v38 }
 0xbf4   : > { %v8094_v41 = vpop.eup %6975 }
 0xbf5   : > { %v3131_v45 = vsel %vm1943_vm6, %v8094_v41, 0.0 }
 0xbf6   : > { %3288 = vadd.xlane.f32.xlu1 %v3287_v37  ;;  %3294 = vadd.xlane.f32.xlu0 %v3293_v18 }
 0xbf7   : > { %3132 = vadd.xlane.f32.xlu2 %v3131_v45 }
 0xbfe   : > { %3297 = vadd.xlane.f32.xlu1 %v3296_v26 }
 0xbff   : > { %3291 = vadd.xlane.f32.xlu2 %v3290_v11 }
 0xc07   : > { %3300 = vadd.xlane.f32.xlu2 %v3299_v2 }
 0xc0f   : > { %3303 = vadd.xlane.f32.xlu2 %v3302_v19 }
 0xc31   : > { %v3112_v63 = vpop.xlane.xlu1 %3111 }
 0xc32   : > { %6977 = vrcp.f32 %v3112_v63 }
 0xc38   : > { %v6978_v30 = vpop.eup %6977 }
 0xc39   : > { %v3115_v51 = vpop.xlane.xlu2 %3114  ;;  %v3142_v57 = vmul.f32 %v6978_v30, %v8045_v23  ;;  %v8137_v30 = vld [vmem:[%s8073_s28 + $0x38] sm:$0xff]  ;;  %s1172_s28 = scalar_lea.vmem %s9301_s10, %s7472_s7  ;;  %s9303_s10 = sld [smem:[#allocation20_spill]] }
 0xc3a   : > { %6979 = vrcp.f32 %v3115_v51 }
 0xc40   : > { %v6980_v35 = vpop.eup %6979 }
 0xc41   : > { %v3143_v61 = vmul.f32 %v6980_v35, %v8049_v50  ;;  %v3118_v21 = vpop.xlane.xlu0 %3117 }
 0xc42   : > { %6981 = vrcp.f32 %v3118_v21 }
 0xc43   : > { %v3150_v16 = vpack.c.bf16 %v3143_v61, %v3142_v57  ;;  %v3305_v61 = vsel %vm1268_vm0, %v8137_v30, 0.0 }
 0xc45   : > { %6515 = vmatmul.msk.bf16.vlgmr.msrb.gmra.mxu3 %vm1943_vm6, %v3150_v16 }
 0xc48   : > { %v6982_v10 = vpop.eup %6981 }
 0xc49   : > { %v3121_v22 = vpop.xlane.xlu1 %3120  ;;  %v3144_v52 = vmul.f32 %v6982_v10, %v8053_v6 }
 0xc4a   : > { %6983 = vrcp.f32 %v3121_v22 }
 0xc50   : > { %v6984_v28 = vpop.eup %6983 }
 0xc51   : > { %v3145_v46 = vmul.f32 %v6984_v28, %v8057_v13  ;;  %v3124_v38 = vpop.xlane.xlu2 %3123 }
 0xc52   : > { %6985 = vrcp.f32 %v3124_v38 }
 0xc53   : > { %v3151_v60 = vpack.c.bf16 %v3145_v46, %v3144_v52 }
 0xc55   : > { %6516 = vmatmul.msk.bf16.gmra.mxu3 %vm1943_vm6, %v3151_v60 }
 0xc58   : > { %v6986_v50 = vpop.eup %6985 }
 0xc59   : > { %v3127_v23 = vpop.xlane.xlu0 %3126  ;;  %v3146_v56 = vmul.f32 %v6986_v50, %v8061_v15 }
 0xc5a   : > { %6987 = vrcp.f32 %v3127_v23 }
 0xc60   : > { %v6988_v49 = vpop.eup %6987 }
 0xc61   : > { %v3147_v37 = vmul.f32 %v6988_v49, %v8065_v39  ;;  %v3130_v18 = vpop.xlane.xlu1 %3129  ;;  %v3286_v45 = vpop.xlane.xlu0 %3285 }
 0xc62   : > { %v3308_v6 = vmul.f32 %v3286_v45, %v7425_v20  ;;  %6989 = vrcp.f32 %v3130_v18 }
 0xc63   : > { %v3152_v26 = vpack.c.bf16 %v3147_v37, %v3146_v56 }
 0xc64   : > { %v8128_v13 = vsub.f32 %v8076_v12, %v3308_v6 }
 0xc65   : > { %6517 = vmatmul.msk.bf16.gmra.mxu3 %vm1943_vm6, %v3152_v26 }
 0xc66   : > { %v3324_v11 = vmul.f32 %v8128_v13, %v8128_v13 }
 0xc68   : > { %v3332_v2 = vsel %vm1268_vm0, %v3324_v11, 0.0  ;;  %v6990_v21 = vpop.eup %6989 }
 0xc69   : > { %v3289_v15 = vpop.xlane.xlu1 %3288  ;;  %3333 = vadd.xlane.f32.xlu0 %v3332_v2  ;;  %v3295_v39 = vpop.xlane.xlu0 %3294 }
 0xc6a   : > { %v3309_v19 = vmul.f32 %v3289_v15, %v7425_v20  ;;  %v3133_v63 = vpop.xlane.xlu2 %3132  ;;  %v3311_v51 = vmul.f32 %v3295_v39, %v7425_v20 }
 0xc6b   : > { %6991 = vrcp.f32 %v3133_v63 }
 0xc6c   : > { %v8140_v12 = vsub.f32 %v8085_v31, %v3309_v19  ;;  %v8143_v35 = vsub.f32 %v8088_v53, %v3311_v51  ;;  %v3148_v53 = vmul.f32 %v6990_v21, %v8080_v4 }
 0xc6e   : > { %v3325_v57 = vmul.f32 %v8140_v12, %v8140_v12  ;;  %v3327_v16 = vmul.f32 %v8143_v35, %v8143_v35 }
 0xc70   : > { %v3335_v22 = vsel %vm1268_vm0, %v3325_v57, 0.0  ;;  %v3341_v10 = vsel %vm1268_vm0, %v3327_v16, 0.0 }
 0xc71   : > { %v6992_v28 = vpop.eup %6991  ;;  %3336 = vadd.xlane.f32.xlu1 %v3335_v22  ;;  %v3298_v31 = vpop.xlane.xlu1 %3297  ;;  %3306 = vadd.xlane.f32.xlu0 %v3305_v61 }
 0xc72   : > { %v3149_v52 = vmul.f32 %v6992_v28, %v8094_v41  ;;  %v3312_v46 = vmul.f32 %v3298_v31, %v7425_v20  ;;  %v3292_v60 = vpop.xlane.xlu2 %3291  ;;  %3342 = vadd.xlane.f32.xlu2 %v3341_v10 }
 0xc73   : > { %v3310_v38 = vmul.f32 %v3292_v60, %v7425_v20 }
 0xc74   : > { %v8158_v23 = vsub.f32 %v8099_v54, %v3312_v46  ;;  %v3153_v50 = vpack.c.bf16 %v3149_v52, %v3148_v53 }
 0xc75   : > { %v8161_v49 = vsub.f32 %v8102_v32, %v3310_v38 }
 0xc76   : > { %6518 = vmatmul.msk.bf16.gmra.mxu3 %vm1943_vm6, %v3153_v50  ;;  %v3328_v4 = vmul.f32 %v8158_v23, %v8158_v23 }
 0xc77   : > { %v3326_v41 = vmul.f32 %v8161_v49, %v8161_v49 }
 0xc78   : > { %v3344_v56 = vsel %vm1268_vm0, %v3328_v4, 0.0 }
 0xc79   : > { %v3338_v37 = vsel %vm1268_vm0, %v3326_v41, 0.0  ;;  %3345 = vadd.xlane.f32.xlu0 %v3344_v56 }
 0xc7a   : > { %3339 = vadd.xlane.f32.xlu1 %v3338_v37  ;;  %v3301_v54 = vpop.xlane.xlu2 %3300 }
 0xc7b   : > { %v3313_v32 = vmul.f32 %v3301_v54, %v7425_v20 }
 0xc7d   : > { %v8172_v18 = vsub.f32 %v8109_v1, %v3313_v32  ;;  %v6519_v1 = vld [vmem:[%s7831_s9 + $0x6] sm:$0x3] }
 0xc7e   : > { %v3218_v19 = vsel %vm2424_vm7, %v6519_v1, 0 }
 0xc7f   : > { %v3329_v45 = vmul.f32 %v8172_v18, %v8172_v18  ;;  %3227 = vmatpush.bf16.msra.mxu0 %v3218_v19 }
 0xc81   : > { %v3347_v6 = vsel %vm1268_vm0, %v3329_v45, 0.0 }
 0xc82   : > { %3348 = vadd.xlane.f32.xlu1 %v3347_v6  ;;  %v3304_v26 = vpop.xlane.xlu2 %3303 }
 0xc83   : > { %v3314_v11 = vmul.f32 %v3304_v26, %v7425_v20 }
 0xc85   : > { %v8179_v2 = vsub.f32 %v8114_v58, %v3314_v11  ;;  %v6760_v58 = vld [vmem:[%s1172_s28] sm:$0xff]  ;;  %s9302_s28 = sld [smem:[#allocation15_spill]] }
 0xc86   : > { %3507 = vmatpush.bf16.msra.mxu1 %v6760_v58 }
 0xc87   : > { %v3330_v15 = vmul.f32 %v8179_v2, %v8179_v2 }
 0xc89   : > { %v3350_v39 = vsel %vm1268_vm0, %v3330_v15, 0.0 }
 0xc8a   : > { %3351 = vadd.xlane.f32.xlu2 %v3350_v39 }
 0xc8b   : > { %s1175_s9 = scalar_lea.vmem %s9302_s28, %s9316_s4 }
 0xcc8   : > { %v3179_v63 = vpop.f32.mrf.mxu3 }
 0xcd0   : > { %v3181_v51 = vpop.f32.mrf.mxu3 }
 0xcd1   : > { %v3199_v57 = vpack.c.bf16 %v3181_v51, %v3179_v63 }
 0xcd3   : > { %6520 = vmatmul.msk.bf16.vlgmr.msra.gmra.mxu0 %vm1881_vm5, %v3199_v57 }
 0xcd8   : > { %v3184_v61 = vpop.f32.mrf.mxu3 }
 0xcdc   : > { %v3334_v16 = vpop.xlane.xlu0 %3333 }
 0xcdd   : > { %v3356_v21 = vmul.f32 %v3334_v16, %v7425_v20 }
 0xcdf   : > { %v3364_v22 = vadd.f32 1e-05, %v3356_v21 }
 0xce0   : > { %v3186_v10 = vpop.f32.mrf.mxu3 }
 0xce1   : > { %6993 = vrsqrt.f32 %v3364_v22  ;;  %v3200_v28 = vpack.c.bf16 %v3186_v10, %v3184_v61  ;;  %vm3378_vm9 = vweird.f32 %v3364_v22 }
 0xce3   : > { %6521 = vmatmul.msk.bf16.gmra.mxu0 %vm1881_vm5, %v3200_v28 }
 0xce4   : > { %v3337_v31 = vpop.xlane.xlu1 %3336  ;;  %v3307_v53 = vpop.xlane.xlu0 %3306 }
 0xce5   : > { %v3357_v52 = vmul.f32 %v3337_v31, %v7425_v20  ;;  %v3343_v46 = vpop.xlane.xlu2 %3342  ;;  %v3315_v60 = vmul.f32 %v3307_v53, %v7425_v20 }
 0xce6   : > { %v3359_v38 = vmul.f32 %v3343_v46, %v7425_v20 }
 0xce7   : > { %v6994_v50 = vpop.eup %6993  ;;  %v3365_v4 = vadd.f32 1e-05, %v3357_v52  ;;  %v8201_v41 = vsub.f32 %v8137_v30, %v3315_v60 }
 0xce8   : > { %v3373_v56 = vmul.f32 %v6994_v50, %v3364_v22  ;;  %v8203_v37 = vadd.f32 1e-05, %v3359_v38  ;;  %v3189_v54 = vpop.f32.mrf.mxu3  ;;  %vm3379_vm8 = vweird.f32 %v6994_v50 }
 0xce9   : > { %6995 = vrsqrt.f32 %v3365_v4  ;;  %v3331_v32 = vmul.f32 %v8201_v41, %v8201_v41  ;;  %vm3380_vm10 = vmor %vm3378_vm9, %vm3379_vm8  ;;  %vm3388_vm12 = vweird.f32 %v3365_v4 }
 0xcea   : > { %v3374_v45 = vmul.f32 %v6994_v50, %v3373_v56  ;;  %6997 = vrsqrt.f32 %v8203_v37  ;;  %vm3408_vm1 = vweird.f32 %v8203_v37 }
 0xceb   : > { %v3353_v6 = vsel %vm1268_vm0, %v3331_v32, 0.0 }
 0xcec   : > { %v3375_v26 = vmul.f32 0.5, %v3374_v45  ;;  %3354 = vadd.xlane.f32.xlu0 %v3353_v6  ;;  %v3346_v11 = vpop.xlane.xlu0 %3345 }
 0xced   : > { %v3340_v15 = vpop.xlane.xlu1 %3339  ;;  %v3360_v19 = vmul.f32 %v3346_v11, %v7425_v20  ;;  %v8225_v11 = vld [vmem:[%s9291_s3] ss:$0 sm:$0xff]  ;;  %s8584_s3 = scalar_lea.vmem %s9250_s19, %s7472_s7 }
 0xcee   : > { %v3376_v39 = vsub.f32 1.5, %v3375_v26  ;;  %v3358_v30 = vmul.f32 %v3340_v15, %v7425_v20 }
 0xcef   : > { %v6996_v1 = vpop.eup %6995  ;;  %v8215_v10 = vadd.f32 1e-05, %v3360_v19 }
 0xcf0   : > { %v8211_v63 = vpop.eup %6997  ;;  %v3377_v51 = vmul.f32 %v6994_v50, %v3376_v39  ;;  %v3383_v57 = vmul.f32 %v6996_v1, %v3365_v4  ;;  %v3366_v58 = vadd.f32 1e-05, %v3358_v30  ;;  %v3191_v61 = vpop.f32.mrf.mxu3  ;;  %vm3389_vm11 = vweird.f32 %v6996_v1 }
 0xcf1   : > { %v3403_v16 = vmul.f32 %v8211_v63, %v8203_v37  ;;  %v3201_v28 = vpack.c.bf16 %v3191_v61, %v3189_v54  ;;  %vm3390_vm13 = vmor %vm3388_vm12, %vm3389_vm11  ;;  %vm3409_vm2 = vweird.f32 %v8211_v63 }
 0xcf2   : > { %v3384_v21 = vmul.f32 %v6996_v1, %v3383_v57  ;;  %6999 = vrsqrt.f32 %v3366_v58  ;;  %v3381_v31 = vsel %vm3380_vm10, %v6994_v50, %v3377_v51  ;;  %vm3398_vm14 = vweird.f32 %v3366_v58  ;;  %vm3410_vm4 = vmor %vm3408_vm1, %vm3409_vm2 }
 0xcf3   : > { %v3404_v52 = vmul.f32 %v8211_v63, %v3403_v16  ;;  %6522 = vmatmul.msk.bf16.gmra.mxu0 %vm1881_vm5, %v3201_v28  ;;  %v3452_v56 = vmul.f32 %v3381_v31, %v8128_v13  ;;  %7001 = vrsqrt.f32 %v8215_v10  ;;  %vm3418_vm10 = vweird.f32 %v8215_v10 }
 0xcf4   : > { %v3385_v53 = vmul.f32 0.5, %v3384_v21 }
 0xcf5   : > { %v3349_v46 = vpop.xlane.xlu1 %3348  ;;  %v3405_v45 = vmul.f32 0.5, %v3404_v52  ;;  %v3460_v15 = vmul.f32 %v8225_v11, %v3452_v56 }
 0xcf6   : > { %v3386_v60 = vsub.f32 1.5, %v3385_v53  ;;  %v3361_v38 = vmul.f32 %v3349_v46, %v7425_v20 }
 0xcf7   : > { %v3406_v30 = vsub.f32 1.5, %v3405_v45 }
 0xcf8   : > { %v7000_v22 = vpop.eup %6999  ;;  %v3387_v32 = vmul.f32 %v6996_v1, %v3386_v60  ;;  %v3369_v54 = vadd.f32 1e-05, %v3361_v38 }
 0xcf9   : > { %v3393_v50 = vmul.f32 %v7000_v22, %v3366_v58  ;;  %v3194_v6 = vpop.f32.mrf.mxu3  ;;  %v7002_v19 = vpop.eup %7001  ;;  %vm3399_vm15 = vweird.f32 %v7000_v22  ;;  %v3407_v21 = vmul.f32 %v8211_v63, %v3406_v30 }
 0xcfa   : > { %v3391_v26 = vsel %vm3390_vm13, %v6996_v1, %v3387_v32  ;;  %7003 = vrsqrt.f32 %v3369_v54  ;;  %v8235_v1 = vld [vmem:[%s9292_s29] ss:$0 sm:$0xff]  ;;  %vm3400_vm3 = vmor %vm3398_vm14, %vm3399_vm15  ;;  %v3413_v58 = vmul.f32 %v7002_v19, %v8215_v10  ;;  %vm3428_vm8 = vweird.f32 %v3369_v54 }
 0xcfb   : > { %v3453_v13 = vmul.f32 %v3391_v26, %v8140_v12  ;;  %v3394_v39 = vmul.f32 %v7000_v22, %v3393_v50  ;;  %v3468_v12 = vadd.f32 %v8235_v1, %v3460_v15  ;;  %v3411_v38 = vsel %vm3410_vm4, %v8211_v63, %v3407_v21 }
 0xcfc   : > { %v3414_v56 = vmul.f32 %v7002_v19, %v3413_v58  ;;  %v3455_v50 = vmul.f32 %v3411_v38, %v8143_v35  ;;  %vm3419_vm11 = vweird.f32 %v7002_v19 }
 0xcfd   : > { %v3461_v4 = vmul.f32 %v8225_v11, %v3453_v13  ;;  %v3395_v51 = vmul.f32 0.5, %v3394_v39  ;;  %vm3420_vm13 = vmor %vm3418_vm10, %vm3419_vm11 }
 0xcfe   : > { %v3415_v26 = vmul.f32 0.5, %v3414_v56  ;;  %v3463_v13 = vmul.f32 %v8225_v11, %v3455_v50 }
 0xcff   : > { %v3469_v57 = vadd.f32 %v8235_v1, %v3461_v4  ;;  %v3396_v61 = vsub.f32 1.5, %v3395_v51 }
 0xd00   : > { %v7004_v16 = vpop.eup %7003  ;;  %v3471_v63 = vadd.f32 %v8235_v1, %v3463_v13 }
 0xd01   : > { %v3476_v37 = vpack.c.bf16 %v3469_v57, %v3468_v12  ;;  %v3397_v28 = vmul.f32 %v7000_v22, %v3396_v61  ;;  %v3423_v31 = vmul.f32 %v7004_v16, %v3369_v54  ;;  %v3196_v53 = vpop.f32.mrf.mxu3  ;;  %vm3429_vm9 = vweird.f32 %v7004_v16 }
 0xd02   : > { %v3202_v52 = vpack.c.bf16 %v3196_v53, %v3194_v6  ;;  %vm3430_vm12 = vmor %vm3428_vm8, %vm3429_vm9 }
 0xd03   : > { %v3401_v46 = vsel %vm3400_vm3, %v7000_v22, %v3397_v28  ;;  %v3424_v60 = vmul.f32 %v7004_v16, %v3423_v31  ;;  %6528 = vmatmul.msk.bf16.vlgmr.msra.gmra.mxu1 %vm1268_vm0, %v3476_v37  ;;  %v3416_v22 = vsub.f32 1.5, %v3415_v26  ;;  %v3352_v37 = vpop.xlane.xlu2 %3351 }
 0xd04   : > { %v3454_v32 = vmul.f32 %v3401_v46, %v8161_v49  ;;  %6523 = vmatmul.msk.bf16.gmra.mxu0 %vm1881_vm5, %v3202_v52 }
 0xd05   : > { %v3425_v45 = vmul.f32 0.5, %v3424_v60  ;;  %v3417_v30 = vmul.f32 %v7002_v19, %v3416_v22 }
 0xd06   : > { %v3462_v6 = vmul.f32 %v8225_v11, %v3454_v32 }
 0xd07   : > { %v3426_v15 = vsub.f32 1.5, %v3425_v45  ;;  %v3421_v51 = vsel %vm3420_vm13, %v7002_v19, %v3417_v30 }
 0xd08   : > { %v3470_v39 = vadd.f32 %v8235_v1, %v3462_v6  ;;  %v3456_v54 = vmul.f32 %v3421_v51, %v8158_v23 }
 0xd09   : > { %v3427_v49 = vmul.f32 %v7004_v16, %v3426_v15 }
 0xd0a   : > { %v3477_v35 = vpack.c.bf16 %v3471_v63, %v3470_v39  ;;  %v3464_v10 = vmul.f32 %v8225_v11, %v3456_v54  ;;  %v8274_v54 = vld [vmem:[%s1198_s8] ss:$0 sm:$0xff]  ;;  %s8412_s8 = scalar_lea.vmem %s9248_s17, %s7645_s30 }
 0xd0b   : > { %v3431_v4 = vsel %vm3430_vm12, %v7004_v16, %v3427_v49  ;;  %v3362_v16 = vmul.f32 %v3352_v37, %v7425_v20 }
 0xd0c   : > { %v3457_v12 = vmul.f32 %v3431_v4, %v8172_v18  ;;  %v3472_v21 = vadd.f32 %v8235_v1, %v3464_v10 }
 0xd0d   : > { %v3370_v28 = vadd.f32 1e-05, %v3362_v16 }
 0xd0e   : > { %v3465_v57 = vmul.f32 %v8225_v11, %v3457_v12 }
 0xd0f   : > { %7005 = vrsqrt.f32 %v3370_v28  ;;  %vm3438_vm14 = vweird.f32 %v3370_v28 }
 0xd10   : > { %v3473_v61 = vadd.f32 %v8235_v1, %v3465_v57 }
 0xd12   : > { %v3478_v58 = vpack.c.bf16 %v3473_v61, %v3472_v21 }
 0xd13   : > { %6529 = vmatmul.msk.bf16.gmra.mxu1 %vm1268_vm0, %v3477_v35 }
 0xd15   : > { %v7006_v18 = vpop.eup %7005 }
 0xd16   : > { %v3433_v23 = vmul.f32 %v7006_v18, %v3370_v28  ;;  %vm3439_vm15 = vweird.f32 %v7006_v18 }
 0xd17   : > { %vm3440_vm1 = vmor %vm3438_vm14, %vm3439_vm15 }
 0xd18   : > { %v3434_v53 = vmul.f32 %v7006_v18, %v3433_v23 }
 0xd1a   : > { %v3435_v56 = vmul.f32 0.5, %v3434_v53 }
 0xd1c   : > { %v3436_v32 = vsub.f32 1.5, %v3435_v56 }
 0xd1e   : > { %v3437_v26 = vmul.f32 %v7006_v18, %v3436_v32 }
 0xd20   : > { %v3441_v13 = vsel %vm3440_vm1, %v7006_v18, %v3437_v26 }
 0xd21   : > { %v3458_v49 = vmul.f32 %v3441_v13, %v8179_v2 }
 0xd23   : > { %6530 = vmatmul.msk.bf16.gmra.mxu1 %vm1268_vm0, %v3478_v58  ;;  %v3466_v51 = vmul.f32 %v8225_v11, %v3458_v49 }
 0xd25   : > { %v3474_v10 = vadd.f32 %v8235_v1, %v3466_v51 }
 0xd50   : > { %v3229_v19 = vpop.f32.mrf.mxu0 }
 0xd51   : > { %v3249_v12 = vadd.f32 %v3229_v19, %v8015_v55 }
 0xd53   : > { %v3260_v21 = vadd.f32 %v8274_v54, %v3249_v12 }
 0xd55   : > { %v3268_v16 = vadd.f32 %v3260_v21, %v7563_v25 }
 0xd58   : > { %v3231_v31 = vpop.f32.mrf.mxu0 }
 0xd5f   : > { %v3355_v52 = vpop.xlane.xlu0 %3354 }
 0xd60   : > { %v3363_v46 = vmul.f32 %v3355_v52, %v7425_v20  ;;  %v3234_v60 = vpop.f32.mrf.mxu0 }
 0xd62   : > { %v3371_v38 = vadd.f32 1e-05, %v3363_v46  ;;  %v2489_v46 = vadd.f32 %v7934_v34, %v7908_v48 }
 0xd64   : > { %7007 = vrsqrt.f32 %v3371_v38  ;;  %vm3448_vm3 = vweird.f32 %v3371_v38  ;;  %v2874_v56 = vadd.f32 %v8023_v7, %v2489_v46 }
 0xd68   : > { %v3236_v45 = vpop.f32.mrf.mxu0 }
 0xd6a   : > { %v7008_v50 = vpop.eup %7007 }
 0xd6b   : > { %v3443_v6 = vmul.f32 %v7008_v50, %v3371_v38  ;;  %vm3449_vm2 = vweird.f32 %v7008_v50 }
 0xd6c   : > { %vm3450_vm4 = vmor %vm3448_vm3, %vm3449_vm2 }
 0xd6d   : > { %v3444_v15 = vmul.f32 %v7008_v50, %v3443_v6 }
 0xd6f   : > { %v3445_v22 = vmul.f32 0.5, %v3444_v15 }
 0xd70   : > { %v3239_v63 = vpop.f32.mrf.mxu0 }
 0xd71   : > { %v3446_v39 = vsub.f32 1.5, %v3445_v22  ;;  %v3253_v7 = vadd.f32 %v3239_v63, %v8027_v59 }
 0xd73   : > { %v3447_v30 = vmul.f32 %v7008_v50, %v3446_v39 }
 0xd75   : > { %v3451_v35 = vsel %vm3450_vm4, %v7008_v50, %v3447_v30  ;;  %v3252_v50 = vadd.f32 %v3236_v45, %v2874_v56  ;;  %v3264_v45 = vadd.f32 %v8274_v54, %v3253_v7 }
 0xd76   : > { %v3459_v4 = vmul.f32 %v3451_v35, %v8201_v41  ;;  %v2484_v41 = vadd.f32 %v7928_v5, %v7901_v44 }
 0xd77   : > { %v3263_v26 = vadd.f32 %v8274_v54, %v3252_v50  ;;  %v3272_v59 = vadd.f32 %v3264_v45, %v7583_v40 }
 0xd78   : > { %v3467_v2 = vmul.f32 %v8225_v11, %v3459_v4  ;;  %v3241_v57 = vpop.f32.mrf.mxu0  ;;  %v2872_v55 = vadd.f32 %v8017_v8, %v2484_v41  ;;  %v8290_v11 = vld [vmem:[%s1175_s9] ss:$0 sm:$0xff]  ;;  %s8404_s9 = scalar_lea.vmem %s9247_s16, %s7645_s30 }
 0xd79   : > { %v3271_v6 = vadd.f32 %v3263_v26, %v7578_v9 }
 0xd7a   : > { %v3475_v61 = vadd.f32 %v8235_v1, %v3467_v2  ;;  %v3250_v37 = vadd.f32 %v3231_v31, %v2872_v55  ;;  %v3251_v31 = vadd.f32 %v3234_v60, %v8021_v29  ;;  %v2499_v2 = vadd.f32 %v7948_v24, %v7923_v0 }
 0xd7c   : > { %v3479_v58 = vpack.c.bf16 %v3475_v61, %v3474_v10  ;;  %v3261_v44 = vadd.f32 %v8274_v54, %v3250_v37  ;;  %v2878_v10 = vadd.f32 %v8035_v47, %v2499_v2 }
 0xd7e   : > { %6531 = vmatmul.msk.bf16.gmra.mxu1 %vm1268_vm0, %v3479_v58  ;;  %v3269_v23 = vadd.f32 %v3261_v44, %v7568_v62 }
 0xd80   : > { %v3509_v1 = vpop.f32.mrf.mxu1 }
 0xd81   : > { %v3529_v28 = vadd.f32 %v3509_v1, %v3268_v16  ;;  %v3244_v19 = vpop.f32.mrf.mxu0 }
 0xd82   : > { %v3255_v5 = vadd.f32 %v3244_v19, %v8033_v42  ;;  %v3262_v42 = vadd.f32 %v8274_v54, %v3251_v31 }
 0xd83   : > { %v8295_v8 = vadd.f32 %v8290_v11, %v3529_v28 }
 0xd84   : > { %v3266_v18 = vadd.f32 %v8274_v54, %v3255_v5  ;;  %v3270_v29 = vadd.f32 %v3262_v42, %v7573_v3  ;;  %v2494_v3 = vadd.f32 %v7942_v14, %v7915_v43 }
 0xd85   : > { %v3549_v25 = vsel %vm1268_vm0, %v8295_v8, 0.0 }
 0xd86   : > { %3550 = vadd.xlane.f32.xlu1 %v3549_v25  ;;  %v2876_v39 = vadd.f32 %v8029_v33, %v2494_v3 }
 0xd88   : > { %v3511_v53 = vpop.f32.mrf.mxu1  ;;  %v3254_v30 = vadd.f32 %v3241_v57, %v2876_v39 }
 0xd89   : > { %v3530_v52 = vadd.f32 %v3511_v53, %v3269_v23  ;;  %v3246_v57 = vpop.f32.mrf.mxu0 }
 0xd8a   : > { %v3265_v35 = vadd.f32 %v8274_v54, %v3254_v30  ;;  %v3256_v41 = vadd.f32 %v3246_v57, %v2878_v10 }
 0xd8b   : > { %v8306_v38 = vadd.f32 %v8290_v11, %v3530_v52 }
 0xd8c   : > { %v3273_v33 = vadd.f32 %v3265_v35, %v7588_v17  ;;  %v3274_v17 = vadd.f32 %v3266_v18, %v7597_v27  ;;  %v3267_v16 = vadd.f32 %v8274_v54, %v3256_v41  ;;  %v6761_v35 = vld [vmem:[%s8404_s9] sm:$0xff] }
 0xd8d   : > { %v3552_v32 = vsel %vm1268_vm0, %v8306_v38, 0.0  ;;  %3773 = vmatpush.bf16.msra.mxu2 %v6761_v35 }
 0xd8e   : > { %3553 = vadd.xlane.f32.xlu2 %v3552_v32  ;;  %v3275_v19 = vadd.f32 %v3267_v16, %v7609_v36 }
 0xd90   : > { %v3514_v62 = vpop.f32.mrf.mxu1 }
 0xd91   : > { %v3531_v60 = vadd.f32 %v3514_v62, %v3270_v29 }
 0xd93   : > { %v8314_v48 = vadd.f32 %v8290_v11, %v3531_v60 }
 0xd95   : > { %v3555_v34 = vsel %vm1268_vm0, %v8314_v48, 0.0 }
 0xd96   : > { %3556 = vadd.xlane.f32.xlu0 %v3555_v34 }
 0xd98   : > { %v3516_v15 = vpop.f32.mrf.mxu1 }
 0xd99   : > { %v3532_v13 = vadd.f32 %v3516_v15, %v3271_v6 }
 0xd9b   : > { %v8324_v22 = vadd.f32 %v8290_v11, %v3532_v13 }
 0xd9d   : > { %v3558_v49 = vsel %vm1268_vm0, %v8324_v22, 0.0 }
 0xd9e   : > { %3559 = vadd.xlane.f32.xlu1 %v3558_v49 }
 0xda0   : > { %v3519_v9 = vpop.f32.mrf.mxu1 }
 0xda1   : > { %v3533_v63 = vadd.f32 %v3519_v9, %v3272_v59 }
 0xda3   : > { %v8332_v43 = vadd.f32 %v8290_v11, %v3533_v63 }
 0xda5   : > { %v3561_v14 = vsel %vm1268_vm0, %v8332_v43, 0.0 }
 0xda6   : > { %3562 = vadd.xlane.f32.xlu2 %v3561_v14  ;;  %v6762_v14 = vld [vmem:[%s8412_s8] sm:$0xff] }
 0xda7   : > { %3810 = vmatpush.bf16.msra.mxu3 %v6762_v14 }
 0xda8   : > { %v3521_v4 = vpop.f32.mrf.mxu1 }
 0xda9   : > { %v3534_v51 = vadd.f32 %v3521_v4, %v3273_v33  ;;  %v6763_v33 = vld [vmem:[%s8418_s12] sm:$0xff] }
 0xdaa   : > { %3847 = vmatpush.bf16.msrb.mxu0 %v6763_v33 }
 0xdab   : > { %v8338_v12 = vadd.f32 %v8290_v11, %v3534_v51 }
 0xdad   : > { %v3564_v40 = vsel %vm1268_vm0, %v8338_v12, 0.0 }
 0xdae   : > { %3565 = vadd.xlane.f32.xlu0 %v3564_v40 }
 0xdf9   : > { %v3551_v61 = vpop.xlane.xlu1 %3550 }
 0xdfa   : > { %v3573_v21 = vmul.f32 %v3551_v61, %v7425_v20 }
 0xdfb   : > { %v3524_v58 = vpop.f32.mrf.mxu1 }
 0xdfc   : > { %v8348_v55 = vsub.f32 %v8295_v8, %v3573_v21  ;;  %v3535_v37 = vadd.f32 %v3524_v58, %v3274_v17 }
 0xdfe   : > { %v8352_v1 = vadd.f32 %v8290_v11, %v3535_v37  ;;  %v3589_v0 = vmul.f32 %v8348_v55, %v8348_v55 }
 0xe00   : > { %v3597_v24 = vsel %vm1268_vm0, %v3589_v0, 0.0  ;;  %v3567_v47 = vsel %vm1268_vm0, %v8352_v1, 0.0 }
 0xe01   : > { %v3554_v28 = vpop.xlane.xlu2 %3553  ;;  %3598 = vadd.xlane.f32.xlu1 %v3597_v24  ;;  %3568 = vadd.xlane.f32.xlu0 %v3567_v47 }
 0xe02   : > { %v3574_v27 = vmul.f32 %v3554_v28, %v7425_v20 }
 0xe03   : > { %v3526_v44 = vpop.f32.mrf.mxu1 }
 0xe04   : > { %v8362_v54 = vsub.f32 %v8306_v38, %v3574_v27  ;;  %v3536_v5 = vadd.f32 %v3526_v44, %v3275_v19 }
 0xe06   : > { %v8365_v18 = vadd.f32 %v8290_v11, %v3536_v5  ;;  %v3590_v25 = vmul.f32 %v8362_v54, %v8362_v54 }
 0xe08   : > { %v3600_v31 = vsel %vm1268_vm0, %v3590_v25, 0.0  ;;  %v3570_v23 = vsel %vm1268_vm0, %v8365_v18, 0.0 }
 0xe09   : > { %3601 = vadd.xlane.f32.xlu2 %v3600_v31  ;;  %v3557_v53 = vpop.xlane.xlu0 %3556  ;;  %3571 = vadd.xlane.f32.xlu1 %v3570_v23 }
 0xe0a   : > { %v3575_v36 = vmul.f32 %v3557_v53, %v7425_v20 }
 0xe0c   : > { %v8374_v52 = vsub.f32 %v8314_v48, %v3575_v36 }
 0xe0e   : > { %v3591_v11 = vmul.f32 %v8374_v52, %v8374_v52 }
 0xe10   : > { %v3603_v46 = vsel %vm1268_vm0, %v3591_v11, 0.0 }
 0xe11   : > { %v3560_v42 = vpop.xlane.xlu1 %3559  ;;  %3604 = vadd.xlane.f32.xlu2 %v3603_v46 }
 0xe12   : > { %v3576_v56 = vmul.f32 %v3560_v42, %v7425_v20 }
 0xe14   : > { %v8381_v32 = vsub.f32 %v8324_v22, %v3576_v56 }
 0xe16   : > { %v3592_v50 = vmul.f32 %v8381_v32, %v8381_v32 }
 0xe18   : > { %v3606_v29 = vsel %vm1268_vm0, %v3592_v50, 0.0 }
 0xe19   : > { %v3563_v62 = vpop.xlane.xlu2 %3562  ;;  %3607 = vadd.xlane.f32.xlu0 %v3606_v29 }
 0xe1a   : > { %v3577_v60 = vmul.f32 %v3563_v62, %v7425_v20 }
 0xe1c   : > { %v8388_v26 = vsub.f32 %v8332_v43, %v3577_v60 }
 0xe1e   : > { %v3593_v34 = vmul.f32 %v8388_v26, %v8388_v26 }
 0xe20   : > { %v3609_v7 = vsel %vm1268_vm0, %v3593_v34, 0.0  ;;  %v8443_v34 = vld [vmem:[%s9298_s5] ss:$0 sm:$0xff] }
 0xe21   : > { %v3566_v6 = vpop.xlane.xlu0 %3565  ;;  %3610 = vadd.xlane.f32.xlu1 %v3609_v7 }
 0xe22   : > { %v3578_v15 = vmul.f32 %v3566_v6, %v7425_v20 }
 0xe24   : > { %v8395_v13 = vsub.f32 %v8338_v12, %v3578_v15 }
 0xe26   : > { %v3594_v3 = vmul.f32 %v8395_v13, %v8395_v13 }
 0xe28   : > { %v3612_v45 = vsel %vm1268_vm0, %v3594_v3, 0.0 }
 0xe29   : > { %3613 = vadd.xlane.f32.xlu2 %v3612_v45 }
 0xe74   : > { %v3599_v39 = vpop.xlane.xlu1 %3598  ;;  %v3569_v49 = vpop.xlane.xlu0 %3568 }
 0xe75   : > { %v3621_v30 = vmul.f32 %v3599_v39, %v7425_v20  ;;  %v3579_v59 = vmul.f32 %v3569_v49, %v7425_v20 }
 0xe77   : > { %v3629_v9 = vadd.f32 1e-05, %v3621_v30  ;;  %v8421_v63 = vsub.f32 %v8352_v1, %v3579_v59  ;;  %v8452_v30 = vld [vmem:[%s9299_s6] ss:$0 sm:$0xff] }
 0xe79   : > { %7009 = vrsqrt.f32 %v3629_v9  ;;  %v3595_v4 = vmul.f32 %v8421_v63, %v8421_v63  ;;  %vm3643_vm9 = vweird.f32 %v3629_v9 }
 0xe7b   : > { %v3615_v51 = vsel %vm1268_vm0, %v3595_v4, 0.0 }
 0xe7c   : > { %v3602_v40 = vpop.xlane.xlu2 %3601  ;;  %v3572_v2 = vpop.xlane.xlu1 %3571  ;;  %3616 = vadd.xlane.f32.xlu0 %v3615_v51 }
 0xe7d   : > { %v3622_v57 = vmul.f32 %v3602_v40, %v7425_v20  ;;  %v3580_v10 = vmul.f32 %v3572_v2, %v7425_v20 }
 0xe7f   : > { %v7010_v61 = vpop.eup %7009  ;;  %v3630_v41 = vadd.f32 1e-05, %v3622_v57  ;;  %v8432_v21 = vsub.f32 %v8365_v18, %v3580_v10 }
 0xe80   : > { %v3638_v17 = vmul.f32 %v7010_v61, %v3629_v9  ;;  %vm3644_vm8 = vweird.f32 %v7010_v61 }
 0xe81   : > { %7011 = vrsqrt.f32 %v3630_v41  ;;  %v3596_v58 = vmul.f32 %v8432_v21, %v8432_v21  ;;  %vm3645_vm10 = vmor %vm3643_vm9, %vm3644_vm8  ;;  %vm3653_vm12 = vweird.f32 %v3630_v41 }
 0xe82   : > { %v3639_v37 = vmul.f32 %v7010_v61, %v3638_v17 }
 0xe83   : > { %v3618_v16 = vsel %vm1268_vm0, %v3596_v58, 0.0 }
 0xe84   : > { %v3640_v0 = vmul.f32 0.5, %v3639_v37  ;;  %v3605_v24 = vpop.xlane.xlu2 %3604  ;;  %3619 = vadd.xlane.f32.xlu1 %v3618_v16 }
 0xe85   : > { %v3623_v47 = vmul.f32 %v3605_v24, %v7425_v20 }
 0xe86   : > { %v3641_v28 = vsub.f32 1.5, %v3640_v0 }
 0xe87   : > { %v7012_v27 = vpop.eup %7011  ;;  %v3631_v19 = vadd.f32 1e-05, %v3623_v47 }
 0xe88   : > { %v3642_v44 = vmul.f32 %v7010_v61, %v3641_v28  ;;  %v3648_v5 = vmul.f32 %v7012_v27, %v3630_v41  ;;  %vm3654_vm11 = vweird.f32 %v7012_v27 }
 0xe89   : > { %7013 = vrsqrt.f32 %v3631_v19  ;;  %vm3655_vm13 = vmor %vm3653_vm12, %vm3654_vm11  ;;  %vm3663_vm15 = vweird.f32 %v3631_v19 }
 0xe8a   : > { %v3649_v25 = vmul.f32 %v7012_v27, %v3648_v5  ;;  %v3646_v31 = vsel %vm3645_vm10, %v7010_v61, %v3642_v44 }
 0xe8b   : > { %v3717_v42 = vmul.f32 %v3646_v31, %v8348_v55 }
 0xe8c   : > { %v3650_v23 = vmul.f32 0.5, %v3649_v25  ;;  %v3608_v53 = vpop.xlane.xlu0 %3607 }
 0xe8d   : > { %v3624_v36 = vmul.f32 %v3608_v53, %v7425_v20  ;;  %v3725_v7 = vmul.f32 %v8443_v34, %v3717_v42 }
 0xe8e   : > { %v3651_v11 = vsub.f32 1.5, %v3650_v23 }
 0xe8f   : > { %v7014_v46 = vpop.eup %7013  ;;  %v3632_v56 = vadd.f32 1e-05, %v3624_v36  ;;  %v3733_v59 = vadd.f32 %v8452_v30, %v3725_v7 }
 0xe90   : > { %v3652_v50 = vmul.f32 %v7012_v27, %v3651_v11  ;;  %v3658_v29 = vmul.f32 %v7014_v46, %v3631_v19  ;;  %vm3664_vm14 = vweird.f32 %v7014_v46 }
 0xe91   : > { %7015 = vrsqrt.f32 %v3632_v56  ;;  %vm3665_vm1 = vmor %vm3663_vm15, %vm3664_vm14  ;;  %vm3673_vm3 = vweird.f32 %v3632_v56 }
 0xe92   : > { %v3656_v62 = vsel %vm3655_vm13, %v7012_v27, %v3652_v50  ;;  %v3659_v60 = vmul.f32 %v7014_v46, %v3658_v29 }
 0xe93   : > { %v3718_v6 = vmul.f32 %v3656_v62, %v8362_v54 }
 0xe94   : > { %v3660_v15 = vmul.f32 0.5, %v3659_v60  ;;  %v3611_v3 = vpop.xlane.xlu1 %3610 }
 0xe95   : > { %v3726_v55 = vmul.f32 %v8443_v34, %v3718_v6  ;;  %v3625_v45 = vmul.f32 %v3611_v3, %v7425_v20 }
 0xe96   : > { %v3661_v39 = vsub.f32 1.5, %v3660_v15 }
 0xe97   : > { %v7016_v49 = vpop.eup %7015  ;;  %v3734_v9 = vadd.f32 %v8452_v30, %v3726_v55  ;;  %v3633_v35 = vadd.f32 1e-05, %v3625_v45 }
 0xe98   : > { %v3662_v14 = vmul.f32 %v7014_v46, %v3661_v39  ;;  %v3668_v54 = vmul.f32 %v7016_v49, %v3632_v56  ;;  %vm3674_vm2 = vweird.f32 %v7016_v49 }
 0xe99   : > { %v8456_v33 = vpack.c.bf16 %v3734_v9, %v3733_v59  ;;  %7017 = vrsqrt.f32 %v3633_v35  ;;  %vm3675_vm4 = vmor %vm3673_vm3, %vm3674_vm2  ;;  %vm3683_vm9 = vweird.f32 %v3633_v35 }
 0xe9a   : > { %v3669_v4 = vmul.f32 %v7016_v49, %v3668_v54  ;;  %v3666_v51 = vsel %vm3665_vm1, %v7014_v46, %v3662_v14  ;;  %v6764_v54 = vld [vmem:[%s8404_s9 + $0x8] sm:$0xff] }
 0xe9b   : > { %6536 = vmatmul.msk.bf16.vlgmr.msra.gmra.mxu2 %vm1268_vm0, %v8456_v33  ;;  %6544 = vmatmul.msk.bf16.vlgmr.msra.gmra.mxu3 %vm1268_vm0, %v8456_v33  ;;  %v3719_v41 = vmul.f32 %v3666_v51, %v8374_v52 }
 0xe9c   : > { %v3670_v40 = vmul.f32 0.5, %v3669_v4  ;;  %6552 = vmatmul.msk.bf16.vlgmr.msrb.gmra.mxu0 %vm1268_vm0, %v8456_v33  ;;  %v3614_v2 = vpop.xlane.xlu2 %3613  ;;  %v6765_v4 = vld [vmem:[%s8412_s8 + $0x8] sm:$0xff]  ;;  %4096 = vmatpush.bf16.msrb.mxu3 %v6764_v54 }
 0xe9d   : > { %v3626_v57 = vmul.f32 %v3614_v2, %v7425_v20  ;;  %v3727_v24 = vmul.f32 %v8443_v34, %v3719_v41  ;;  %4134 = vmatpush.bf16.msra.mxu0 %v6765_v4 }
 0xe9e   : > { %v3671_v10 = vsub.f32 1.5, %v3670_v40 }
 0xe9f   : > { %v7018_v61 = vpop.eup %7017  ;;  %v3634_v17 = vadd.f32 1e-05, %v3626_v57  ;;  %v3735_v5 = vadd.f32 %v8452_v30, %v3727_v24 }
 0xea0   : > { %v3672_v58 = vmul.f32 %v7016_v49, %v3671_v10  ;;  %v3678_v37 = vmul.f32 %v7018_v61, %v3633_v35  ;;  %vm3684_vm8 = vweird.f32 %v7018_v61 }
 0xea1   : > { %7019 = vrsqrt.f32 %v3634_v17  ;;  %vm3685_vm10 = vmor %vm3683_vm9, %vm3684_vm8  ;;  %vm3693_vm12 = vweird.f32 %v3634_v17 }
 0xea2   : > { %v3676_v16 = vsel %vm3675_vm4, %v7016_v49, %v3672_v58  ;;  %v3679_v0 = vmul.f32 %v7018_v61, %v3678_v37 }
 0xea3   : > { %v3720_v47 = vmul.f32 %v3676_v16, %v8381_v32 }
 0xea4   : > { %v3680_v28 = vmul.f32 0.5, %v3679_v0 }
 0xea5   : > { %v3728_v27 = vmul.f32 %v8443_v34, %v3720_v47 }
 0xea6   : > { %v3681_v19 = vsub.f32 1.5, %v3680_v28 }
 0xea7   : > { %v7020_v44 = vpop.eup %7019  ;;  %v3736_v52 = vadd.f32 %v8452_v30, %v3728_v27 }
 0xea8   : > { %v3682_v25 = vmul.f32 %v7018_v61, %v3681_v19  ;;  %v3688_v31 = vmul.f32 %v7020_v44, %v3634_v17  ;;  %vm3694_vm11 = vweird.f32 %v7020_v44 }
 0xea9   : > { %v8471_v23 = vpack.c.bf16 %v3736_v52, %v3735_v5  ;;  %vm3695_vm13 = vmor %vm3693_vm12, %vm3694_vm11 }
 0xeaa   : > { %v3689_v53 = vmul.f32 %v7020_v44, %v3688_v31  ;;  %v3686_v32 = vsel %vm3685_vm10, %v7018_v61, %v3682_v25 }
 0xeab   : > { %6537 = vmatmul.msk.bf16.gmra.mxu2 %vm1268_vm0, %v8471_v23  ;;  %6545 = vmatmul.msk.bf16.gmra.mxu3 %vm1268_vm0, %v8471_v23  ;;  %v3721_v46 = vmul.f32 %v3686_v32, %v8388_v26 }
 0xeac   : > { %v3690_v36 = vmul.f32 0.5, %v3689_v53  ;;  %6553 = vmatmul.msk.bf16.gmra.mxu0 %vm1268_vm0, %v8471_v23 }
 0xead   : > { %v3729_v50 = vmul.f32 %v8443_v34, %v3721_v46 }
 0xeae   : > { %v3691_v11 = vsub.f32 1.5, %v3690_v36 }
 0xeaf   : > { %v3737_v60 = vadd.f32 %v8452_v30, %v3729_v50 }
 0xeb0   : > { %v3692_v42 = vmul.f32 %v7020_v44, %v3691_v11 }
 0xeb2   : > { %v3696_v56 = vsel %vm3695_vm13, %v7020_v44, %v3692_v42 }
 0xeb3   : > { %v3722_v29 = vmul.f32 %v3696_v56, %v8395_v13 }
 0xeb5   : > { %v3730_v62 = vmul.f32 %v8443_v34, %v3722_v29 }
 0xeb7   : > { %v3738_v7 = vadd.f32 %v8452_v30, %v3730_v62 }
 0xeb9   : > { %v8485_v6 = vpack.c.bf16 %v3738_v7, %v3737_v60 }
 0xebb   : > { %6538 = vmatmul.msk.bf16.gmra.mxu2 %vm1268_vm0, %v8485_v6  ;;  %6546 = vmatmul.msk.bf16.gmra.mxu3 %vm1268_vm0, %v8485_v6 }
 0xebc   : > { %6554 = vmatmul.msk.bf16.gmra.mxu0 %vm1268_vm0, %v8485_v6 }
 0xeef   : > { %v3617_v26 = vpop.xlane.xlu0 %3616 }
 0xef0   : > { %v3627_v13 = vmul.f32 %v3617_v26, %v7425_v20 }
 0xef2   : > { %v3635_v15 = vadd.f32 1e-05, %v3627_v13 }
 0xef4   : > { %7021 = vrsqrt.f32 %v3635_v15  ;;  %vm3703_vm15 = vweird.f32 %v3635_v15 }
 0xef7   : > { %v3620_v3 = vpop.xlane.xlu1 %3619 }
 0xef8   : > { %v3628_v55 = vmul.f32 %v3620_v3, %v7425_v20 }
 0xefa   : > { %v7022_v45 = vpop.eup %7021  ;;  %v3636_v39 = vadd.f32 1e-05, %v3628_v55 }
 0xefb   : > { %v3698_v49 = vmul.f32 %v7022_v45, %v3635_v15  ;;  %vm3704_vm14 = vweird.f32 %v7022_v45 }
 0xefc   : > { %7023 = vrsqrt.f32 %v3636_v39  ;;  %vm3705_vm1 = vmor %vm3703_vm15, %vm3704_vm14  ;;  %vm3713_vm3 = vweird.f32 %v3636_v39 }
 0xefd   : > { %v3699_v59 = vmul.f32 %v7022_v45, %v3698_v49 }
 0xeff   : > { %v3700_v9 = vmul.f32 0.5, %v3699_v59 }
 0xf01   : > { %v3701_v35 = vsub.f32 1.5, %v3700_v9 }
 0xf02   : > { %v7024_v14 = vpop.eup %7023 }
 0xf03   : > { %v3702_v51 = vmul.f32 %v7022_v45, %v3701_v35  ;;  %v3708_v40 = vmul.f32 %v7024_v14, %v3636_v39  ;;  %vm3714_vm2 = vweird.f32 %v7024_v14 }
 0xf04   : > { %vm3715_vm4 = vmor %vm3713_vm3, %vm3714_vm2 }
 0xf05   : > { %v3709_v2 = vmul.f32 %v7024_v14, %v3708_v40  ;;  %v3706_v57 = vsel %vm3705_vm1, %v7022_v45, %v3702_v51 }
 0xf06   : > { %v3723_v41 = vmul.f32 %v3706_v57, %v8421_v63 }
 0xf07   : > { %v3710_v10 = vmul.f32 0.5, %v3709_v2 }
 0xf08   : > { %v3731_v37 = vmul.f32 %v8443_v34, %v3723_v41 }
 0xf09   : > { %v3711_v61 = vsub.f32 1.5, %v3710_v10 }
 0xf0a   : > { %v3739_v24 = vadd.f32 %v8452_v30, %v3731_v37 }
 0xf0b   : > { %v3712_v17 = vmul.f32 %v7024_v14, %v3711_v61  ;;  %v6766_v61 = vld [vmem:[%s8418_s12 + $0x8] sm:$0xff] }
 0xf0d   : > { %v3716_v58 = vsel %vm3715_vm4, %v7024_v14, %v3712_v17 }
 0xf0e   : > { %v3724_v16 = vmul.f32 %v3716_v58, %v8432_v21 }
 0xf10   : > { %v3732_v0 = vmul.f32 %v8443_v34, %v3724_v16 }
 0xf12   : > { %v3740_v47 = vadd.f32 %v8452_v30, %v3732_v0 }
 0xf14   : > { %v8503_v28 = vpack.c.bf16 %v3740_v47, %v3739_v24 }
 0xf16   : > { %6539 = vmatmul.msk.bf16.gmra.mxu2 %vm1268_vm0, %v8503_v28  ;;  %6547 = vmatmul.msk.bf16.gmra.mxu3 %vm1268_vm0, %v8503_v28 }
 0xf17   : > { %6555 = vmatmul.msk.bf16.gmra.mxu0 %vm1268_vm0, %v8503_v28 }
 0xf19   : > { %v3849_v63 = vpop.f32.mrf.mxu0 }
 0xf1e   : > { %v3812_v21 = vpop.f32.mrf.mxu3  ;;  %v3775_v13 = vpop.f32.mrf.mxu2 }
 0xf21   : > { %v3851_v34 = vpop.f32.mrf.mxu0 }
 0xf22   : > { %v4030_v26 = vpack.c.bf16 %v3851_v34, %v3849_v63 }
 0xf26   : > { %6570 = vmatmul.msk.bf16.vlgmr.msrb.gmra.mxu3 %vm1268_vm0, %v8456_v33  ;;  %v3814_v30 = vpop.f32.mrf.mxu3  ;;  %v3777_v49 = vpop.f32.mrf.mxu2 }
 0xf27   : > { %6580 = vmatmul.msk.bf16.vlgmr.msra.gmra.mxu0 %vm1268_vm0, %v8456_v33  ;;  %v3873_v59 = vpack.c.bf16 %v3814_v30, %v3812_v21  ;;  %v3869_v54 = vpack.c.bf16 %v3777_v49, %v3775_v13 }
 0xf29   : > { %v3854_v27 = vpop.f32.mrf.mxu0  ;;  %v3890_v35 = vsel %vm1881_vm5, %v3873_v59, 0 }
 0xf2e   : > { %v3817_v19 = vpop.f32.mrf.mxu3  ;;  %v3780_v14 = vpop.f32.mrf.mxu2 }
 0xf31   : > { %v3856_v44 = vpop.f32.mrf.mxu0 }
 0xf32   : > { %v4031_v60 = vpack.c.bf16 %v3856_v44, %v3854_v27 }
 0xf36   : > { %6571 = vmatmul.msk.bf16.gmra.mxu3 %vm1268_vm0, %v8471_v23  ;;  %v3819_v5 = vpop.f32.mrf.mxu3  ;;  %v3782_v51 = vpop.f32.mrf.mxu2 }
 0xf37   : > { %6581 = vmatmul.msk.bf16.gmra.mxu0 %vm1268_vm0, %v8471_v23  ;;  %v3874_v55 = vpack.c.bf16 %v3819_v5, %v3817_v19  ;;  %v3870_v2 = vpack.c.bf16 %v3782_v51, %v3780_v14 }
 0xf39   : > { %v3859_v52 = vpop.f32.mrf.mxu0  ;;  %v3893_v39 = vsel %vm1881_vm5, %v3874_v55, 0 }
 0xf3e   : > { %v3822_v25 = vpop.f32.mrf.mxu3  ;;  %v3785_v57 = vpop.f32.mrf.mxu2 }
 0xf41   : > { %v3861_v31 = vpop.f32.mrf.mxu0 }
 0xf42   : > { %v4032_v42 = vpack.c.bf16 %v3861_v31, %v3859_v52 }
 0xf46   : > { %6572 = vmatmul.msk.bf16.gmra.mxu3 %vm1268_vm0, %v8485_v6  ;;  %v3824_v53 = vpop.f32.mrf.mxu3  ;;  %v3787_v17 = vpop.f32.mrf.mxu2 }
 0xf47   : > { %6582 = vmatmul.msk.bf16.gmra.mxu0 %vm1268_vm0, %v8485_v6  ;;  %v3875_v7 = vpack.c.bf16 %v3824_v53, %v3822_v25  ;;  %v3871_v16 = vpack.c.bf16 %v3787_v17, %v3785_v57 }
 0xf49   : > { %v3896_v3 = vsel %vm1881_vm5, %v3875_v7, 0 }
 0xf56   : > { %6573 = vmatmul.msk.bf16.gmra.mxu3 %vm1268_vm0, %v8503_v28 }
 0xf57   : > { %6583 = vmatmul.msk.bf16.gmra.mxu0 %vm1268_vm0, %v8503_v28 }
 0xf94   : > { %v3864_v32 = vpop.f32.mrf.mxu0 }
 0xf99   : > { %v3827_v36 = vpop.f32.mrf.mxu3  ;;  %v3790_v24 = vpop.f32.mrf.mxu2 }
 0xf9c   : > { %v3866_v11 = vpop.f32.mrf.mxu0 }
 0xf9d   : > { %v4033_v46 = vpack.c.bf16 %v3866_v11, %v3864_v32 }
 0xf9f   : > { %4050 = vmatpush.bf16.msrb.mxu2 %v4033_v46 }
 0xfa1   : > { %v3829_v56 = vpop.f32.mrf.mxu3  ;;  %v3792_v21 = vpop.f32.mrf.mxu2 }
 0xfa2   : > { %v3876_v50 = vpack.c.bf16 %v3829_v56, %v3827_v36  ;;  %v3872_v30 = vpack.c.bf16 %v3792_v21, %v3790_v24 }
 0xfa3   : > { %4051 = vmatpush.bf16.msrb.mxu2 %v4032_v42 }
 0xfa4   : > { %v4136_v29 = vpop.f32.mrf.mxu0  ;;  %v3899_v62 = vsel %vm1881_vm5, %v3876_v50, 0 }
 0xfa5   : > { %3905 = vmatpush.bf16.xpose.msrb.mxu1 %v3899_v62 }
 0xfa7   : > { %4052 = vmatpush.bf16.msrb.mxu2 %v4031_v60 }
 0xfab   : > { %4053 = vmatpush.bf16.msrb.mxu2 %v4030_v26 }
 0xfac   : > { %v4138_v15 = vpop.f32.mrf.mxu0 }
 0xfad   : > { %3906 = vmatpush.bf16.xpose.msrb.mxu1 %v3896_v3  ;;  %v4198_v27 = vpack.c.bf16 %v4138_v15, %v4136_v29 }
 0xfaf   : > { %v4215_v19 = vsel %vm1881_vm5, %v4198_v27, 0 }
 0xfb4   : > { %v4141_v45 = vpop.f32.mrf.mxu0 }
 0xfb5   : > { %3907 = vmatpush.bf16.xpose.msrb.mxu1 %v3893_v39 }
 0xfbc   : > { %v4143_v9 = vpop.f32.mrf.mxu0 }
 0xfbd   : > { %3908 = vmatpush.bf16.xpose.msrb.mxu1 %v3890_v35  ;;  %v4199_v63 = vpack.c.bf16 %v4143_v9, %v4141_v45 }
 0xfbf   : > { %v4218_v34 = vsel %vm1881_vm5, %v4199_v63, 0 }
 0xfc4   : > { %v4146_v4 = vpop.f32.mrf.mxu0  ;;  %6556 = vmatmul.msk.bf16.vlgmr.msrb.gmra.mxu1 %vm1881_vm5, %v3869_v54 }
 0xfc5   : > { %4172 = vmatpush.bf16.msra.mxu1 %v6766_v61 }
 0xfcc   : > { %v4148_v40 = vpop.f32.mrf.mxu0 }
 0xfcd   : > { %v4200_v0 = vpack.c.bf16 %v4148_v40, %v4146_v4 }
 0xfcf   : > { %v4221_v47 = vsel %vm1881_vm5, %v4200_v0, 0 }
 0xfd4   : > { %v4151_v10 = vpop.f32.mrf.mxu0  ;;  %6557 = vmatmul.msk.bf16.gmra.mxu1 %vm1881_vm5, %v3870_v2 }
 0xfdc   : > { %v4153_v41 = vpop.f32.mrf.mxu0 }
 0xfdd   : > { %v4201_v58 = vpack.c.bf16 %v4153_v41, %v4151_v10 }
 0xfdf   : > { %v4224_v37 = vsel %vm1881_vm5, %v4201_v58, 0 }
 0xfe0   : > { %4230 = vmatpush.bf16.xpose.msra.mxu2 %v4224_v37 }
 0xfe4   : > { %6558 = vmatmul.msk.bf16.gmra.mxu1 %vm1881_vm5, %v3871_v16 }
 0xfe8   : > { %4231 = vmatpush.bf16.xpose.msra.mxu2 %v4221_v47 }
 0xff0   : > { %4232 = vmatpush.bf16.xpose.msra.mxu2 %v4218_v34 }
 0xff4   : > { %6559 = vmatmul.msk.bf16.gmra.mxu1 %vm1881_vm5, %v3872_v30 }
 0xff8   : > { %4233 = vmatpush.bf16.xpose.msra.mxu2 %v4215_v19 }
0x1004   : > { %6590 = vmatmul.msk.bf16.vlgmr.msra.gmra.mxu1 %vm1268_vm0, %v8456_v33 }
0x1014   : > { %6591 = vmatmul.msk.bf16.gmra.mxu1 %vm1268_vm0, %v8471_v23 }
0x1024   : > { %6592 = vmatmul.msk.bf16.gmra.mxu1 %vm1268_vm0, %v8485_v6 }
0x1034   : > { %6593 = vmatmul.msk.bf16.gmra.mxu1 %vm1268_vm0, %v8503_v28 }
0x1041   : > { %v3910_v44 = vpop.f32.mrf.mxu1 }
0x1042   : > { %v3930_v5 = vmul.f32 0.5, %v3910_v44 }
0x1044   : > { %v3938_v52 = vsel %vm1943_vm6, %v3930_v5, -inf }
0x1045   : > { %3939 = vmax.xlane.f32.xlu2 %v3938_v52 }
0x1049   : > { %v3912_v25 = vpop.f32.mrf.mxu1 }
0x104a   : > { %v3931_v31 = vmul.f32 0.5, %v3912_v25 }
0x104c   : > { %v3941_v53 = vsel %vm1943_vm6, %v3931_v31, -inf }
0x104d   : > { %3942 = vmax.xlane.f32.xlu0 %v3941_v53 }
0x1051   : > { %v3915_v32 = vpop.f32.mrf.mxu1 }
0x1052   : > { %v3932_v36 = vmul.f32 0.5, %v3915_v32 }
0x1054   : > { %v3944_v11 = vsel %vm1943_vm6, %v3932_v36, -inf }
0x1055   : > { %3945 = vmax.xlane.f32.xlu1 %v3944_v11 }
0x1059   : > { %v3917_v46 = vpop.f32.mrf.mxu1 }
0x105a   : > { %v3933_v42 = vmul.f32 0.5, %v3917_v46 }
0x105c   : > { %v3947_v56 = vsel %vm1943_vm6, %v3933_v42, -inf }
0x105d   : > { %3948 = vmax.xlane.f32.xlu2 %v3947_v56 }
0x1061   : > { %v3920_v50 = vpop.f32.mrf.mxu1 }
0x1062   : > { %v3934_v29 = vmul.f32 0.5, %v3920_v50 }
0x1064   : > { %v3950_v62 = vsel %vm1943_vm6, %v3934_v29, -inf }
0x1065   : > { %3951 = vmax.xlane.f32.xlu0 %v3950_v62 }
0x1069   : > { %v3922_v60 = vpop.f32.mrf.mxu1 }
0x106a   : > { %v3935_v7 = vmul.f32 0.5, %v3922_v60 }
0x106c   : > { %v3953_v26 = vsel %vm1943_vm6, %v3935_v7, -inf }
0x106d   : > { %3954 = vmax.xlane.f32.xlu1 %v3953_v26 }
0x1071   : > { %v3925_v13 = vpop.f32.mrf.mxu1 }
0x1072   : > { %v8554_v15 = vmul.f32 0.5, %v3925_v13 }
0x1074   : > { %v3956_v3 = vsel %vm1943_vm6, %v8554_v15, -inf }
0x1075   : > { %3957 = vmax.xlane.f32.xlu2 %v3956_v3 }
0x1079   : > { %v3927_v55 = vpop.f32.mrf.mxu1 }
0x107a   : > { %v8558_v45 = vmul.f32 0.5, %v3927_v55 }
0x107c   : > { %v3959_v39 = vsel %vm1943_vm6, %v8558_v45, -inf }
0x107d   : > { %3960 = vmax.xlane.f32.xlu0 %v3959_v39 }
0x1081   : > { %v4174_v49 = vpop.f32.mrf.mxu1 }
0x1089   : > { %v4176_v59 = vpop.f32.mrf.mxu1 }
0x108a   : > { %v4355_v24 = vpack.c.bf16 %v4176_v59, %v4174_v49 }
0x1091   : > { %v4179_v9 = vpop.f32.mrf.mxu1 }
0x1099   : > { %v4181_v35 = vpop.f32.mrf.mxu1 }
0x109a   : > { %v4356_v58 = vpack.c.bf16 %v4181_v35, %v4179_v9 }
0x10a1   : > { %v4184_v14 = vpop.f32.mrf.mxu1 }
0x10a9   : > { %v4186_v54 = vpop.f32.mrf.mxu1 }
0x10aa   : > { %v4357_v61 = vpack.c.bf16 %v4186_v54, %v4184_v14 }
0x10b1   : > { %v4189_v4 = vpop.f32.mrf.mxu1 }
0x10b8   : > { %v3940_v51 = vpop.xlane.xlu2 %3939 }
0x10b9   : > { %v3962_v40 = vsub.f32 %v3930_v5, %v3940_v51  ;;  %v4191_v2 = vpop.f32.mrf.mxu1 }
0x10ba   : > { %v4358_v57 = vpack.c.bf16 %v4191_v2, %v4189_v4 }
0x10bb   : > { %v3970_v10 = vmul.f32 1.442695, %v3962_v40 }
0x10bc   : > { %4375 = vmatpush.bf16.msra.mxu3 %v4358_v57 }
0x10bd   : > { %7025 = vpow2.f32 %v3970_v10 }
0x10c0   : > { %v3943_v41 = vpop.xlane.xlu0 %3942  ;;  %4376 = vmatpush.bf16.msra.mxu3 %v4357_v61 }
0x10c1   : > { %v3963_v17 = vsub.f32 %v3931_v31, %v3943_v41 }
0x10c3   : > { %v7026_v37 = vpop.eup %7025  ;;  %v3972_v16 = vmul.f32 1.442695, %v3963_v17 }
0x10c4   : > { %4377 = vmatpush.bf16.msra.mxu3 %v4356_v58  ;;  %v3986_v0 = vsel %vm1943_vm6, %v7026_v37, 0.0 }
0x10c5   : > { %7027 = vpow2.f32 %v3972_v16  ;;  %3987 = vadd.xlane.f32.xlu1 %v3986_v0 }
0x10c8   : > { %v3946_v47 = vpop.xlane.xlu1 %3945  ;;  %4378 = vmatpush.bf16.msra.mxu3 %v4355_v24 }
0x10c9   : > { %v3964_v63 = vsub.f32 %v3932_v36, %v3946_v47 }
0x10cb   : > { %v7028_v21 = vpop.eup %7027  ;;  %v3974_v34 = vmul.f32 1.442695, %v3964_v63 }
0x10cc   : > { %v3989_v30 = vsel %vm1943_vm6, %v7028_v21, 0.0 }
0x10cd   : > { %7029 = vpow2.f32 %v3974_v34  ;;  %3990 = vadd.xlane.f32.xlu2 %v3989_v30  ;;  %v4098_v30 = vpop.f32.mrf.mxu3 }
0x10d0   : > { %v3949_v27 = vpop.xlane.xlu2 %3948 }
0x10d1   : > { %v3965_v19 = vsub.f32 %v3933_v42, %v3949_v27 }
0x10d3   : > { %v7030_v44 = vpop.eup %7029  ;;  %v3976_v5 = vmul.f32 1.442695, %v3965_v19 }
0x10d4   : > { %v3992_v52 = vsel %vm1943_vm6, %v7030_v44, 0.0 }
0x10d5   : > { %7031 = vpow2.f32 %v3976_v5  ;;  %3993 = vadd.xlane.f32.xlu0 %v3992_v52 }
0x10d8   : > { %v3952_v25 = vpop.xlane.xlu0 %3951 }
0x10d9   : > { %v3966_v31 = vsub.f32 %v3934_v29, %v3952_v25  ;;  %v4100_v25 = vpop.f32.mrf.mxu3 }
0x10db   : > { %v7032_v53 = vpop.eup %7031  ;;  %v3978_v32 = vmul.f32 1.442695, %v3966_v31 }
0x10dc   : > { %v3995_v36 = vsel %vm1943_vm6, %v7032_v53, 0.0 }
0x10dd   : > { %7033 = vpow2.f32 %v3978_v32  ;;  %3996 = vadd.xlane.f32.xlu1 %v3995_v36 }
0x10e0   : > { %v3955_v11 = vpop.xlane.xlu1 %3954 }
0x10e1   : > { %v3967_v46 = vsub.f32 %v3935_v7, %v3955_v11  ;;  %v4103_v31 = vpop.f32.mrf.mxu3 }
0x10e3   : > { %v7034_v56 = vpop.eup %7033  ;;  %v3980_v50 = vmul.f32 1.442695, %v3967_v46  ;;  %v6767_v46 = vld [vmem:[%s8404_s9 + $0x10] sm:$0xff] }
0x10e4   : > { %v3998_v42 = vsel %vm1943_vm6, %v7034_v56, 0.0 }
0x10e5   : > { %7035 = vpow2.f32 %v3980_v50  ;;  %3999 = vadd.xlane.f32.xlu2 %v3998_v42 }
0x10e8   : > { %v3958_v62 = vpop.xlane.xlu2 %3957 }
0x10e9   : > { %v3968_v60 = vsub.f32 %v8554_v15, %v3958_v62  ;;  %v4105_v32 = vpop.f32.mrf.mxu3 }
0x10ea   : > { %v4195_v11 = vpack.c.bf16 %v4105_v32, %v4103_v31 }
0x10eb   : > { %v7036_v26 = vpop.eup %7035  ;;  %v3982_v13 = vmul.f32 1.442695, %v3968_v60  ;;  %v4079_v60 = vld [vmem:[%s8584_s3] sm:$0x3] }
0x10ec   : > { %v4001_v29 = vsel %vm1943_vm6, %v7036_v26, 0.0 }
0x10ed   : > { %7037 = vpow2.f32 %v3982_v13  ;;  %4002 = vadd.xlane.f32.xlu0 %v4001_v29 }
0x10f0   : > { %v3961_v3 = vpop.xlane.xlu0 %3960 }
0x10f1   : > { %v3969_v55 = vsub.f32 %v8558_v45, %v3961_v3  ;;  %v4108_v36 = vpop.f32.mrf.mxu3 }
0x10f3   : > { %v7038_v39 = vpop.eup %7037  ;;  %v3984_v7 = vmul.f32 1.442695, %v3969_v55 }
0x10f4   : > { %v4004_v49 = vsel %vm1943_vm6, %v7038_v39, 0.0 }
0x10f5   : > { %7039 = vpow2.f32 %v3984_v7  ;;  %4005 = vadd.xlane.f32.xlu1 %v4004_v49 }
0x10fb   : > { %v7040_v59 = vpop.eup %7039 }
0x10fc   : > { %v4007_v9 = vsel %vm1943_vm6, %v7040_v59, 0.0 }
0x10fd   : > { %4008 = vadd.xlane.f32.xlu2 %v4007_v9 }
0x1138   : > { %v3988_v15 = vpop.xlane.xlu1 %3987 }
0x1139   : > { %7041 = vrcp.f32 %v3988_v15 }
0x113f   : > { %v7042_v14 = vpop.eup %7041 }
0x1140   : > { %v3991_v35 = vpop.xlane.xlu2 %3990  ;;  %v4018_v4 = vmul.f32 %v7042_v14, %v7026_v37 }
0x1141   : > { %7043 = vrcp.f32 %v3991_v35 }
0x1147   : > { %v7044_v54 = vpop.eup %7043 }
0x1148   : > { %v4019_v51 = vmul.f32 %v7044_v54, %v7028_v21  ;;  %v3994_v45 = vpop.xlane.xlu0 %3993 }
0x1149   : > { %7045 = vrcp.f32 %v3994_v45 }
0x114a   : > { %v4026_v40 = vpack.c.bf16 %v4019_v51, %v4018_v4 }
0x114c   : > { %6560 = vmatmul.msk.bf16.vlgmr.msrb.gmra.mxu2 %vm1943_vm6, %v4026_v40 }
0x114d   : > { %4510 = vmatpush.bf16.msrb.mxu2 %v6767_v46 }
0x114f   : > { %v7046_v57 = vpop.eup %7045 }
0x1150   : > { %v3997_v2 = vpop.xlane.xlu1 %3996  ;;  %v4020_v61 = vmul.f32 %v7046_v57, %v7030_v44 }
0x1151   : > { %7047 = vrcp.f32 %v3997_v2 }
0x1157   : > { %v7048_v10 = vpop.eup %7047 }
0x1158   : > { %v4021_v41 = vmul.f32 %v7048_v10, %v7032_v53  ;;  %v4000_v58 = vpop.xlane.xlu2 %3999  ;;  %v4194_v53 = vpack.c.bf16 %v4100_v25, %v4098_v30 }
0x1159   : > { %7049 = vrcp.f32 %v4000_v58 }
0x115a   : > { %v4027_v17 = vpack.c.bf16 %v4021_v41, %v4020_v61 }
0x115c   : > { %6561 = vmatmul.msk.bf16.gmra.mxu2 %vm1943_vm6, %v4027_v17 }
0x115f   : > { %v7050_v37 = vpop.eup %7049 }
0x1160   : > { %v4003_v16 = vpop.xlane.xlu0 %4002  ;;  %v4022_v24 = vmul.f32 %v7050_v37, %v7034_v56  ;;  %v4110_v56 = vpop.f32.mrf.mxu3 }
0x1161   : > { %7051 = vrcp.f32 %v4003_v16  ;;  %v4196_v50 = vpack.c.bf16 %v4110_v56, %v4108_v36 }
0x1167   : > { %v7052_v0 = vpop.eup %7051 }
0x1168   : > { %v4023_v47 = vmul.f32 %v7052_v0, %v7036_v26  ;;  %v4006_v21 = vpop.xlane.xlu1 %4005  ;;  %v4113_v42 = vpop.f32.mrf.mxu3  ;;  %v4463_v26 = vsel %vm2424_vm7, %v4079_v60, 0 }
0x1169   : > { %7053 = vrcp.f32 %v4006_v21  ;;  %4472 = vmatpush.bf16.msrb.mxu1 %v4463_v26 }
0x116a   : > { %v4028_v63 = vpack.c.bf16 %v4023_v47, %v4022_v24 }
0x116c   : > { %6562 = vmatmul.msk.bf16.gmra.mxu2 %vm1943_vm6, %v4028_v63 }
0x116f   : > { %v7054_v27 = vpop.eup %7053 }
0x1170   : > { %v4009_v34 = vpop.xlane.xlu2 %4008  ;;  %v4024_v44 = vmul.f32 %v7054_v27, %v7038_v39  ;;  %v4115_v62 = vpop.f32.mrf.mxu3 }
0x1171   : > { %7055 = vrcp.f32 %v4009_v34  ;;  %v4197_v13 = vpack.c.bf16 %v4115_v62, %v4113_v42 }
0x1177   : > { %v7056_v19 = vpop.eup %7055 }
0x1178   : > { %v4025_v5 = vmul.f32 %v7056_v19, %v7040_v59 }
0x117a   : > { %v4029_v52 = vpack.c.bf16 %v4025_v5, %v4024_v44 }
0x117c   : > { %6563 = vmatmul.msk.bf16.gmra.mxu2 %vm1943_vm6, %v4029_v52 }
0x118c   : > { %6594 = vmatmul.msk.bf16.vlgmr.msra.gmra.mxu2 %vm1881_vm5, %v4194_v53 }
0x119c   : > { %6595 = vmatmul.msk.bf16.gmra.mxu2 %vm1881_vm5, %v4195_v11 }
0x11ac   : > { %6596 = vmatmul.msk.bf16.gmra.mxu2 %vm1881_vm5, %v4196_v50 }
0x11bc   : > { %6597 = vmatmul.msk.bf16.gmra.mxu2 %vm1881_vm5, %v4197_v13 }
0x11cc   : > { %6617 = vmatmul.msk.bf16.vlgmr.msrb.gmra.mxu2 %vm1268_vm0, %v8456_v33 }
0x11cf   : > { %v4055_v29 = vpop.f32.mrf.mxu2 }
0x11d7   : > { %v4057_v3 = vpop.f32.mrf.mxu2 }
0x11d8   : > { %v4075_v55 = vpack.c.bf16 %v4057_v3, %v4055_v29 }
0x11da   : > { %6607 = vmatmul.msk.bf16.vlgmr.msrb.gmra.mxu1 %vm1881_vm5, %v4075_v55 }
0x11dc   : > { %6618 = vmatmul.msk.bf16.gmra.mxu2 %vm1268_vm0, %v8471_v23 }
0x11df   : > { %v4060_v39 = vpop.f32.mrf.mxu2 }
0x11e7   : > { %v4062_v7 = vpop.f32.mrf.mxu2 }
0x11e8   : > { %v4076_v49 = vpack.c.bf16 %v4062_v7, %v4060_v39 }
0x11ea   : > { %6608 = vmatmul.msk.bf16.gmra.mxu1 %vm1881_vm5, %v4076_v49 }
0x11ec   : > { %6619 = vmatmul.msk.bf16.gmra.mxu2 %vm1268_vm0, %v8485_v6 }
0x11ef   : > { %v4065_v59 = vpop.f32.mrf.mxu2 }
0x11f7   : > { %v4067_v9 = vpop.f32.mrf.mxu2 }
0x11f8   : > { %v4077_v15 = vpack.c.bf16 %v4067_v9, %v4065_v59 }
0x11fa   : > { %6609 = vmatmul.msk.bf16.gmra.mxu1 %vm1881_vm5, %v4077_v15 }
0x11fc   : > { %6620 = vmatmul.msk.bf16.gmra.mxu2 %vm1268_vm0, %v8503_v28 }
0x11ff   : > { %v4070_v35 = vpop.f32.mrf.mxu2 }
0x1207   : > { %v4072_v14 = vpop.f32.mrf.mxu2 }
0x1208   : > { %v4078_v54 = vpack.c.bf16 %v4072_v14, %v4070_v35 }
0x120a   : > { %6610 = vmatmul.msk.bf16.gmra.mxu1 %vm1881_vm5, %v4078_v54 }
0x120f   : > { %v4235_v4 = vpop.f32.mrf.mxu2 }
0x1210   : > { %v4255_v51 = vmul.f32 0.5, %v4235_v4 }
0x1212   : > { %v4263_v40 = vsel %vm1943_vm6, %v4255_v51, -inf }
0x1213   : > { %4264 = vmax.xlane.f32.xlu0 %v4263_v40 }
0x1217   : > { %v4237_v45 = vpop.f32.mrf.mxu2 }
0x1218   : > { %v4256_v2 = vmul.f32 0.5, %v4237_v45 }
0x121a   : > { %v4266_v57 = vsel %vm1943_vm6, %v4256_v2, -inf }
0x121b   : > { %4267 = vmax.xlane.f32.xlu1 %v4266_v57 }
0x121f   : > { %v4240_v10 = vpop.f32.mrf.mxu2 }
0x1220   : > { %v4257_v61 = vmul.f32 0.5, %v4240_v10 }
0x1222   : > { %v4269_v41 = vsel %vm1943_vm6, %v4257_v61, -inf }
0x1223   : > { %4270 = vmax.xlane.f32.xlu2 %v4269_v41 }
0x1227   : > { %v4242_v17 = vpop.f32.mrf.mxu2 }
0x1228   : > { %v4258_v58 = vmul.f32 0.5, %v4242_v17 }
0x122a   : > { %v4272_v16 = vsel %vm1943_vm6, %v4258_v58, -inf }
0x122b   : > { %4273 = vmax.xlane.f32.xlu0 %v4272_v16 }
0x122f   : > { %v4245_v37 = vpop.f32.mrf.mxu2 }
0x1230   : > { %v4259_v0 = vmul.f32 0.5, %v4245_v37 }
0x1232   : > { %v4275_v24 = vsel %vm1943_vm6, %v4259_v0, -inf }
0x1233   : > { %4276 = vmax.xlane.f32.xlu1 %v4275_v24 }
0x1237   : > { %v4247_v47 = vpop.f32.mrf.mxu2 }
0x1238   : > { %v4260_v63 = vmul.f32 0.5, %v4247_v47 }
0x123a   : > { %v4278_v21 = vsel %vm1943_vm6, %v4260_v63, -inf }
0x123b   : > { %4279 = vmax.xlane.f32.xlu2 %v4278_v21 }
0x123f   : > { %v4250_v34 = vpop.f32.mrf.mxu2 }
0x1240   : > { %v4261_v30 = vmul.f32 0.5, %v4250_v34 }
0x1242   : > { %v4281_v27 = vsel %vm1943_vm6, %v4261_v30, -inf }
0x1243   : > { %4282 = vmax.xlane.f32.xlu0 %v4281_v27 }
0x1247   : > { %v4252_v19 = vpop.f32.mrf.mxu2 }
0x1248   : > { %v4262_v44 = vmul.f32 0.5, %v4252_v19 }
0x124a   : > { %v4284_v5 = vsel %vm1943_vm6, %v4262_v44, -inf }
0x124b   : > { %4285 = vmax.xlane.f32.xlu1 %v4284_v5 }
0x1286   : > { %v4265_v52 = vpop.xlane.xlu0 %4264 }
0x1287   : > { %v4287_v25 = vsub.f32 %v4255_v51, %v4265_v52 }
0x1289   : > { %v4295_v31 = vmul.f32 1.442695, %v4287_v25 }
0x128b   : > { %7057 = vpow2.f32 %v4295_v31 }
0x128e   : > { %v4268_v53 = vpop.xlane.xlu1 %4267 }
0x128f   : > { %v4288_v32 = vsub.f32 %v4256_v2, %v4268_v53 }
0x1291   : > { %v7058_v36 = vpop.eup %7057  ;;  %v4297_v11 = vmul.f32 1.442695, %v4288_v32 }
0x1292   : > { %v4311_v46 = vsel %vm1943_vm6, %v7058_v36, 0.0 }
0x1293   : > { %7059 = vpow2.f32 %v4297_v11  ;;  %4312 = vadd.xlane.f32.xlu2 %v4311_v46 }
0x1296   : > { %v4271_v56 = vpop.xlane.xlu2 %4270 }
0x1297   : > { %v4289_v50 = vsub.f32 %v4257_v61, %v4271_v56 }
0x1299   : > { %v7060_v42 = vpop.eup %7059  ;;  %v4299_v62 = vmul.f32 1.442695, %v4289_v50 }
0x129a   : > { %v4314_v60 = vsel %vm1943_vm6, %v7060_v42, 0.0 }
0x129b   : > { %7061 = vpow2.f32 %v4299_v62  ;;  %4315 = vadd.xlane.f32.xlu0 %v4314_v60 }
0x129e   : > { %v4274_v26 = vpop.xlane.xlu0 %4273 }
0x129f   : > { %v4290_v13 = vsub.f32 %v4258_v58, %v4274_v26 }
0x12a1   : > { %v7062_v29 = vpop.eup %7061  ;;  %v4301_v3 = vmul.f32 1.442695, %v4290_v13 }
0x12a2   : > { %v4317_v55 = vsel %vm1943_vm6, %v7062_v29, 0.0 }
0x12a3   : > { %7063 = vpow2.f32 %v4301_v3  ;;  %4318 = vadd.xlane.f32.xlu1 %v4317_v55 }
0x12a6   : > { %v4277_v39 = vpop.xlane.xlu1 %4276 }
0x12a7   : > { %v4291_v7 = vsub.f32 %v4259_v0, %v4277_v39  ;;  %v6602_v39 = vld [vmem:[%s8584_s3 + $0x2] sm:$0x3] }
0x12a9   : > { %v7064_v49 = vpop.eup %7063  ;;  %v4303_v59 = vmul.f32 1.442695, %v4291_v7  ;;  %v4419_v7 = vsel %vm2424_vm7, %v6602_v39, 0 }
0x12aa   : > { %v4320_v9 = vsel %vm1943_vm6, %v7064_v49, 0.0  ;;  %4428 = vmatpush.bf16.msrb.mxu0 %v4419_v7 }
0x12ab   : > { %7065 = vpow2.f32 %v4303_v59  ;;  %4321 = vadd.xlane.f32.xlu2 %v4320_v9 }
0x12ae   : > { %v4280_v15 = vpop.xlane.xlu2 %4279 }
0x12af   : > { %v4292_v35 = vsub.f32 %v4260_v63, %v4280_v15 }
0x12b1   : > { %v7066_v14 = vpop.eup %7065  ;;  %v4305_v54 = vmul.f32 1.442695, %v4292_v35 }
0x12b2   : > { %v4323_v4 = vsel %vm1943_vm6, %v7066_v14, 0.0 }
0x12b3   : > { %7067 = vpow2.f32 %v4305_v54  ;;  %4324 = vadd.xlane.f32.xlu0 %v4323_v4 }
0x12b6   : > { %v4283_v51 = vpop.xlane.xlu0 %4282 }
0x12b7   : > { %v4293_v40 = vsub.f32 %v4261_v30, %v4283_v51  ;;  %v6769_v51 = vld [vmem:[%s8418_s12 + $0x10] sm:$0xff] }
0x12b8   : > { %4586 = vmatpush.bf16.msra.mxu0 %v6769_v51 }
0x12b9   : > { %v7068_v45 = vpop.eup %7067  ;;  %v4307_v2 = vmul.f32 1.442695, %v4293_v40 }
0x12ba   : > { %v4326_v57 = vsel %vm1943_vm6, %v7068_v45, 0.0 }
0x12bb   : > { %7069 = vpow2.f32 %v4307_v2  ;;  %4327 = vadd.xlane.f32.xlu1 %v4326_v57 }
0x12be   : > { %v4286_v10 = vpop.xlane.xlu1 %4285 }
0x12bf   : > { %v4294_v61 = vsub.f32 %v4262_v44, %v4286_v10  ;;  %v6768_v44 = vld [vmem:[%s8412_s8 + $0x10] sm:$0xff] }
0x12c0   : > { %4548 = vmatpush.bf16.msrb.mxu3 %v6768_v44 }
0x12c1   : > { %v7070_v41 = vpop.eup %7069  ;;  %v4309_v17 = vmul.f32 1.442695, %v4294_v61 }
0x12c2   : > { %v4329_v58 = vsel %vm1943_vm6, %v7070_v41, 0.0 }
0x12c3   : > { %7071 = vpow2.f32 %v4309_v17  ;;  %4330 = vadd.xlane.f32.xlu2 %v4329_v58 }
0x12c9   : > { %v7072_v16 = vpop.eup %7071 }
0x12ca   : > { %v4332_v37 = vsel %vm1943_vm6, %v7072_v16, 0.0 }
0x12cb   : > { %4333 = vadd.xlane.f32.xlu0 %v4332_v37  ;;  %v6770_v37 = vld [vmem:[%s8404_s9 + $0x18] sm:$0xff] }
0x1306   : > { %v4313_v0 = vpop.xlane.xlu2 %4312 }
0x1307   : > { %7073 = vrcp.f32 %v4313_v0 }
0x130d   : > { %v7074_v47 = vpop.eup %7073 }
0x130e   : > { %v4316_v24 = vpop.xlane.xlu0 %4315  ;;  %v4343_v21 = vmul.f32 %v7074_v47, %v7058_v36 }
0x130f   : > { %7075 = vrcp.f32 %v4316_v24 }
0x1315   : > { %v7076_v63 = vpop.eup %7075 }
0x1316   : > { %v4344_v34 = vmul.f32 %v7076_v63, %v7060_v42  ;;  %v4319_v27 = vpop.xlane.xlu1 %4318 }
0x1317   : > { %7077 = vrcp.f32 %v4319_v27 }
0x1318   : > { %v4351_v30 = vpack.c.bf16 %v4344_v34, %v4343_v21  ;;  %v4512_v34 = vpop.f32.mrf.mxu2 }
0x131a   : > { %6598 = vmatmul.msk.bf16.vlgmr.msra.gmra.mxu3 %vm1943_vm6, %v4351_v30 }
0x131d   : > { %v7078_v5 = vpop.eup %7077 }
0x131e   : > { %v4322_v19 = vpop.xlane.xlu2 %4321  ;;  %v4345_v25 = vmul.f32 %v7078_v5, %v7062_v29 }
0x131f   : > { %7079 = vrcp.f32 %v4322_v19 }
0x1320   : > { %v4514_v44 = vpop.f32.mrf.mxu2 }
0x1325   : > { %v7080_v52 = vpop.eup %7079 }
0x1326   : > { %v4346_v31 = vmul.f32 %v7080_v52, %v7064_v49  ;;  %v4325_v32 = vpop.xlane.xlu0 %4324 }
0x1327   : > { %7081 = vrcp.f32 %v4325_v32 }
0x1328   : > { %v4352_v53 = vpack.c.bf16 %v4346_v31, %v4345_v25 }
0x132a   : > { %6599 = vmatmul.msk.bf16.gmra.mxu3 %vm1943_vm6, %v4352_v53  ;;  %v4517_v53 = vpop.f32.mrf.mxu2 }
0x132d   : > { %v7082_v11 = vpop.eup %7081 }
0x132e   : > { %v4328_v36 = vpop.xlane.xlu1 %4327  ;;  %v4347_v56 = vmul.f32 %v7082_v11, %v7066_v14 }
0x132f   : > { %7083 = vrcp.f32 %v4328_v36  ;;  %v4608_v36 = vpack.c.bf16 %v4514_v44, %v4512_v34 }
0x1332   : > { %v4519_v11 = vpop.f32.mrf.mxu2 }
0x1335   : > { %v7084_v46 = vpop.eup %7083 }
0x1336   : > { %v4348_v50 = vmul.f32 %v7084_v46, %v7068_v45  ;;  %v4331_v62 = vpop.xlane.xlu2 %4330 }
0x1337   : > { %7085 = vrcp.f32 %v4331_v62 }
0x1338   : > { %v4353_v42 = vpack.c.bf16 %v4348_v50, %v4347_v56 }
0x133a   : > { %6600 = vmatmul.msk.bf16.gmra.mxu3 %vm1943_vm6, %v4353_v42  ;;  %v4522_v56 = vpop.f32.mrf.mxu2  ;;  %v4609_v42 = vpack.c.bf16 %v4519_v11, %v4517_v53 }
0x133d   : > { %v7086_v26 = vpop.eup %7085 }
0x133e   : > { %v4334_v60 = vpop.xlane.xlu0 %4333  ;;  %v4349_v29 = vmul.f32 %v7086_v26, %v7070_v41 }
0x133f   : > { %7087 = vrcp.f32 %v4334_v60 }
0x1342   : > { %v4524_v60 = vpop.f32.mrf.mxu2 }
0x1345   : > { %v7088_v13 = vpop.eup %7087 }
0x1346   : > { %v4350_v3 = vmul.f32 %v7088_v13, %v7072_v16  ;;  %v6771_v13 = vld [vmem:[%s8412_s8 + $0x18] sm:$0xff]  ;;  %s1221_s8 = scalar_lea.vmem %s9251_s20, %s9316_s4 }
0x1348   : > { %v4354_v55 = vpack.c.bf16 %v4350_v3, %v4349_v29  ;;  %v4610_v29 = vpack.c.bf16 %v4524_v60, %v4522_v56 }
0x134a   : > { %6601 = vmatmul.msk.bf16.gmra.mxu3 %vm1943_vm6, %v4354_v55  ;;  %v4527_v3 = vpop.f32.mrf.mxu2 }
0x1352   : > { %v4529_v39 = vpop.f32.mrf.mxu2 }
0x135a   : > { %6627 = vmatmul.msk.bf16.vlgmr.msrb.gmra.mxu3 %vm1268_vm0, %v8456_v33 }
0x136a   : > { %6628 = vmatmul.msk.bf16.gmra.mxu3 %vm1268_vm0, %v8471_v23 }
0x137a   : > { %6629 = vmatmul.msk.bf16.gmra.mxu3 %vm1268_vm0, %v8485_v6 }
0x138a   : > { %6630 = vmatmul.msk.bf16.gmra.mxu3 %vm1268_vm0, %v8503_v28 }
0x139d   : > { %v4380_v49 = vpop.f32.mrf.mxu3 }
0x13a5   : > { %v4382_v59 = vpop.f32.mrf.mxu3 }
0x13a6   : > { %v4400_v9 = vpack.c.bf16 %v4382_v59, %v4380_v49  ;;  %v4611_v49 = vpack.c.bf16 %v4529_v39, %v4527_v3  ;;  %v8678_v59 = vpop.f32.mrf.mxu1 }
0x13a8   : > { %6603 = vmatmul.msk.bf16.vlgmr.msrb.gmra.mxu0 %vm1881_vm5, %v4400_v9 }
0x13a9   : > { %4888 = vmatpush.bf16.msrb.mxu0 %v6770_v37 }
0x13ad   : > { %v4385_v15 = vpop.f32.mrf.mxu3 }
0x13b5   : > { %v4387_v35 = vpop.f32.mrf.mxu3 }
0x13b6   : > { %v4401_v14 = vpack.c.bf16 %v4387_v35, %v4385_v15  ;;  %v8681_v15 = vpop.f32.mrf.mxu1 }
0x13b8   : > { %6604 = vmatmul.msk.bf16.gmra.mxu0 %vm1881_vm5, %v4401_v14 }
0x13bd   : > { %v4390_v54 = vpop.f32.mrf.mxu3 }
0x13be   : > { %v8685_v14 = vpop.f32.mrf.mxu1 }
0x13c5   : > { %v4392_v4 = vpop.f32.mrf.mxu3 }
0x13c6   : > { %v4402_v40 = vpack.c.bf16 %v4392_v4, %v4390_v54  ;;  %v8687_v4 = vpop.f32.mrf.mxu1 }
0x13c8   : > { %6605 = vmatmul.msk.bf16.gmra.mxu0 %vm1881_vm5, %v4402_v40 }
0x13cd   : > { %v4395_v45 = vpop.f32.mrf.mxu3 }
0x13d5   : > { %v4397_v2 = vpop.f32.mrf.mxu3 }
0x13d6   : > { %v4403_v57 = vpack.c.bf16 %v4397_v2, %v4395_v45  ;;  %v8691_v45 = vpop.f32.mrf.mxu1 }
0x13d8   : > { %6606 = vmatmul.msk.bf16.gmra.mxu0 %vm1881_vm5, %v4403_v57 }
0x13dd   : > { %v4550_v10 = vpop.f32.mrf.mxu3 }
0x13de   : > { %v8695_v57 = vpop.f32.mrf.mxu1 }
0x13e5   : > { %v4552_v61 = vpop.f32.mrf.mxu3 }
0x13e6   : > { %v4612_v52 = vpack.c.bf16 %v4552_v61, %v4550_v10 }
0x13e8   : > { %6637 = vmatmul.msk.bf16.vlgmr.msra.gmra.mxu0 %vm1268_vm0, %v8456_v33  ;;  %v4629_v31 = vsel %vm1881_vm5, %v4612_v52, 0 }
0x13ed   : > { %v4555_v41 = vpop.f32.mrf.mxu3 }
0x13f5   : > { %v4557_v17 = vpop.f32.mrf.mxu3 }
0x13f6   : > { %v4613_v27 = vpack.c.bf16 %v4557_v17, %v4555_v41  ;;  %v8697_v17 = vpop.f32.mrf.mxu1 }
0x13f8   : > { %6638 = vmatmul.msk.bf16.gmra.mxu0 %vm1268_vm0, %v8471_v23  ;;  %v4632_v5 = vsel %vm1881_vm5, %v4613_v27, 0 }
0x13fd   : > { %v4560_v58 = vpop.f32.mrf.mxu3 }
0x13fe   : > { %v8701_v37 = vpop.f32.mrf.mxu1 }
0x1405   : > { %v4562_v16 = vpop.f32.mrf.mxu3 }
0x1406   : > { %v4614_v21 = vpack.c.bf16 %v4562_v16, %v4560_v58 }
0x1408   : > { %6639 = vmatmul.msk.bf16.gmra.mxu0 %vm1268_vm0, %v8485_v6  ;;  %v4635_v30 = vsel %vm1881_vm5, %v4614_v21, 0 }
0x140d   : > { %v4565_v0 = vpop.f32.mrf.mxu3 }
0x1415   : > { %v4567_v24 = vpop.f32.mrf.mxu3 }
0x1416   : > { %v4615_v47 = vpack.c.bf16 %v4567_v24, %v4565_v0 }
0x1418   : > { %6640 = vmatmul.msk.bf16.gmra.mxu0 %vm1268_vm0, %v8503_v28  ;;  %v4638_v63 = vsel %vm1881_vm5, %v4615_v47, 0 }
0x1419   : > { %4644 = vmatpush.bf16.xpose.msra.mxu1 %v4638_v63 }
0x1421   : > { %4645 = vmatpush.bf16.xpose.msra.mxu1 %v4635_v30 }
0x1425   : > { %v8648_v19 = vpop.f32.mrf.mxu0 }
0x1428   : > { %6660 = vmatmul.msk.bf16.vlgmr.msrb.gmra.mxu0 %vm1268_vm0, %v8456_v33 }
0x1429   : > { %4646 = vmatpush.bf16.xpose.msra.mxu1 %v4632_v5 }
0x142d   : > { %v8653_v25 = vpop.f32.mrf.mxu0 }
0x1431   : > { %4647 = vmatpush.bf16.xpose.msra.mxu1 %v4629_v31 }
0x1435   : > { %v8656_v32 = vpop.f32.mrf.mxu0 }
0x1438   : > { %6641 = vmatmul.msk.bf16.vlgmr.msra.gmra.mxu1 %vm1881_vm5, %v4608_v36  ;;  %6661 = vmatmul.msk.bf16.gmra.mxu0 %vm1268_vm0, %v8471_v23 }
0x1439   : > { %4926 = vmatpush.bf16.msrb.mxu1 %v6771_v13 }
0x143d   : > { %v8661_v46 = vpop.f32.mrf.mxu0 }
0x1445   : > { %v8663_v50 = vpop.f32.mrf.mxu0 }
0x1448   : > { %6642 = vmatmul.msk.bf16.gmra.mxu1 %vm1881_vm5, %v4609_v42  ;;  %6662 = vmatmul.msk.bf16.gmra.mxu0 %vm1268_vm0, %v8485_v6 }
0x144d   : > { %v8668_v62 = vpop.f32.mrf.mxu0 }
0x1455   : > { %v8670_v26 = vpop.f32.mrf.mxu0 }
0x1458   : > { %6643 = vmatmul.msk.bf16.gmra.mxu1 %vm1881_vm5, %v4610_v29  ;;  %6663 = vmatmul.msk.bf16.gmra.mxu0 %vm1268_vm0, %v8503_v28 }
0x145d   : > { %v8676_v55 = vpop.f32.mrf.mxu0 }
0x1465   : > { %v4588_v7 = vpop.f32.mrf.mxu0 }
0x1468   : > { %6644 = vmatmul.msk.bf16.gmra.mxu1 %vm1881_vm5, %v4611_v49 }
0x146d   : > { %v4590_v9 = vpop.f32.mrf.mxu0 }
0x146e   : > { %v4769_v16 = vpack.c.bf16 %v4590_v9, %v4588_v7 }
0x1475   : > { %v4593_v35 = vpop.f32.mrf.mxu0 }
0x1478   : > { %6670 = vmatmul.msk.bf16.vlgmr.msrb.gmra.mxu1 %vm1268_vm0, %v8456_v33 }
0x147d   : > { %v4595_v54 = vpop.f32.mrf.mxu0 }
0x147e   : > { %v4770_v58 = vpack.c.bf16 %v4595_v54, %v4593_v35 }
0x1485   : > { %v4598_v51 = vpop.f32.mrf.mxu0 }
0x1488   : > { %6671 = vmatmul.msk.bf16.gmra.mxu1 %vm1268_vm0, %v8471_v23 }
0x148d   : > { %v4600_v40 = vpop.f32.mrf.mxu0 }
0x148e   : > { %v4771_v41 = vpack.c.bf16 %v4600_v40, %v4598_v51 }
0x1495   : > { %v4603_v2 = vpop.f32.mrf.mxu0 }
0x1498   : > { %6672 = vmatmul.msk.bf16.gmra.mxu1 %vm1268_vm0, %v8485_v6 }
0x149d   : > { %v4605_v10 = vpop.f32.mrf.mxu0 }
0x149e   : > { %v4772_v61 = vpack.c.bf16 %v4605_v10, %v4603_v2  ;;  %v6649_v2 = vld [vmem:[%s8584_s3 + $0x4] sm:$0x3] }
0x149f   : > { %v4833_v10 = vsel %vm2424_vm7, %v6649_v2, 0 }
0x14a0   : > { %4789 = vmatpush.bf16.msra.mxu2 %v4772_v61  ;;  %4842 = vmatpush.bf16.msra.mxu3 %v4833_v10 }
0x14a4   : > { %4790 = vmatpush.bf16.msra.mxu2 %v4771_v41 }
0x14a8   : > { %4791 = vmatpush.bf16.msra.mxu2 %v4770_v58  ;;  %6673 = vmatmul.msk.bf16.gmra.mxu1 %vm1268_vm0, %v8503_v28 }
0x14ac   : > { %4792 = vmatpush.bf16.msra.mxu2 %v4769_v16 }
0x14b5   : > { %v4649_v0 = vpop.f32.mrf.mxu1 }
0x14b6   : > { %v4669_v24 = vmul.f32 0.5, %v4649_v0 }
0x14b8   : > { %v4677_v47 = vsel %vm1943_vm6, %v4669_v24, -inf }
0x14b9   : > { %4678 = vmax.xlane.f32.xlu1 %v4677_v47 }
0x14bd   : > { %v4651_v63 = vpop.f32.mrf.mxu1 }
0x14be   : > { %v4670_v21 = vmul.f32 0.5, %v4651_v63 }
0x14c0   : > { %v4680_v34 = vsel %vm1943_vm6, %v4670_v21, -inf }
0x14c1   : > { %4681 = vmax.xlane.f32.xlu2 %v4680_v34 }
0x14c5   : > { %v4654_v30 = vpop.f32.mrf.mxu1 }
0x14c6   : > { %v4671_v27 = vmul.f32 0.5, %v4654_v30 }
0x14c8   : > { %v4683_v44 = vsel %vm1943_vm6, %v4671_v27, -inf }
0x14c9   : > { %4684 = vmax.xlane.f32.xlu0 %v4683_v44 }
0x14cd   : > { %v4656_v5 = vpop.f32.mrf.mxu1 }
0x14ce   : > { %v4672_v52 = vmul.f32 0.5, %v4656_v5 }
0x14d0   : > { %v4686_v31 = vsel %vm1943_vm6, %v4672_v52, -inf }
0x14d1   : > { %4687 = vmax.xlane.f32.xlu1 %v4686_v31 }
0x14d5   : > { %v4659_v53 = vpop.f32.mrf.mxu1 }
0x14d6   : > { %v8707_v36 = vmul.f32 0.5, %v4659_v53 }
0x14d8   : > { %v4689_v11 = vsel %vm1943_vm6, %v8707_v36, -inf }
0x14d9   : > { %4690 = vmax.xlane.f32.xlu2 %v4689_v11 }
0x14dd   : > { %v4661_v56 = vpop.f32.mrf.mxu1 }
0x14de   : > { %v8711_v42 = vmul.f32 0.5, %v4661_v56 }
0x14e0   : > { %v4692_v60 = vsel %vm1943_vm6, %v8711_v42, -inf }
0x14e1   : > { %4693 = vmax.xlane.f32.xlu0 %v4692_v60 }
0x14e5   : > { %v4664_v13 = vpop.f32.mrf.mxu1 }
0x14e6   : > { %v8715_v29 = vmul.f32 0.5, %v4664_v13 }
0x14e8   : > { %v4695_v3 = vsel %vm1943_vm6, %v8715_v29, -inf }
0x14e9   : > { %4696 = vmax.xlane.f32.xlu1 %v4695_v3 }
0x14ed   : > { %v4666_v39 = vpop.f32.mrf.mxu1 }
0x14ee   : > { %v8719_v7 = vmul.f32 0.5, %v4666_v39 }
0x14f0   : > { %v4698_v49 = vsel %vm1943_vm6, %v8719_v7, -inf }
0x14f1   : > { %4699 = vmax.xlane.f32.xlu2 %v4698_v49 }
0x14f5   : > { %v4928_v9 = vpop.f32.mrf.mxu1 }
0x14fd   : > { %v4930_v35 = vpop.f32.mrf.mxu1 }
0x14fe   : > { %v4990_v54 = vpack.c.bf16 %v4930_v35, %v4928_v9 }
0x1505   : > { %v4933_v51 = vpop.f32.mrf.mxu1 }
0x150d   : > { %v4935_v40 = vpop.f32.mrf.mxu1 }
0x1515   : > { %v4938_v61 = vpop.f32.mrf.mxu1 }
0x151d   : > { %v4940_v41 = vpop.f32.mrf.mxu1 }
0x151e   : > { %v4992_v44 = vpack.c.bf16 %v4940_v41, %v4938_v61  ;;  %v5007_v41 = vsel %vm1881_vm5, %v4990_v54, 0 }
0x1520   : > { %v5013_v60 = vsel %vm1881_vm5, %v4992_v44, 0 }
0x1525   : > { %v4943_v58 = vpop.f32.mrf.mxu1 }
0x152c   : > { %v4679_v16 = vpop.xlane.xlu1 %4678 }
0x152d   : > { %v4701_v0 = vsub.f32 %v4669_v24, %v4679_v16  ;;  %v4945_v47 = vpop.f32.mrf.mxu1  ;;  %v4991_v24 = vpack.c.bf16 %v4935_v40, %v4933_v51 }
0x152e   : > { %v4993_v63 = vpack.c.bf16 %v4945_v47, %v4943_v58 }
0x152f   : > { %v4709_v34 = vmul.f32 1.442695, %v4701_v0 }
0x1530   : > { %v5016_v30 = vsel %vm1881_vm5, %v4993_v63, 0 }
0x1531   : > { %7089 = vpow2.f32 %v4709_v34  ;;  %5022 = vmatpush.bf16.xpose.msrb.mxu3 %v5016_v30 }
0x1534   : > { %v4682_v5 = vpop.xlane.xlu2 %4681 }
0x1535   : > { %v4702_v31 = vsub.f32 %v4670_v21, %v4682_v5  ;;  %v5010_v21 = vsel %vm1881_vm5, %v4991_v24, 0 }
0x1537   : > { %v8726_v53 = vpop.eup %7089  ;;  %v4711_v11 = vmul.f32 1.442695, %v4702_v31 }
0x1538   : > { %v4725_v56 = vsel %vm1943_vm6, %v8726_v53, 0.0 }
0x1539   : > { %7091 = vpow2.f32 %v4711_v11  ;;  %4726 = vadd.xlane.f32.xlu0 %v4725_v56  ;;  %5023 = vmatpush.bf16.xpose.msrb.mxu3 %v5013_v60 }
0x153c   : > { %v4685_v13 = vpop.xlane.xlu0 %4684 }
0x153d   : > { %v4703_v3 = vsub.f32 %v4671_v27, %v4685_v13 }
0x153f   : > { %v7092_v39 = vpop.eup %7091  ;;  %v4713_v49 = vmul.f32 1.442695, %v4703_v3 }
0x1540   : > { %v4728_v9 = vsel %vm1943_vm6, %v7092_v39, 0.0 }
0x1541   : > { %7093 = vpow2.f32 %v4713_v49  ;;  %4729 = vadd.xlane.f32.xlu1 %v4728_v9  ;;  %5024 = vmatpush.bf16.xpose.msrb.mxu3 %v5010_v21 }
0x1544   : > { %v4688_v35 = vpop.xlane.xlu1 %4687 }
0x1545   : > { %v4704_v2 = vsub.f32 %v4672_v52, %v4688_v35 }
0x1547   : > { %v7094_v10 = vpop.eup %7093  ;;  %v4715_v61 = vmul.f32 1.442695, %v4704_v2 }
0x1548   : > { %v4731_v58 = vsel %vm1943_vm6, %v7094_v10, 0.0 }
0x1549   : > { %7095 = vpow2.f32 %v4715_v61  ;;  %5025 = vmatpush.bf16.xpose.msrb.mxu3 %v5007_v41  ;;  %4732 = vadd.xlane.f32.xlu2 %v4731_v58 }
0x154c   : > { %v4691_v27 = vpop.xlane.xlu2 %4690 }
0x154d   : > { %v4705_v51 = vsub.f32 %v8707_v36, %v4691_v27 }
0x154f   : > { %v7096_v40 = vpop.eup %7095  ;;  %v4717_v16 = vmul.f32 1.442695, %v4705_v51 }
0x1550   : > { %v4734_v0 = vsel %vm1943_vm6, %v7096_v40, 0.0 }
0x1551   : > { %7097 = vpow2.f32 %v4717_v16  ;;  %4735 = vadd.xlane.f32.xlu0 %v4734_v0 }
0x1554   : > { %v4694_v47 = vpop.xlane.xlu0 %4693 }
0x1555   : > { %v4706_v52 = vsub.f32 %v8711_v42, %v4694_v47 }
0x1557   : > { %v7098_v63 = vpop.eup %7097  ;;  %v4719_v34 = vmul.f32 1.442695, %v4706_v52  ;;  %v6772_v52 = vld [vmem:[%s8418_s12 + $0x18] sm:$0xff] }
0x1558   : > { %v4737_v54 = vsel %vm1943_vm6, %v7098_v63, 0.0  ;;  %4964 = vmatpush.bf16.msrb.mxu2 %v6772_v52 }
0x1559   : > { %7099 = vpow2.f32 %v4719_v34  ;;  %4738 = vadd.xlane.f32.xlu1 %v4737_v54 }
0x155c   : > { %v4697_v30 = vpop.xlane.xlu1 %4696 }
0x155d   : > { %v4707_v44 = vsub.f32 %v8715_v29, %v4697_v30 }
0x155f   : > { %v7100_v5 = vpop.eup %7099  ;;  %v4721_v36 = vmul.f32 1.442695, %v4707_v44 }
0x1560   : > { %v4740_v31 = vsel %vm1943_vm6, %v7100_v5, 0.0 }
0x1561   : > { %7101 = vpow2.f32 %v4721_v36  ;;  %4741 = vadd.xlane.f32.xlu2 %v4740_v31 }
0x1564   : > { %v4700_v11 = vpop.xlane.xlu2 %4699 }
0x1565   : > { %v4708_v56 = vsub.f32 %v8719_v7, %v4700_v11 }
0x1567   : > { %v7102_v60 = vpop.eup %7101  ;;  %v4723_v42 = vmul.f32 1.442695, %v4708_v56 }
0x1568   : > { %v4743_v24 = vsel %vm1943_vm6, %v7102_v60, 0.0 }
0x1569   : > { %7103 = vpow2.f32 %v4723_v42  ;;  %4744 = vadd.xlane.f32.xlu0 %v4743_v24 }
0x156f   : > { %v7104_v13 = vpop.eup %7103 }
0x1570   : > { %v4746_v3 = vsel %vm1943_vm6, %v7104_v13, 0.0 }
0x1571   : > { %4747 = vadd.xlane.f32.xlu1 %v4746_v3 }
0x15ac   : > { %v4727_v29 = vpop.xlane.xlu0 %4726 }
0x15ad   : > { %7105 = vrcp.f32 %v4727_v29 }
0x15b3   : > { %v7106_v9 = vpop.eup %7105 }
0x15b4   : > { %v4730_v49 = vpop.xlane.xlu1 %4729  ;;  %v4757_v35 = vmul.f32 %v7106_v9, %v8726_v53 }
0x15b5   : > { %7107 = vrcp.f32 %v4730_v49 }
0x15bb   : > { %v7108_v21 = vpop.eup %7107 }
0x15bc   : > { %v4758_v7 = vmul.f32 %v7108_v21, %v7092_v39  ;;  %v4733_v61 = vpop.xlane.xlu2 %4732 }
0x15bd   : > { %7109 = vrcp.f32 %v4733_v61 }
0x15be   : > { %v4765_v2 = vpack.c.bf16 %v4758_v7, %v4757_v35 }
0x15c0   : > { %6645 = vmatmul.msk.bf16.vlgmr.msra.gmra.mxu2 %vm1943_vm6, %v4765_v2 }
0x15c3   : > { %v7110_v58 = vpop.eup %7109 }
0x15c4   : > { %v4736_v41 = vpop.xlane.xlu0 %4735  ;;  %v4759_v51 = vmul.f32 %v7110_v58, %v7094_v10 }
0x15c5   : > { %7111 = vrcp.f32 %v4736_v41 }
0x15cb   : > { %v7112_v27 = vpop.eup %7111 }
0x15cc   : > { %v4760_v16 = vmul.f32 %v7112_v27, %v7096_v40  ;;  %v4739_v47 = vpop.xlane.xlu1 %4738 }
0x15cd   : > { %7113 = vrcp.f32 %v4739_v47 }
0x15ce   : > { %v4766_v0 = vpack.c.bf16 %v4760_v16, %v4759_v51 }
0x15d0   : > { %6646 = vmatmul.msk.bf16.gmra.mxu2 %vm1943_vm6, %v4766_v0 }
0x15d3   : > { %v7114_v39 = vpop.eup %7113 }
0x15d4   : > { %v4742_v53 = vpop.xlane.xlu2 %4741  ;;  %v4761_v54 = vmul.f32 %v7114_v39, %v7098_v63 }
0x15d5   : > { %7115 = vrcp.f32 %v4742_v53 }
0x15db   : > { %v7116_v34 = vpop.eup %7115 }
0x15dc   : > { %v4762_v30 = vmul.f32 %v7116_v34, %v7100_v5  ;;  %v4745_v36 = vpop.xlane.xlu0 %4744 }
0x15dd   : > { %7117 = vrcp.f32 %v4745_v36 }
0x15de   : > { %v4767_v44 = vpack.c.bf16 %v4762_v30, %v4761_v54 }
0x15e0   : > { %6647 = vmatmul.msk.bf16.gmra.mxu2 %vm1943_vm6, %v4767_v44 }
0x15e3   : > { %v7118_v40 = vpop.eup %7117 }
0x15e4   : > { %v4748_v10 = vpop.xlane.xlu1 %4747  ;;  %v4763_v11 = vmul.f32 %v7118_v40, %v7102_v60 }
0x15e5   : > { %7119 = vrcp.f32 %v4748_v10 }
0x15eb   : > { %v7120_v31 = vpop.eup %7119 }
0x15ec   : > { %v4764_v56 = vmul.f32 %v7120_v31, %v7104_v13 }
0x15ee   : > { %v4768_v42 = vpack.c.bf16 %v4764_v56, %v4763_v11  ;;  %v4475_v11 = vadd.f32 %v8678_v59, %v8648_v19  ;;  %v4490_v59 = vadd.f32 %v8697_v17, %v8670_v26 }
0x15f0   : > { %6648 = vmatmul.msk.bf16.gmra.mxu2 %vm1943_vm6, %v4768_v42 }
0x1600   : > { %6680 = vmatmul.msk.bf16.vlgmr.msrb.gmra.mxu2 %vm1268_vm0, %v8456_v33 }
0x1610   : > { %6681 = vmatmul.msk.bf16.gmra.mxu2 %vm1268_vm0, %v8471_v23  ;;  %v4890_v23 = vpop.f32.mrf.mxu0 }
0x1620   : > { %6682 = vmatmul.msk.bf16.gmra.mxu2 %vm1268_vm0, %v8485_v6 }
0x1630   : > { %6683 = vmatmul.msk.bf16.gmra.mxu2 %vm1268_vm0, %v8503_v28  ;;  %v4892_v28 = vpop.f32.mrf.mxu0 }
0x1631   : > { %v4986_v61 = vpack.c.bf16 %v4892_v28, %v4890_v23 }
0x1638   : > { %v4895_v7 = vpop.f32.mrf.mxu0 }
0x1640   : > { %v4897_v41 = vpop.f32.mrf.mxu0 }
0x1641   : > { %v4987_v16 = vpack.c.bf16 %v4897_v41, %v4895_v7 }
0x1643   : > { %v4794_v63 = vpop.f32.mrf.mxu2 }
0x1648   : > { %v4900_v27 = vpop.f32.mrf.mxu0 }
0x164b   : > { %v4796_v5 = vpop.f32.mrf.mxu2 }
0x164c   : > { %v4814_v24 = vpack.c.bf16 %v4796_v5, %v4794_v63  ;;  %v4480_v5 = vadd.f32 %v8685_v14, %v8656_v32 }
0x164e   : > { %6650 = vmatmul.msk.bf16.vlgmr.msra.gmra.mxu3 %vm1881_vm5, %v4814_v24 }
0x1650   : > { %v4902_v47 = vpop.f32.mrf.mxu0 }
0x1651   : > { %v4988_v53 = vpack.c.bf16 %v4902_v47, %v4900_v27 }
0x1653   : > { %v4799_v60 = vpop.f32.mrf.mxu2 }
0x1658   : > { %v4905_v39 = vpop.f32.mrf.mxu0 }
0x165b   : > { %v4801_v13 = vpop.f32.mrf.mxu2 }
0x165c   : > { %v4815_v3 = vpack.c.bf16 %v4801_v13, %v4799_v60 }
0x165e   : > { %6651 = vmatmul.msk.bf16.gmra.mxu3 %vm1881_vm5, %v4815_v3  ;;  %v4485_v3 = vadd.f32 %v8691_v45, %v8663_v50 }
0x1660   : > { %v4907_v54 = vpop.f32.mrf.mxu0 }
0x1661   : > { %v4989_v44 = vpack.c.bf16 %v4907_v54, %v4905_v39 }
0x1663   : > { %v4804_v33 = vpop.f32.mrf.mxu2 }
0x166b   : > { %v4806_v29 = vpop.f32.mrf.mxu2 }
0x166c   : > { %v4816_v49 = vpack.c.bf16 %v4806_v29, %v4804_v33 }
0x166e   : > { %6652 = vmatmul.msk.bf16.gmra.mxu3 %vm1881_vm5, %v4816_v49 }
0x1673   : > { %v4809_v6 = vpop.f32.mrf.mxu2 }
0x167b   : > { %v4811_v9 = vpop.f32.mrf.mxu2 }
0x167c   : > { %v4817_v21 = vpack.c.bf16 %v4811_v9, %v4809_v6 }
0x167e   : > { %6653 = vmatmul.msk.bf16.gmra.mxu3 %vm1881_vm5, %v4817_v21 }
0x1683   : > { %v4966_v35 = vpop.f32.mrf.mxu2 }
0x168b   : > { %v4968_v2 = vpop.f32.mrf.mxu2 }
0x168c   : > { %v5147_v31 = vpack.c.bf16 %v4968_v2, %v4966_v35 }
0x168e   : > { %6684 = vmatmul.msk.bf16.vlgmr.msrb.gmra.mxu3 %vm1881_vm5, %v4986_v61 }
0x1693   : > { %v4971_v58 = vpop.f32.mrf.mxu2 }
0x169b   : > { %v4973_v51 = vpop.f32.mrf.mxu2 }
0x169c   : > { %v5148_v40 = vpack.c.bf16 %v4973_v51, %v4971_v58 }
0x169e   : > { %6685 = vmatmul.msk.bf16.gmra.mxu3 %vm1881_vm5, %v4987_v16 }
0x16a3   : > { %v4976_v0 = vpop.f32.mrf.mxu2 }
0x16ab   : > { %v4978_v52 = vpop.f32.mrf.mxu2 }
0x16ac   : > { %v5149_v10 = vpack.c.bf16 %v4978_v52, %v4976_v0 }
0x16ae   : > { %6686 = vmatmul.msk.bf16.gmra.mxu3 %vm1881_vm5, %v4988_v53 }
0x16b3   : > { %v4981_v34 = vpop.f32.mrf.mxu2 }
0x16bb   : > { %v4983_v30 = vpop.f32.mrf.mxu2 }
0x16bc   : > { %v5150_v36 = vpack.c.bf16 %v4983_v30, %v4981_v34 }
0x16be   : > { %6687 = vmatmul.msk.bf16.gmra.mxu3 %vm1881_vm5, %v4989_v44  ;;  %5167 = vmatpush.bf16.msra.mxu0 %v5150_v36 }
0x16c2   : > { %5168 = vmatpush.bf16.msra.mxu0 %v5149_v10 }
0x16c6   : > { %5169 = vmatpush.bf16.msra.mxu0 %v5148_v40 }
0x16ca   : > { %5170 = vmatpush.bf16.msra.mxu0 %v5147_v31 }
0x16d1   : > { %v4844_v56 = vpop.f32.mrf.mxu3 }
0x16d2   : > { %v8768_v42 = vadd.f32 %v4844_v56, %v4475_v11 }
0x16d9   : > { %v8770_v63 = vpop.f32.mrf.mxu3 }
0x16e1   : > { %v4849_v24 = vpop.f32.mrf.mxu3 }
0x16e2   : > { %v8774_v60 = vadd.f32 %v4849_v24, %v4480_v5 }
0x16e9   : > { %v8776_v13 = vpop.f32.mrf.mxu3 }
0x16f1   : > { %v4854_v33 = vpop.f32.mrf.mxu3 }
0x16f2   : > { %v8780_v29 = vadd.f32 %v4854_v33, %v4485_v3 }
0x16f9   : > { %v8782_v19 = vpop.f32.mrf.mxu3 }
0x1701   : > { %v4859_v49 = vpop.f32.mrf.mxu3 }
0x1702   : > { %v8786_v23 = vadd.f32 %v4859_v49, %v4490_v59 }
0x1709   : > { %v8788_v32 = vpop.f32.mrf.mxu3 }
0x1711   : > { %v5027_v14 = vpop.f32.mrf.mxu3 }
0x1712   : > { %v5047_v6 = vmul.f32 0.5, %v5027_v14 }
0x1714   : > { %v5055_v9 = vsel %vm1943_vm6, %v5047_v6, -inf }
0x1715   : > { %5056 = vmax.xlane.f32.xlu2 %v5055_v9 }
0x1719   : > { %v5029_v21 = vpop.f32.mrf.mxu3 }
0x171a   : > { %v5048_v50 = vmul.f32 0.5, %v5029_v21 }
0x171c   : > { %v5058_v45 = vsel %vm1943_vm6, %v5048_v50, -inf }
0x171d   : > { %5059 = vmax.xlane.f32.xlu0 %v5058_v45 }
0x1721   : > { %v5032_v28 = vpop.f32.mrf.mxu3 }
0x1722   : > { %v5049_v35 = vmul.f32 0.5, %v5032_v28 }
0x1724   : > { %v5061_v7 = vsel %vm1943_vm6, %v5049_v35, -inf }
0x1725   : > { %5062 = vmax.xlane.f32.xlu1 %v5061_v7 }
0x1729   : > { %v5034_v26 = vpop.f32.mrf.mxu3 }
0x172a   : > { %v5050_v17 = vmul.f32 0.5, %v5034_v26 }
0x172c   : > { %v5064_v2 = vsel %vm1943_vm6, %v5050_v17, -inf }
0x172d   : > { %5065 = vmax.xlane.f32.xlu2 %v5064_v2 }
0x1731   : > { %v5037_v61 = vpop.f32.mrf.mxu3 }
0x1732   : > { %v5051_v41 = vmul.f32 0.5, %v5037_v61 }
0x1734   : > { %v5067_v58 = vsel %vm1943_vm6, %v5051_v41, -inf }
0x1735   : > { %5068 = vmax.xlane.f32.xlu0 %v5067_v58 }
0x1739   : > { %v5039_v27 = vpop.f32.mrf.mxu3 }
0x173a   : > { %v5052_v51 = vmul.f32 0.5, %v5039_v27 }
0x173c   : > { %v5070_v16 = vsel %vm1943_vm6, %v5052_v51, -inf }
0x173d   : > { %5071 = vmax.xlane.f32.xlu1 %v5070_v16 }
0x1741   : > { %v5042_v0 = vpop.f32.mrf.mxu3 }
0x1742   : > { %v5053_v47 = vmul.f32 0.5, %v5042_v0 }
0x1744   : > { %v5073_v52 = vsel %vm1943_vm6, %v5053_v47, -inf }
0x1745   : > { %5074 = vmax.xlane.f32.xlu2 %v5073_v52 }
0x1749   : > { %v5044_v53 = vpop.f32.mrf.mxu3 }
0x174a   : > { %v5054_v39 = vmul.f32 0.5, %v5044_v53 }
0x174c   : > { %v5076_v34 = vsel %vm1943_vm6, %v5054_v39, -inf }
0x174d   : > { %5077 = vmax.xlane.f32.xlu0 %v5076_v34 }
0x1788   : > { %v5057_v54 = vpop.xlane.xlu2 %5056 }
0x1789   : > { %v5079_v30 = vsub.f32 %v5047_v6, %v5057_v54 }
0x178b   : > { %v5087_v44 = vmul.f32 1.442695, %v5079_v30 }
0x178d   : > { %7121 = vpow2.f32 %v5087_v44 }
0x1790   : > { %v5060_v36 = vpop.xlane.xlu0 %5059 }
0x1791   : > { %v5080_v10 = vsub.f32 %v5048_v50, %v5060_v36 }
0x1793   : > { %v7122_v40 = vpop.eup %7121  ;;  %v5089_v31 = vmul.f32 1.442695, %v5080_v10 }
0x1794   : > { %v5103_v11 = vsel %vm1943_vm6, %v7122_v40, 0.0 }
0x1795   : > { %7123 = vpow2.f32 %v5089_v31  ;;  %5104 = vadd.xlane.f32.xlu1 %v5103_v11 }
0x1798   : > { %v5063_v56 = vpop.xlane.xlu1 %5062 }
0x1799   : > { %v5081_v5 = vsub.f32 %v5049_v35, %v5063_v56 }
0x179b   : > { %v7124_v24 = vpop.eup %7123  ;;  %v5091_v3 = vmul.f32 1.442695, %v5081_v5 }
0x179c   : > { %v5106_v33 = vsel %vm1943_vm6, %v7124_v24, 0.0 }
0x179d   : > { %7125 = vpow2.f32 %v5091_v3  ;;  %5107 = vadd.xlane.f32.xlu2 %v5106_v33 }
0x17a0   : > { %v5066_v59 = vpop.xlane.xlu2 %5065 }
0x17a1   : > { %v5082_v49 = vsub.f32 %v5050_v17, %v5066_v59 }
0x17a3   : > { %v7126_v14 = vpop.eup %7125  ;;  %v5093_v6 = vmul.f32 1.442695, %v5082_v49 }
0x17a4   : > { %v5109_v9 = vsel %vm1943_vm6, %v7126_v14, 0.0 }
0x17a5   : > { %7127 = vpow2.f32 %v5093_v6  ;;  %5110 = vadd.xlane.f32.xlu0 %v5109_v9 }
0x17a8   : > { %v5069_v21 = vpop.xlane.xlu0 %5068 }
0x17a9   : > { %v5083_v50 = vsub.f32 %v5051_v41, %v5069_v21 }
0x17ab   : > { %v7128_v45 = vpop.eup %7127  ;;  %v5095_v28 = vmul.f32 1.442695, %v5083_v50  ;;  %v6692_v50 = vld [vmem:[%s8584_s3 + $0x6] sm:$0x3]  ;;  %s1237_s3 = scalar_lea.vmem %s9257_s26, %s9316_s4 }
0x17ac   : > { %v5112_v35 = vsel %vm1943_vm6, %v7128_v45, 0.0 }
0x17ad   : > { %7129 = vpow2.f32 %v5095_v28  ;;  %5113 = vadd.xlane.f32.xlu1 %v5112_v35  ;;  %v5211_v28 = vsel %vm2424_vm7, %v6692_v50, 0 }
0x17ae   : > { %5220 = vmatpush.bf16.msra.mxu1 %v5211_v28 }
0x17b0   : > { %v5072_v7 = vpop.xlane.xlu1 %5071 }
0x17b1   : > { %v5084_v26 = vsub.f32 %v5052_v51, %v5072_v7 }
0x17b3   : > { %v7130_v2 = vpop.eup %7129  ;;  %v5097_v61 = vmul.f32 1.442695, %v5084_v26 }
0x17b4   : > { %v5115_v17 = vsel %vm1943_vm6, %v7130_v2, 0.0 }
0x17b5   : > { %7131 = vpow2.f32 %v5097_v61  ;;  %5116 = vadd.xlane.f32.xlu2 %v5115_v17 }
0x17b8   : > { %v5075_v58 = vpop.xlane.xlu2 %5074 }
0x17b9   : > { %v5085_v27 = vsub.f32 %v5053_v47, %v5075_v58 }
0x17bb   : > { %v7132_v16 = vpop.eup %7131  ;;  %v5099_v0 = vmul.f32 1.442695, %v5085_v27 }
0x17bc   : > { %v5118_v41 = vsel %vm1943_vm6, %v7132_v16, 0.0 }
0x17bd   : > { %7133 = vpow2.f32 %v5099_v0  ;;  %5119 = vadd.xlane.f32.xlu0 %v5118_v41 }
0x17c0   : > { %v5078_v52 = vpop.xlane.xlu0 %5077 }
0x17c1   : > { %v5086_v53 = vsub.f32 %v5054_v39, %v5078_v52 }
0x17c3   : > { %v7134_v34 = vpop.eup %7133  ;;  %v5101_v54 = vmul.f32 1.442695, %v5086_v53 }
0x17c4   : > { %v5121_v51 = vsel %vm1943_vm6, %v7134_v34, 0.0 }
0x17c5   : > { %7135 = vpow2.f32 %v5101_v54  ;;  %5122 = vadd.xlane.f32.xlu1 %v5121_v51 }
0x17cb   : > { %v7136_v30 = vpop.eup %7135 }
0x17cc   : > { %v5124_v44 = vsel %vm1943_vm6, %v7136_v30, 0.0 }
0x17cd   : > { %5125 = vadd.xlane.f32.xlu2 %v5124_v44 }
0x1808   : > { %v5105_v36 = vpop.xlane.xlu1 %5104 }
0x1809   : > { %7137 = vrcp.f32 %v5105_v36 }
0x180f   : > { %v7138_v10 = vpop.eup %7137 }
0x1810   : > { %v5108_v47 = vpop.xlane.xlu2 %5107  ;;  %v5135_v11 = vmul.f32 %v7138_v10, %v7122_v40 }
0x1811   : > { %7139 = vrcp.f32 %v5108_v47 }
0x1817   : > { %v7140_v31 = vpop.eup %7139 }
0x1818   : > { %v5136_v56 = vmul.f32 %v7140_v31, %v7124_v24  ;;  %v5111_v5 = vpop.xlane.xlu0 %5110  ;;  %v6826_v31 = vld [vmem:[%s1221_s8] ss:$0 sm:$0xff]  ;;  %s1229_s8 = scalar_lea.vmem %s9255_s24, %s9316_s4 }
0x1819   : > { %7141 = vrcp.f32 %v5111_v5  ;;  %v4477_v5 = vadd.f32 %v8681_v15, %v8653_v25 }
0x181a   : > { %v5143_v39 = vpack.c.bf16 %v5136_v56, %v5135_v11 }
0x181c   : > { %6688 = vmatmul.msk.bf16.vlgmr.msra.gmra.mxu0 %vm1943_vm6, %v5143_v39 }
0x181f   : > { %v7142_v33 = vpop.eup %7141 }
0x1820   : > { %v5114_v3 = vpop.xlane.xlu1 %5113  ;;  %v5137_v49 = vmul.f32 %v7142_v33, %v7126_v14  ;;  %v4865_v33 = vadd.f32 %v8770_v63, %v4477_v5  ;;  %v4482_v63 = vadd.f32 %v8687_v4, %v8661_v46 }
0x1821   : > { %7143 = vrcp.f32 %v5114_v3 }
0x1822   : > { %v4867_v28 = vadd.f32 %v8776_v13, %v4482_v63  ;;  %v4487_v13 = vadd.f32 %v8695_v57, %v8668_v62 }
0x1827   : > { %v7144_v59 = vpop.eup %7143 }
0x1828   : > { %v5138_v6 = vmul.f32 %v7144_v59, %v7128_v45  ;;  %v5117_v21 = vpop.xlane.xlu2 %5116 }
0x1829   : > { %7145 = vrcp.f32 %v5117_v21 }
0x182a   : > { %v5144_v9 = vpack.c.bf16 %v5138_v6, %v5137_v49 }
0x182c   : > { %6689 = vmatmul.msk.bf16.gmra.mxu0 %vm1943_vm6, %v5144_v9 }
0x182f   : > { %v7146_v24 = vpop.eup %7145 }
0x1830   : > { %v5120_v40 = vpop.xlane.xlu0 %5119  ;;  %v5139_v7 = vmul.f32 %v7146_v24, %v7130_v2 }
0x1831   : > { %7147 = vrcp.f32 %v5120_v40 }
0x1837   : > { %v7148_v35 = vpop.eup %7147 }
0x1838   : > { %v5140_v26 = vmul.f32 %v7148_v35, %v7132_v16  ;;  %v5123_v17 = vpop.xlane.xlu1 %5122 }
0x1839   : > { %7149 = vrcp.f32 %v5123_v17 }
0x183a   : > { %v5145_v61 = vpack.c.bf16 %v5140_v26, %v5139_v7 }
0x183c   : > { %6690 = vmatmul.msk.bf16.gmra.mxu0 %vm1943_vm6, %v5145_v61  ;;  %v4869_v61 = vadd.f32 %v8782_v19, %v4487_v13  ;;  %v4492_v19 = vadd.f32 %v8701_v37, %v8676_v55  ;;  %v6773_v13 = vld [vmem:[%s1226_s0] sm:$0xff]  ;;  %s1246_s0 = scalar_lea.vmem %s9303_s10, %s7403_s1 }
0x183d   : > { %5504 = vmatpush.bf16.msra.mxu2 %v6773_v13 }
0x183f   : > { %v7150_v45 = vpop.eup %7149 }
0x1840   : > { %v5126_v14 = vpop.xlane.xlu2 %5125  ;;  %v5141_v27 = vmul.f32 %v7150_v45, %v7134_v34 }
0x1841   : > { %7151 = vrcp.f32 %v5126_v14 }
0x1847   : > { %v7152_v58 = vpop.eup %7151 }
0x1848   : > { %v5142_v0 = vmul.f32 %v7152_v58, %v7136_v30 }
0x184a   : > { %v5146_v41 = vpack.c.bf16 %v5142_v0, %v5141_v27  ;;  %v4871_v0 = vadd.f32 %v8788_v32, %v4492_v19 }
0x184c   : > { %6691 = vmatmul.msk.bf16.gmra.mxu0 %vm1943_vm6, %v5146_v41 }
0x1899   : > { %v5172_v2 = vpop.f32.mrf.mxu0 }
0x18a1   : > { %v5174_v16 = vpop.f32.mrf.mxu0 }
0x18a2   : > { %v5192_v52 = vpack.c.bf16 %v5174_v16, %v5172_v2 }
0x18a4   : > { %6693 = vmatmul.msk.bf16.vlgmr.msra.gmra.mxu1 %vm1881_vm5, %v5192_v52 }
0x18a9   : > { %v5177_v53 = vpop.f32.mrf.mxu0 }
0x18b1   : > { %v5179_v54 = vpop.f32.mrf.mxu0 }
0x18b2   : > { %v5193_v51 = vpack.c.bf16 %v5179_v54, %v5177_v53 }
0x18b4   : > { %6694 = vmatmul.msk.bf16.gmra.mxu1 %vm1881_vm5, %v5193_v51 }
0x18b9   : > { %v5182_v44 = vpop.f32.mrf.mxu0 }
0x18c1   : > { %v5184_v34 = vpop.f32.mrf.mxu0 }
0x18c2   : > { %v5194_v30 = vpack.c.bf16 %v5184_v34, %v5182_v44 }
0x18c4   : > { %6695 = vmatmul.msk.bf16.gmra.mxu1 %vm1881_vm5, %v5194_v30 }
0x18c9   : > { %v5187_v36 = vpop.f32.mrf.mxu0 }
0x18d1   : > { %v5189_v47 = vpop.f32.mrf.mxu0 }
0x18d2   : > { %v5195_v10 = vpack.c.bf16 %v5189_v47, %v5187_v36 }
0x18d4   : > { %6696 = vmatmul.msk.bf16.gmra.mxu1 %vm1881_vm5, %v5195_v10 }
0x1921   : > { %v5222_v11 = vpop.f32.mrf.mxu1 }
0x1922   : > { %v5242_v56 = vadd.f32 %v5222_v11, %v8768_v42 }
0x1924   : > { %v5253_v39 = vadd.f32 %v6826_v31, %v5242_v56 }
0x1926   : > { %v8824_v3 = vadd.f32 %v5253_v39, %v8295_v8 }
0x1928   : > { %v5271_v59 = vsel %vm1268_vm0, %v8824_v3, 0.0 }
0x1929   : > { %v5224_v49 = vpop.f32.mrf.mxu1  ;;  %5272 = vadd.xlane.f32.xlu0 %v5271_v59 }
0x192a   : > { %v5243_v6 = vadd.f32 %v5224_v49, %v4865_v33 }
0x192c   : > { %v5254_v9 = vadd.f32 %v6826_v31, %v5243_v6 }
0x192e   : > { %v8830_v21 = vadd.f32 %v5254_v9, %v8306_v38 }
0x1930   : > { %v5274_v42 = vsel %vm1268_vm0, %v8830_v21, 0.0 }
0x1931   : > { %5275 = vadd.xlane.f32.xlu1 %v5274_v42  ;;  %v5227_v25 = vpop.f32.mrf.mxu1 }
0x1932   : > { %v5244_v8 = vadd.f32 %v5227_v25, %v8774_v60 }
0x1934   : > { %v5255_v15 = vadd.f32 %v6826_v31, %v5244_v8 }
0x1936   : > { %v8838_v50 = vadd.f32 %v5255_v15, %v8314_v48 }
0x1938   : > { %v5277_v38 = vsel %vm1268_vm0, %v8838_v50, 0.0 }
0x1939   : > { %5278 = vadd.xlane.f32.xlu2 %v5277_v38  ;;  %v5229_v40 = vpop.f32.mrf.mxu1 }
0x193a   : > { %v5245_v24 = vadd.f32 %v5229_v40, %v4867_v28 }
0x193c   : > { %v5256_v35 = vadd.f32 %v6826_v31, %v5245_v24 }
0x193e   : > { %v8844_v7 = vadd.f32 %v5256_v35, %v8324_v22 }
0x1940   : > { %v5280_v60 = vsel %vm1268_vm0, %v8844_v7, 0.0 }
0x1941   : > { %5281 = vadd.xlane.f32.xlu0 %v5280_v60  ;;  %v5232_v46 = vpop.f32.mrf.mxu1 }
0x1942   : > { %v5246_v48 = vadd.f32 %v5232_v46, %v8780_v29 }
0x1944   : > { %v5257_v4 = vadd.f32 %v6826_v31, %v5246_v48 }
0x1946   : > { %v8852_v26 = vadd.f32 %v5257_v4, %v8332_v43 }
0x1948   : > { %v5283_v22 = vsel %vm1268_vm0, %v8852_v26, 0.0 }
0x1949   : > { %5284 = vadd.xlane.f32.xlu1 %v5283_v22  ;;  %v5234_v17 = vpop.f32.mrf.mxu1 }
0x194a   : > { %v5247_v14 = vadd.f32 %v5234_v17, %v4869_v61 }
0x194c   : > { %v5258_v45 = vadd.f32 %v6826_v31, %v5247_v14 }
0x194e   : > { %v8858_v58 = vadd.f32 %v5258_v45, %v8338_v12 }
0x1950   : > { %v5286_v29 = vsel %vm1268_vm0, %v8858_v58, 0.0 }
0x1951   : > { %5287 = vadd.xlane.f32.xlu2 %v5286_v29  ;;  %v5237_v62 = vpop.f32.mrf.mxu1 }
0x1952   : > { %v5248_v43 = vadd.f32 %v5237_v62, %v8786_v23 }
0x1954   : > { %v5259_v57 = vadd.f32 %v6826_v31, %v5248_v43 }
0x1956   : > { %v8866_v27 = vadd.f32 %v5259_v57, %v8352_v1 }
0x1958   : > { %v5289_v12 = vsel %vm1268_vm0, %v8866_v27, 0.0 }
0x1959   : > { %v5239_v41 = vpop.f32.mrf.mxu1  ;;  %5290 = vadd.xlane.f32.xlu2 %v5289_v12 }
0x195a   : > { %v5249_v2 = vadd.f32 %v5239_v41, %v4871_v0 }
0x195c   : > { %v5260_v16 = vadd.f32 %v6826_v31, %v5249_v2 }
0x195e   : > { %v8880_v54 = vadd.f32 %v5260_v16, %v8365_v18 }
0x1960   : > { %v5292_v30 = vsel %vm1268_vm0, %v8880_v54, 0.0 }
0x199c   : > { %v5273_v52 = vpop.xlane.xlu0 %5272 }
0x199d   : > { %v5295_v53 = vmul.f32 %v5273_v52, %v7425_v20 }
0x199f   : > { %v8873_v23 = vsub.f32 %v8824_v3, %v5295_v53 }
0x19a1   : > { %v5311_v55 = vmul.f32 %v8873_v23, %v8873_v23 }
0x19a3   : > { %v5319_v1 = vsel %vm1268_vm0, %v5311_v55, 0.0 }
0x19a4   : > { %v5276_v37 = vpop.xlane.xlu1 %5275  ;;  %5320 = vadd.xlane.f32.xlu0 %v5319_v1 }
0x19a5   : > { %v5296_v32 = vmul.f32 %v5276_v37, %v7425_v20 }
0x19a7   : > { %v8883_v51 = vsub.f32 %v8830_v21, %v5296_v32 }
0x19a9   : > { %v5312_v44 = vmul.f32 %v8883_v51, %v8883_v51 }
0x19ab   : > { %v5322_v34 = vsel %vm1268_vm0, %v5312_v44, 0.0 }
0x19ac   : > { %v5279_v36 = vpop.xlane.xlu2 %5278  ;;  %5323 = vadd.xlane.f32.xlu1 %v5322_v34  ;;  %5293 = vadd.xlane.f32.xlu0 %v5292_v30 }
0x19ad   : > { %v5297_v47 = vmul.f32 %v5279_v36, %v7425_v20 }
0x19af   : > { %v8892_v10 = vsub.f32 %v8838_v50, %v5297_v47 }
0x19b1   : > { %v5313_v18 = vmul.f32 %v8892_v10, %v8892_v10 }
0x19b3   : > { %v5325_v31 = vsel %vm1268_vm0, %v5313_v18, 0.0  ;;  %v8943_v18 = vld [vmem:[%s9252_s21] ss:$0 sm:$0xff] }
0x19b4   : > { %5326 = vadd.xlane.f32.xlu1 %v5325_v31  ;;  %v5282_v11 = vpop.xlane.xlu0 %5281 }
0x19b5   : > { %v5298_v56 = vmul.f32 %v5282_v11, %v7425_v20 }
0x19b7   : > { %v8899_v39 = vsub.f32 %v8844_v7, %v5298_v56 }
0x19b9   : > { %v5314_v5 = vmul.f32 %v8899_v39, %v8899_v39 }
0x19bb   : > { %v5328_v33 = vsel %vm1268_vm0, %v5314_v5, 0.0 }
0x19bc   : > { %v5285_v59 = vpop.xlane.xlu1 %5284  ;;  %5329 = vadd.xlane.f32.xlu2 %v5328_v33 }
0x19bd   : > { %v5299_v49 = vmul.f32 %v5285_v59, %v7425_v20 }
0x19bf   : > { %v8906_v6 = vsub.f32 %v8852_v26, %v5299_v49  ;;  %v8949_v49 = vld [vmem:[%s9253_s22] ss:$0 sm:$0xff] }
0x19c1   : > { %v5315_v9 = vmul.f32 %v8906_v6, %v8906_v6 }
0x19c3   : > { %v5331_v42 = vsel %vm1268_vm0, %v5315_v9, 0.0 }
0x19c4   : > { %v5288_v25 = vpop.xlane.xlu2 %5287  ;;  %5332 = vadd.xlane.f32.xlu0 %v5331_v42 }
0x19c5   : > { %v5300_v8 = vmul.f32 %v5288_v25, %v7425_v20 }
0x19c7   : > { %v8913_v15 = vsub.f32 %v8858_v58, %v5300_v8 }
0x19c9   : > { %v5316_v63 = vmul.f32 %v8913_v15, %v8913_v15 }
0x19cb   : > { %v5334_v28 = vsel %vm1268_vm0, %v5316_v63, 0.0 }
0x19cc   : > { %5335 = vadd.xlane.f32.xlu1 %v5334_v28  ;;  %v5291_v38 = vpop.xlane.xlu2 %5290 }
0x19cd   : > { %v5301_v40 = vmul.f32 %v5291_v38, %v7425_v20 }
0x19cf   : > { %v8920_v24 = vsub.f32 %v8866_v27, %v5301_v40 }
0x19d1   : > { %v5317_v35 = vmul.f32 %v8920_v24, %v8920_v24 }
0x19d3   : > { %v5337_v60 = vsel %vm1268_vm0, %v5317_v35, 0.0 }
0x19d4   : > { %5338 = vadd.xlane.f32.xlu2 %v5337_v60 }
0x1a17   : > { %v5321_v46 = vpop.xlane.xlu0 %5320 }
0x1a18   : > { %v5343_v48 = vmul.f32 %v5321_v46, %v7425_v20 }
0x1a1a   : > { %v5351_v4 = vadd.f32 1e-05, %v5343_v48 }
0x1a1c   : > { %7153 = vrsqrt.f32 %v5351_v4  ;;  %vm5365_vm7 = vweird.f32 %v5351_v4 }
0x1a1f   : > { %v5324_v61 = vpop.xlane.xlu1 %5323  ;;  %v5294_v22 = vpop.xlane.xlu0 %5293 }
0x1a20   : > { %v5344_v17 = vmul.f32 %v5324_v61, %v7425_v20  ;;  %v5302_v14 = vmul.f32 %v5294_v22, %v7425_v20 }
0x1a22   : > { %v7154_v45 = vpop.eup %7153  ;;  %v5352_v29 = vadd.f32 1e-05, %v5344_v17  ;;  %v8933_v62 = vsub.f32 %v8880_v54, %v5302_v14 }
0x1a23   : > { %v5360_v43 = vmul.f32 %v7154_v45, %v5351_v4  ;;  %vm5366_vm5 = vweird.f32 %v7154_v45 }
0x1a24   : > { %7155 = vrsqrt.f32 %v5352_v29  ;;  %v5318_v57 = vmul.f32 %v8933_v62, %v8933_v62  ;;  %vm5367_vm8 = vmor %vm5365_vm7, %vm5366_vm5  ;;  %vm5375_vm10 = vweird.f32 %v5352_v29 }
0x1a25   : > { %v5361_v19 = vmul.f32 %v7154_v45, %v5360_v43 }
0x1a26   : > { %v5340_v0 = vsel %vm1268_vm0, %v5318_v57, 0.0 }
0x1a27   : > { %v5362_v12 = vmul.f32 0.5, %v5361_v19  ;;  %v5327_v41 = vpop.xlane.xlu1 %5326  ;;  %5341 = vadd.xlane.f32.xlu0 %v5340_v0 }
0x1a28   : > { %v5345_v2 = vmul.f32 %v5327_v41, %v7425_v20 }
0x1a29   : > { %v5363_v16 = vsub.f32 1.5, %v5362_v12 }
0x1a2a   : > { %v7156_v52 = vpop.eup %7155  ;;  %v5353_v53 = vadd.f32 1e-05, %v5345_v2 }
0x1a2b   : > { %v5364_v55 = vmul.f32 %v7154_v45, %v5363_v16  ;;  %v5370_v1 = vmul.f32 %v7156_v52, %v5352_v29  ;;  %vm5376_vm9 = vweird.f32 %v7156_v52 }
0x1a2c   : > { %7157 = vrsqrt.f32 %v5353_v53  ;;  %vm5377_vm11 = vmor %vm5375_vm10, %vm5376_vm9  ;;  %vm5385_vm13 = vweird.f32 %v5353_v53 }
0x1a2d   : > { %v5371_v37 = vmul.f32 %v7156_v52, %v5370_v1  ;;  %v5368_v32 = vsel %vm5367_vm8, %v7154_v45, %v5364_v55 }
0x1a2e   : > { %v5439_v31 = vmul.f32 %v5368_v32, %v8873_v23 }
0x1a2f   : > { %v5372_v44 = vmul.f32 0.5, %v5371_v37  ;;  %v5330_v34 = vpop.xlane.xlu2 %5329 }
0x1a30   : > { %v5346_v30 = vmul.f32 %v5330_v34, %v7425_v20  ;;  %v5450_v9 = vmul.f32 %v8943_v18, %v5439_v31 }
0x1a31   : > { %v5373_v36 = vsub.f32 1.5, %v5372_v44 }
0x1a32   : > { %v7158_v47 = vpop.eup %7157  ;;  %v5354_v11 = vadd.f32 1e-05, %v5346_v30  ;;  %v5461_v40 = vadd.f32 %v8949_v49, %v5450_v9 }
0x1a33   : > { %v5374_v56 = vmul.f32 %v7156_v52, %v5373_v36  ;;  %v5380_v5 = vmul.f32 %v7158_v47, %v5353_v53  ;;  %vm5386_vm12 = vweird.f32 %v7158_v47 }
0x1a34   : > { %7159 = vrsqrt.f32 %v5354_v11  ;;  %vm5387_vm14 = vmor %vm5385_vm13, %vm5386_vm12  ;;  %vm5395_vm1 = vweird.f32 %v5354_v11 }
0x1a35   : > { %v5378_v33 = vsel %vm5377_vm11, %v7156_v52, %v5374_v56  ;;  %v5381_v59 = vmul.f32 %v7158_v47, %v5380_v5 }
0x1a36   : > { %v5440_v42 = vmul.f32 %v5378_v33, %v8883_v51 }
0x1a37   : > { %v5382_v25 = vmul.f32 0.5, %v5381_v59  ;;  %v5333_v23 = vpop.xlane.xlu0 %5332 }
0x1a38   : > { %v5451_v8 = vmul.f32 %v8943_v18, %v5440_v42  ;;  %v5347_v63 = vmul.f32 %v5333_v23, %v7425_v20 }
0x1a39   : > { %v5383_v28 = vsub.f32 1.5, %v5382_v25 }
0x1a3a   : > { %v7160_v38 = vpop.eup %7159  ;;  %v5462_v35 = vadd.f32 %v8949_v49, %v5451_v8  ;;  %v5355_v60 = vadd.f32 1e-05, %v5347_v63 }
0x1a3b   : > { %v5384_v46 = vmul.f32 %v7158_v47, %v5383_v28  ;;  %v5390_v51 = vmul.f32 %v7160_v38, %v5354_v11  ;;  %vm5396_vm15 = vweird.f32 %v7160_v38 }
0x1a3c   : > { %v5469_v48 = vpack.c.bf16 %v5462_v35, %v5461_v40  ;;  %7161 = vrsqrt.f32 %v5355_v60  ;;  %vm5397_vm2 = vmor %vm5395_vm1, %vm5396_vm15  ;;  %vm5405_vm4 = vweird.f32 %v5355_v60 }
0x1a3d   : > { %v5391_v4 = vmul.f32 %v7160_v38, %v5390_v51  ;;  %v5388_v13 = vsel %vm5387_vm14, %v7158_v47, %v5384_v46 }
0x1a3e   : > { %6701 = vmatmul.msk.bf16.vlgmr.msra.gmra.mxu2 %vm1268_vm0, %v5469_v48  ;;  %v5441_v29 = vmul.f32 %v5388_v13, %v8892_v10 }
0x1a3f   : > { %v5392_v61 = vmul.f32 0.5, %v5391_v4  ;;  %v5336_v22 = vpop.xlane.xlu1 %5335 }
0x1a40   : > { %v5348_v17 = vmul.f32 %v5336_v22, %v7425_v20  ;;  %v5452_v2 = vmul.f32 %v8943_v18, %v5441_v29 }
0x1a41   : > { %v5393_v14 = vsub.f32 1.5, %v5392_v61 }
0x1a42   : > { %v7162_v45 = vpop.eup %7161  ;;  %v5356_v43 = vadd.f32 1e-05, %v5348_v17  ;;  %v5463_v1 = vadd.f32 %v8949_v49, %v5452_v2 }
0x1a43   : > { %v5394_v57 = vmul.f32 %v7160_v38, %v5393_v14  ;;  %v5400_v19 = vmul.f32 %v7162_v45, %v5355_v60  ;;  %vm5406_vm3 = vweird.f32 %v7162_v45 }
0x1a44   : > { %7163 = vrsqrt.f32 %v5356_v43  ;;  %vm5407_vm5 = vmor %vm5405_vm4, %vm5406_vm3  ;;  %vm5415_vm8 = vweird.f32 %v5356_v43 }
0x1a45   : > { %v5398_v0 = vsel %vm5397_vm2, %v7160_v38, %v5394_v57  ;;  %v5401_v12 = vmul.f32 %v7162_v45, %v5400_v19 }
0x1a46   : > { %v5442_v41 = vmul.f32 %v5398_v0, %v8899_v39 }
0x1a47   : > { %v5402_v16 = vmul.f32 0.5, %v5401_v12  ;;  %v5339_v25 = vpop.xlane.xlu2 %5338 }
0x1a48   : > { %v5453_v52 = vmul.f32 %v8943_v18, %v5442_v41 }
0x1a49   : > { %v5403_v53 = vsub.f32 1.5, %v5402_v16 }
0x1a4a   : > { %v7164_v55 = vpop.eup %7163  ;;  %v5464_v10 = vadd.f32 %v8949_v49, %v5453_v52 }
0x1a4b   : > { %v5404_v37 = vmul.f32 %v7162_v45, %v5403_v53  ;;  %v5410_v32 = vmul.f32 %v7164_v55, %v5356_v43  ;;  %vm5416_vm7 = vweird.f32 %v7164_v55 }
0x1a4c   : > { %v5470_v44 = vpack.c.bf16 %v5464_v10, %v5463_v1  ;;  %vm5417_vm9 = vmor %vm5415_vm8, %vm5416_vm7 }
0x1a4d   : > { %v5411_v34 = vmul.f32 %v7164_v55, %v5410_v32  ;;  %v5408_v39 = vsel %vm5407_vm5, %v7162_v45, %v5404_v37 }
0x1a4e   : > { %6702 = vmatmul.msk.bf16.gmra.mxu2 %vm1268_vm0, %v5470_v44  ;;  %v5443_v47 = vmul.f32 %v5408_v39, %v8906_v6  ;;  %v5349_v6 = vmul.f32 %v5339_v25, %v7425_v20 }
0x1a4f   : > { %v5412_v30 = vmul.f32 0.5, %v5411_v34 }
0x1a50   : > { %v5454_v5 = vmul.f32 %v8943_v18, %v5443_v47  ;;  %v5357_v23 = vadd.f32 1e-05, %v5349_v6 }
0x1a51   : > { %v5413_v36 = vsub.f32 1.5, %v5412_v30 }
0x1a52   : > { %v5465_v59 = vadd.f32 %v8949_v49, %v5454_v5  ;;  %7165 = vrsqrt.f32 %v5357_v23  ;;  %vm5425_vm11 = vweird.f32 %v5357_v23 }
0x1a53   : > { %v5414_v31 = vmul.f32 %v7164_v55, %v5413_v36 }
0x1a55   : > { %v5418_v11 = vsel %vm5417_vm9, %v7164_v55, %v5414_v31 }
0x1a56   : > { %v5444_v56 = vmul.f32 %v5418_v11, %v8913_v15 }
0x1a58   : > { %v5455_v33 = vmul.f32 %v8943_v18, %v5444_v56  ;;  %v7166_v8 = vpop.eup %7165 }
0x1a59   : > { %v5420_v63 = vmul.f32 %v7166_v8, %v5357_v23  ;;  %vm5426_vm10 = vweird.f32 %v7166_v8 }
0x1a5a   : > { %v5466_v9 = vadd.f32 %v8949_v49, %v5455_v33  ;;  %vm5427_vm12 = vmor %vm5425_vm11, %vm5426_vm10 }
0x1a5b   : > { %v5421_v28 = vmul.f32 %v7166_v8, %v5420_v63 }
0x1a5c   : > { %v5471_v42 = vpack.c.bf16 %v5466_v9, %v5465_v59 }
0x1a5d   : > { %v5422_v35 = vmul.f32 0.5, %v5421_v28 }
0x1a5e   : > { %6703 = vmatmul.msk.bf16.gmra.mxu2 %vm1268_vm0, %v5471_v42 }
0x1a5f   : > { %v5423_v60 = vsub.f32 1.5, %v5422_v35 }
0x1a61   : > { %v5424_v51 = vmul.f32 %v7166_v8, %v5423_v60 }
0x1a63   : > { %v5428_v13 = vsel %vm5427_vm12, %v7166_v8, %v5424_v51 }
0x1a64   : > { %v5445_v17 = vmul.f32 %v5428_v13, %v8920_v24  ;;  %v8991_v24 = vld [vmem:[%s1229_s8] ss:$0 sm:$0xff] }
0x1a66   : > { %v5456_v29 = vmul.f32 %v8943_v18, %v5445_v17 }
0x1a68   : > { %v5467_v57 = vadd.f32 %v8949_v49, %v5456_v29 }
0x1a9a   : > { %v5342_v15 = vpop.xlane.xlu0 %5341 }
0x1a9b   : > { %v5350_v38 = vmul.f32 %v5342_v15, %v7425_v20 }
0x1a9d   : > { %v5358_v40 = vadd.f32 1e-05, %v5350_v38 }
0x1a9f   : > { %7167 = vrsqrt.f32 %v5358_v40  ;;  %vm5435_vm14 = vweird.f32 %v5358_v40 }
0x1aa5   : > { %v7168_v46 = vpop.eup %7167 }
0x1aa6   : > { %v5430_v48 = vmul.f32 %v7168_v46, %v5358_v40  ;;  %vm5436_vm13 = vweird.f32 %v7168_v46 }
0x1aa7   : > { %vm5437_vm15 = vmor %vm5435_vm14, %vm5436_vm13 }
0x1aa8   : > { %v5431_v4 = vmul.f32 %v7168_v46, %v5430_v48 }
0x1aaa   : > { %v5432_v61 = vmul.f32 0.5, %v5431_v4 }
0x1aac   : > { %v5433_v22 = vsub.f32 1.5, %v5432_v61 }
0x1aae   : > { %v5434_v14 = vmul.f32 %v7168_v46, %v5433_v22 }
0x1ab0   : > { %v5438_v20 = vsel %vm5437_vm15, %v7168_v46, %v5434_v14 }
0x1ab1   : > { %v5446_v45 = vmul.f32 %v5438_v20, %v8933_v62 }
0x1ab3   : > { %v5457_v43 = vmul.f32 %v8943_v18, %v5446_v45  ;;  %v6777_v45 = vld [vmem:[%s9044_s11 + $0x18] sm:$0xff] }
0x1ab4   : > { %5934 = vmatpush.bf16.msra.mxu3 %v6777_v45 }
0x1ab5   : > { %v5468_v19 = vadd.f32 %v8949_v49, %v5457_v43 }
0x1ab7   : > { %v5472_v0 = vpack.c.bf16 %v5468_v19, %v5467_v57 }
0x1ab9   : > { %6704 = vmatmul.msk.bf16.gmra.mxu2 %vm1268_vm0, %v5472_v0 }
0x1ac1   : > { %v5506_v12 = vpop.f32.mrf.mxu2 }
0x1ac2   : > { %v8994_v62 = vadd.f32 %v8991_v24, %v5506_v12 }
0x1ac4   : > { %v8997_v41 = vmul.f32 0.70710677, %v8994_v62 }
0x1ac6   : > { %v5542_v18 = vmul.f32 %v8997_v41, %v8997_v41 }
0x1ac8   : > { %v9001_v49 = vmin.f32 %v5542_v18, 16.0 }
0x1ac9   : > { %v5508_v2 = vpop.f32.mrf.mxu2 }
0x1aca   : > { %v5544_v16 = vmul.f32 2.1237322e-06, %v9001_v49  ;;  %v5555_v52 = vmul.f32 3.8918573e-05, %v9001_v49  ;;  %v9006_v53 = vadd.f32 %v8991_v24, %v5508_v2  ;;  %v6776_v2 = vld [vmem:[%s9044_s11 + $0x10] sm:$0xff] }
0x1acb   : > { %5935 = vmatpush.bf16.msra.mxu3 %v6776_v2 }
0x1acc   : > { %v5545_v55 = vadd.f32 0.00028619796, %v5544_v16  ;;  %v5556_v1 = vadd.f32 0.001143296, %v5555_v52  ;;  %v9009_v10 = vmul.f32 0.70710677, %v9006_v53 }
0x1ace   : > { %v5546_v37 = vmul.f32 %v5545_v55, %v9001_v49  ;;  %v5557_v32 = vmul.f32 %v5556_v1, %v9001_v49  ;;  %v5582_v44 = vmul.f32 %v9009_v10, %v9009_v10 }
0x1ad0   : > { %v5547_v34 = vadd.f32 0.0036580483, %v5546_v37  ;;  %v5558_v39 = vadd.f32 0.014752088, %v5557_v32  ;;  %v9015_v30 = vmin.f32 %v5582_v44, 16.0 }
0x1ad1   : > { %v5511_v36 = vpop.f32.mrf.mxu2 }
0x1ad2   : > { %v5559_v47 = vmul.f32 %v5558_v39, %v9001_v49  ;;  %v9019_v31 = vadd.f32 %v8991_v24, %v5511_v36  ;;  %v5584_v11 = vmul.f32 2.1237322e-06, %v9015_v30  ;;  %v5595_v56 = vmul.f32 3.8918573e-05, %v9015_v30 }
0x1ad3   : > { %v5548_v5 = vmul.f32 %v5547_v34, %v9001_v49 }
0x1ad4   : > { %v5560_v33 = vadd.f32 0.112945676, %v5559_v47  ;;  %v5585_v59 = vadd.f32 0.00028619796, %v5584_v11  ;;  %v5596_v9 = vadd.f32 0.001143296, %v5595_v56 }
0x1ad5   : > { %v9025_v42 = vmul.f32 0.70710677, %v9019_v31  ;;  %v5549_v63 = vadd.f32 0.05243302, %v5548_v5  ;;  %v6775_v5 = vld [vmem:[%s9044_s11 + $0x8] sm:$0xff] }
0x1ad6   : > { %v5561_v25 = vmul.f32 %v5560_v33, %v9001_v49  ;;  %v5586_v6 = vmul.f32 %v5585_v59, %v9015_v30  ;;  %v5597_v23 = vmul.f32 %v5596_v9, %v9015_v30  ;;  %5936 = vmatpush.bf16.msra.mxu3 %v6775_v5 }
0x1ad7   : > { %v5622_v8 = vmul.f32 %v9025_v42, %v9025_v42  ;;  %v5550_v17 = vmul.f32 %v5549_v63, %v9001_v49 }
0x1ad8   : > { %v5562_v28 = vadd.f32 0.4994258, %v5561_v25  ;;  %v5587_v15 = vadd.f32 0.0036580483, %v5586_v6  ;;  %v5598_v38 = vadd.f32 0.014752088, %v5597_v23 }
0x1ad9   : > { %v9032_v40 = vmin.f32 %v5622_v8, 16.0  ;;  %v5513_v35 = vpop.f32.mrf.mxu2  ;;  %v5551_v12 = vadd.f32 0.18741608, %v5550_v17 }
0x1ada   : > { %v5563_v60 = vmul.f32 %v5562_v28, %v9001_v49  ;;  %v9036_v46 = vadd.f32 %v8991_v24, %v5513_v35  ;;  %v5599_v51 = vmul.f32 %v5598_v38, %v9015_v30  ;;  %v5588_v13 = vmul.f32 %v5587_v15, %v9015_v30 }
0x1adb   : > { %v5624_v48 = vmul.f32 2.1237322e-06, %v9032_v40  ;;  %v5635_v61 = vmul.f32 3.8918573e-05, %v9032_v40  ;;  %v5552_v47 = vmul.f32 %v5551_v12, %v9001_v49 }
0x1adc   : > { %v9046_v4 = vadd.f32 1.0, %v5563_v60  ;;  %v9051_v22 = vmul.f32 0.70710677, %v9036_v46  ;;  %v5600_v14 = vadd.f32 0.112945676, %v5599_v51  ;;  %v6774_v60 = vld [vmem:[%s9044_s11] sm:$0xff] }
0x1add   : > { %v5625_v20 = vadd.f32 0.00028619796, %v5624_v48  ;;  %v5589_v57 = vadd.f32 0.05243302, %v5588_v13  ;;  %v5636_v19 = vadd.f32 0.001143296, %v5635_v61  ;;  %5937 = vmatpush.bf16.msra.mxu3 %v6774_v60 }
0x1ade   : > { %7169 = vrcp.f32 %v9046_v4  ;;  %v5601_v29 = vmul.f32 %v5600_v14, %v9015_v30  ;;  %v5662_v0 = vmul.f32 %v9051_v22, %v9051_v22  ;;  %v5574_v23 = vand.u32 2147483647, %v9046_v4 }
0x1adf   : > { %v5626_v43 = vmul.f32 %v5625_v20, %v9032_v40  ;;  %v5637_v52 = vmul.f32 %v5636_v19, %v9032_v40  ;;  %v5590_v44 = vmul.f32 %v5589_v57, %v9015_v30  ;;  %v5576_v49 = vand.u32 2147483648, %v9046_v4 }
0x1ae0   : > { %v5602_v18 = vadd.f32 0.4994258, %v5601_v29  ;;  %v9062_v55 = vmin.f32 %v5662_v0, 16.0  ;;  %v5553_v51 = vadd.f32 1.1283791, %v5552_v47  ;;  %vm5570_vm2 = vweird.f32 %v9046_v4 }
0x1ae1   : > { %v5627_v16 = vadd.f32 0.0036580483, %v5626_v43  ;;  %v5516_v1 = vpop.f32.mrf.mxu2  ;;  %v5638_v34 = vadd.f32 0.014752088, %v5637_v52  ;;  %v5591_v63 = vadd.f32 0.18741608, %v5590_v44 }
0x1ae2   : > { %v5603_v37 = vmul.f32 %v5602_v18, %v9015_v30  ;;  %v5664_v39 = vmul.f32 2.1237322e-06, %v9062_v55  ;;  %v5675_v36 = vmul.f32 3.8918573e-05, %v9062_v55  ;;  %v9078_v8 = vadd.f32 %v8991_v24, %v5516_v1 }
0x1ae3   : > { %v5628_v33 = vmul.f32 %v5627_v16, %v9032_v40  ;;  %v5639_v59 = vmul.f32 %v5638_v34, %v9032_v40  ;;  %v5577_v45 = vor.u32 1.1754944e-38, %v5576_v49  ;;  %v5592_v29 = vmul.f32 %v5591_v63, %v9015_v30 }
0x1ae4   : > { %v7170_v32 = vpop.eup %7169  ;;  %v9070_v56 = vadd.f32 1.0, %v5603_v37  ;;  %v5665_v9 = vadd.f32 0.00028619796, %v5664_v39  ;;  %v5676_v25 = vadd.f32 0.001143296, %v5675_v36  ;;  %vm5575_vm4 = vcmp.eq.f32.partialorder %v5574_v23, 8.507059e+37 }
0x1ae5   : > { %v5566_v11 = vmul.f32 %v7170_v32, %v9046_v4  ;;  %v5640_v28 = vadd.f32 0.112945676, %v5639_v59  ;;  %vm5571_vm1 = vweird.f32 %v7170_v32  ;;  %v5629_v48 = vadd.f32 0.05243302, %v5628_v33 }
0x1ae6   : > { %7171 = vrcp.f32 %v9070_v56  ;;  %v5666_v38 = vmul.f32 %v5665_v9, %v9062_v55  ;;  %v5677_v35 = vmul.f32 %v5676_v25, %v9062_v55  ;;  %v9087_v20 = vmul.f32 0.70710677, %v9078_v8  ;;  %vm5572_vm3 = vmor %vm5570_vm2, %vm5571_vm1 }
0x1ae7   : > { %v5567_v6 = vsub.f32 1.0, %v5566_v11  ;;  %v5641_v13 = vmul.f32 %v5640_v28, %v9032_v40  ;;  %v5554_v18 = vmul.f32 %v5553_v51, %v8997_v41  ;;  %v5630_v52 = vmul.f32 %v5629_v48, %v9032_v40 }
0x1ae8   : > { %v5667_v17 = vadd.f32 0.0036580483, %v5666_v38  ;;  %v5678_v14 = vadd.f32 0.014752088, %v5677_v35  ;;  %v5702_v12 = vmul.f32 %v9087_v20, %v9087_v20  ;;  %v5593_v44 = vadd.f32 1.1283791, %v5592_v29 }
0x1ae9   : > { %v5568_v15 = vmul.f32 %v7170_v32, %v5567_v6  ;;  %v5642_v43 = vadd.f32 0.4994258, %v5641_v13  ;;  %v5518_v57 = vpop.f32.mrf.mxu2  ;;  %v5614_v39 = vand.u32 2147483647, %v9070_v56  ;;  %v5616_v47 = vand.u32 2147483648, %v9070_v56 }
0x1aea   : > { %v5679_v4 = vmul.f32 %v5678_v14, %v9062_v55  ;;  %v5668_v1 = vmul.f32 %v5667_v17, %v9062_v55  ;;  %v9102_v36 = vmin.f32 %v5702_v12, 16.0  ;;  %v5631_v59 = vadd.f32 0.18741608, %v5630_v52 }
0x1aeb   : > { %v5569_v61 = vadd.f32 %v7170_v32, %v5568_v15  ;;  %v5643_v30 = vmul.f32 %v5642_v43, %v9032_v40  ;;  %vm5610_vm7 = vweird.f32 %v9070_v56  ;;  %v5594_v15 = vmul.f32 %v5593_v44, %v9009_v10 }
0x1aec   : > { %v7172_v19 = vpop.eup %7171  ;;  %v5680_v37 = vadd.f32 0.112945676, %v5679_v4  ;;  %v5715_v9 = vmul.f32 3.8918573e-05, %v9102_v36  ;;  %v5669_v25 = vadd.f32 0.05243302, %v5668_v1  ;;  %v5632_v51 = vmul.f32 %v5631_v59, %v9032_v40 }
0x1aed   : > { %v5573_v0 = vsel %vm5572_vm3, %v7170_v32, %v5569_v61  ;;  %v5606_v16 = vmul.f32 %v7172_v19, %v9070_v56  ;;  %v9099_v32 = vadd.f32 %v8991_v24, %v5518_v57  ;;  %v9105_v11 = vadd.f32 1.0, %v5643_v30 }
0x1aee   : > { %v5578_v2 = vsel %vm5575_vm4, %v5577_v45, %v5573_v0  ;;  %v5681_v5 = vmul.f32 %v5680_v37, %v9062_v55  ;;  %vm5611_vm5 = vweird.f32 %v7172_v19  ;;  %v5704_v63 = vmul.f32 2.1237322e-06, %v9102_v36 }
0x1aef   : > { %v5607_v34 = vsub.f32 1.0, %v5606_v16  ;;  %v5579_v41 = vmul.f32 %v5578_v2, %v5554_v18  ;;  %7173 = vrcp.f32 %v9105_v11  ;;  %v9111_v6 = vmul.f32 0.70710677, %v9099_v32  ;;  %vm5612_vm8 = vmor %vm5610_vm7, %vm5611_vm5 }
0x1af0   : > { %v5682_v49 = vadd.f32 0.4994258, %v5681_v5  ;;  %v5617_v38 = vor.u32 1.1754944e-38, %v5616_v47  ;;  %v5716_v35 = vadd.f32 0.001143296, %v5715_v9  ;;  %vm5615_vm9 = vcmp.eq.f32.partialorder %v5614_v39, 8.507059e+37 }
0x1af1   : > { %v5608_v33 = vmul.f32 %v7172_v19, %v5607_v34  ;;  %v6705_v28 = vclamps-f32 %v5579_v41, 1.0  ;;  %v5670_v61 = vmul.f32 %v5669_v25, %v9062_v55  ;;  %v5742_v17 = vmul.f32 %v9111_v6, %v9111_v6 }
0x1af2   : > { %v5683_v48 = vmul.f32 %v5682_v49, %v9062_v55  ;;  %v5717_v56 = vmul.f32 %v5716_v35, %v9102_v36  ;;  %v5705_v10 = vadd.f32 0.00028619796, %v5704_v63  ;;  %v5526_v40 = vmul.f32 0.5, %v8994_v62 }
0x1af3   : > { %v5609_v23 = vadd.f32 %v7172_v19, %v5608_v33  ;;  %v5862_v43 = vadd.f32 1.0, %v6705_v28  ;;  %v5527_v0 = vmul.f32 0.5, %v9006_v53  ;;  %v5633_v18 = vadd.f32 1.1283791, %v5632_v51 }
0x1af4   : > { %v9122_v45 = vadd.f32 1.0, %v5683_v48  ;;  %v5718_v57 = vadd.f32 0.014752088, %v5717_v56  ;;  %v5654_v2 = vand.u32 2147483647, %v9105_v11  ;;  %v5706_v1 = vmul.f32 %v5705_v10, %v9102_v36 }
0x1af5   : > { %v5613_v60 = vsel %vm5612_vm8, %v7172_v19, %v5609_v23  ;;  %v7174_v29 = vpop.eup %7173  ;;  %v9124_v19 = vmin.f32 %v5742_v17, 16.0  ;;  %v5671_v16 = vadd.f32 0.18741608, %v5670_v61  ;;  %v5870_v44 = vmul.f32 %v5862_v43, %v5526_v40 }
0x1af6   : > { %v5618_v13 = vsel %vm5615_vm9, %v5617_v38, %v5613_v60  ;;  %v5646_v12 = vmul.f32 %v7174_v29, %v9105_v11  ;;  %7175 = vrcp.f32 %v9122_v45  ;;  %v5719_v37 = vmul.f32 %v5718_v57, %v9102_v36 }
0x1af7   : > { %v5619_v14 = vmul.f32 %v5618_v13, %v5594_v15  ;;  %v5656_v62 = vand.u32 2147483648, %v9105_v11  ;;  %v5744_v53 = vmul.f32 2.1237322e-06, %v9124_v19  ;;  %v5755_v34 = vmul.f32 3.8918573e-05, %v9124_v19 }
0x1af8   : > { %v5647_v30 = vsub.f32 1.0, %v5646_v12  ;;  %vm5651_vm10 = vweird.f32 %v7174_v29  ;;  %v5720_v47 = vadd.f32 0.112945676, %v5719_v37  ;;  %vm5650_vm11 = vweird.f32 %v9105_v11 }
0x1af9   : > { %v6706_v4 = vclamps-f32 %v5619_v14, 1.0  ;;  %v5672_v5 = vmul.f32 %v5671_v16, %v9062_v55  ;;  %v5745_v33 = vadd.f32 0.00028619796, %v5744_v53  ;;  %v5756_v59 = vadd.f32 0.001143296, %v5755_v34  ;;  %vm5652_vm12 = vmor %vm5650_vm11, %vm5651_vm10 }
0x1afa   : > { %v5648_v41 = vmul.f32 %v7174_v29, %v5647_v30  ;;  %v5707_v23 = vadd.f32 0.0036580483, %v5706_v1  ;;  %v5721_v49 = vmul.f32 %v5720_v47, %v9102_v36  ;;  %v5657_v28 = vor.u32 1.1754944e-38, %v5656_v62 }
0x1afb   : > { %v5863_v52 = vadd.f32 1.0, %v6706_v4  ;;  %v5746_v15 = vmul.f32 %v5745_v33, %v9124_v19  ;;  %v5757_v38 = vmul.f32 %v5756_v59, %v9124_v19  ;;  %vm5655_vm13 = vcmp.eq.f32.partialorder %v5654_v2, 8.507059e+37 }
0x1afc   : > { %v5649_v25 = vadd.f32 %v7174_v29, %v5648_v41  ;;  %v7176_v63 = vpop.eup %7175  ;;  %v5722_v60 = vadd.f32 0.4994258, %v5721_v49  ;;  %v5634_v48 = vmul.f32 %v5633_v18, %v9025_v42  ;;  %v5673_v13 = vadd.f32 1.1283791, %v5672_v5 }
0x1afd   : > { %v5871_v39 = vmul.f32 %v5863_v52, %v5527_v0  ;;  %v5686_v11 = vmul.f32 %v7176_v63, %v9122_v45  ;;  %v5758_v51 = vadd.f32 0.014752088, %v5757_v38  ;;  %v5708_v56 = vmul.f32 %v5707_v23, %v9102_v36 }
0x1afe   : > { %v5653_v35 = vsel %vm5652_vm12, %v7174_v29, %v5649_v25  ;;  %v5696_v17 = vand.u32 2147483648, %v9122_v45  ;;  %v5723_v14 = vmul.f32 %v5722_v60, %v9102_v36  ;;  %v5747_v10 = vadd.f32 0.0036580483, %v5746_v15 }
0x1aff   : > { %v5878_v9 = vpack.c.bf16 %v5871_v39, %v5870_v44  ;;  %v5658_v55 = vsel %vm5655_vm13, %v5657_v28, %v5653_v35  ;;  %v5687_v61 = vsub.f32 1.0, %v5686_v11  ;;  %v5759_v29 = vmul.f32 %v5758_v51, %v9124_v19 }
0x1b00   : > { %v5659_v43 = vmul.f32 %v5658_v55, %v5634_v48  ;;  %vm5691_vm14 = vweird.f32 %v7176_v63  ;;  %v5694_v40 = vand.u32 2147483647, %v9122_v45  ;;  %v5724_v0 = vadd.f32 1.0, %v5723_v14 }
0x1b01   : > { %6729 = vmatmul.msk.bf16.vlgmr.msra.gmra.mxu3 %vm1943_vm6, %v5878_v9  ;;  %v5688_v57 = vmul.f32 %v7176_v63, %v5687_v61  ;;  %v5760_v4 = vadd.f32 0.112945676, %v5759_v29  ;;  %vm5690_vm15 = vweird.f32 %v9122_v45  ;;  %v5709_v42 = vadd.f32 0.05243302, %v5708_v56 }
0x1b02   : > { %v5674_v18 = vmul.f32 %v5673_v13, %v9051_v22  ;;  %vm5692_vm1 = vmor %vm5690_vm15, %vm5691_vm14  ;;  %v5697_v2 = vor.u32 1.1754944e-38, %v5696_v17  ;;  %7177 = vrcp.f32 %v5724_v0  ;;  %v5748_v16 = vmul.f32 %v5747_v10, %v9124_v19 }
0x1b03   : > { %v5689_v12 = vadd.f32 %v7176_v63, %v5688_v57  ;;  %v6707_v52 = vclamps-f32 %v5659_v43, 1.0  ;;  %vm5695_vm2 = vcmp.eq.f32.partialorder %v5694_v40, 8.507059e+37  ;;  %v5761_v1 = vmul.f32 %v5760_v4, %v9124_v19 }
0x1b04   : > { %v5710_v62 = vmul.f32 %v5709_v42, %v9102_v36  ;;  %v5749_v34 = vadd.f32 0.05243302, %v5748_v16  ;;  %v5528_v47 = vmul.f32 0.5, %v9019_v31  ;;  %v5529_v5 = vmul.f32 0.5, %v9036_v46 }
0x1b05   : > { %v5693_v30 = vsel %vm5692_vm1, %v7176_v63, %v5689_v12  ;;  %v5762_v53 = vadd.f32 0.4994258, %v5761_v1  ;;  %v5864_v45 = vadd.f32 1.0, %v6707_v52  ;;  %v5736_v11 = vand.u32 2147483648, %v5724_v0 }
0x1b06   : > { %v5698_v37 = vsel %vm5695_vm2, %v5697_v2, %v5693_v30  ;;  %v5711_v59 = vadd.f32 0.18741608, %v5710_v62  ;;  %v5750_v25 = vmul.f32 %v5749_v34, %v9124_v19  ;;  %vm5730_vm4 = vweird.f32 %v5724_v0 }
0x1b07   : > { %v5699_v44 = vmul.f32 %v5698_v37, %v5674_v18  ;;  %v5763_v22 = vmul.f32 %v5762_v53, %v9124_v19  ;;  %v5872_v49 = vmul.f32 %v5864_v45, %v5528_v47  ;;  %v5734_v46 = vand.u32 2147483647, %v5724_v0 }
0x1b08   : > { %v7178_v41 = vpop.eup %7177  ;;  %v5712_v38 = vmul.f32 %v5711_v59, %v9102_v36  ;;  %v5751_v55 = vadd.f32 0.18741608, %v5750_v25  ;;  %v5737_v13 = vor.u32 1.1754944e-38, %v5736_v11  ;;  %v5530_v52 = vmul.f32 0.5, %v9078_v8 }
0x1b09   : > { %v6708_v39 = vclamps-f32 %v5699_v44, 1.0  ;;  %v5726_v9 = vmul.f32 %v7178_v41, %v5724_v0  ;;  %v5764_v23 = vadd.f32 1.0, %v5763_v22  ;;  %vm5731_vm3 = vweird.f32 %v7178_v41 }
0x1b0a   : > { %vm5732_vm5 = vmor %vm5730_vm4, %vm5731_vm3  ;;  %v5713_v60 = vadd.f32 1.1283791, %v5712_v38  ;;  %v5752_v61 = vmul.f32 %v5751_v55, %v9124_v19  ;;  %vm5735_vm7 = vcmp.eq.f32.partialorder %v5734_v46, 8.507059e+37  ;;  %v5531_v30 = vmul.f32 0.5, %v9099_v32 }
0x1b0b   : > { %v5865_v33 = vadd.f32 1.0, %v6708_v39  ;;  %v5727_v28 = vsub.f32 1.0, %v5726_v9  ;;  %7179 = vrcp.f32 %v5764_v23  ;;  %v5776_v29 = vand.u32 2147483648, %v5764_v23 }
0x1b0c   : > { %v5714_v36 = vmul.f32 %v5713_v60, %v9087_v20  ;;  %v5753_v10 = vadd.f32 1.1283791, %v5752_v61  ;;  %v5774_v40 = vand.u32 2147483647, %v5764_v23  ;;  %vm5770_vm9 = vweird.f32 %v5764_v23 }
0x1b0d   : > { %v5873_v63 = vmul.f32 %v5865_v33, %v5529_v5  ;;  %v5728_v35 = vmul.f32 %v7178_v41, %v5727_v28  ;;  %v5777_v4 = vor.u32 1.1754944e-38, %v5776_v29 }
0x1b0e   : > { %v5754_v42 = vmul.f32 %v5753_v10, %v9111_v6  ;;  %vm5775_vm11 = vcmp.eq.f32.partialorder %v5774_v40, 8.507059e+37 }
0x1b0f   : > { %v5879_v15 = vpack.c.bf16 %v5873_v63, %v5872_v49  ;;  %v5729_v31 = vadd.f32 %v7178_v41, %v5728_v35 }
0x1b11   : > { %6730 = vmatmul.msk.bf16.gmra.mxu3 %vm1943_vm6, %v5879_v15  ;;  %v5733_v51 = vsel %vm5732_vm5, %v7178_v41, %v5729_v31  ;;  %v7180_v48 = vpop.eup %7179 }
0x1b12   : > { %v5766_v56 = vmul.f32 %v7180_v48, %v5764_v23  ;;  %v5738_v17 = vsel %vm5735_vm7, %v5737_v13, %v5733_v51  ;;  %vm5771_vm8 = vweird.f32 %v7180_v48 }
0x1b13   : > { %v5739_v43 = vmul.f32 %v5738_v17, %v5714_v36  ;;  %vm5772_vm10 = vmor %vm5770_vm9, %vm5771_vm8 }
0x1b14   : > { %v5767_v14 = vsub.f32 1.0, %v5766_v56 }
0x1b15   : > { %v6709_v12 = vclamps-f32 %v5739_v43, 1.0 }
0x1b16   : > { %v5768_v57 = vmul.f32 %v7180_v48, %v5767_v14 }
0x1b17   : > { %v5866_v16 = vadd.f32 1.0, %v6709_v12 }
0x1b18   : > { %v5769_v0 = vadd.f32 %v7180_v48, %v5768_v57 }
0x1b19   : > { %v5874_v37 = vmul.f32 %v5866_v16, %v5530_v52 }
0x1b1a   : > { %v5773_v19 = vsel %vm5772_vm10, %v7180_v48, %v5769_v0 }
0x1b1b   : > { %v5778_v18 = vsel %vm5775_vm11, %v5777_v4, %v5773_v19 }
0x1b1c   : > { %v5779_v2 = vmul.f32 %v5778_v18, %v5754_v42 }
0x1b1e   : > { %v6710_v20 = vclamps-f32 %v5779_v2, 1.0 }
0x1b20   : > { %v5867_v1 = vadd.f32 1.0, %v6710_v20 }
0x1b22   : > { %v5875_v44 = vmul.f32 %v5867_v1, %v5531_v30 }
0x1b24   : > { %v5880_v62 = vpack.c.bf16 %v5875_v44, %v5874_v37 }
0x1b26   : > { %6731 = vmatmul.msk.bf16.gmra.mxu3 %vm1943_vm6, %v5880_v62 }
0x1b3c   : > { %v5521_v53 = vpop.f32.mrf.mxu2 }
0x1b3d   : > { %v9171_v34 = vadd.f32 %v8991_v24, %v5521_v53 }
0x1b3f   : > { %v9174_v6 = vmul.f32 0.70710677, %v9171_v34 }
0x1b41   : > { %v5782_v45 = vmul.f32 %v9174_v6, %v9174_v6 }
0x1b43   : > { %v5783_v39 = vmin.f32 %v5782_v45, 16.0 }
0x1b44   : > { %v5523_v8 = vpop.f32.mrf.mxu2 }
0x1b45   : > { %v5784_v22 = vmul.f32 2.1237322e-06, %v5783_v39  ;;  %v5795_v32 = vmul.f32 3.8918573e-05, %v5783_v39  ;;  %v9179_v41 = vadd.f32 %v8991_v24, %v5523_v8 }
0x1b47   : > { %v5785_v47 = vadd.f32 0.00028619796, %v5784_v22  ;;  %v5796_v5 = vadd.f32 0.001143296, %v5795_v32  ;;  %v9182_v33 = vmul.f32 0.70710677, %v9179_v41 }
0x1b49   : > { %v5797_v59 = vmul.f32 %v5796_v5, %v5783_v39  ;;  %v5822_v9 = vmul.f32 %v9182_v33, %v9182_v33  ;;  %v5786_v25 = vmul.f32 %v5785_v47, %v5783_v39 }
0x1b4b   : > { %v5798_v23 = vadd.f32 0.014752088, %v5797_v59  ;;  %v5823_v49 = vmin.f32 %v5822_v9, 16.0  ;;  %v5787_v38 = vadd.f32 0.0036580483, %v5786_v25 }
0x1b4d   : > { %v5799_v63 = vmul.f32 %v5798_v23, %v5783_v39  ;;  %v5824_v28 = vmul.f32 2.1237322e-06, %v5823_v49  ;;  %v5835_v15 = vmul.f32 3.8918573e-05, %v5823_v49  ;;  %v5788_v60 = vmul.f32 %v5787_v38, %v5783_v39 }
0x1b4f   : > { %v5800_v35 = vadd.f32 0.112945676, %v5799_v63  ;;  %v5825_v11 = vadd.f32 0.00028619796, %v5824_v28  ;;  %v5836_v24 = vadd.f32 0.001143296, %v5835_v15 }
0x1b50   : > { %v5789_v17 = vadd.f32 0.05243302, %v5788_v60 }
0x1b51   : > { %v5801_v55 = vmul.f32 %v5800_v35, %v5783_v39  ;;  %v5826_v31 = vmul.f32 %v5825_v11, %v5823_v49  ;;  %v5837_v46 = vmul.f32 %v5836_v24, %v5823_v49 }
0x1b52   : > { %v5790_v43 = vmul.f32 %v5789_v17, %v5783_v39 }
0x1b53   : > { %v5802_v51 = vadd.f32 0.4994258, %v5801_v55  ;;  %v5827_v48 = vadd.f32 0.0036580483, %v5826_v31  ;;  %v5838_v13 = vadd.f32 0.014752088, %v5837_v46 }
0x1b54   : > { %v5791_v12 = vadd.f32 0.18741608, %v5790_v43  ;;  %v5532_v55 = vmul.f32 0.5, %v9171_v34  ;;  %v5533_v31 = vmul.f32 0.5, %v9179_v41 }
0x1b55   : > { %v5803_v61 = vmul.f32 %v5802_v51, %v5783_v39  ;;  %v5839_v56 = vmul.f32 %v5838_v13, %v5823_v49  ;;  %v5828_v14 = vmul.f32 %v5827_v48, %v5823_v49 }
0x1b56   : > { %v5792_v16 = vmul.f32 %v5791_v12, %v5783_v39 }
0x1b57   : > { %v5804_v36 = vadd.f32 1.0, %v5803_v61  ;;  %v5840_v10 = vadd.f32 0.112945676, %v5839_v56  ;;  %v5829_v57 = vadd.f32 0.05243302, %v5828_v14 }
0x1b58   : > { %v5793_v44 = vadd.f32 1.1283791, %v5792_v16 }
0x1b59   : > { %7181 = vrcp.f32 %v5804_v36  ;;  %v5841_v29 = vmul.f32 %v5840_v10, %v5823_v49  ;;  %v5830_v19 = vmul.f32 %v5829_v57, %v5823_v49  ;;  %v5816_v52 = vand.u32 2147483648, %v5804_v36 }
0x1b5a   : > { %v5814_v1 = vand.u32 2147483647, %v5804_v36  ;;  %vm5810_vm13 = vweird.f32 %v5804_v36  ;;  %v5794_v47 = vmul.f32 %v5793_v44, %v9174_v6 }
0x1b5b   : > { %v5842_v40 = vadd.f32 0.4994258, %v5841_v29  ;;  %v5831_v30 = vadd.f32 0.18741608, %v5830_v19  ;;  %v5817_v45 = vor.u32 1.1754944e-38, %v5816_v52 }
0x1b5c   : > { %vm5815_vm15 = vcmp.eq.f32.partialorder %v5814_v1, 8.507059e+37 }
0x1b5d   : > { %v5843_v0 = vmul.f32 %v5842_v40, %v5823_v49  ;;  %v5832_v8 = vmul.f32 %v5831_v30, %v5823_v49 }
0x1b5f   : > { %v7182_v4 = vpop.eup %7181  ;;  %v5844_v18 = vadd.f32 1.0, %v5843_v0  ;;  %v5833_v39 = vadd.f32 1.1283791, %v5832_v8 }
0x1b60   : > { %v5806_v42 = vmul.f32 %v7182_v4, %v5804_v36  ;;  %vm5811_vm12 = vweird.f32 %v7182_v4 }
0x1b61   : > { %7183 = vrcp.f32 %v5844_v18  ;;  %vm5812_vm14 = vmor %vm5810_vm13, %vm5811_vm12  ;;  %v5856_v59 = vand.u32 2147483648, %v5844_v18  ;;  %v5854_v23 = vand.u32 2147483647, %v5844_v18  ;;  %vm5850_vm2 = vweird.f32 %v5844_v18 }
0x1b62   : > { %v5807_v2 = vsub.f32 1.0, %v5806_v42  ;;  %v5834_v49 = vmul.f32 %v5833_v39, %v9182_v33  ;;  %v6830_v33 = vld [vmem:[%s1237_s3] ss:$0 sm:$0xff] }
0x1b63   : > { %v5857_v28 = vor.u32 1.1754944e-38, %v5856_v59  ;;  %vm5855_vm4 = vcmp.eq.f32.partialorder %v5854_v23, 8.507059e+37 }
0x1b64   : > { %v5808_v20 = vmul.f32 %v7182_v4, %v5807_v2 }
0x1b66   : > { %v5809_v37 = vadd.f32 %v7182_v4, %v5808_v20 }
0x1b67   : > { %v7184_v62 = vpop.eup %7183 }
0x1b68   : > { %v5813_v53 = vsel %vm5812_vm14, %v7182_v4, %v5809_v37  ;;  %v5846_v22 = vmul.f32 %v7184_v62, %v5844_v18  ;;  %vm5851_vm1 = vweird.f32 %v7184_v62 }
0x1b69   : > { %v5818_v32 = vsel %vm5815_vm15, %v5817_v45, %v5813_v53  ;;  %vm5852_vm3 = vmor %vm5850_vm2, %vm5851_vm1 }
0x1b6a   : > { %v5847_v5 = vsub.f32 1.0, %v5846_v22  ;;  %v5819_v9 = vmul.f32 %v5818_v32, %v5794_v47 }
0x1b6c   : > { %v5848_v25 = vmul.f32 %v7184_v62, %v5847_v5  ;;  %v6711_v15 = vclamps-f32 %v5819_v9, 1.0 }
0x1b6e   : > { %v5849_v63 = vadd.f32 %v7184_v62, %v5848_v25  ;;  %v5868_v11 = vadd.f32 1.0, %v6711_v15 }
0x1b70   : > { %v5853_v38 = vsel %vm5852_vm3, %v7184_v62, %v5849_v63  ;;  %v5876_v60 = vmul.f32 %v5868_v11, %v5532_v55 }
0x1b71   : > { %v5858_v35 = vsel %vm5855_vm4, %v5857_v28, %v5853_v38 }
0x1b72   : > { %v5859_v6 = vmul.f32 %v5858_v35, %v5834_v49 }
0x1b74   : > { %v6712_v24 = vclamps-f32 %v5859_v6, 1.0 }
0x1b76   : > { %v5869_v46 = vadd.f32 1.0, %v6712_v24 }
0x1b78   : > { %v5877_v51 = vmul.f32 %v5869_v46, %v5533_v31 }
0x1b7a   : > { %v5881_v48 = vpack.c.bf16 %v5877_v51, %v5876_v60 }
0x1b7c   : > { %6732 = vmatmul.msk.bf16.gmra.mxu3 %vm1943_vm6, %v5881_v48 }
0x1b84   : > { %v5939_v13 = vpop.f32.mrf.mxu3 }
0x1b85   : > { %v5940_v61 = vadd.f32 %v6830_v33, %v5939_v13 }
0x1b87   : > { %v5959_v34 = vadd.f32 %v5940_v61, %v8824_v3 }
0x1b89   : > { %5967 = vst.msk [vmem:[%s1246_s0] sm:$0xff] %vm1268_vm0, %v5959_v34 }
0x1b8c   : > { %v5941_v41 = vpop.f32.mrf.mxu3 }
0x1b8d   : > { %v5942_v56 = vadd.f32 %v6830_v33, %v5941_v41 }
0x1b8f   : > { %v5960_v17 = vadd.f32 %v5942_v56, %v8830_v21 }
0x1b91   : > { %5968 = vst.msk [vmem:[%s1246_s0 + $0x8] sm:$0xff] %vm1268_vm0, %v5960_v17 }
0x1b94   : > { %v5944_v36 = vpop.f32.mrf.mxu3 }
0x1b95   : > { %v5945_v14 = vadd.f32 %v6830_v33, %v5944_v36 }
0x1b97   : > { %v5961_v10 = vadd.f32 %v5945_v14, %v8838_v50 }
0x1b99   : > { %5969 = vst.msk [vmem:[%s1246_s0 + $0x10] sm:$0xff] %vm1268_vm0, %v5961_v10 }
0x1b9c   : > { %v5946_v29 = vpop.f32.mrf.mxu3 }
0x1b9d   : > { %v5947_v43 = vadd.f32 %v6830_v33, %v5946_v29 }
0x1b9f   : > { %v5962_v57 = vadd.f32 %v5947_v43, %v8844_v7 }
0x1ba1   : > { %5970 = vst.msk [vmem:[%s1246_s0 + $0x18] sm:$0xff] %vm1268_vm0, %v5962_v57 }
0x1ba9   : > { %v5949_v3 = vpop.f32.mrf.mxu3 }
0x1baa   : > { %v5950_v40 = vadd.f32 %v6830_v33, %v5949_v3 }
0x1bac   : > { %v5963_v0 = vadd.f32 %v5950_v40, %v8852_v26 }
0x1bae   : > { %5971 = vst.msk [vmem:[%s1246_s0 + $0x20] sm:$0xff] %vm1268_vm0, %v5963_v0 }
0x1bb1   : > { %v5951_v21 = vpop.f32.mrf.mxu3 }
0x1bb2   : > { %v5952_v4 = vadd.f32 %v6830_v33, %v5951_v21 }
0x1bb4   : > { %v5964_v12 = vadd.f32 %v5952_v4, %v8858_v58 }
0x1bb6   : > { %5972 = vst.msk [vmem:[%s1246_s0 + $0x28] sm:$0xff] %vm1268_vm0, %v5964_v12 }
0x1bff   : > { %v5954_v50 = vpop.f32.mrf.mxu3 }
0x1c00   : > { %v5955_v42 = vadd.f32 %v6830_v33, %v5954_v50 }
0x1c02   : > { %v5965_v19 = vadd.f32 %v5955_v42, %v8866_v27 }
0x1c04   : > { %5973 = vst.msk [vmem:[%s1246_s0 + $0x30] sm:$0xff] %vm1268_vm0, %v5965_v19 }
0x1c07   : > { %v5956_v7 = vpop.f32.mrf.mxu3 }
0x1c08   : > { %v5957_v18 = vadd.f32 %v6830_v33, %v5956_v7 }
0x1c0a   : > { %v5966_v2 = vadd.f32 %v5957_v18, %v8880_v54 }
0x1c0c   : > { %5974 = vst.msk [vmem:[%s1246_s0 + $0x38] sm:$0xff] %vm1268_vm0, %v5966_v2 }
0x1c0d PF: > { %s9304_s4 = sld [smem:[#allocation4_spill]] }
0x1c0e   : > { %s9305_s7 = sld [smem:[#allocation2_spill]] }
0x1c0f   : > { %s9307_s8 = sld [smem:[#allocation5_spill]] }
0x1c10   : > { %s9308_s30 = sld [smem:[#allocation6_spill]] }
0x1c13   : > { %s37_s9 = sadd.s32 1, %s9304_s4   ;;  %s9306_s4 = sld [smem:[#allocation3_spill]] }
0x1c14   : > { %p34_p7 = scmp.ge.s32.totalorder %s37_s9, 6  }
0x1c16   :  { %36 = sbr.rel (!%p34_p7) target bundleno = 15 (0xf), region = 242 }

</bundles_post_ra>
